<compile_context>
chip_gen: v7x
topology: tpu7x:2x2x1
jax: 0.10.0
libtpu: 0.0.40
codegen_flags: <defaults>
</compile_context>

<pallas_src>
import functools

import jax
import jax.numpy as jnp
import numpy as np
from jax.experimental import pallas as pl
from jax.experimental.pallas import tpu as pltpu


_STEPS_PER_BLOCK = 8   # (8, O) output blocks -> (8,128)-aligned unmasked stores


def _decoder_kernel(tok_ref,        # scalar-prefetch SMEM: (T_pad,) int32 token ids
                    emb_ref,        # (O, H)   bf16  embedding table (VMEM-resident)
                    h0_ref,         # (1, H)   f32   initial hidden
                    w_ih_ref,       # (H, 3H)  bf16  input->gates (r|z|n), transposed
                    w_hh_ref,       # (H, 3H)  bf16  hidden->gates (r|z|n), transposed
                    b_i_ref,        # (1, 3H)  f32   (b_ir+b_hr | b_iz+b_hz | b_in)
                    b_hn_ref,       # (1, H)   f32   b_hn (applied inside r*(...))
                    w_out_ref,      # (H, O)   bf16  output linear weight, transposed
                    b_out_ref,      # (1, O)   f32   output linear bias
                    out_ref,        # (S, O)   f32   log-softmax rows for this chunk
                    h_out_ref,      # (1, H)   f32   final hidden
                    h_scratch,      # VMEM (1, H) f32 hidden-state carry across chunks
                    *, steps_per_block, total_steps):
    c = pl.program_id(0)
    H = h0_ref.shape[-1]
    O = b_out_ref.shape[-1]
    S = steps_per_block

    @pl.when(c == 0)
    def _():
        h_scratch[...] = h0_ref[...]

    h = h_scratch[...]                                        # (1, H) f32
    base = c * S

    # hoisted loop invariants (avoid per-step broadcast_in_dim / reloads)
    lane_ids = jax.lax.broadcasted_iota(jnp.int32, (1, O), 1)
    b_i = b_i_ref[...]
    b_hn = b_hn_ref[...]
    b_out = b_out_ref[...]

    rows = []
    for s in range(S):                       # static unroll, S = 8
        tok = tok_ref[base + s]              # scalar read from SMEM

        # embedding lookup as one-hot MXU matmul (exact), then relu
        onehot = (lane_ids == tok).astype(jnp.bfloat16)                   # (1, O)
        x = jnp.dot(onehot, emb_ref[...],
                    preferred_element_type=jnp.float32)                    # (1, H) f32
        x = jnp.maximum(x, 0.0).astype(jnp.bfloat16)

        # GRU cell (PyTorch semantics), two lane-dense matmuls:
        gi = jnp.dot(x, w_ih_ref[...],
                     preferred_element_type=jnp.float32) + b_i             # (1, 3H)
        gh = jnp.dot(h.astype(jnp.bfloat16), w_hh_ref[...],
                     preferred_element_type=jnp.float32)                   # (1, 3H)
        r = jax.nn.sigmoid(gi[:, :H] + gh[:, :H])
        z = jax.nn.sigmoid(gi[:, H:2 * H] + gh[:, H:2 * H])
        n = jnp.tanh(gi[:, 2 * H:] + r * (gh[:, 2 * H:] + b_hn))
        h_new = (1.0 - z) * n + z * h                                      # (1, H) f32

        # out = log_softmax(Linear(h_new))
        logits = jnp.dot(h_new.astype(jnp.bfloat16), w_out_ref[...],
                         preferred_element_type=jnp.float32) + b_out       # (1, O)
        m = jnp.max(logits, axis=1, keepdims=True)
        lse = jnp.log(jnp.sum(jnp.exp(logits - m), axis=1, keepdims=True)) + m
        rows.append(logits - lse)

        # mask padded tail steps so the carried hidden stays exact for any T
        valid = (base + s) < total_steps
        h = jnp.where(valid, h_new, h)

    out_ref[...] = jnp.concatenate(rows, axis=0)              # (S, O) unmasked store
    h_scratch[...] = h

    @pl.when(c == pl.num_programs(0) - 1)
    def _():
        h_out_ref[...] = h


def _vmem_limit_bytes(H, O, S):
    bf16, f32 = 2, 4
    # resident weights (double-buffered by the default pipeline even with
    # constant index_maps)
    weights = O * H * bf16 + 2 * (H * 3 * H) * bf16 + H * O * bf16
    small = (H + 3 * H + H + O) * f32                 # h0, b_i, b_hn, b_out
    outs = S * O * f32 + H * f32                      # log-prob block + final hidden
    resident = 2 * (weights + small + outs) + H * f32  # + hidden-carry scratch
    return int(min(resident + (4 << 20), 96 << 20))


def decoder_rnn_forward(tokens, hidden, params):
    """Run T fused decode steps.

    tokens: (T,) int32 token ids (teacher-forced sequence).
    hidden: (1, 1, H) float32 initial hidden state.
    Returns (log_probs (T, O) float32, hidden (1, 1, H) float32).
    """
    H = params["w_hh_cat"].shape[0]
    O = params["w_out_cat"].shape[-1]
    tokens = jnp.asarray(tokens, jnp.int32).reshape((-1,))
    T = int(tokens.shape[0])
    S = _STEPS_PER_BLOCK
    n_chunks = pl.cdiv(T, S)
    T_pad = n_chunks * S
    tokens_pad = jnp.pad(tokens, (0, T_pad - T))   # pad with token 0 (masked in-kernel)
    h0 = hidden.reshape(1, H).astype(jnp.float32)

    const2 = lambda c, tok: (0, 0)
    grid_spec = pltpu.PrefetchScalarGridSpec(
        num_scalar_prefetch=1,
        grid=(n_chunks,),
        in_specs=[
            # constant index_maps -> DMA'd once, VMEM-resident for the whole sequence
            pl.BlockSpec((O, H), const2),        # embedding table (bf16)
            pl.BlockSpec((1, H), const2),        # h0 (f32)
            pl.BlockSpec((H, 3 * H), const2),    # W_ih concatenated (bf16)
            pl.BlockSpec((H, 3 * H), const2),    # W_hh concatenated (bf16)
            pl.BlockSpec((1, 3 * H), const2),    # fused gate bias (f32)
            pl.BlockSpec((1, H), const2),        # b_hn (f32)
            pl.BlockSpec((H, O), const2),        # W_out (bf16)
            pl.BlockSpec((1, O), const2),        # b_out (f32)
        ],
        out_specs=[
            pl.BlockSpec((S, O), lambda c, tok: (c, 0)),   # per-chunk log-probs
            pl.BlockSpec((1, H), const2),                  # final hidden
        ],
        scratch_shapes=[pltpu.VMEM((1, H), jnp.float32)],
    )

    log_probs, h_new = pl.pallas_call(
        functools.partial(_decoder_kernel, steps_per_block=S, total_steps=T),
        grid_spec=grid_spec,
        out_shape=(
            jax.ShapeDtypeStruct((T_pad, O), jnp.float32),
            jax.ShapeDtypeStruct((1, H), jnp.float32),
        ),
        compiler_params=pltpu.CompilerParams(
            # chunk axis carries the hidden-state recurrence -> sequential
            dimension_semantics=("arbitrary",),
            vmem_limit_bytes=_vmem_limit_bytes(H, O, S),
        ),
    )(tokens_pad, params["embedding"], h0,
      params["w_ih_cat"], params["w_hh_cat"],
      params["b_i"], params["b_hn"],
      params["w_out_cat"], params["b_out"])

    return log_probs[:T], h_new.reshape(1, 1, H)


def decoder_rnn_step(token, hidden, params):
    """Single-step API matching DecoderRNN.forward(input, hidden)."""
    log_probs, h_new = decoder_rnn_forward(
        jnp.asarray(token, jnp.int32).reshape((1,)), hidden, params)
    return log_probs, h_new


def init_params(key, hidden_size, output_size):
    """Build packed parameters mirroring PyTorch's DecoderRNN layers."""
    H, O = hidden_size, output_size
    k = 1.0 / np.sqrt(np.float32(H))
    keys = jax.random.split(key, 8)
    u = lambda kk, shape: jax.random.uniform(kk, shape, jnp.float32, -k, k)

    # PyTorch stores W_ih/W_hh as (3H, H) in (r, z, n) order; transpose each
    # gate to (H, H) and concatenate along the output axis -> (H, 3H).
    w_ih = u(keys[0], (3, H, H))
    w_hh = u(keys[1], (3, H, H))
    b_ih = u(keys[2], (3, H))
    b_hh = u(keys[3], (3, H))
    w_out = u(keys[4], (O, H))
    b_out = u(keys[5], (O,))
    emb = jax.random.normal(keys[6], (O, H), jnp.float32)

    w_ih_cat = jnp.concatenate([w_ih[g].T for g in range(3)], axis=1)   # (H, 3H)
    w_hh_cat = jnp.concatenate([w_hh[g].T for g in range(3)], axis=1)   # (H, 3H)
    # pre-add input+hidden biases for r and z; keep b_in on the x side and
    # b_hn separate (it sits inside r * (W_hn h + b_hn)).
    b_i = jnp.concatenate([b_ih[0] + b_hh[0],
                           b_ih[1] + b_hh[1],
                           b_ih[2]], axis=0).reshape(1, 3 * H)

    return {
        "embedding": emb.astype(jnp.bfloat16),
        "w_ih_cat": w_ih_cat.astype(jnp.bfloat16),
        "w_hh_cat": w_hh_cat.astype(jnp.bfloat16),
        "b_i": b_i,
        "b_hn": b_hh[2].reshape(1, H),
        "w_out_cat": jnp.transpose(w_out, (1, 0)).astype(jnp.bfloat16),  # (H, O)
        "b_out": b_out.reshape(1, O),
    }


def reference_forward(tokens, hidden, p):
    """Pure-JAX reference with the same bf16-weight numerics as the kernel."""
    H = p["w_hh_cat"].shape[0]
    tokens = jnp.asarray(tokens, jnp.int32).reshape((-1,))
    h = hidden.reshape(1, H).astype(jnp.float32)
    outs = []
    for t in range(int(tokens.shape[0])):
        row = p["embedding"][tokens[t]].astype(jnp.float32).reshape(1, H)
        x = jnp.maximum(row, 0.0).astype(jnp.bfloat16)
        gi = jnp.dot(x, p["w_ih_cat"],
                     preferred_element_type=jnp.float32) + p["b_i"]
        gh = jnp.dot(h.astype(jnp.bfloat16), p["w_hh_cat"],
                     preferred_element_type=jnp.float32)
        r = jax.nn.sigmoid(gi[:, :H] + gh[:, :H])
        z = jax.nn.sigmoid(gi[:, H:2 * H] + gh[:, H:2 * H])
        n = jnp.tanh(gi[:, 2 * H:] + r * (gh[:, 2 * H:] + p["b_hn"]))
        h = (1.0 - z) * n + z * h
        logits = jnp.dot(h.astype(jnp.bfloat16), p["w_out_cat"],
                         preferred_element_type=jnp.float32) + p["b_out"]
        outs.append(jax.nn.log_softmax(logits, axis=1))
    return jnp.concatenate(outs, axis=0), h.reshape(1, 1, H)


if __name__ == "__main__":
    hidden_size = 256     # matches the module; multiple of 128 -> lane-dense
    output_size = 256     # multiple of 128
    T = 13                # not a multiple of 8 -> exercises the padded/masked tail

    key = jax.random.PRNGKey(0)
    params = init_params(key, hidden_size, output_size)

    tokens = jax.random.randint(jax.random.PRNGKey(1), (T,), 0, output_size,
                                dtype=jnp.int32)
    hidden = jnp.zeros((1, 1, hidden_size), jnp.float32)     # initHidden()

    # fused multi-step decode (2 grid chunks, masked tail)
    log_probs, h_new = decoder_rnn_forward(tokens, hidden, params)
    jax.block_until_ready((log_probs, h_new))

    ref_lp, ref_h = reference_forward(tokens, hidden, params)
    np.testing.assert_allclose(np.asarray(log_probs), np.asarray(ref_lp),
                               rtol=2e-3, atol=2e-3)
    np.testing.assert_allclose(np.asarray(h_new), np.asarray(ref_h),
                               rtol=2e-3, atol=2e-3)

    # single-step API (same semantics as DecoderRNN.forward)
    lp1, h1 = decoder_rnn_step(jnp.int32(7), hidden, params)
    jax.block_until_ready((lp1, h1))
    ref_lp1, ref_h1 = reference_forward(jnp.asarray([7], jnp.int32), hidden, params)
    np.testing.assert_allclose(np.asarray(lp1), np.asarray(ref_lp1),
                               rtol=2e-3, atol=2e-3)
    np.testing.assert_allclose(np.asarray(h1), np.asarray(ref_h1),
                               rtol=2e-3, atol=2e-3)

    print("KERNEL_OK")
</pallas_src>

<mosaic_0001>
module attributes {stable_mosaic.version = 11 : i64} {
  func.func @_decoder_kernel(%arg0: i32, %arg1: memref<16xi32, #tpu.memory_space<smem>>, %arg2: memref<256x256xbf16, #tpu.memory_space<vmem>>, %arg3: memref<1x256xf32, #tpu.memory_space<vmem>>, %arg4: memref<256x768xbf16, #tpu.memory_space<vmem>>, %arg5: memref<256x768xbf16, #tpu.memory_space<vmem>>, %arg6: memref<1x768xf32, #tpu.memory_space<vmem>>, %arg7: memref<1x256xf32, #tpu.memory_space<vmem>>, %arg8: memref<256x256xbf16, #tpu.memory_space<vmem>>, %arg9: memref<1x256xf32, #tpu.memory_space<vmem>>, %arg10: memref<8x256xf32, #tpu.memory_space<vmem>>, %arg11: memref<1x256xf32, #tpu.memory_space<vmem>>, %arg12: memref<1x256xf32, #tpu.memory_space<vmem>>) attributes {dimension_semantics = [#tpu.dimension_semantics<arbitrary>], iteration_bounds = array<i64: 2>, scalar_prefetch = 1 : i64, scratch_operands = 1 : i64, tpu.core_type = #tpu.core_type<tc>, window_params = [{pipeline_mode = #tpu.pipeline_mode<synchronous>, transform_indices = @transform_0, window_bounds = array<i64: 256, 256>}, {pipeline_mode = #tpu.pipeline_mode<synchronous>, transform_indices = @transform_1, window_bounds = array<i64: 1, 256>}, {pipeline_mode = #tpu.pipeline_mode<synchronous>, transform_indices = @transform_2, window_bounds = array<i64: 256, 768>}, {pipeline_mode = #tpu.pipeline_mode<synchronous>, transform_indices = @transform_3, window_bounds = array<i64: 256, 768>}, {pipeline_mode = #tpu.pipeline_mode<synchronous>, transform_indices = @transform_4, window_bounds = array<i64: 1, 768>}, {pipeline_mode = #tpu.pipeline_mode<synchronous>, transform_indices = @transform_5, window_bounds = array<i64: 1, 256>}, {pipeline_mode = #tpu.pipeline_mode<synchronous>, transform_indices = @transform_6, window_bounds = array<i64: 256, 256>}, {pipeline_mode = #tpu.pipeline_mode<synchronous>, transform_indices = @transform_7, window_bounds = array<i64: 1, 256>}, {transform_indices = @transform_8, window_bounds = array<i64: 8, 256>}, {pipeline_mode = #tpu.pipeline_mode<synchronous>, transform_indices = @transform_9, window_bounds = array<i64: 1, 256>}]} {
    %c0_i32 = arith.constant 0 : i32
    %0 = arith.cmpi eq, %arg0, %c0_i32 : i32
    %1 = arith.extui %0 : i1 to i32
    %c0_i32_0 = arith.constant 0 : i32
    %2 = arith.cmpi ne, %1, %c0_i32_0 : i32
    scf.if %2 {
      %c0_173 = arith.constant 0 : index
      %c0_174 = arith.constant 0 : index
      %527 = vector.load %arg3[%c0_173, %c0_174] : memref<1x256xf32, #tpu.memory_space<vmem>>, vector<1x256xf32>
      %c0_175 = arith.constant 0 : index
      %c0_176 = arith.constant 0 : index
      %528 = vector.load %arg12[%c0_175, %c0_176] : memref<1x256xf32, #tpu.memory_space<vmem>>, vector<1x256xf32>
      tpu.vector_store %arg12[%c0_175, %c0_176], %527 {strides = array<i32>} : memref<1x256xf32, #tpu.memory_space<vmem>>, vector<1x256xf32>,
    } else {
    }
    %c0 = arith.constant 0 : index
    %c0_1 = arith.constant 0 : index
    %3 = vector.load %arg12[%c0, %c0_1] : memref<1x256xf32, #tpu.memory_space<vmem>>, vector<1x256xf32>
    %c8_i32 = arith.constant 8 : i32
    %4 = arith.muli %arg0, %c8_i32 : i32
    %5 = tpu.iota {dimensions = array<i32: 1>} : vector<1x256xi32>
    %c0_2 = arith.constant 0 : index
    %c0_3 = arith.constant 0 : index
    %6 = vector.load %arg6[%c0_2, %c0_3] : memref<1x768xf32, #tpu.memory_space<vmem>>, vector<1x768xf32>
    %c0_4 = arith.constant 0 : index
    %c0_5 = arith.constant 0 : index
    %7 = vector.load %arg7[%c0_4, %c0_5] : memref<1x256xf32, #tpu.memory_space<vmem>>, vector<1x256xf32>
    %c0_6 = arith.constant 0 : index
    %c0_7 = arith.constant 0 : index
    %8 = vector.load %arg9[%c0_6, %c0_7] : memref<1x256xf32, #tpu.memory_space<vmem>>, vector<1x256xf32>
    %c0_i32_8 = arith.constant 0 : i32
    %9 = arith.addi %4, %c0_i32_8 : i32
    %10 = arith.index_cast %9 : i32 to index
    %11 = memref.load %arg1[%10] : memref<16xi32, #tpu.memory_space<smem>>
    %12 = vector.broadcast %11 : i32 to vector<1x256xi32>
    %13 = arith.cmpi eq, %5, %12 : vector<1x256xi32>
    %14 = arith.extui %13 : vector<1x256xi1> to vector<1x256xi32>
    %15 = arith.sitofp %14 : vector<1x256xi32> to vector<1x256xf32>
    %16 = arith.truncf %15 : vector<1x256xf32> to vector<1x256xbf16>
    %c0_9 = arith.constant 0 : index
    %c0_10 = arith.constant 0 : index
    %17 = vector.load %arg2[%c0_9, %c0_10] : memref<256x256xbf16, #tpu.memory_space<vmem>>, vector<256x256xbf16>
    %cst = arith.constant dense<0.000000e+00> : vector<1x256xf32>
    %18 = tpu.matmul %16, %17, %cst {dimension_numbers = #tpu.dot_dimension_numbers<[1], [0], [0], [1], [0, 0, 1, 1], [], []>} : vector<1x256xbf16>, vector<256x256xbf16>, vector<1x256xf32> -> vector<1x256xf32>
    %cst_11 = arith.constant 0.000000e+00 : f32
    %19 = vector.broadcast %cst_11 : f32 to vector<1x256xf32>
    %20 = arith.maximumf %18, %19 : vector<1x256xf32>
    %21 = arith.truncf %20 : vector<1x256xf32> to vector<1x256xbf16>
    %c0_12 = arith.constant 0 : index
    %c0_13 = arith.constant 0 : index
    %22 = vector.load %arg4[%c0_12, %c0_13] : memref<256x768xbf16, #tpu.memory_space<vmem>>, vector<256x768xbf16>
    %cst_14 = arith.constant dense<0.000000e+00> : vector<1x768xf32>
    %23 = tpu.matmul %21, %22, %cst_14 {dimension_numbers = #tpu.dot_dimension_numbers<[1], [0], [0], [1], [0, 0, 1, 1], [], []>} : vector<1x256xbf16>, vector<256x768xbf16>, vector<1x768xf32> -> vector<1x768xf32>
    %24 = arith.addf %23, %6 : vector<1x768xf32>
    %25 = arith.truncf %3 : vector<1x256xf32> to vector<1x256xbf16>
    %c0_15 = arith.constant 0 : index
    %c0_16 = arith.constant 0 : index
    %26 = vector.load %arg5[%c0_15, %c0_16] : memref<256x768xbf16, #tpu.memory_space<vmem>>, vector<256x768xbf16>
    %cst_17 = arith.constant dense<0.000000e+00> : vector<1x768xf32>
    %27 = tpu.matmul %25, %26, %cst_17 {dimension_numbers = #tpu.dot_dimension_numbers<[1], [0], [0], [1], [0, 0, 1, 1], [], []>} : vector<1x256xbf16>, vector<256x768xbf16>, vector<1x768xf32> -> vector<1x768xf32>
    %28 = vector.extract_strided_slice %24 {offsets = [0, 0], sizes = [1, 256], strides = [1, 1]} : vector<1x768xf32> to vector<1x256xf32>
    %29 = vector.extract_strided_slice %27 {offsets = [0, 0], sizes = [1, 256], strides = [1, 1]} : vector<1x768xf32> to vector<1x256xf32>
    %30 = arith.addf %28, %29 : vector<1x256xf32>
    %31 = arith.negf %30 : vector<1x256xf32>
    %32 = math.exp %31 : vector<1x256xf32>
    %cst_18 = arith.constant 1.000000e+00 : f32
    %33 = vector.broadcast %cst_18 : f32 to vector<1x256xf32>
    %34 = arith.addf %33, %32 : vector<1x256xf32>
    %35 = arith.divf %33, %34 : vector<1x256xf32>
    %36 = vector.extract_strided_slice %24 {offsets = [0, 256], sizes = [1, 256], strides = [1, 1]} : vector<1x768xf32> to vector<1x256xf32>
    %37 = vector.extract_strided_slice %27 {offsets = [0, 256], sizes = [1, 256], strides = [1, 1]} : vector<1x768xf32> to vector<1x256xf32>
    %38 = arith.addf %36, %37 : vector<1x256xf32>
    %39 = arith.negf %38 : vector<1x256xf32>
    %40 = math.exp %39 : vector<1x256xf32>
    %cst_19 = arith.constant 1.000000e+00 : f32
    %41 = vector.broadcast %cst_19 : f32 to vector<1x256xf32>
    %42 = arith.addf %41, %40 : vector<1x256xf32>
    %43 = arith.divf %41, %42 : vector<1x256xf32>
    %44 = vector.extract_strided_slice %24 {offsets = [0, 512], sizes = [1, 256], strides = [1, 1]} : vector<1x768xf32> to vector<1x256xf32>
    %45 = vector.extract_strided_slice %27 {offsets = [0, 512], sizes = [1, 256], strides = [1, 1]} : vector<1x768xf32> to vector<1x256xf32>
    %46 = arith.addf %45, %7 : vector<1x256xf32>
    %47 = arith.mulf %35, %46 : vector<1x256xf32>
    %48 = arith.addf %44, %47 : vector<1x256xf32>
    %49 = math.tanh %48 : vector<1x256xf32>
    %cst_20 = arith.constant 1.000000e+00 : f32
    %50 = vector.broadcast %cst_20 : f32 to vector<1x256xf32>
    %51 = arith.subf %50, %43 : vector<1x256xf32>
    %52 = arith.mulf %51, %49 : vector<1x256xf32>
    %53 = arith.mulf %43, %3 : vector<1x256xf32>
    %54 = arith.addf %52, %53 : vector<1x256xf32>
    %55 = arith.truncf %54 : vector<1x256xf32> to vector<1x256xbf16>
    %c0_21 = arith.constant 0 : index
    %c0_22 = arith.constant 0 : index
    %56 = vector.load %arg8[%c0_21, %c0_22] : memref<256x256xbf16, #tpu.memory_space<vmem>>, vector<256x256xbf16>
    %cst_23 = arith.constant dense<0.000000e+00> : vector<1x256xf32>
    %57 = tpu.matmul %55, %56, %cst_23 {dimension_numbers = #tpu.dot_dimension_numbers<[1], [0], [0], [1], [0, 0, 1, 1], [], []>} : vector<1x256xbf16>, vector<256x256xbf16>, vector<1x256xf32> -> vector<1x256xf32>
    %58 = arith.addf %57, %8 : vector<1x256xf32>
    %cst_24 = arith.constant dense<0xFF800000> : vector<1xf32>
    %59 = vector.multi_reduction <maximumf>, %58, %cst_24 [1] : vector<1x256xf32> to vector<1xf32>
    %60 = vector.shape_cast %59 : vector<1xf32> to vector<1x1xf32>
    %61 = vector.broadcast %60 : vector<1x1xf32> to vector<1x256xf32>
    %62 = arith.subf %58, %61 : vector<1x256xf32>
    %63 = math.exp %62 : vector<1x256xf32>
    %cst_25 = arith.constant dense<0.000000e+00> : vector<1xf32>
    %64 = vector.multi_reduction <add>, %63, %cst_25 [1] : vector<1x256xf32> to vector<1xf32>
    %65 = vector.shape_cast %64 : vector<1xf32> to vector<1x1xf32>
    %66 = math.log %65 : vector<1x1xf32>
    %67 = arith.addf %66, %60 : vector<1x1xf32>
    %68 = vector.broadcast %67 : vector<1x1xf32> to vector<1x256xf32>
    %69 = arith.subf %58, %68 : vector<1x256xf32>
    %c0_i32_26 = arith.constant 0 : i32
    %70 = arith.addi %4, %c0_i32_26 : i32
    %c13_i32 = arith.constant 13 : i32
    %71 = arith.cmpi slt, %70, %c13_i32 : i32
    %72 = arith.select %71, %54, %3 : vector<1x256xf32>
    %c1_i32 = arith.constant 1 : i32
    %73 = arith.addi %4, %c1_i32 : i32
    %74 = arith.index_cast %73 : i32 to index
    %75 = memref.load %arg1[%74] : memref<16xi32, #tpu.memory_space<smem>>
    %76 = vector.broadcast %75 : i32 to vector<1x256xi32>
    %77 = arith.cmpi eq, %5, %76 : vector<1x256xi32>
    %78 = arith.extui %77 : vector<1x256xi1> to vector<1x256xi32>
    %79 = arith.sitofp %78 : vector<1x256xi32> to vector<1x256xf32>
    %80 = arith.truncf %79 : vector<1x256xf32> to vector<1x256xbf16>
    %c0_27 = arith.constant 0 : index
    %c0_28 = arith.constant 0 : index
    %81 = vector.load %arg2[%c0_27, %c0_28] : memref<256x256xbf16, #tpu.memory_space<vmem>>, vector<256x256xbf16>
    %cst_29 = arith.constant dense<0.000000e+00> : vector<1x256xf32>
    %82 = tpu.matmul %80, %81, %cst_29 {dimension_numbers = #tpu.dot_dimension_numbers<[1], [0], [0], [1], [0, 0, 1, 1], [], []>} : vector<1x256xbf16>, vector<256x256xbf16>, vector<1x256xf32> -> vector<1x256xf32>
    %cst_30 = arith.constant 0.000000e+00 : f32
    %83 = vector.broadcast %cst_30 : f32 to vector<1x256xf32>
    %84 = arith.maximumf %82, %83 : vector<1x256xf32>
    %85 = arith.truncf %84 : vector<1x256xf32> to vector<1x256xbf16>
    %c0_31 = arith.constant 0 : index
    %c0_32 = arith.constant 0 : index
    %86 = vector.load %arg4[%c0_31, %c0_32] : memref<256x768xbf16, #tpu.memory_space<vmem>>, vector<256x768xbf16>
    %cst_33 = arith.constant dense<0.000000e+00> : vector<1x768xf32>
    %87 = tpu.matmul %85, %86, %cst_33 {dimension_numbers = #tpu.dot_dimension_numbers<[1], [0], [0], [1], [0, 0, 1, 1], [], []>} : vector<1x256xbf16>, vector<256x768xbf16>, vector<1x768xf32> -> vector<1x768xf32>
    %88 = arith.addf %87, %6 : vector<1x768xf32>
    %89 = arith.truncf %72 : vector<1x256xf32> to vector<1x256xbf16>
    %c0_34 = arith.constant 0 : index
    %c0_35 = arith.constant 0 : index
    %90 = vector.load %arg5[%c0_34, %c0_35] : memref<256x768xbf16, #tpu.memory_space<vmem>>, vector<256x768xbf16>
    %cst_36 = arith.constant dense<0.000000e+00> : vector<1x768xf32>
    %91 = tpu.matmul %89, %90, %cst_36 {dimension_numbers = #tpu.dot_dimension_numbers<[1], [0], [0], [1], [0, 0, 1, 1], [], []>} : vector<1x256xbf16>, vector<256x768xbf16>, vector<1x768xf32> -> vector<1x768xf32>
    %92 = vector.extract_strided_slice %88 {offsets = [0, 0], sizes = [1, 256], strides = [1, 1]} : vector<1x768xf32> to vector<1x256xf32>
    %93 = vector.extract_strided_slice %91 {offsets = [0, 0], sizes = [1, 256], strides = [1, 1]} : vector<1x768xf32> to vector<1x256xf32>
    %94 = arith.addf %92, %93 : vector<1x256xf32>
    %95 = arith.negf %94 : vector<1x256xf32>
    %96 = math.exp %95 : vector<1x256xf32>
    %cst_37 = arith.constant 1.000000e+00 : f32
    %97 = vector.broadcast %cst_37 : f32 to vector<1x256xf32>
    %98 = arith.addf %97, %96 : vector<1x256xf32>
    %99 = arith.divf %97, %98 : vector<1x256xf32>
    %100 = vector.extract_strided_slice %88 {offsets = [0, 256], sizes = [1, 256], strides = [1, 1]} : vector<1x768xf32> to vector<1x256xf32>
    %101 = vector.extract_strided_slice %91 {offsets = [0, 256], sizes = [1, 256], strides = [1, 1]} : vector<1x768xf32> to vector<1x256xf32>
    %102 = arith.addf %100, %101 : vector<1x256xf32>
    %103 = arith.negf %102 : vector<1x256xf32>
    %104 = math.exp %103 : vector<1x256xf32>
    %cst_38 = arith.constant 1.000000e+00 : f32
    %105 = vector.broadcast %cst_38 : f32 to vector<1x256xf32>
    %106 = arith.addf %105, %104 : vector<1x256xf32>
    %107 = arith.divf %105, %106 : vector<1x256xf32>
    %108 = vector.extract_strided_slice %88 {offsets = [0, 512], sizes = [1, 256], strides = [1, 1]} : vector<1x768xf32> to vector<1x256xf32>
    %109 = vector.extract_strided_slice %91 {offsets = [0, 512], sizes = [1, 256], strides = [1, 1]} : vector<1x768xf32> to vector<1x256xf32>
    %110 = arith.addf %109, %7 : vector<1x256xf32>
    %111 = arith.mulf %99, %110 : vector<1x256xf32>
    %112 = arith.addf %108, %111 : vector<1x256xf32>
    %113 = math.tanh %112 : vector<1x256xf32>
    %cst_39 = arith.constant 1.000000e+00 : f32
    %114 = vector.broadcast %cst_39 : f32 to vector<1x256xf32>
    %115 = arith.subf %114, %107 : vector<1x256xf32>
    %116 = arith.mulf %115, %113 : vector<1x256xf32>
    %117 = arith.mulf %107, %72 : vector<1x256xf32>
    %118 = arith.addf %116, %117 : vector<1x256xf32>
    %119 = arith.truncf %118 : vector<1x256xf32> to vector<1x256xbf16>
    %c0_40 = arith.constant 0 : index
    %c0_41 = arith.constant 0 : index
    %120 = vector.load %arg8[%c0_40, %c0_41] : memref<256x256xbf16, #tpu.memory_space<vmem>>, vector<256x256xbf16>
    %cst_42 = arith.constant dense<0.000000e+00> : vector<1x256xf32>
    %121 = tpu.matmul %119, %120, %cst_42 {dimension_numbers = #tpu.dot_dimension_numbers<[1], [0], [0], [1], [0, 0, 1, 1], [], []>} : vector<1x256xbf16>, vector<256x256xbf16>, vector<1x256xf32> -> vector<1x256xf32>
    %122 = arith.addf %121, %8 : vector<1x256xf32>
    %cst_43 = arith.constant dense<0xFF800000> : vector<1xf32>
    %123 = vector.multi_reduction <maximumf>, %122, %cst_43 [1] : vector<1x256xf32> to vector<1xf32>
    %124 = vector.shape_cast %123 : vector<1xf32> to vector<1x1xf32>
    %125 = vector.broadcast %124 : vector<1x1xf32> to vector<1x256xf32>
    %126 = arith.subf %122, %125 : vector<1x256xf32>
    %127 = math.exp %126 : vector<1x256xf32>
    %cst_44 = arith.constant dense<0.000000e+00> : vector<1xf32>
    %128 = vector.multi_reduction <add>, %127, %cst_44 [1] : vector<1x256xf32> to vector<1xf32>
    %129 = vector.shape_cast %128 : vector<1xf32> to vector<1x1xf32>
    %130 = math.log %129 : vector<1x1xf32>
    %131 = arith.addf %130, %124 : vector<1x1xf32>
    %132 = vector.broadcast %131 : vector<1x1xf32> to vector<1x256xf32>
    %133 = arith.subf %122, %132 : vector<1x256xf32>
    %c1_i32_45 = arith.constant 1 : i32
    %134 = arith.addi %4, %c1_i32_45 : i32
    %c13_i32_46 = arith.constant 13 : i32
    %135 = arith.cmpi slt, %134, %c13_i32_46 : i32
    %136 = arith.select %135, %118, %72 : vector<1x256xf32>
    %c2_i32 = arith.constant 2 : i32
    %137 = arith.addi %4, %c2_i32 : i32
    %138 = arith.index_cast %137 : i32 to index
    %139 = memref.load %arg1[%138] : memref<16xi32, #tpu.memory_space<smem>>
    %140 = vector.broadcast %139 : i32 to vector<1x256xi32>
    %141 = arith.cmpi eq, %5, %140 : vector<1x256xi32>
    %142 = arith.extui %141 : vector<1x256xi1> to vector<1x256xi32>
    %143 = arith.sitofp %142 : vector<1x256xi32> to vector<1x256xf32>
    %144 = arith.truncf %143 : vector<1x256xf32> to vector<1x256xbf16>
    %c0_47 = arith.constant 0 : index
    %c0_48 = arith.constant 0 : index
    %145 = vector.load %arg2[%c0_47, %c0_48] : memref<256x256xbf16, #tpu.memory_space<vmem>>, vector<256x256xbf16>
    %cst_49 = arith.constant dense<0.000000e+00> : vector<1x256xf32>
    %146 = tpu.matmul %144, %145, %cst_49 {dimension_numbers = #tpu.dot_dimension_numbers<[1], [0], [0], [1], [0, 0, 1, 1], [], []>} : vector<1x256xbf16>, vector<256x256xbf16>, vector<1x256xf32> -> vector<1x256xf32>
    %cst_50 = arith.constant 0.000000e+00 : f32
    %147 = vector.broadcast %cst_50 : f32 to vector<1x256xf32>
    %148 = arith.maximumf %146, %147 : vector<1x256xf32>
    %149 = arith.truncf %148 : vector<1x256xf32> to vector<1x256xbf16>
    %c0_51 = arith.constant 0 : index
    %c0_52 = arith.constant 0 : index
    %150 = vector.load %arg4[%c0_51, %c0_52] : memref<256x768xbf16, #tpu.memory_space<vmem>>, vector<256x768xbf16>
    %cst_53 = arith.constant dense<0.000000e+00> : vector<1x768xf32>
    %151 = tpu.matmul %149, %150, %cst_53 {dimension_numbers = #tpu.dot_dimension_numbers<[1], [0], [0], [1], [0, 0, 1, 1], [], []>} : vector<1x256xbf16>, vector<256x768xbf16>, vector<1x768xf32> -> vector<1x768xf32>
    %152 = arith.addf %151, %6 : vector<1x768xf32>
    %153 = arith.truncf %136 : vector<1x256xf32> to vector<1x256xbf16>
    %c0_54 = arith.constant 0 : index
    %c0_55 = arith.constant 0 : index
    %154 = vector.load %arg5[%c0_54, %c0_55] : memref<256x768xbf16, #tpu.memory_space<vmem>>, vector<256x768xbf16>
    %cst_56 = arith.constant dense<0.000000e+00> : vector<1x768xf32>
    %155 = tpu.matmul %153, %154, %cst_56 {dimension_numbers = #tpu.dot_dimension_numbers<[1], [0], [0], [1], [0, 0, 1, 1], [], []>} : vector<1x256xbf16>, vector<256x768xbf16>, vector<1x768xf32> -> vector<1x768xf32>
    %156 = vector.extract_strided_slice %152 {offsets = [0, 0], sizes = [1, 256], strides = [1, 1]} : vector<1x768xf32> to vector<1x256xf32>
    %157 = vector.extract_strided_slice %155 {offsets = [0, 0], sizes = [1, 256], strides = [1, 1]} : vector<1x768xf32> to vector<1x256xf32>
    %158 = arith.addf %156, %157 : vector<1x256xf32>
    %159 = arith.negf %158 : vector<1x256xf32>
    %160 = math.exp %159 : vector<1x256xf32>
    %cst_57 = arith.constant 1.000000e+00 : f32
    %161 = vector.broadcast %cst_57 : f32 to vector<1x256xf32>
    %162 = arith.addf %161, %160 : vector<1x256xf32>
    %163 = arith.divf %161, %162 : vector<1x256xf32>
    %164 = vector.extract_strided_slice %152 {offsets = [0, 256], sizes = [1, 256], strides = [1, 1]} : vector<1x768xf32> to vector<1x256xf32>
    %165 = vector.extract_strided_slice %155 {offsets = [0, 256], sizes = [1, 256], strides = [1, 1]} : vector<1x768xf32> to vector<1x256xf32>
    %166 = arith.addf %164, %165 : vector<1x256xf32>
    %167 = arith.negf %166 : vector<1x256xf32>
    %168 = math.exp %167 : vector<1x256xf32>
    %cst_58 = arith.constant 1.000000e+00 : f32
    %169 = vector.broadcast %cst_58 : f32 to vector<1x256xf32>
    %170 = arith.addf %169, %168 : vector<1x256xf32>
    %171 = arith.divf %169, %170 : vector<1x256xf32>
    %172 = vector.extract_strided_slice %152 {offsets = [0, 512], sizes = [1, 256], strides = [1, 1]} : vector<1x768xf32> to vector<1x256xf32>
    %173 = vector.extract_strided_slice %155 {offsets = [0, 512], sizes = [1, 256], strides = [1, 1]} : vector<1x768xf32> to vector<1x256xf32>
    %174 = arith.addf %173, %7 : vector<1x256xf32>
    %175 = arith.mulf %163, %174 : vector<1x256xf32>
    %176 = arith.addf %172, %175 : vector<1x256xf32>
    %177 = math.tanh %176 : vector<1x256xf32>
    %cst_59 = arith.constant 1.000000e+00 : f32
    %178 = vector.broadcast %cst_59 : f32 to vector<1x256xf32>
    %179 = arith.subf %178, %171 : vector<1x256xf32>
    %180 = arith.mulf %179, %177 : vector<1x256xf32>
    %181 = arith.mulf %171, %136 : vector<1x256xf32>
    %182 = arith.addf %180, %181 : vector<1x256xf32>
    %183 = arith.truncf %182 : vector<1x256xf32> to vector<1x256xbf16>
    %c0_60 = arith.constant 0 : index
    %c0_61 = arith.constant 0 : index
    %184 = vector.load %arg8[%c0_60, %c0_61] : memref<256x256xbf16, #tpu.memory_space<vmem>>, vector<256x256xbf16>
    %cst_62 = arith.constant dense<0.000000e+00> : vector<1x256xf32>
    %185 = tpu.matmul %183, %184, %cst_62 {dimension_numbers = #tpu.dot_dimension_numbers<[1], [0], [0], [1], [0, 0, 1, 1], [], []>} : vector<1x256xbf16>, vector<256x256xbf16>, vector<1x256xf32> -> vector<1x256xf32>
    %186 = arith.addf %185, %8 : vector<1x256xf32>
    %cst_63 = arith.constant dense<0xFF800000> : vector<1xf32>
    %187 = vector.multi_reduction <maximumf>, %186, %cst_63 [1] : vector<1x256xf32> to vector<1xf32>
    %188 = vector.shape_cast %187 : vector<1xf32> to vector<1x1xf32>
    %189 = vector.broadcast %188 : vector<1x1xf32> to vector<1x256xf32>
    %190 = arith.subf %186, %189 : vector<1x256xf32>
    %191 = math.exp %190 : vector<1x256xf32>
    %cst_64 = arith.constant dense<0.000000e+00> : vector<1xf32>
    %192 = vector.multi_reduction <add>, %191, %cst_64 [1] : vector<1x256xf32> to vector<1xf32>
    %193 = vector.shape_cast %192 : vector<1xf32> to vector<1x1xf32>
    %194 = math.log %193 : vector<1x1xf32>
    %195 = arith.addf %194, %188 : vector<1x1xf32>
    %196 = vector.broadcast %195 : vector<1x1xf32> to vector<1x256xf32>
    %197 = arith.subf %186, %196 : vector<1x256xf32>
    %c2_i32_65 = arith.constant 2 : i32
    %198 = arith.addi %4, %c2_i32_65 : i32
    %c13_i32_66 = arith.constant 13 : i32
    %199 = arith.cmpi slt, %198, %c13_i32_66 : i32
    %200 = arith.select %199, %182, %136 : vector<1x256xf32>
    %c3_i32 = arith.constant 3 : i32
    %201 = arith.addi %4, %c3_i32 : i32
    %202 = arith.index_cast %201 : i32 to index
    %203 = memref.load %arg1[%202] : memref<16xi32, #tpu.memory_space<smem>>
    %204 = vector.broadcast %203 : i32 to vector<1x256xi32>
    %205 = arith.cmpi eq, %5, %204 : vector<1x256xi32>
    %206 = arith.extui %205 : vector<1x256xi1> to vector<1x256xi32>
    %207 = arith.sitofp %206 : vector<1x256xi32> to vector<1x256xf32>
    %208 = arith.truncf %207 : vector<1x256xf32> to vector<1x256xbf16>
    %c0_67 = arith.constant 0 : index
    %c0_68 = arith.constant 0 : index
    %209 = vector.load %arg2[%c0_67, %c0_68] : memref<256x256xbf16, #tpu.memory_space<vmem>>, vector<256x256xbf16>
    %cst_69 = arith.constant dense<0.000000e+00> : vector<1x256xf32>
    %210 = tpu.matmul %208, %209, %cst_69 {dimension_numbers = #tpu.dot_dimension_numbers<[1], [0], [0], [1], [0, 0, 1, 1], [], []>} : vector<1x256xbf16>, vector<256x256xbf16>, vector<1x256xf32> -> vector<1x256xf32>
    %cst_70 = arith.constant 0.000000e+00 : f32
    %211 = vector.broadcast %cst_70 : f32 to vector<1x256xf32>
    %212 = arith.maximumf %210, %211 : vector<1x256xf32>
    %213 = arith.truncf %212 : vector<1x256xf32> to vector<1x256xbf16>
    %c0_71 = arith.constant 0 : index
    %c0_72 = arith.constant 0 : index
    %214 = vector.load %arg4[%c0_71, %c0_72] : memref<256x768xbf16, #tpu.memory_space<vmem>>, vector<256x768xbf16>
    %cst_73 = arith.constant dense<0.000000e+00> : vector<1x768xf32>
    %215 = tpu.matmul %213, %214, %cst_73 {dimension_numbers = #tpu.dot_dimension_numbers<[1], [0], [0], [1], [0, 0, 1, 1], [], []>} : vector<1x256xbf16>, vector<256x768xbf16>, vector<1x768xf32> -> vector<1x768xf32>
    %216 = arith.addf %215, %6 : vector<1x768xf32>
    %217 = arith.truncf %200 : vector<1x256xf32> to vector<1x256xbf16>
    %c0_74 = arith.constant 0 : index
    %c0_75 = arith.constant 0 : index
    %218 = vector.load %arg5[%c0_74, %c0_75] : memref<256x768xbf16, #tpu.memory_space<vmem>>, vector<256x768xbf16>
    %cst_76 = arith.constant dense<0.000000e+00> : vector<1x768xf32>
    %219 = tpu.matmul %217, %218, %cst_76 {dimension_numbers = #tpu.dot_dimension_numbers<[1], [0], [0], [1], [0, 0, 1, 1], [], []>} : vector<1x256xbf16>, vector<256x768xbf16>, vector<1x768xf32> -> vector<1x768xf32>
    %220 = vector.extract_strided_slice %216 {offsets = [0, 0], sizes = [1, 256], strides = [1, 1]} : vector<1x768xf32> to vector<1x256xf32>
    %221 = vector.extract_strided_slice %219 {offsets = [0, 0], sizes = [1, 256], strides = [1, 1]} : vector<1x768xf32> to vector<1x256xf32>
    %222 = arith.addf %220, %221 : vector<1x256xf32>
    %223 = arith.negf %222 : vector<1x256xf32>
    %224 = math.exp %223 : vector<1x256xf32>
    %cst_77 = arith.constant 1.000000e+00 : f32
    %225 = vector.broadcast %cst_77 : f32 to vector<1x256xf32>
    %226 = arith.addf %225, %224 : vector<1x256xf32>
    %227 = arith.divf %225, %226 : vector<1x256xf32>
    %228 = vector.extract_strided_slice %216 {offsets = [0, 256], sizes = [1, 256], strides = [1, 1]} : vector<1x768xf32> to vector<1x256xf32>
    %229 = vector.extract_strided_slice %219 {offsets = [0, 256], sizes = [1, 256], strides = [1, 1]} : vector<1x768xf32> to vector<1x256xf32>
    %230 = arith.addf %228, %229 : vector<1x256xf32>
    %231 = arith.negf %230 : vector<1x256xf32>
    %232 = math.exp %231 : vector<1x256xf32>
    %cst_78 = arith.constant 1.000000e+00 : f32
    %233 = vector.broadcast %cst_78 : f32 to vector<1x256xf32>
    %234 = arith.addf %233, %232 : vector<1x256xf32>
    %235 = arith.divf %233, %234 : vector<1x256xf32>
    %236 = vector.extract_strided_slice %216 {offsets = [0, 512], sizes = [1, 256], strides = [1, 1]} : vector<1x768xf32> to vector<1x256xf32>
    %237 = vector.extract_strided_slice %219 {offsets = [0, 512], sizes = [1, 256], strides = [1, 1]} : vector<1x768xf32> to vector<1x256xf32>
    %238 = arith.addf %237, %7 : vector<1x256xf32>
    %239 = arith.mulf %227, %238 : vector<1x256xf32>
    %240 = arith.addf %236, %239 : vector<1x256xf32>
    %241 = math.tanh %240 : vector<1x256xf32>
    %cst_79 = arith.constant 1.000000e+00 : f32
    %242 = vector.broadcast %cst_79 : f32 to vector<1x256xf32>
    %243 = arith.subf %242, %235 : vector<1x256xf32>
    %244 = arith.mulf %243, %241 : vector<1x256xf32>
    %245 = arith.mulf %235, %200 : vector<1x256xf32>
    %246 = arith.addf %244, %245 : vector<1x256xf32>
    %247 = arith.truncf %246 : vector<1x256xf32> to vector<1x256xbf16>
    %c0_80 = arith.constant 0 : index
    %c0_81 = arith.constant 0 : index
    %248 = vector.load %arg8[%c0_80, %c0_81] : memref<256x256xbf16, #tpu.memory_space<vmem>>, vector<256x256xbf16>
    %cst_82 = arith.constant dense<0.000000e+00> : vector<1x256xf32>
    %249 = tpu.matmul %247, %248, %cst_82 {dimension_numbers = #tpu.dot_dimension_numbers<[1], [0], [0], [1], [0, 0, 1, 1], [], []>} : vector<1x256xbf16>, vector<256x256xbf16>, vector<1x256xf32> -> vector<1x256xf32>
    %250 = arith.addf %249, %8 : vector<1x256xf32>
    %cst_83 = arith.constant dense<0xFF800000> : vector<1xf32>
    %251 = vector.multi_reduction <maximumf>, %250, %cst_83 [1] : vector<1x256xf32> to vector<1xf32>
    %252 = vector.shape_cast %251 : vector<1xf32> to vector<1x1xf32>
    %253 = vector.broadcast %252 : vector<1x1xf32> to vector<1x256xf32>
    %254 = arith.subf %250, %253 : vector<1x256xf32>
    %255 = math.exp %254 : vector<1x256xf32>
    %cst_84 = arith.constant dense<0.000000e+00> : vector<1xf32>
    %256 = vector.multi_reduction <add>, %255, %cst_84 [1] : vector<1x256xf32> to vector<1xf32>
    %257 = vector.shape_cast %256 : vector<1xf32> to vector<1x1xf32>
    %258 = math.log %257 : vector<1x1xf32>
    %259 = arith.addf %258, %252 : vector<1x1xf32>
    %260 = vector.broadcast %259 : vector<1x1xf32> to vector<1x256xf32>
    %261 = arith.subf %250, %260 : vector<1x256xf32>
    %c3_i32_85 = arith.constant 3 : i32
    %262 = arith.addi %4, %c3_i32_85 : i32
    %c13_i32_86 = arith.constant 13 : i32
    %263 = arith.cmpi slt, %262, %c13_i32_86 : i32
    %264 = arith.select %263, %246, %200 : vector<1x256xf32>
    %c4_i32 = arith.constant 4 : i32
    %265 = arith.addi %4, %c4_i32 : i32
    %266 = arith.index_cast %265 : i32 to index
    %267 = memref.load %arg1[%266] : memref<16xi32, #tpu.memory_space<smem>>
    %268 = vector.broadcast %267 : i32 to vector<1x256xi32>
    %269 = arith.cmpi eq, %5, %268 : vector<1x256xi32>
    %270 = arith.extui %269 : vector<1x256xi1> to vector<1x256xi32>
    %271 = arith.sitofp %270 : vector<1x256xi32> to vector<1x256xf32>
    %272 = arith.truncf %271 : vector<1x256xf32> to vector<1x256xbf16>
    %c0_87 = arith.constant 0 : index
    %c0_88 = arith.constant 0 : index
    %273 = vector.load %arg2[%c0_87, %c0_88] : memref<256x256xbf16, #tpu.memory_space<vmem>>, vector<256x256xbf16>
    %cst_89 = arith.constant dense<0.000000e+00> : vector<1x256xf32>
    %274 = tpu.matmul %272, %273, %cst_89 {dimension_numbers = #tpu.dot_dimension_numbers<[1], [0], [0], [1], [0, 0, 1, 1], [], []>} : vector<1x256xbf16>, vector<256x256xbf16>, vector<1x256xf32> -> vector<1x256xf32>
    %cst_90 = arith.constant 0.000000e+00 : f32
    %275 = vector.broadcast %cst_90 : f32 to vector<1x256xf32>
    %276 = arith.maximumf %274, %275 : vector<1x256xf32>
    %277 = arith.truncf %276 : vector<1x256xf32> to vector<1x256xbf16>
    %c0_91 = arith.constant 0 : index
    %c0_92 = arith.constant 0 : index
    %278 = vector.load %arg4[%c0_91, %c0_92] : memref<256x768xbf16, #tpu.memory_space<vmem>>, vector<256x768xbf16>
    %cst_93 = arith.constant dense<0.000000e+00> : vector<1x768xf32>
    %279 = tpu.matmul %277, %278, %cst_93 {dimension_numbers = #tpu.dot_dimension_numbers<[1], [0], [0], [1], [0, 0, 1, 1], [], []>} : vector<1x256xbf16>, vector<256x768xbf16>, vector<1x768xf32> -> vector<1x768xf32>
    %280 = arith.addf %279, %6 : vector<1x768xf32>
    %281 = arith.truncf %264 : vector<1x256xf32> to vector<1x256xbf16>
    %c0_94 = arith.constant 0 : index
    %c0_95 = arith.constant 0 : index
    %282 = vector.load %arg5[%c0_94, %c0_95] : memref<256x768xbf16, #tpu.memory_space<vmem>>, vector<256x768xbf16>
    %cst_96 = arith.constant dense<0.000000e+00> : vector<1x768xf32>
    %283 = tpu.matmul %281, %282, %cst_96 {dimension_numbers = #tpu.dot_dimension_numbers<[1], [0], [0], [1], [0, 0, 1, 1], [], []>} : vector<1x256xbf16>, vector<256x768xbf16>, vector<1x768xf32> -> vector<1x768xf32>
    %284 = vector.extract_strided_slice %280 {offsets = [0, 0], sizes = [1, 256], strides = [1, 1]} : vector<1x768xf32> to vector<1x256xf32>
    %285 = vector.extract_strided_slice %283 {offsets = [0, 0], sizes = [1, 256], strides = [1, 1]} : vector<1x768xf32> to vector<1x256xf32>
    %286 = arith.addf %284, %285 : vector<1x256xf32>
    %287 = arith.negf %286 : vector<1x256xf32>
    %288 = math.exp %287 : vector<1x256xf32>
    %cst_97 = arith.constant 1.000000e+00 : f32
    %289 = vector.broadcast %cst_97 : f32 to vector<1x256xf32>
    %290 = arith.addf %289, %288 : vector<1x256xf32>
    %291 = arith.divf %289, %290 : vector<1x256xf32>
    %292 = vector.extract_strided_slice %280 {offsets = [0, 256], sizes = [1, 256], strides = [1, 1]} : vector<1x768xf32> to vector<1x256xf32>
    %293 = vector.extract_strided_slice %283 {offsets = [0, 256], sizes = [1, 256], strides = [1, 1]} : vector<1x768xf32> to vector<1x256xf32>
    %294 = arith.addf %292, %293 : vector<1x256xf32>
    %295 = arith.negf %294 : vector<1x256xf32>
    %296 = math.exp %295 : vector<1x256xf32>
    %cst_98 = arith.constant 1.000000e+00 : f32
    %297 = vector.broadcast %cst_98 : f32 to vector<1x256xf32>
    %298 = arith.addf %297, %296 : vector<1x256xf32>
    %299 = arith.divf %297, %298 : vector<1x256xf32>
    %300 = vector.extract_strided_slice %280 {offsets = [0, 512], sizes = [1, 256], strides = [1, 1]} : vector<1x768xf32> to vector<1x256xf32>
    %301 = vector.extract_strided_slice %283 {offsets = [0, 512], sizes = [1, 256], strides = [1, 1]} : vector<1x768xf32> to vector<1x256xf32>
    %302 = arith.addf %301, %7 : vector<1x256xf32>
    %303 = arith.mulf %291, %302 : vector<1x256xf32>
    %304 = arith.addf %300, %303 : vector<1x256xf32>
    %305 = math.tanh %304 : vector<1x256xf32>
    %cst_99 = arith.constant 1.000000e+00 : f32
    %306 = vector.broadcast %cst_99 : f32 to vector<1x256xf32>
    %307 = arith.subf %306, %299 : vector<1x256xf32>
    %308 = arith.mulf %307, %305 : vector<1x256xf32>
    %309 = arith.mulf %299, %264 : vector<1x256xf32>
    %310 = arith.addf %308, %309 : vector<1x256xf32>
    %311 = arith.truncf %310 : vector<1x256xf32> to vector<1x256xbf16>
    %c0_100 = arith.constant 0 : index
    %c0_101 = arith.constant 0 : index
    %312 = vector.load %arg8[%c0_100, %c0_101] : memref<256x256xbf16, #tpu.memory_space<vmem>>, vector<256x256xbf16>
    %cst_102 = arith.constant dense<0.000000e+00> : vector<1x256xf32>
    %313 = tpu.matmul %311, %312, %cst_102 {dimension_numbers = #tpu.dot_dimension_numbers<[1], [0], [0], [1], [0, 0, 1, 1], [], []>} : vector<1x256xbf16>, vector<256x256xbf16>, vector<1x256xf32> -> vector<1x256xf32>
    %314 = arith.addf %313, %8 : vector<1x256xf32>
    %cst_103 = arith.constant dense<0xFF800000> : vector<1xf32>
    %315 = vector.multi_reduction <maximumf>, %314, %cst_103 [1] : vector<1x256xf32> to vector<1xf32>
    %316 = vector.shape_cast %315 : vector<1xf32> to vector<1x1xf32>
    %317 = vector.broadcast %316 : vector<1x1xf32> to vector<1x256xf32>
    %318 = arith.subf %314, %317 : vector<1x256xf32>
    %319 = math.exp %318 : vector<1x256xf32>
    %cst_104 = arith.constant dense<0.000000e+00> : vector<1xf32>
    %320 = vector.multi_reduction <add>, %319, %cst_104 [1] : vector<1x256xf32> to vector<1xf32>
    %321 = vector.shape_cast %320 : vector<1xf32> to vector<1x1xf32>
    %322 = math.log %321 : vector<1x1xf32>
    %323 = arith.addf %322, %316 : vector<1x1xf32>
    %324 = vector.broadcast %323 : vector<1x1xf32> to vector<1x256xf32>
    %325 = arith.subf %314, %324 : vector<1x256xf32>
    %c4_i32_105 = arith.constant 4 : i32
    %326 = arith.addi %4, %c4_i32_105 : i32
    %c13_i32_106 = arith.constant 13 : i32
    %327 = arith.cmpi slt, %326, %c13_i32_106 : i32
    %328 = arith.select %327, %310, %264 : vector<1x256xf32>
    %c5_i32 = arith.constant 5 : i32
    %329 = arith.addi %4, %c5_i32 : i32
    %330 = arith.index_cast %329 : i32 to index
    %331 = memref.load %arg1[%330] : memref<16xi32, #tpu.memory_space<smem>>
    %332 = vector.broadcast %331 : i32 to vector<1x256xi32>
    %333 = arith.cmpi eq, %5, %332 : vector<1x256xi32>
    %334 = arith.extui %333 : vector<1x256xi1> to vector<1x256xi32>
    %335 = arith.sitofp %334 : vector<1x256xi32> to vector<1x256xf32>
    %336 = arith.truncf %335 : vector<1x256xf32> to vector<1x256xbf16>
    %c0_107 = arith.constant 0 : index
    %c0_108 = arith.constant 0 : index
    %337 = vector.load %arg2[%c0_107, %c0_108] : memref<256x256xbf16, #tpu.memory_space<vmem>>, vector<256x256xbf16>
    %cst_109 = arith.constant dense<0.000000e+00> : vector<1x256xf32>
    %338 = tpu.matmul %336, %337, %cst_109 {dimension_numbers = #tpu.dot_dimension_numbers<[1], [0], [0], [1], [0, 0, 1, 1], [], []>} : vector<1x256xbf16>, vector<256x256xbf16>, vector<1x256xf32> -> vector<1x256xf32>
    %cst_110 = arith.constant 0.000000e+00 : f32
    %339 = vector.broadcast %cst_110 : f32 to vector<1x256xf32>
    %340 = arith.maximumf %338, %339 : vector<1x256xf32>
    %341 = arith.truncf %340 : vector<1x256xf32> to vector<1x256xbf16>
    %c0_111 = arith.constant 0 : index
    %c0_112 = arith.constant 0 : index
    %342 = vector.load %arg4[%c0_111, %c0_112] : memref<256x768xbf16, #tpu.memory_space<vmem>>, vector<256x768xbf16>
    %cst_113 = arith.constant dense<0.000000e+00> : vector<1x768xf32>
    %343 = tpu.matmul %341, %342, %cst_113 {dimension_numbers = #tpu.dot_dimension_numbers<[1], [0], [0], [1], [0, 0, 1, 1], [], []>} : vector<1x256xbf16>, vector<256x768xbf16>, vector<1x768xf32> -> vector<1x768xf32>
    %344 = arith.addf %343, %6 : vector<1x768xf32>
    %345 = arith.truncf %328 : vector<1x256xf32> to vector<1x256xbf16>
    %c0_114 = arith.constant 0 : index
    %c0_115 = arith.constant 0 : index
    %346 = vector.load %arg5[%c0_114, %c0_115] : memref<256x768xbf16, #tpu.memory_space<vmem>>, vector<256x768xbf16>
    %cst_116 = arith.constant dense<0.000000e+00> : vector<1x768xf32>
    %347 = tpu.matmul %345, %346, %cst_116 {dimension_numbers = #tpu.dot_dimension_numbers<[1], [0], [0], [1], [0, 0, 1, 1], [], []>} : vector<1x256xbf16>, vector<256x768xbf16>, vector<1x768xf32> -> vector<1x768xf32>
    %348 = vector.extract_strided_slice %344 {offsets = [0, 0], sizes = [1, 256], strides = [1, 1]} : vector<1x768xf32> to vector<1x256xf32>
    %349 = vector.extract_strided_slice %347 {offsets = [0, 0], sizes = [1, 256], strides = [1, 1]} : vector<1x768xf32> to vector<1x256xf32>
    %350 = arith.addf %348, %349 : vector<1x256xf32>
    %351 = arith.negf %350 : vector<1x256xf32>
    %352 = math.exp %351 : vector<1x256xf32>
    %cst_117 = arith.constant 1.000000e+00 : f32
    %353 = vector.broadcast %cst_117 : f32 to vector<1x256xf32>
    %354 = arith.addf %353, %352 : vector<1x256xf32>
    %355 = arith.divf %353, %354 : vector<1x256xf32>
    %356 = vector.extract_strided_slice %344 {offsets = [0, 256], sizes = [1, 256], strides = [1, 1]} : vector<1x768xf32> to vector<1x256xf32>
    %357 = vector.extract_strided_slice %347 {offsets = [0, 256], sizes = [1, 256], strides = [1, 1]} : vector<1x768xf32> to vector<1x256xf32>
    %358 = arith.addf %356, %357 : vector<1x256xf32>
    %359 = arith.negf %358 : vector<1x256xf32>
    %360 = math.exp %359 : vector<1x256xf32>
    %cst_118 = arith.constant 1.000000e+00 : f32
    %361 = vector.broadcast %cst_118 : f32 to vector<1x256xf32>
    %362 = arith.addf %361, %360 : vector<1x256xf32>
    %363 = arith.divf %361, %362 : vector<1x256xf32>
    %364 = vector.extract_strided_slice %344 {offsets = [0, 512], sizes = [1, 256], strides = [1, 1]} : vector<1x768xf32> to vector<1x256xf32>
    %365 = vector.extract_strided_slice %347 {offsets = [0, 512], sizes = [1, 256], strides = [1, 1]} : vector<1x768xf32> to vector<1x256xf32>
    %366 = arith.addf %365, %7 : vector<1x256xf32>
    %367 = arith.mulf %355, %366 : vector<1x256xf32>
    %368 = arith.addf %364, %367 : vector<1x256xf32>
    %369 = math.tanh %368 : vector<1x256xf32>
    %cst_119 = arith.constant 1.000000e+00 : f32
    %370 = vector.broadcast %cst_119 : f32 to vector<1x256xf32>
    %371 = arith.subf %370, %363 : vector<1x256xf32>
    %372 = arith.mulf %371, %369 : vector<1x256xf32>
    %373 = arith.mulf %363, %328 : vector<1x256xf32>
    %374 = arith.addf %372, %373 : vector<1x256xf32>
    %375 = arith.truncf %374 : vector<1x256xf32> to vector<1x256xbf16>
    %c0_120 = arith.constant 0 : index
    %c0_121 = arith.constant 0 : index
    %376 = vector.load %arg8[%c0_120, %c0_121] : memref<256x256xbf16, #tpu.memory_space<vmem>>, vector<256x256xbf16>
    %cst_122 = arith.constant dense<0.000000e+00> : vector<1x256xf32>
    %377 = tpu.matmul %375, %376, %cst_122 {dimension_numbers = #tpu.dot_dimension_numbers<[1], [0], [0], [1], [0, 0, 1, 1], [], []>} : vector<1x256xbf16>, vector<256x256xbf16>, vector<1x256xf32> -> vector<1x256xf32>
    %378 = arith.addf %377, %8 : vector<1x256xf32>
    %cst_123 = arith.constant dense<0xFF800000> : vector<1xf32>
    %379 = vector.multi_reduction <maximumf>, %378, %cst_123 [1] : vector<1x256xf32> to vector<1xf32>
    %380 = vector.shape_cast %379 : vector<1xf32> to vector<1x1xf32>
    %381 = vector.broadcast %380 : vector<1x1xf32> to vector<1x256xf32>
    %382 = arith.subf %378, %381 : vector<1x256xf32>
    %383 = math.exp %382 : vector<1x256xf32>
    %cst_124 = arith.constant dense<0.000000e+00> : vector<1xf32>
    %384 = vector.multi_reduction <add>, %383, %cst_124 [1] : vector<1x256xf32> to vector<1xf32>
    %385 = vector.shape_cast %384 : vector<1xf32> to vector<1x1xf32>
    %386 = math.log %385 : vector<1x1xf32>
    %387 = arith.addf %386, %380 : vector<1x1xf32>
    %388 = vector.broadcast %387 : vector<1x1xf32> to vector<1x256xf32>
    %389 = arith.subf %378, %388 : vector<1x256xf32>
    %c5_i32_125 = arith.constant 5 : i32
    %390 = arith.addi %4, %c5_i32_125 : i32
    %c13_i32_126 = arith.constant 13 : i32
    %391 = arith.cmpi slt, %390, %c13_i32_126 : i32
    %392 = arith.select %391, %374, %328 : vector<1x256xf32>
    %c6_i32 = arith.constant 6 : i32
    %393 = arith.addi %4, %c6_i32 : i32
    %394 = arith.index_cast %393 : i32 to index
    %395 = memref.load %arg1[%394] : memref<16xi32, #tpu.memory_space<smem>>
    %396 = vector.broadcast %395 : i32 to vector<1x256xi32>
    %397 = arith.cmpi eq, %5, %396 : vector<1x256xi32>
    %398 = arith.extui %397 : vector<1x256xi1> to vector<1x256xi32>
    %399 = arith.sitofp %398 : vector<1x256xi32> to vector<1x256xf32>
    %400 = arith.truncf %399 : vector<1x256xf32> to vector<1x256xbf16>
    %c0_127 = arith.constant 0 : index
    %c0_128 = arith.constant 0 : index
    %401 = vector.load %arg2[%c0_127, %c0_128] : memref<256x256xbf16, #tpu.memory_space<vmem>>, vector<256x256xbf16>
    %cst_129 = arith.constant dense<0.000000e+00> : vector<1x256xf32>
    %402 = tpu.matmul %400, %401, %cst_129 {dimension_numbers = #tpu.dot_dimension_numbers<[1], [0], [0], [1], [0, 0, 1, 1], [], []>} : vector<1x256xbf16>, vector<256x256xbf16>, vector<1x256xf32> -> vector<1x256xf32>
    %cst_130 = arith.constant 0.000000e+00 : f32
    %403 = vector.broadcast %cst_130 : f32 to vector<1x256xf32>
    %404 = arith.maximumf %402, %403 : vector<1x256xf32>
    %405 = arith.truncf %404 : vector<1x256xf32> to vector<1x256xbf16>
    %c0_131 = arith.constant 0 : index
    %c0_132 = arith.constant 0 : index
    %406 = vector.load %arg4[%c0_131, %c0_132] : memref<256x768xbf16, #tpu.memory_space<vmem>>, vector<256x768xbf16>
    %cst_133 = arith.constant dense<0.000000e+00> : vector<1x768xf32>
    %407 = tpu.matmul %405, %406, %cst_133 {dimension_numbers = #tpu.dot_dimension_numbers<[1], [0], [0], [1], [0, 0, 1, 1], [], []>} : vector<1x256xbf16>, vector<256x768xbf16>, vector<1x768xf32> -> vector<1x768xf32>
    %408 = arith.addf %407, %6 : vector<1x768xf32>
    %409 = arith.truncf %392 : vector<1x256xf32> to vector<1x256xbf16>
    %c0_134 = arith.constant 0 : index
    %c0_135 = arith.constant 0 : index
    %410 = vector.load %arg5[%c0_134, %c0_135] : memref<256x768xbf16, #tpu.memory_space<vmem>>, vector<256x768xbf16>
    %cst_136 = arith.constant dense<0.000000e+00> : vector<1x768xf32>
    %411 = tpu.matmul %409, %410, %cst_136 {dimension_numbers = #tpu.dot_dimension_numbers<[1], [0], [0], [1], [0, 0, 1, 1], [], []>} : vector<1x256xbf16>, vector<256x768xbf16>, vector<1x768xf32> -> vector<1x768xf32>
    %412 = vector.extract_strided_slice %408 {offsets = [0, 0], sizes = [1, 256], strides = [1, 1]} : vector<1x768xf32> to vector<1x256xf32>
    %413 = vector.extract_strided_slice %411 {offsets = [0, 0], sizes = [1, 256], strides = [1, 1]} : vector<1x768xf32> to vector<1x256xf32>
    %414 = arith.addf %412, %413 : vector<1x256xf32>
    %415 = arith.negf %414 : vector<1x256xf32>
    %416 = math.exp %415 : vector<1x256xf32>
    %cst_137 = arith.constant 1.000000e+00 : f32
    %417 = vector.broadcast %cst_137 : f32 to vector<1x256xf32>
    %418 = arith.addf %417, %416 : vector<1x256xf32>
    %419 = arith.divf %417, %418 : vector<1x256xf32>
    %420 = vector.extract_strided_slice %408 {offsets = [0, 256], sizes = [1, 256], strides = [1, 1]} : vector<1x768xf32> to vector<1x256xf32>
    %421 = vector.extract_strided_slice %411 {offsets = [0, 256], sizes = [1, 256], strides = [1, 1]} : vector<1x768xf32> to vector<1x256xf32>
    %422 = arith.addf %420, %421 : vector<1x256xf32>
    %423 = arith.negf %422 : vector<1x256xf32>
    %424 = math.exp %423 : vector<1x256xf32>
    %cst_138 = arith.constant 1.000000e+00 : f32
    %425 = vector.broadcast %cst_138 : f32 to vector<1x256xf32>
    %426 = arith.addf %425, %424 : vector<1x256xf32>
    %427 = arith.divf %425, %426 : vector<1x256xf32>
    %428 = vector.extract_strided_slice %408 {offsets = [0, 512], sizes = [1, 256], strides = [1, 1]} : vector<1x768xf32> to vector<1x256xf32>
    %429 = vector.extract_strided_slice %411 {offsets = [0, 512], sizes = [1, 256], strides = [1, 1]} : vector<1x768xf32> to vector<1x256xf32>
    %430 = arith.addf %429, %7 : vector<1x256xf32>
    %431 = arith.mulf %419, %430 : vector<1x256xf32>
    %432 = arith.addf %428, %431 : vector<1x256xf32>
    %433 = math.tanh %432 : vector<1x256xf32>
    %cst_139 = arith.constant 1.000000e+00 : f32
    %434 = vector.broadcast %cst_139 : f32 to vector<1x256xf32>
    %435 = arith.subf %434, %427 : vector<1x256xf32>
    %436 = arith.mulf %435, %433 : vector<1x256xf32>
    %437 = arith.mulf %427, %392 : vector<1x256xf32>
    %438 = arith.addf %436, %437 : vector<1x256xf32>
    %439 = arith.truncf %438 : vector<1x256xf32> to vector<1x256xbf16>
    %c0_140 = arith.constant 0 : index
    %c0_141 = arith.constant 0 : index
    %440 = vector.load %arg8[%c0_140, %c0_141] : memref<256x256xbf16, #tpu.memory_space<vmem>>, vector<256x256xbf16>
    %cst_142 = arith.constant dense<0.000000e+00> : vector<1x256xf32>
    %441 = tpu.matmul %439, %440, %cst_142 {dimension_numbers = #tpu.dot_dimension_numbers<[1], [0], [0], [1], [0, 0, 1, 1], [], []>} : vector<1x256xbf16>, vector<256x256xbf16>, vector<1x256xf32> -> vector<1x256xf32>
    %442 = arith.addf %441, %8 : vector<1x256xf32>
    %cst_143 = arith.constant dense<0xFF800000> : vector<1xf32>
    %443 = vector.multi_reduction <maximumf>, %442, %cst_143 [1] : vector<1x256xf32> to vector<1xf32>
    %444 = vector.shape_cast %443 : vector<1xf32> to vector<1x1xf32>
    %445 = vector.broadcast %444 : vector<1x1xf32> to vector<1x256xf32>
    %446 = arith.subf %442, %445 : vector<1x256xf32>
    %447 = math.exp %446 : vector<1x256xf32>
    %cst_144 = arith.constant dense<0.000000e+00> : vector<1xf32>
    %448 = vector.multi_reduction <add>, %447, %cst_144 [1] : vector<1x256xf32> to vector<1xf32>
    %449 = vector.shape_cast %448 : vector<1xf32> to vector<1x1xf32>
    %450 = math.log %449 : vector<1x1xf32>
    %451 = arith.addf %450, %444 : vector<1x1xf32>
    %452 = vector.broadcast %451 : vector<1x1xf32> to vector<1x256xf32>
    %453 = arith.subf %442, %452 : vector<1x256xf32>
    %c6_i32_145 = arith.constant 6 : i32
    %454 = arith.addi %4, %c6_i32_145 : i32
    %c13_i32_146 = arith.constant 13 : i32
    %455 = arith.cmpi slt, %454, %c13_i32_146 : i32
    %456 = arith.select %455, %438, %392 : vector<1x256xf32>
    %c7_i32 = arith.constant 7 : i32
    %457 = arith.addi %4, %c7_i32 : i32
    %458 = arith.index_cast %457 : i32 to index
    %459 = memref.load %arg1[%458] : memref<16xi32, #tpu.memory_space<smem>>
    %460 = vector.broadcast %459 : i32 to vector<1x256xi32>
    %461 = arith.cmpi eq, %5, %460 : vector<1x256xi32>
    %462 = arith.extui %461 : vector<1x256xi1> to vector<1x256xi32>
    %463 = arith.sitofp %462 : vector<1x256xi32> to vector<1x256xf32>
    %464 = arith.truncf %463 : vector<1x256xf32> to vector<1x256xbf16>
    %c0_147 = arith.constant 0 : index
    %c0_148 = arith.constant 0 : index
    %465 = vector.load %arg2[%c0_147, %c0_148] : memref<256x256xbf16, #tpu.memory_space<vmem>>, vector<256x256xbf16>
    %cst_149 = arith.constant dense<0.000000e+00> : vector<1x256xf32>
    %466 = tpu.matmul %464, %465, %cst_149 {dimension_numbers = #tpu.dot_dimension_numbers<[1], [0], [0], [1], [0, 0, 1, 1], [], []>} : vector<1x256xbf16>, vector<256x256xbf16>, vector<1x256xf32> -> vector<1x256xf32>
    %cst_150 = arith.constant 0.000000e+00 : f32
    %467 = vector.broadcast %cst_150 : f32 to vector<1x256xf32>
    %468 = arith.maximumf %466, %467 : vector<1x256xf32>
    %469 = arith.truncf %468 : vector<1x256xf32> to vector<1x256xbf16>
    %c0_151 = arith.constant 0 : index
    %c0_152 = arith.constant 0 : index
    %470 = vector.load %arg4[%c0_151, %c0_152] : memref<256x768xbf16, #tpu.memory_space<vmem>>, vector<256x768xbf16>
    %cst_153 = arith.constant dense<0.000000e+00> : vector<1x768xf32>
    %471 = tpu.matmul %469, %470, %cst_153 {dimension_numbers = #tpu.dot_dimension_numbers<[1], [0], [0], [1], [0, 0, 1, 1], [], []>} : vector<1x256xbf16>, vector<256x768xbf16>, vector<1x768xf32> -> vector<1x768xf32>
    %472 = arith.addf %471, %6 : vector<1x768xf32>
    %473 = arith.truncf %456 : vector<1x256xf32> to vector<1x256xbf16>
    %c0_154 = arith.constant 0 : index
    %c0_155 = arith.constant 0 : index
    %474 = vector.load %arg5[%c0_154, %c0_155] : memref<256x768xbf16, #tpu.memory_space<vmem>>, vector<256x768xbf16>
    %cst_156 = arith.constant dense<0.000000e+00> : vector<1x768xf32>
    %475 = tpu.matmul %473, %474, %cst_156 {dimension_numbers = #tpu.dot_dimension_numbers<[1], [0], [0], [1], [0, 0, 1, 1], [], []>} : vector<1x256xbf16>, vector<256x768xbf16>, vector<1x768xf32> -> vector<1x768xf32>
    %476 = vector.extract_strided_slice %472 {offsets = [0, 0], sizes = [1, 256], strides = [1, 1]} : vector<1x768xf32> to vector<1x256xf32>
    %477 = vector.extract_strided_slice %475 {offsets = [0, 0], sizes = [1, 256], strides = [1, 1]} : vector<1x768xf32> to vector<1x256xf32>
    %478 = arith.addf %476, %477 : vector<1x256xf32>
    %479 = arith.negf %478 : vector<1x256xf32>
    %480 = math.exp %479 : vector<1x256xf32>
    %cst_157 = arith.constant 1.000000e+00 : f32
    %481 = vector.broadcast %cst_157 : f32 to vector<1x256xf32>
    %482 = arith.addf %481, %480 : vector<1x256xf32>
    %483 = arith.divf %481, %482 : vector<1x256xf32>
    %484 = vector.extract_strided_slice %472 {offsets = [0, 256], sizes = [1, 256], strides = [1, 1]} : vector<1x768xf32> to vector<1x256xf32>
    %485 = vector.extract_strided_slice %475 {offsets = [0, 256], sizes = [1, 256], strides = [1, 1]} : vector<1x768xf32> to vector<1x256xf32>
    %486 = arith.addf %484, %485 : vector<1x256xf32>
    %487 = arith.negf %486 : vector<1x256xf32>
    %488 = math.exp %487 : vector<1x256xf32>
    %cst_158 = arith.constant 1.000000e+00 : f32
    %489 = vector.broadcast %cst_158 : f32 to vector<1x256xf32>
    %490 = arith.addf %489, %488 : vector<1x256xf32>
    %491 = arith.divf %489, %490 : vector<1x256xf32>
    %492 = vector.extract_strided_slice %472 {offsets = [0, 512], sizes = [1, 256], strides = [1, 1]} : vector<1x768xf32> to vector<1x256xf32>
    %493 = vector.extract_strided_slice %475 {offsets = [0, 512], sizes = [1, 256], strides = [1, 1]} : vector<1x768xf32> to vector<1x256xf32>
    %494 = arith.addf %493, %7 : vector<1x256xf32>
    %495 = arith.mulf %483, %494 : vector<1x256xf32>
    %496 = arith.addf %492, %495 : vector<1x256xf32>
    %497 = math.tanh %496 : vector<1x256xf32>
    %cst_159 = arith.constant 1.000000e+00 : f32
    %498 = vector.broadcast %cst_159 : f32 to vector<1x256xf32>
    %499 = arith.subf %498, %491 : vector<1x256xf32>
    %500 = arith.mulf %499, %497 : vector<1x256xf32>
    %501 = arith.mulf %491, %456 : vector<1x256xf32>
    %502 = arith.addf %500, %501 : vector<1x256xf32>
    %503 = arith.truncf %502 : vector<1x256xf32> to vector<1x256xbf16>
    %c0_160 = arith.constant 0 : index
    %c0_161 = arith.constant 0 : index
    %504 = vector.load %arg8[%c0_160, %c0_161] : memref<256x256xbf16, #tpu.memory_space<vmem>>, vector<256x256xbf16>
    %cst_162 = arith.constant dense<0.000000e+00> : vector<1x256xf32>
    %505 = tpu.matmul %503, %504, %cst_162 {dimension_numbers = #tpu.dot_dimension_numbers<[1], [0], [0], [1], [0, 0, 1, 1], [], []>} : vector<1x256xbf16>, vector<256x256xbf16>, vector<1x256xf32> -> vector<1x256xf32>
    %506 = arith.addf %505, %8 : vector<1x256xf32>
    %cst_163 = arith.constant dense<0xFF800000> : vector<1xf32>
    %507 = vector.multi_reduction <maximumf>, %506, %cst_163 [1] : vector<1x256xf32> to vector<1xf32>
    %508 = vector.shape_cast %507 : vector<1xf32> to vector<1x1xf32>
    %509 = vector.broadcast %508 : vector<1x1xf32> to vector<1x256xf32>
    %510 = arith.subf %506, %509 : vector<1x256xf32>
    %511 = math.exp %510 : vector<1x256xf32>
    %cst_164 = arith.constant dense<0.000000e+00> : vector<1xf32>
    %512 = vector.multi_reduction <add>, %511, %cst_164 [1] : vector<1x256xf32> to vector<1xf32>
    %513 = vector.shape_cast %512 : vector<1xf32> to vector<1x1xf32>
    %514 = math.log %513 : vector<1x1xf32>
    %515 = arith.addf %514, %508 : vector<1x1xf32>
    %516 = vector.broadcast %515 : vector<1x1xf32> to vector<1x256xf32>
    %517 = arith.subf %506, %516 : vector<1x256xf32>
    %c7_i32_165 = arith.constant 7 : i32
    %518 = arith.addi %4, %c7_i32_165 : i32
    %c13_i32_166 = arith.constant 13 : i32
    %519 = arith.cmpi slt, %518, %c13_i32_166 : i32
    %520 = arith.select %519, %502, %456 : vector<1x256xf32>
    %521 = tpu.concatenate %69, %133, %197, %261, %325, %389, %453, %517 in 0 : vector<1x256xf32>, vector<1x256xf32>, vector<1x256xf32>, vector<1x256xf32>, vector<1x256xf32>, vector<1x256xf32>, vector<1x256xf32>, vector<1x256xf32> -> vector<8x256xf32>
    %c0_167 = arith.constant 0 : index
    %c0_168 = arith.constant 0 : index
    %522 = vector.load %arg10[%c0_167, %c0_168] : memref<8x256xf32, #tpu.memory_space<vmem>>, vector<8x256xf32>
    tpu.vector_store %arg10[%c0_167, %c0_168], %521 {strides = array<i32>} : memref<8x256xf32, #tpu.memory_space<vmem>>, vector<8x256xf32>,
    %c0_169 = arith.constant 0 : index
    %c0_170 = arith.constant 0 : index
    %523 = vector.load %arg12[%c0_169, %c0_170] : memref<1x256xf32, #tpu.memory_space<vmem>>, vector<1x256xf32>
    tpu.vector_store %arg12[%c0_169, %c0_170], %520 {strides = array<i32>} : memref<1x256xf32, #tpu.memory_space<vmem>>, vector<1x256xf32>,
    %c1_i32_171 = arith.constant 1 : i32
    %524 = arith.cmpi eq, %arg0, %c1_i32_171 : i32
    %525 = arith.extui %524 : i1 to i32
    %c0_i32_172 = arith.constant 0 : i32
    %526 = arith.cmpi ne, %525, %c0_i32_172 : i32
    scf.if %526 {
      %c0_173 = arith.constant 0 : index
      %c0_174 = arith.constant 0 : index
      %527 = vector.load %arg11[%c0_173, %c0_174] : memref<1x256xf32, #tpu.memory_space<vmem>>, vector<1x256xf32>
      tpu.vector_store %arg11[%c0_173, %c0_174], %520 {strides = array<i32>} : memref<1x256xf32, #tpu.memory_space<vmem>>, vector<1x256xf32>,
    } else {
    }
    return
  }
  func.func @transform_0(%arg0: i32, %arg1: memref<16xi32, #tpu.memory_space<smem>>) -> (i32, i32) {
    %c0_i32 = arith.constant 0 : i32
    %c0_i32_0 = arith.constant 0 : i32
    %c0_i32_1 = arith.constant 0 : i32
    return %c0_i32, %c0_i32_0 : i32, i32
  }
  func.func @transform_1(%arg0: i32, %arg1: memref<16xi32, #tpu.memory_space<smem>>) -> (i32, i32) {
    %c0_i32 = arith.constant 0 : i32
    %c0_i32_0 = arith.constant 0 : i32
    %c0_i32_1 = arith.constant 0 : i32
    return %c0_i32, %c0_i32_0 : i32, i32
  }
  func.func @transform_2(%arg0: i32, %arg1: memref<16xi32, #tpu.memory_space<smem>>) -> (i32, i32) {
    %c0_i32 = arith.constant 0 : i32
    %c0_i32_0 = arith.constant 0 : i32
    %c0_i32_1 = arith.constant 0 : i32
    return %c0_i32, %c0_i32_0 : i32, i32
  }
  func.func @transform_3(%arg0: i32, %arg1: memref<16xi32, #tpu.memory_space<smem>>) -> (i32, i32) {
    %c0_i32 = arith.constant 0 : i32
    %c0_i32_0 = arith.constant 0 : i32
    %c0_i32_1 = arith.constant 0 : i32
    return %c0_i32, %c0_i32_0 : i32, i32
  }
  func.func @transform_4(%arg0: i32, %arg1: memref<16xi32, #tpu.memory_space<smem>>) -> (i32, i32) {
    %c0_i32 = arith.constant 0 : i32
    %c0_i32_0 = arith.constant 0 : i32
    %c0_i32_1 = arith.constant 0 : i32
    return %c0_i32, %c0_i32_0 : i32, i32
  }
  func.func @transform_5(%arg0: i32, %arg1: memref<16xi32, #tpu.memory_space<smem>>) -> (i32, i32) {
    %c0_i32 = arith.constant 0 : i32
    %c0_i32_0 = arith.constant 0 : i32
    %c0_i32_1 = arith.constant 0 : i32
    return %c0_i32, %c0_i32_0 : i32, i32
  }
  func.func @transform_6(%arg0: i32, %arg1: memref<16xi32, #tpu.memory_space<smem>>) -> (i32, i32) {
    %c0_i32 = arith.constant 0 : i32
    %c0_i32_0 = arith.constant 0 : i32
    %c0_i32_1 = arith.constant 0 : i32
    return %c0_i32, %c0_i32_0 : i32, i32
  }
  func.func @transform_7(%arg0: i32, %arg1: memref<16xi32, #tpu.memory_space<smem>>) -> (i32, i32) {
    %c0_i32 = arith.constant 0 : i32
    %c0_i32_0 = arith.constant 0 : i32
    %c0_i32_1 = arith.constant 0 : i32
    return %c0_i32, %c0_i32_0 : i32, i32
  }
  func.func @transform_8(%arg0: i32, %arg1: memref<16xi32, #tpu.memory_space<smem>>) -> (i32, i32) {
    %c0_i32 = arith.constant 0 : i32
    %c0_i32_0 = arith.constant 0 : i32
    return %arg0, %c0_i32 : i32, i32
  }
  func.func @transform_9(%arg0: i32, %arg1: memref<16xi32, #tpu.memory_space<smem>>) -> (i32, i32) {
    %c0_i32 = arith.constant 0 : i32
    %c0_i32_0 = arith.constant 0 : i32
    %c0_i32_1 = arith.constant 0 : i32
    return %c0_i32, %c0_i32_0 : i32, i32
  }
}

</mosaic_0001>

<bundles_post_ra>
// kernel: tpu_custom_call.1
= control target key start
LH: loop header
LB: loop body
LE: loop exit
PB: predicated region body
PF: predicated region fallthrough
CT: control target
= control target key end

     0   :  { %s12638_s0 = inlined_call_operand.hbm [shape: s32[16], index: 0, kind: input, shape index: {}]   ;;  %s12639_s1 = inlined_call_operand.hbm [shape: bf16[256,256], index: 1, kind: input, shape index: {}]   ;;  %s12640_s2 = inlined_call_operand.vmem [shape: f32[1,256], index: 2, kind: input, shape index: {}]   ;;  %s12641_s3 = inlined_call_operand.hbm [shape: bf16[256,768], index: 3, kind: input, shape index: {}]   ;;  %s12642_s4 = inlined_call_operand.hbm [shape: bf16[256,768], index: 4, kind: input, shape index: {}]   ;;  %s12643_s5 = inlined_call_operand.vmem [shape: f32[1,768], index: 5, kind: input, shape index: {}]   ;;  %s12644_s6 = inlined_call_operand.vmem [shape: f32[1,256], index: 6, kind: input, shape index: {}]   ;;  %s12645_s7 = inlined_call_operand.hbm [shape: bf16[256,256], index: 7, kind: input, shape index: {}]   ;;  %s12646_s8 = inlined_call_operand.vmem [shape: f32[1,256], index: 8, kind: input, shape index: {}]   ;;  %s12647_s9 = inlined_call_operand.hbm [shape: f32[16,256], index: 9, kind: output, shape index: {0}]   ;;  %s12648_s10 = inlined_call_operand.hbm [shape: f32[1,256], index: 10, kind: output, shape index: {1}]  }
   0x1   :  { %13375 = sst [smem:[#allocation183_spill]] %s12641_s3  ;;  %s7566_s15 = scalar_lea.hbm %s12638_s0, 16 }
   0x2   :  { %p7567_p0 = scmp.ne.s32.totalorder %s12638_s0, %s7566_s15  ;;  %p7570_p1 = scmp.lt.u32.totalorder %s7566_s15, %s12638_s0 }
   0x4   :  { %p7572_p2 = pnand %p7570_p1, %p7567_p0 }
   0x6   :  { %7575 = shalt.err (!%p7572_p2)  }
   0x7   :  { %s7796_s20 = smov [#allocation4]  }
   0x8   :  { %17 = dma.hbm_to_smem %s12638_s0, 16, %s7796_s20, [#allocation3] }
   0x9   :  { %7758 = dma.done.wait [#allocation3], 16 }
   0xa   :  { %7759 = vsyncadd [#allocation3], 4294967280 }
   0xb   :  { %19 = sfence }
   0xc   :  { %20 = vsyncpa [#allocation6], 0 }
   0xd   :  { %21 = vsyncpa [#allocation9], 0 }
   0xe   :  { %22 = vsyncpa [#allocation12], 0 }
   0xf   :  { %23 = vsyncpa [#allocation7], 0 }
  0x10   :  { %25 = vsyncpa [#allocation7 + $0x1], 0 }
  0x11   :  { %26 = vsyncpa [#allocation15], 0  ;;  %s7876_s23 = smov 0   ;;  %s7878_s24 = smov 0  }
  0x12   :  { %s7880_s25 = smov 0   ;;  %s7882_s26 = smov 0  }
  0x13 LB: > { %13376 = sst [smem:[#allocation22_spill]] %s7790_s25  ;;  %s7897_s0 = sadd.s32 4294967295, %s7794_s26   ;;  %s7794_s26 = sphi %s7882_s26, %s14804_s26   ;;  %s7790_s25 = sphi %s7880_s25, %s14806_s25   ;;  %s7786_s24 = sphi %s7878_s24, %s14808_s24   ;;  %s7782_s23 = sphi %s7876_s23, %s14807_s23  }
  0x14   : > { %s5553_s27 = sadd.s32 4294967294, %s7794_s26   ;;  %s7901_s28 = sadd.s32 1, %s7794_s26  }
  0x15   : > { %13377 = sst [smem:[#allocation23_spill]] %s7901_s28  ;;  %s207_s29 = sadd.s32 1, %s7790_s25 }
  0x16   : > { %s204_s30 = ssub.s32 %s7794_s26, %s7901_s28  ;;  %p217_p3 = scmp.ne.s32.totalorder %s7790_s25, %s7786_s24 }
  0x17   : > { %p205_p4 = scmp.eq.s32.totalorder %s204_s30, 0  ;;  %p12649_p5 = scmp.eq.s32.totalorder %s7897_s0, 1 }
  0x18   : > { %p223_p6 = scmp.ne.s32.totalorder %s7786_s24, %s7782_s23  ;;  %p224_p7 = scmp.eq.s32.totalorder %s5553_s27, 1 }
  0x19   : > { %s7912_s11 = scalar_select %p205_p4, %s7790_s25, %s207_s29  }
  0x1a   : > { %p7916_p8 = por %p12649_p5, %p217_p3  ;;  %p7920_p9 = por %p224_p7, %p223_p6 }
  0x1b   : > { %13378 = sst [smem:[#allocation24_spill]] %s7912_s11  ;;  %p5554_p10 = scmp.ge.s32.totalorder %s7794_s26, 1 }
  0x1c   : > { %s13379_s12 = scalar_select %p7916_p8, 1, 0 }
  0x1d   : > { %s13380_s13 = scalar_select %p7920_p9, 1, 0 }
  0x1e   : > { %p252_p11 = scmp.lt.s32.totalorder %s7794_s26, 3  ;;  %p12650_p13 = scmp.eq.s32.totalorder %s7897_s0, 0 }
  0x1f   : > { %13381 = sst [smem:[#allocation25_spill]] %s13380_s13  ;;  %s7797_s15 = smov [#allocation8]  }
  0x20   : > { %p7928_p0 = pnand %p5554_p10, %p252_p11  ;;  %s280_s16 = sshll.u32 %s7797_s15, 4  ;;  %s281_s16 = int_to_ptr.vmem [resolvable:$true] %s280_s16 }
  0x21   : > { %s7798_s18 = smov [#allocation5]   ;;  %s13384_s3 = sld [smem:[#allocation183_spill]] }
  0x22   : > { %s13382_s14 = scalar_select %p7928_p0, 1, 0 }
  0x23   : > { %p6030_p1 = pneg %p7928_p0  ;;  %s264_s19 = sshll.u32 %s7798_s18, 4  ;;  %s7940_s19 = int_to_ptr.vmem [resolvable:$true] %s264_s19 }
  0x25   : > { %p7936_p2 = pnand %p12650_p13, %p6030_p1 }
  0x27   : > { %s7576_s22 = scalar_lea.hbm %s13384_s3, 12288  ;;  %p7950_p4 = pneg %p7936_p2 }
  0x28   : > { %p7577_p3 = scmp.ne.s32.totalorder %s13384_s3, %s7576_s22  ;;  %p7583_p10 = scmp.lt.u32.totalorder %s7576_s22, %s13384_s3 }
  0x2a   : > { %p7579_p6 = pnand %p7950_p4, %p7577_p3 }
  0x2c   : > { %p7580_p7 = pneg %p7579_p6 }
  0x2e   : > { %p7585_p11 = pnand %p7583_p10, %p7580_p7 }
  0x30   : > { %7588 = shalt.err (!%p7585_p11)
}
  0x31   : > { %s7589_s20 = scalar_lea.vmem %s281_s16, 12288  ;;  %p7597_p13 = scmp.lt.s32.totalorder %s281_s16, %s281_s16 }
  0x32   : > { %p7590_p1 = scmp.ne.s32.totalorder %s281_s16, %s7589_s20  ;;  %p7598_p9 = scmp.lt.s32.totalorder %s7589_s20, %s7589_s20 }
  0x34   : > { %p7592_p5 = pnand %p7590_p1, %p7950_p4  ;;  %p7599_p8 = por %p7598_p9, %p7597_p13 }
  0x36   : > { %p7593_p12 = pneg %p7592_p5 }
  0x38   : > { %p7600_p0 = pnand %p7599_p8, %p7593_p12 }
  0x3a   : > { %7603 = shalt.err (!%p7600_p0)
}
  0x3b   : > { %s12657_s21 = smov 384   ;;  %s12658_s27 = smov 24  }
  0x3c   : > { %6036 = dma.hbm_to_vmem [thread:$0]  (!%p7936_p2), %s13384_s3, 12288, %s281_s16, [#allocation9], %s12657_s21, %s12657_s21, %s12658_s27  }
  0x3d   : > { %s7604_s11 = scalar_lea.hbm %s12639_s1, 4096 }
  0x3e   : > { %p7605_p5 = scmp.ne.s32.totalorder %s12639_s1, %s7604_s11  ;;  %p7611_p12 = scmp.lt.u32.totalorder %s7604_s11, %s12639_s1 }
  0x40   : > { %p7607_p8 = pnand %p7605_p5, %p7950_p4 }
  0x42   : > { %p7608_p9 = pneg %p7607_p8 }
  0x44   : > { %p7613_p13 = pnand %p7611_p12, %p7608_p9 }
  0x46   : > { %7616 = shalt.err (!%p7613_p13)
}
  0x47   : > { %s7617_s16 = scalar_lea.vmem %s7940_s19, 4096  ;;  %p7625_p7 = scmp.lt.s32.totalorder %s7940_s19, %s7940_s19 }
  0x48   : > { %p7618_p0 = scmp.ne.s32.totalorder %s7940_s19, %s7617_s16  ;;  %p7626_p10 = scmp.lt.s32.totalorder %s7617_s16, %s7617_s16 }
  0x4a   : > { %p7620_p3 = pnand %p7618_p0, %p7950_p4  ;;  %p7627_p11 = por %p7626_p10, %p7625_p7 }
  0x4c   : > { %p7621_p6 = pneg %p7620_p3 }
  0x4e   : > { %p7628_p1 = pnand %p7627_p11, %p7621_p6 }
  0x50   : > { %7631 = shalt.err (!%p7628_p1)
}
  0x51   : > { %s12659_s25 = smov 128   ;;  %s7802_s28 = smov 8  }
  0x52   : > { %6033 = dma.hbm_to_vmem [thread:$0]  (!%p7936_p2), %s12639_s1, 4096, %s7940_s19, [#allocation6], %s12659_s25, %s12659_s25, %s7802_s28  }
  0x53   : > { %s7803_s22 = smov [#allocation10]   ;;  %s7804_s15 = smov [#allocation11]  }
  0x54   : > { %s293_s29 = sshll.u32 %s7803_s22, 4  ;;  %s312_s18 = sshll.u32 %s7804_s15, 4  ;;  %s294_s29 = int_to_ptr.vmem [resolvable:$true] %s293_s29  ;;  %s7995_s18 = int_to_ptr.vmem [resolvable:$true] %s312_s18 }
  0x55   : > { %s7632_s21 = scalar_lea.hbm %s12642_s4, 12288 }
  0x56   : > { %p7633_p5 = scmp.ne.s32.totalorder %s12642_s4, %s7632_s21  ;;  %p7639_p12 = scmp.lt.u32.totalorder %s7632_s21, %s12642_s4 }
  0x58   : > { %p7635_p8 = pnand %p7633_p5, %p7950_p4 }
  0x5a   : > { %p7636_p9 = pneg %p7635_p8 }
  0x5c   : > { %p7641_p13 = pnand %p7639_p12, %p7636_p9 }
  0x5e   : > { %7644 = shalt.err (!%p7641_p13)
}
  0x5f   : > { %s7645_s13 = scalar_lea.vmem %s294_s29, 12288  ;;  %p7653_p7 = scmp.lt.s32.totalorder %s294_s29, %s294_s29 }
  0x60   : > { %p7646_p0 = scmp.ne.s32.totalorder %s294_s29, %s7645_s13  ;;  %p7654_p10 = scmp.lt.s32.totalorder %s7645_s13, %s7645_s13 }
  0x62   : > { %p7648_p3 = pnand %p7646_p0, %p7950_p4  ;;  %p7655_p11 = por %p7654_p10, %p7653_p7 }
  0x64   : > { %p7649_p6 = pneg %p7648_p3 }
  0x66   : > { %p7656_p1 = pnand %p7655_p11, %p7649_p6 }
  0x68   : > { %7659 = shalt.err (!%p7656_p1)
}
  0x69   : > { %s13386_s3 = smov 24   ;;  %s13387_s27 = smov 384  }
  0x6a   : > { %6039 = dma.hbm_to_vmem [thread:$0]  (!%p7936_p2), %s12642_s4, 12288, %s294_s29, [#allocation9], %s13387_s27, %s13387_s27, %s13386_s3  }
  0x6b   : > { %s7660_s16 = scalar_lea.hbm %s12645_s7, 4096 }
  0x6c   : > { %p7661_p5 = scmp.ne.s32.totalorder %s12645_s7, %s7660_s16  ;;  %p7667_p12 = scmp.lt.u32.totalorder %s7660_s16, %s12645_s7 }
  0x6e   : > { %p7663_p8 = pnand %p7661_p5, %p7950_p4 }
  0x70   : > { %p7664_p9 = pneg %p7663_p8 }
  0x72   : > { %p7669_p13 = pnand %p7667_p12, %p7664_p9 }
  0x74   : > { %7672 = shalt.err (!%p7669_p13)
}
  0x75   : > { %s7673_s29 = scalar_lea.vmem %s7995_s18, 4096  ;;  %p7681_p7 = scmp.lt.s32.totalorder %s7995_s18, %s7995_s18 }
  0x76   : > { %p7674_p0 = scmp.ne.s32.totalorder %s7995_s18, %s7673_s29  ;;  %p7682_p10 = scmp.lt.s32.totalorder %s7673_s29, %s7673_s29 }
  0x78   : > { %p7676_p3 = pnand %p7674_p0, %p7950_p4  ;;  %p7683_p11 = por %p7682_p10, %p7681_p7 }
  0x7a   : > { %p7677_p6 = pneg %p7676_p3 }
  0x7c   : > { %p7684_p1 = pnand %p7683_p11, %p7677_p6 }
  0x7e   : > { %7687 = shalt.err (!%p7684_p1)
}
  0x7f   : > { %s13388_s25 = smov 128   ;;  %p13389_p5 = scmp.ne.s32.totalorder %s13382_s14, 0 }
  0x80   : > { %6042 = dma.hbm_to_vmem [thread:$0]  (!%p7936_p2), %s12645_s7, 4096, %s7995_s18, [#allocation12], %s13388_s25, %s13388_s25, %s7802_s28  }
  0x81   : > { %331 = sbr.rel (%p13389_p5) target bundleno = 4609 (0x1201), region = 52 }
  0x88   : > { %p13390_p4 = scmp.eq.s32.totalorder %s7897_s0, 0 }
  0x8a   : > { %7761 = dma.done.wait (%p13390_p4), [#allocation6], 4096   ;;  %p13391_p8 = pmov %p13390_p4 }
  0x8b   : > { %p13392_p9 = pmov %p13390_p4 }
  0x8c   : > { %7763 = vsyncadd (%p13391_p8), [#allocation6], 4294963200 }
  0x8d   : > { %7765 = dma.done.wait (%p13392_p9), [#allocation9], 24576   ;;  %p13393_p12 = pmov %p13390_p4 }
  0x8e   : > { %p13394_p13 = pmov %p13390_p4 }
  0x8f   : > { %7767 = vsyncadd (%p13393_p12), [#allocation9], 4294942720 }
  0x90   : > { %7769 = dma.done.wait (%p13394_p13), [#allocation12], 4096   ;;  %p13395_p2 = pmov %p13390_p4 }
  0x91   : > { %s369_s14 = sand.u32 1, %s7786_s24   ;;  %p13396_p0 = scmp.ne.s32.totalorder %s7897_s0, 0 }
  0x92   : > { %7771 = vsyncadd (%p13395_p2), [#allocation12], 4294963200  ;;  %s5564_s17 = sshll.u32 %s369_s14, 4  ;;  %v378_v0 = vld [vmem:[%s12640_s2] sm:$0x3] (!%p13396_p0)  ;;  %v379_v1 = vlaneseq (!%p13396_p0) }
  0x93   : > { %s8061_s30 = scalar_lea.vmem [#allocation13], %s5564_s17  ;;  %377 = sbr.rel (%p13396_p0) target bundleno = 154 (0x9a), region = 72 }
  0x94   : > { %vm381_vm0 = vcmp.lt.s32.totalorder (!%p13396_p0), %v379_v1, 256 }
  0x95   : > { %383 = vst.msk [vmem:[#allocation2] sm:$0x3] (!%p13396_p0), %vm381_vm0, %v378_v0 }
  0x9a PF: > { %v6102_v2 = vld [vmem:[#allocation5 + $0x4] ss:$8 sps:$4 sm:$0xff]   ;;  %v6104_v3 = vld [vmem:[#allocation5] ss:$8 sps:$4 sm:$0xff]   ;;  %v6105_v4 = vld [vmem:[#allocation5 + $0x14] ss:$8 sps:$4 sm:$0xff]   ;;  %v12660_v7 = vlaneseq }
  0x9b   : > { %594 = vmatprep.subr.bf16.mxu0 %v6102_v2  ;;  %v6107_v5 = vld [vmem:[#allocation5 + $0x10] ss:$8 sps:$4 sm:$0xff]   ;;  %v6108_v6 = vld [vmem:[#allocation5 + $0x24] ss:$8 sps:$4 sm:$0xff]   ;;  %s8069_s22 = sshll.u32 %s7897_s0, 3  ;;  %vm2382_vm14 = vcmask 1040384  }
  0x9c   : > { %595 = vmatpush1.bf16.msra.mxu0 %v6104_v3  ;;  %v6110_v8 = vld [vmem:[#allocation5 + $0x20] ss:$8 sps:$4 sm:$0xff]   ;;  %s8072_s21 = sld [smem:[#allocation4 + %s8069_s22]]  ;;  %v6111_v9 = vld [vmem:[#allocation5 + $0x34] ss:$8 sps:$4 sm:$0xff]   ;;  %v8075_v10 = vand.u32 127, %v12660_v7 }
  0x9d   : > { %596 = vmatprep.subr.bf16.mxu0 %v6105_v4  ;;  %v6113_v11 = vld [vmem:[#allocation5 + $0x30] ss:$8 sps:$4 sm:$0xff]   ;;  %v6114_v12 = vld [vmem:[#allocation5 + $0x44] ss:$8 sps:$4 sm:$0xff]   ;;  %v6116_v14 = vld [vmem:[#allocation5 + $0x40] ss:$8 sps:$4 sm:$0xff]  }
  0x9e   : > { %13397 = vst [vmem:[#allocation26_spill] sm:$0xff] %v8075_v10  ;;  %v8078_v13 = vadd.s32 128, %v8075_v10  ;;  %v6117_v16 = vld [vmem:[#allocation5 + $0x54] ss:$8 sps:$4 sm:$0xff]   ;;  %v6119_v17 = vld [vmem:[#allocation5 + $0x50] ss:$8 sps:$4 sm:$0xff]  }
  0x9f   : > { %v6120_v18 = vld [vmem:[#allocation5 + $0x64] ss:$8 sps:$4 sm:$0xff]   ;;  %v12661_v19 = vmov 1.0|1.0   ;;  %v6122_v21 = vld [vmem:[#allocation5 + $0x60] ss:$8 sps:$4 sm:$0xff]  }
  0xa0   : > { %597 = vmatpush1.bf16.msra.mxu0 %v6107_v5  ;;  %13398 = vst [vmem:[#allocation27_spill] sm:$0xff] %v8078_v13  ;;  %v6150_v20 = vld [vmem:[#allocation8 + $0x4] ss:$24 sps:$4 sm:$0xff]   ;;  %v6154_v23 = vld [vmem:[#allocation8] ss:$24 sps:$4 sm:$0xff]   ;;  %s2410_s15 = sadd.s32 1, %s8069_s22 }
  0xa1   : > { %598 = vmatprep.subr.bf16.mxu0 %v6108_v6  ;;  %v6123_v22 = vld [vmem:[#allocation5 + $0x74] ss:$8 sps:$4 sm:$0xff]   ;;  %1246 = vmatprep.subr.bf16.mxu1 %v6150_v20  ;;  %v6125_v25 = vld [vmem:[#allocation5 + $0x70] ss:$8 sps:$4 sm:$0xff]   ;;  %v6126_v27 = vld [vmem:[#allocation5 + $0x84] ss:$8 sps:$4 sm:$0xff]  }
  0xa2   : > { %v393_v15 = vstv %s8072_s21  ;;  %v6156_v24 = vld [vmem:[#allocation8 + $0x34] ss:$24 sps:$4 sm:$0xff]   ;;  %1247 = vmatpush1.bf16.msra.mxu1 %v6154_v23  ;;  %v6160_v26 = vld [vmem:[#allocation8 + $0x30] ss:$24 sps:$4 sm:$0xff]   ;;  %v6162_v28 = vld [vmem:[#allocation8 + $0x64] ss:$24 sps:$4 sm:$0xff]  }
  0xa3   : > { %vm395_vm1 = vcmp.eq.s32.totalorder %v8078_v13, %v393_v15  ;;  %1248 = vmatprep.subr.bf16.mxu1 %v6156_v24  ;;  %v6128_v29 = vld [vmem:[#allocation5 + $0x80] ss:$8 sps:$4 sm:$0xff]   ;;  %v6168_v31 = vld [vmem:[#allocation8 + $0x94] ss:$24 sps:$4 sm:$0xff]   ;;  %v6131_v33 = vld [vmem:[#allocation5 + $0x90] ss:$8 sps:$4 sm:$0xff]   ;;  %vm8088_vm3 = vcmp.eq.s32.totalorder %v8075_v10, %v393_v15 }
  0xa4   : > { %599 = vmatpush1.bf16.msra.mxu0 %v6110_v8  ;;  %vm5601_vm2 = vmpackc.low %vm395_vm1, %vm395_vm1  ;;  %v6166_v30 = vld [vmem:[#allocation8 + $0x60] ss:$24 sps:$4 sm:$0xff]   ;;  %v6129_v32 = vld [vmem:[#allocation5 + $0x94] ss:$8 sps:$4 sm:$0xff]   ;;  %s8466_s20 = sld [smem:[#allocation4 + %s2410_s15]]  ;;  %p2404_p3 = scmp.lt.s32.totalorder %s8069_s22, 13 }
  0xa5   : > { %600 = vmatprep.subr.bf16.mxu0 %v6111_v9  ;;  %5602 = vmatprep.mubr.msk.bf16.mxu0 %vm5601_vm2, %v12661_v19  ;;  %v6172_v34 = vld [vmem:[#allocation8 + $0x90] ss:$24 sps:$4 sm:$0xff]   ;;  %v6174_v35 = vld [vmem:[#allocation8 + $0xc4] ss:$24 sps:$4 sm:$0xff]   ;;  %v6178_v38 = vld [vmem:[#allocation8 + $0xc0] ss:$24 sps:$4 sm:$0xff]  }
  0xa6   : > { %1249 = vmatpush1.bf16.msra.mxu1 %v6160_v26  ;;  %v6132_v36 = vld [vmem:[#allocation5 + $0xa4] ss:$8 sps:$4 sm:$0xff]   ;;  %v6134_v37 = vld [vmem:[#allocation5 + $0xa0] ss:$8 sps:$4 sm:$0xff]   ;;  %v6135_v40 = vld [vmem:[#allocation5 + $0xb4] ss:$8 sps:$4 sm:$0xff]  }
  0xa7   : > { %1250 = vmatprep.subr.bf16.mxu1 %v6162_v28  ;;  %v6180_v39 = vld [vmem:[#allocation8 + $0xf4] ss:$24 sps:$4 sm:$0xff]   ;;  %v6137_v41 = vld [vmem:[#allocation5 + $0xb0] ss:$8 sps:$4 sm:$0xff]   ;;  %v6186_v43 = vld [vmem:[#allocation8 + $0x124] ss:$24 sps:$4 sm:$0xff]  }
  0xa8   : > { %601 = vmatpush1.bf16.msra.mxu0 %v6113_v11  ;;  %v6184_v42 = vld [vmem:[#allocation8 + $0xf0] ss:$24 sps:$4 sm:$0xff]   ;;  %v6138_v44 = vld [vmem:[#allocation5 + $0xc4] ss:$8 sps:$4 sm:$0xff]   ;;  %v6190_v46 = vld [vmem:[#allocation8 + $0x120] ss:$24 sps:$4 sm:$0xff]  }
  0xa9   : > { %602 = vmatprep.subr.bf16.mxu0 %v6114_v12  ;;  %v6140_v45 = vld [vmem:[#allocation5 + $0xc0] ss:$8 sps:$4 sm:$0xff]   ;;  %v6192_v47 = vld [vmem:[#allocation8 + $0x154] ss:$24 sps:$4 sm:$0xff]   ;;  %v6143_v49 = vld [vmem:[#allocation5 + $0xd0] ss:$8 sps:$4 sm:$0xff]  }
  0xaa   : > { %1251 = vmatpush1.bf16.msra.mxu1 %v6166_v30  ;;  %v6141_v48 = vld [vmem:[#allocation5 + $0xd4] ss:$8 sps:$4 sm:$0xff]   ;;  %v6196_v50 = vld [vmem:[#allocation8 + $0x150] ss:$24 sps:$4 sm:$0xff]   ;;  %v6144_v52 = vld [vmem:[#allocation5 + $0xe4] ss:$8 sps:$4 sm:$0xff]  }
  0xab   : > { %1252 = vmatprep.subr.bf16.mxu1 %v6168_v31  ;;  %v6198_v51 = vld [vmem:[#allocation8 + $0x184] ss:$24 sps:$4 sm:$0xff]   ;;  %v6146_v53 = vld [vmem:[#allocation5 + $0xe0] ss:$8 sps:$4 sm:$0xff]   ;;  %v6204_v56 = vld [vmem:[#allocation8 + $0x1b4] ss:$24 sps:$4 sm:$0xff]  }
  0xac   : > { %603 = vmatpush1.bf16.msra.mxu0 %v6116_v14  ;;  %v6202_v54 = vld [vmem:[#allocation8 + $0x180] ss:$24 sps:$4 sm:$0xff]   ;;  %v6147_v57 = vld [vmem:[#allocation5 + $0xf4] ss:$8 sps:$4 sm:$0xff]   ;;  %vm5603_vm4 = vmpackc.low %vm8088_vm3, %vm8088_vm3  ;;  %s2405_s29 = scalar_select %p2404_p3, 1, 0 }
  0xad   : > { %604 = vmatprep.subr.bf16.mxu0 %v6117_v16  ;;  %v6149_v58 = vld [vmem:[#allocation5 + $0xf0] ss:$8 sps:$4 sm:$0xff]   ;;  %v6210_v60 = vld [vmem:[#allocation8 + $0x1e4] ss:$24 sps:$4 sm:$0xff]   ;;  %v6155_v62 = vld [vmem:[#allocation8 + $0x8] ss:$24 sps:$4 sm:$0xff]  }
  0xae   : > { %1253 = vmatpush1.bf16.msra.mxu1 %v6172_v34  ;;  %v6208_v59 = vld [vmem:[#allocation8 + $0x1b0] ss:$24 sps:$4 sm:$0xff]   ;;  %v6152_v61 = vld [vmem:[#allocation8 + $0xc] ss:$24 sps:$4 sm:$0xff]   ;;  %v6214_v63 = vld [vmem:[#allocation8 + $0x1e0] ss:$24 sps:$4 sm:$0xff]  }
  0xaf   : > { %1254 = vmatprep.subr.bf16.mxu1 %v6174_v35  ;;  %v6216_v0 = vld [vmem:[#allocation8 + $0x214] ss:$24 sps:$4 sm:$0xff]   ;;  %v6220_v2 = vld [vmem:[#allocation8 + $0x210] ss:$24 sps:$4 sm:$0xff]   ;;  %v6222_v4 = vld [vmem:[#allocation8 + $0x244] ss:$24 sps:$4 sm:$0xff]  }
  0xb0   : > { %605 = vmatpush1.bf16.msra.mxu0 %v6119_v17  ;;  %v6158_v1 = vld [vmem:[#allocation8 + $0x3c] ss:$24 sps:$4 sm:$0xff]   ;;  %v6161_v3 = vld [vmem:[#allocation8 + $0x38] ss:$24 sps:$4 sm:$0xff]   ;;  %v6164_v5 = vld [vmem:[#allocation8 + $0x6c] ss:$24 sps:$4 sm:$0xff]  }
  0xb1   : > { %606 = vmatprep.subr.bf16.mxu0 %v6120_v18  ;;  %v6226_v6 = vld [vmem:[#allocation8 + $0x240] ss:$24 sps:$4 sm:$0xff]   ;;  %v6228_v9 = vld [vmem:[#allocation8 + $0x274] ss:$24 sps:$4 sm:$0xff]   ;;  %v6232_v12 = vld [vmem:[#allocation8 + $0x270] ss:$24 sps:$4 sm:$0xff]  }
  0xb2   : > { %1255 = vmatpush1.bf16.msra.mxu1 %v6178_v38  ;;  %v6167_v8 = vld [vmem:[#allocation8 + $0x68] ss:$24 sps:$4 sm:$0xff]   ;;  %v6170_v11 = vld [vmem:[#allocation8 + $0x9c] ss:$24 sps:$4 sm:$0xff]   ;;  %v6173_v14 = vld [vmem:[#allocation8 + $0x98] ss:$24 sps:$4 sm:$0xff]  }
  0xb3   : > { %1256 = vmatprep.subr.bf16.mxu1 %v6180_v39  ;;  %v6234_v15 = vld [vmem:[#allocation8 + $0x2a4] ss:$24 sps:$4 sm:$0xff]   ;;  %v6238_v17 = vld [vmem:[#allocation8 + $0x2a0] ss:$24 sps:$4 sm:$0xff]   ;;  %s2828_s25 = sadd.s32 2, %s8069_s22  ;;  %p9324_p6 = scmp.lt.s32.totalorder %s2410_s15, 13 }
  0xb4   : > { %607 = vmatpush1.bf16.msra.mxu0 %v6122_v21  ;;  %v6176_v16 = vld [vmem:[#allocation8 + $0xcc] ss:$24 sps:$4 sm:$0xff]   ;;  %v6179_v18 = vld [vmem:[#allocation8 + $0xc8] ss:$24 sps:$4 sm:$0xff]   ;;  %v6182_v20 = vld [vmem:[#allocation8 + $0xfc] ss:$24 sps:$4 sm:$0xff]  }
  0xb5   : > { %608 = vmatprep.subr.bf16.mxu0 %v6123_v22  ;;  %v8101_v21 = vld [vmem:[#allocation8 + $0xf8] ss:$24 sps:$4 sm:$0xff]   ;;  %v8103_v22 = vld [vmem:[#allocation8 + $0x12c] ss:$24 sps:$4 sm:$0xff]   ;;  %v8105_v23 = vld [vmem:[#allocation8 + $0x128] ss:$24 sps:$4 sm:$0xff]  }
  0xb6   : > { %1257 = vmatpush1.bf16.msra.mxu1 %v6184_v42  ;;  %v8107_v24 = vld [vmem:[#allocation8 + $0x15c] ss:$24 sps:$4 sm:$0xff]   ;;  %v8113_v26 = vld [vmem:[#allocation8 + $0x18c] ss:$24 sps:$4 sm:$0xff]   ;;  %v8129_v31 = vld [vmem:[#allocation8 + $0x1e8] ss:$24 sps:$4 sm:$0xff]  }
  0xb7   : > { %1258 = vmatprep.subr.bf16.mxu1 %v6186_v43  ;;  %v8119_v28 = vld [vmem:[#allocation8 + $0x1bc] ss:$24 sps:$4 sm:$0xff]   ;;  %v8125_v30 = vld [vmem:[#allocation8 + $0x1ec] ss:$24 sps:$4 sm:$0xff]   ;;  %v8141_v35 = vld [vmem:[#allocation8 + $0x248] ss:$24 sps:$4 sm:$0xff]  }
  0xb8   : > { %609 = vmatpush1.bf16.msra.mxu0 %v6125_v25  ;;  %v8111_v25 = vld [vmem:[#allocation8 + $0x158] ss:$24 sps:$4 sm:$0xff]   ;;  %v8137_v34 = vld [vmem:[#allocation8 + $0x24c] ss:$24 sps:$4 sm:$0xff]   ;;  %v8154_v39 = vld [vmem:[#allocation8 + $0x2a8] ss:$24 sps:$4 sm:$0xff]  }
  0xb9   : > { %610 = vmatprep.subr.bf16.mxu0 %v6126_v27  ;;  %v8117_v27 = vld [vmem:[#allocation8 + $0x188] ss:$24 sps:$4 sm:$0xff]   ;;  %v8151_v38 = vld [vmem:[#allocation8 + $0x2ac] ss:$24 sps:$4 sm:$0xff]   ;;  %v8160_v43 = vld [vmem:[#allocation8 + $0x2d8] ss:$24 sps:$4 sm:$0xff]  }
  0xba   : > { %1259 = vmatpush1.bf16.msra.mxu1 %v6190_v46  ;;  %v6244_v42 = vld [vmem:[#allocation8 + $0x2d0] ss:$24 sps:$4 sm:$0xff]   ;;  %v8168_v46 = vshrl.u32 %v12660_v7, 7  ;;  %v8281_v7 = vld [vmem:[#allocation10 + $0x2dc] ss:$24 sps:$4 sm:$0xff]   ;;  %s9090_s3 = sld [smem:[#allocation4 + %s2828_s25]] }
  0xbb   : > { %1260 = vmatprep.subr.bf16.mxu1 %v6192_v47  ;;  %13409 = vst [vmem:[#allocation36_spill] sm:$0xff] %v8281_v7  ;;  %s2823_s18 = scalar_select %p9324_p6, 1, 0 }
  0xbc   : > { %611 = vmatpush1.bf16.msra.mxu0 %v6128_v29  ;;  %v8123_v29 = vld [vmem:[#allocation8 + $0x1b8] ss:$24 sps:$4 sm:$0xff]   ;;  %13401 = vst [vmem:[#allocation28_spill] sm:$0xff] %v8168_v46  ;;  %v8171_v47 = vsub.s32 1, %v8168_v46  ;;  %s3246_s21 = sadd.s32 3, %s8069_s22  ;;  %p3240_p7 = scmp.lt.s32.totalorder %s2828_s25, 13 }
  0xbd   : > { %612 = vmatprep.subr.bf16.mxu0 %v6129_v32  ;;  %v8131_v32 = vld [vmem:[#allocation8 + $0x21c] ss:$24 sps:$4 sm:$0xff]   ;;  %s9555_s15 = sld [smem:[#allocation4 + %s3246_s21]]  ;;  %s3664_s16 = sadd.s32 4, %s8069_s22 }
  0xbe   : > { %1261 = vmatpush1.bf16.msra.mxu1 %v6196_v50  ;;  %s10166_s11 = sld [smem:[#allocation4 + %s3664_s16]]  ;;  %p3658_p10 = scmp.lt.s32.totalorder %s3246_s21, 13 }
  0xbf   : > { %1262 = vmatprep.subr.bf16.mxu1 %v6198_v51  ;;  %s4082_s13 = sadd.s32 5, %s8069_s22  ;;  %p4076_p11 = scmp.lt.s32.totalorder %s3664_s16, 13 }
  0xc0   : > { %613 = vmatpush1.bf16.msra.mxu0 %v6131_v33  ;;  %v8135_v33 = vld [vmem:[#allocation8 + $0x218] ss:$24 sps:$4 sm:$0xff]   ;;  %s3659_s19 = scalar_select %p3658_p10, 1, 0 }
  0xc1   : > { %614 = vmatprep.subr.bf16.mxu0 %v6132_v36  ;;  %v8143_v36 = vld [vmem:[#allocation8 + $0x27c] ss:$24 sps:$4 sm:$0xff]   ;;  %s4077_s25 = scalar_select %p4076_p11, 1, 0 }
  0xc2   : > { %1263 = vmatpush1.bf16.msra.mxu1 %v6202_v54  ;;  %p4494_p1 = scmp.lt.s32.totalorder %s4082_s13, 13  ;;  %s4918_s28 = sadd.s32 7, %s8069_s22 }
  0xc3   : > { %1264 = vmatprep.subr.bf16.mxu1 %v6204_v56  ;;  %p5330_p4 = scmp.lt.s32.totalorder %s4918_s28, 13  ;;  %p5903_p8 = scmp.ne.s32.totalorder %s7897_s0, 1 }
  0xc4   : > { %615 = vmatpush1.bf16.msra.mxu0 %v6134_v37  ;;  %v8147_v37 = vld [vmem:[#allocation8 + $0x278] ss:$24 sps:$4 sm:$0xff]   ;;  %s4495_s17 = scalar_select %p4494_p1, 1, 0 }
  0xc5   : > { %616 = vmatprep.subr.bf16.mxu0 %v6135_v40  ;;  %v6240_v40 = vld [vmem:[#allocation8 + $0x2d4] ss:$24 sps:$4 sm:$0xff]  }
  0xc6   : > { %1265 = vmatpush1.bf16.msra.mxu1 %v6208_v59 }
  0xc7   : > { %1266 = vmatprep.subr.bf16.mxu1 %v6210_v60  ;;  %v6252_v60 = vld [vmem:[#allocation8 + $0x44] ss:$24 sps:$4 sm:$0xff]  }
  0xc8   : > { %617 = vmatpush1.bf16.msra.mxu0 %v6137_v41  ;;  %v8158_v41 = vld [vmem:[#allocation8 + $0x2dc] ss:$24 sps:$4 sm:$0xff]  }
  0xc9   : > { %618 = vmatprep.subr.bf16.mxu0 %v6138_v44  ;;  %v6246_v44 = vld [vmem:[#allocation8 + $0x14] ss:$24 sps:$4 sm:$0xff]  }
  0xca   : > { %1267 = vmatpush1.bf16.msra.mxu1 %v6214_v63  ;;  %v6256_v63 = vld [vmem:[#allocation8 + $0x40] ss:$24 sps:$4 sm:$0xff]  }
  0xcb   : > { %1268 = vmatprep.subr.bf16.mxu1 %v6216_v0  ;;  %v8187_v0 = vld [vmem:[#allocation10 + $0x38] ss:$24 sps:$4 sm:$0xff]  }
  0xcc   : > { %619 = vmatpush1.bf16.msra.mxu0 %v6140_v45  ;;  %v8164_v45 = vld [vmem:[#allocation10 + $0xc] ss:$24 sps:$4 sm:$0xff]  }
  0xcd   : > { %620 = vmatprep.subr.bf16.mxu0 %v6141_v48  ;;  %v8173_v48 = vld [vmem:[#allocation2] sm:$0x3] }
  0xce   : > { %1269 = vmatpush1.bf16.msra.mxu1 %v6220_v2  ;;  %v8177_v54 = vrot.slane %v8173_v48, %v8171_v47  ;;  %v8189_v2 = vld [vmem:[#allocation10 + $0x6c] ss:$24 sps:$4 sm:$0xff]  }
  0xcf   : > { %1270 = vmatprep.subr.bf16.mxu1 %v6222_v4  ;;  %v8193_v4 = vld [vmem:[#allocation10 + $0x68] ss:$24 sps:$4 sm:$0xff]  }
  0xd0   : > { %621 = vmatpush1.bf16.msra.mxu0 %v6143_v49 }
  0xd1   : > { %622 = vmatprep.subr.bf16.mxu0 %v6144_v52 }
  0xd2   : > { %1271 = vmatpush1.bf16.msra.mxu1 %v6226_v6  ;;  %v8196_v6 = vld [vmem:[#allocation10 + $0x9c] ss:$24 sps:$4 sm:$0xff]  }
  0xd3   : > { %1272 = vmatprep.subr.bf16.mxu1 %v6228_v9  ;;  %v8199_v9 = vld [vmem:[#allocation10 + $0x98] ss:$24 sps:$4 sm:$0xff]  }
  0xd4   : > { %623 = vmatpush1.bf16.msra.mxu0 %v6146_v53 }
  0xd5   : > { %624 = vmatprep.subr.bf16.mxu0 %v6147_v57  ;;  %v6250_v57 = vld [vmem:[#allocation8 + $0x10] ss:$24 sps:$4 sm:$0xff]  }
  0xd6   : > { %1273 = vmatpush1.bf16.msra.mxu1 %v6232_v12  ;;  %v8202_v12 = vld [vmem:[#allocation10 + $0xcc] ss:$24 sps:$4 sm:$0xff]  }
  0xd7   : > { %1274 = vmatprep.subr.bf16.mxu1 %v6234_v15  ;;  %v8205_v15 = vld [vmem:[#allocation10 + $0xc8] ss:$24 sps:$4 sm:$0xff]  }
  0xd8   : > { %625 = vmatpush1.bf16.msra.mxu0 %v6149_v58  ;;  %v6251_v58 = vld [vmem:[#allocation10 + $0x8] ss:$24 sps:$4 sm:$0xff]  }
  0xd9   : > { %1287 = vmatprep.subr.bf16.mxu0 %v6152_v61  ;;  %v6254_v61 = vld [vmem:[#allocation10 + $0x3c] ss:$24 sps:$4 sm:$0xff]  }
  0xda   : > { %1275 = vmatpush1.bf16.msra.mxu1 %v6238_v17  ;;  %v8208_v17 = vld [vmem:[#allocation10 + $0xfc] ss:$24 sps:$4 sm:$0xff]  }
  0xdb   : > { %5604 = vmatmul.mubr.msk.bf16.vlgmr.msra.gmra.mrb[0].mxu0 %vm5603_vm4, %v12661_v19  ;;  %1276 = vmatprep.subr.bf16.mxu1 %v6240_v40  ;;  %v6282_v40 = vld [vmem:[#allocation8 + $0x134] ss:$24 sps:$4 sm:$0xff]  }
  0xdc   : > { %1288 = vmatpush1.bf16.msra.mxu0 %v6155_v62  ;;  %v8183_v62 = vpack.c.bf16 %v8177_v54, %v8177_v54 }
  0xdd   : > { %1289 = vmatprep.subr.bf16.mxu0 %v6158_v1  ;;  %v6258_v1 = vld [vmem:[#allocation8 + $0x74] ss:$24 sps:$4 sm:$0xff]  }
  0xde   : > { %1277 = vmatpush1.bf16.msra.mxu1 %v6244_v42  ;;  %v8214_v42 = vld [vmem:[#allocation10 + $0x12c] ss:$24 sps:$4 sm:$0xff]  }
  0xdf   : > { %1328 = vmatprep.subr.bf16.mxu1 %v6246_v44  ;;  %v6286_v44 = vld [vmem:[#allocation8 + $0x130] ss:$24 sps:$4 sm:$0xff]  }
  0xe0   : > { %1290 = vmatpush1.bf16.msra.mxu0 %v6161_v3  ;;  %v6262_v3 = vld [vmem:[#allocation8 + $0x70] ss:$24 sps:$4 sm:$0xff]  }
  0xe1   : > { %1291 = vmatprep.subr.bf16.mxu0 %v6164_v5  ;;  %v6264_v5 = vld [vmem:[#allocation8 + $0xa4] ss:$24 sps:$4 sm:$0xff]  }
  0xe4   : > { %1292 = vmatpush1.bf16.msra.mxu0 %v6167_v8  ;;  %v6268_v8 = vld [vmem:[#allocation8 + $0xa0] ss:$24 sps:$4 sm:$0xff]  }
  0xe5   : > { %1293 = vmatprep.subr.bf16.mxu0 %v6170_v11  ;;  %v6270_v11 = vld [vmem:[#allocation8 + $0xd4] ss:$24 sps:$4 sm:$0xff]  }
  0xe8   : > { %1294 = vmatpush1.bf16.msra.mxu0 %v6173_v14  ;;  %v6274_v14 = vld [vmem:[#allocation8 + $0xd0] ss:$24 sps:$4 sm:$0xff]  }
  0xe9   : > { %1295 = vmatprep.subr.bf16.mxu0 %v6176_v16  ;;  %v6276_v16 = vld [vmem:[#allocation8 + $0x104] ss:$24 sps:$4 sm:$0xff]  }
  0xec   : > { %1296 = vmatpush1.bf16.msra.mxu0 %v6179_v18  ;;  %v6280_v18 = vld [vmem:[#allocation8 + $0x100] ss:$24 sps:$4 sm:$0xff]  }
  0xed   : > { %1297 = vmatprep.subr.bf16.mxu0 %v6182_v20  ;;  %v8211_v20 = vld [vmem:[#allocation10 + $0xf8] ss:$24 sps:$4 sm:$0xff]  }
  0xf0   : > { %1298 = vmatpush1.bf16.msra.mxu0 %v8101_v21 }
  0xf1   : > { %1299 = vmatprep.subr.bf16.mxu0 %v8103_v22 }
  0xf4   : > { %1300 = vmatpush1.bf16.msra.mxu0 %v8105_v23 }
  0xf5   : > { %1301 = vmatprep.subr.bf16.mxu0 %v8107_v24 }
  0xf8   : > { %1302 = vmatpush1.bf16.msra.mxu0 %v8111_v25 }
  0xf9   : > { %1303 = vmatprep.subr.bf16.mxu0 %v8113_v26 }
  0xfc   : > { %1304 = vmatpush1.bf16.msra.mxu0 %v8117_v27 }
  0xfd   : > { %1305 = vmatprep.subr.bf16.mxu0 %v8119_v28 }
 0x100   : > { %1306 = vmatpush1.bf16.msra.mxu0 %v8123_v29 }
 0x101   : > { %1307 = vmatprep.subr.bf16.mxu0 %v8125_v30 }
 0x104   : > { %1308 = vmatpush1.bf16.msra.mxu0 %v8129_v31 }
 0x105   : > { %1309 = vmatprep.subr.bf16.mxu0 %v8131_v32 }
 0x108   : > { %1310 = vmatpush1.bf16.msra.mxu0 %v8135_v33 }
 0x109   : > { %1311 = vmatprep.subr.bf16.mxu0 %v8137_v34 }
 0x10c   : > { %1312 = vmatpush1.bf16.msra.mxu0 %v8141_v35 }
 0x10d   : > { %1313 = vmatprep.subr.bf16.mxu0 %v8143_v36 }
 0x110   : > { %1314 = vmatpush1.bf16.msra.mxu0 %v8147_v37 }
 0x111   : > { %1315 = vmatprep.subr.bf16.mxu0 %v8151_v38 }
 0x114   : > { %1316 = vmatpush1.bf16.msra.mxu0 %v8154_v39 }
 0x115   : > { %1317 = vmatprep.subr.bf16.mxu0 %v8158_v41 }
 0x118   : > { %1318 = vmatpush1.bf16.msra.mxu0 %v8160_v43 }
 0x119   : > { %1999 = vmatprep.subr.bf16.mxu0 %v8164_v45 }
 0x1ae   : > { %v628_v49 = vpop.f32.mrb[0].mxu0 }
 0x1af   : > { %v635_v50 = vmax.f32 %v628_v49, 0.0  ;;  %v630_v51 = vpop.f32.mrb[1].mxu0  ;;  %v8217_v49 = vld [vmem:[#allocation10 + $0x128] ss:$24 sps:$4 sm:$0xff]  }
 0x1b0   : > { %v636_v52 = vmax.f32 %v630_v51, 0.0  ;;  %v632_v53 = vpop.f32.mrb[2].mxu0  ;;  %v8220_v51 = vld [vmem:[#allocation10 + $0x15c] ss:$24 sps:$4 sm:$0xff]  }
 0x1b1   : > { %v633_v55 = vpop.f32.mrb[3].mxu0  ;;  %v8179_v59 = vpack.c.bf16 %v635_v50, %v635_v50  ;;  %v6288_v50 = vld [vmem:[#allocation8 + $0x164] ss:$24 sps:$4 sm:$0xff]   ;;  %v8223_v53 = vld [vmem:[#allocation10 + $0x158] ss:$24 sps:$4 sm:$0xff]  }
 0x1b2   : > { %v638_v56 = vpack.c.bf16 %v636_v52, %v636_v52  ;;  %v6292_v52 = vld [vmem:[#allocation8 + $0x160] ss:$24 sps:$4 sm:$0xff]   ;;  %v6294_v55 = vld [vmem:[#allocation8 + $0x194] ss:$24 sps:$4 sm:$0xff]  }
 0x1b4   : > { %1278 = vmatprep.mubr.bf16.mxu1 %v638_v56  ;;  %1319 = vmatprep.mubr.bf16.mxu0 %v638_v56 }
 0x1b5   : > { %1279 = vmatmul.mubr.bf16.vlgmr.msra.gmra.mrb[0].mxu1 %v8179_v59  ;;  %1320 = vmatmul.mubr.bf16.vlgmr.msra.gmra.mrb[4].mxu0 %v8179_v59 }
 0x1b6   : > { %1329 = vmatpush1.bf16.msra.mxu1 %v6250_v57  ;;  %2000 = vmatpush1.bf16.msra.mxu0 %v6251_v58  ;;  %v6298_v57 = vld [vmem:[#allocation8 + $0x190] ss:$24 sps:$4 sm:$0xff]  }
 0x1b7   : > { %1360 = vmatprep.mubr.bf16.mxu1 %v638_v56  ;;  %1330 = vmatprep.subr.bf16.mxu1 %v6252_v60  ;;  %v8226_v56 = vld [vmem:[#allocation10 + $0x18c] ss:$24 sps:$4 sm:$0xff]   ;;  %v8229_v58 = vld [vmem:[#allocation10 + $0x188] ss:$24 sps:$4 sm:$0xff]  }
 0x1b8   : > { %2001 = vmatprep.subr.bf16.mxu0 %v6254_v61  ;;  %2031 = vmatprep.mubr.bf16.mxu0 %v8183_v62  ;;  %v6300_v60 = vld [vmem:[#allocation8 + $0x1c4] ss:$24 sps:$4 sm:$0xff]  }
 0x1b9   : > { %v8232_v61 = vld [vmem:[#allocation10 + $0x1bc] ss:$24 sps:$4 sm:$0xff]  }
 0x1ba   : > { %1331 = vmatpush1.bf16.msra.mxu1 %v6256_v63  ;;  %2002 = vmatpush1.bf16.msra.mxu0 %v8187_v0  ;;  %v6304_v63 = vld [vmem:[#allocation8 + $0x1c0] ss:$24 sps:$4 sm:$0xff]  }
 0x1bb   : > { %1332 = vmatprep.subr.bf16.mxu1 %v6258_v1  ;;  %2003 = vmatprep.subr.bf16.mxu0 %v8189_v2  ;;  %v8235_v1 = vld [vmem:[#allocation10 + $0x1b8] ss:$24 sps:$4 sm:$0xff]  }
 0x1be   : > { %1333 = vmatpush1.bf16.msra.mxu1 %v6262_v3  ;;  %2004 = vmatpush1.bf16.msra.mxu0 %v8193_v4  ;;  %v6306_v3 = vld [vmem:[#allocation8 + $0x1f4] ss:$24 sps:$4 sm:$0xff]  }
 0x1bf   : > { %1334 = vmatprep.subr.bf16.mxu1 %v6264_v5  ;;  %2005 = vmatprep.subr.bf16.mxu0 %v8196_v6  ;;  %v8238_v5 = vld [vmem:[#allocation10 + $0x1ec] ss:$24 sps:$4 sm:$0xff]  }
 0x1c2   : > { %1335 = vmatpush1.bf16.msra.mxu1 %v6268_v8  ;;  %2006 = vmatpush1.bf16.msra.mxu0 %v8199_v9  ;;  %v6310_v8 = vld [vmem:[#allocation8 + $0x1f0] ss:$24 sps:$4 sm:$0xff]  }
 0x1c3   : > { %1336 = vmatprep.subr.bf16.mxu1 %v6270_v11  ;;  %2007 = vmatprep.subr.bf16.mxu0 %v8202_v12  ;;  %v8241_v11 = vld [vmem:[#allocation10 + $0x1e8] ss:$24 sps:$4 sm:$0xff]  }
 0x1c6   : > { %1337 = vmatpush1.bf16.msra.mxu1 %v6274_v14  ;;  %2008 = vmatpush1.bf16.msra.mxu0 %v8205_v15  ;;  %v6312_v14 = vld [vmem:[#allocation8 + $0x224] ss:$24 sps:$4 sm:$0xff]  }
 0x1c7   : > { %1338 = vmatprep.subr.bf16.mxu1 %v6276_v16  ;;  %2009 = vmatprep.subr.bf16.mxu0 %v8208_v17  ;;  %v8244_v16 = vld [vmem:[#allocation10 + $0x21c] ss:$24 sps:$4 sm:$0xff]  }
 0x1ca   : > { %1339 = vmatpush1.bf16.msra.mxu1 %v6280_v18  ;;  %2010 = vmatpush1.bf16.msra.mxu0 %v8211_v20  ;;  %v6316_v18 = vld [vmem:[#allocation8 + $0x220] ss:$24 sps:$4 sm:$0xff]  }
 0x1cb   : > { %1340 = vmatprep.subr.bf16.mxu1 %v6282_v40  ;;  %2011 = vmatprep.subr.bf16.mxu0 %v8214_v42  ;;  %v8247_v40 = vld [vmem:[#allocation10 + $0x218] ss:$24 sps:$4 sm:$0xff]  }
 0x1ce   : > { %1341 = vmatpush1.bf16.msra.mxu1 %v6286_v44  ;;  %2012 = vmatpush1.bf16.msra.mxu0 %v8217_v49  ;;  %v6318_v44 = vld [vmem:[#allocation8 + $0x254] ss:$24 sps:$4 sm:$0xff]  }
 0x1cf   : > { %1342 = vmatprep.subr.bf16.mxu1 %v6288_v50  ;;  %2013 = vmatprep.subr.bf16.mxu0 %v8220_v51  ;;  %v8250_v50 = vld [vmem:[#allocation10 + $0x24c] ss:$24 sps:$4 sm:$0xff]  }
 0x1d2   : > { %1343 = vmatpush1.bf16.msra.mxu1 %v6292_v52  ;;  %2014 = vmatpush1.bf16.msra.mxu0 %v8223_v53  ;;  %v6322_v52 = vld [vmem:[#allocation8 + $0x250] ss:$24 sps:$4 sm:$0xff]  }
 0x1d3   : > { %1344 = vmatprep.subr.bf16.mxu1 %v6294_v55  ;;  %2015 = vmatprep.subr.bf16.mxu0 %v8226_v56  ;;  %v8253_v55 = vld [vmem:[#allocation10 + $0x248] ss:$24 sps:$4 sm:$0xff]  }
 0x1d6   : > { %1345 = vmatpush1.bf16.msra.mxu1 %v6298_v57  ;;  %2016 = vmatpush1.bf16.msra.mxu0 %v8229_v58  ;;  %v6324_v57 = vld [vmem:[#allocation8 + $0x284] ss:$24 sps:$4 sm:$0xff]  }
 0x1d7   : > { %1346 = vmatprep.subr.bf16.mxu1 %v6300_v60  ;;  %2017 = vmatprep.subr.bf16.mxu0 %v8232_v61  ;;  %v8256_v60 = vld [vmem:[#allocation10 + $0x27c] ss:$24 sps:$4 sm:$0xff]  }
 0x1da   : > { %1347 = vmatpush1.bf16.msra.mxu1 %v6304_v63  ;;  %2018 = vmatpush1.bf16.msra.mxu0 %v8235_v1  ;;  %v8259_v63 = vld [vmem:[#allocation8 + $0x280] ss:$24 sps:$4 sm:$0xff]  }
 0x1db   : > { %1348 = vmatprep.subr.bf16.mxu1 %v6306_v3  ;;  %2019 = vmatprep.subr.bf16.mxu0 %v8238_v5  ;;  %13402 = vst [vmem:[#allocation29_spill] sm:$0xff] %v8259_v63  ;;  %v8261_v3 = vld [vmem:[#allocation10 + $0x278] ss:$24 sps:$4 sm:$0xff]  }
 0x1dc   : > { %13403 = vst [vmem:[#allocation30_spill] sm:$0xff] %v8261_v3 }
 0x1de   : > { %1349 = vmatpush1.bf16.msra.mxu1 %v6310_v8  ;;  %2020 = vmatpush1.bf16.msra.mxu0 %v8241_v11  ;;  %v8264_v8 = vld [vmem:[#allocation8 + $0x2b4] ss:$24 sps:$4 sm:$0xff]  }
 0x1df   : > { %1350 = vmatprep.subr.bf16.mxu1 %v6312_v14  ;;  %2021 = vmatprep.subr.bf16.mxu0 %v8244_v16  ;;  %13404 = vst [vmem:[#allocation31_spill] sm:$0xff] %v8264_v8  ;;  %v8266_v14 = vld [vmem:[#allocation10 + $0x2ac] ss:$24 sps:$4 sm:$0xff]  }
 0x1e0   : > { %13405 = vst [vmem:[#allocation32_spill] sm:$0xff] %v8266_v14 }
 0x1e2   : > { %1351 = vmatpush1.bf16.msra.mxu1 %v6316_v18  ;;  %2022 = vmatpush1.bf16.msra.mxu0 %v8247_v40  ;;  %v8269_v18 = vsub.s32 0, %v8168_v46 }
 0x1e3   : > { %1352 = vmatprep.subr.bf16.mxu1 %v6318_v44  ;;  %2023 = vmatprep.subr.bf16.mxu0 %v8250_v50  ;;  %v8273_v44 = vld [vmem:[#allocation8 + $0x2b0] ss:$24 sps:$4 sm:$0xff]  }
 0x1e4   : > { %13406 = vst [vmem:[#allocation33_spill] sm:$0xff] %v8273_v44  ;;  %v8285_v19 = vrot.slane %v8173_v48, %v8269_v18 }
 0x1e6   : > { %1353 = vmatpush1.bf16.msra.mxu1 %v6322_v52  ;;  %2024 = vmatpush1.bf16.msra.mxu0 %v8253_v55  ;;  %v8275_v52 = vld [vmem:[#allocation10 + $0x2a8] ss:$24 sps:$4 sm:$0xff]   ;;  %v8301_v48 = vpack.c.bf16 %v8285_v19, %v8285_v19 }
 0x1e7   : > { %1354 = vmatprep.subr.bf16.mxu1 %v6324_v57  ;;  %2025 = vmatprep.subr.bf16.mxu0 %v8256_v60  ;;  %13407 = vst [vmem:[#allocation34_spill] sm:$0xff] %v8275_v52  ;;  %v8279_v57 = vld [vmem:[#allocation8 + $0x2e4] ss:$24 sps:$4 sm:$0xff]  }
 0x1e8   : > { %13408 = vst [vmem:[#allocation35_spill] sm:$0xff] %v8279_v57 }
 0x1ea   : > { %1355 = vmatpush1.bf16.msra.mxu1 %v8259_v63  ;;  %2026 = vmatpush1.bf16.msra.mxu0 %v8261_v3  ;;  %v8289_v63 = vld [vmem:[#allocation8 + $0x2e0] ss:$24 sps:$4 sm:$0xff]  }
 0x1eb   : > { %1356 = vmatprep.subr.bf16.mxu1 %v8264_v8  ;;  %2027 = vmatprep.subr.bf16.mxu0 %v8266_v14  ;;  %13410 = vst [vmem:[#allocation37_spill] sm:$0xff] %v8289_v63  ;;  %v8291_v3 = vld [vmem:[#allocation10 + $0x2d8] ss:$24 sps:$4 sm:$0xff]   ;;  %v8295_v8 = vld [vmem:[#allocation10 + $0x4] ss:$24 sps:$4 sm:$0xff]  }
 0x1ec   : > { %13411 = vst [vmem:[#allocation38_spill] sm:$0xff] %v8291_v3  ;;  %13412 = vst [vmem:[#allocation39_spill] sm:$0xff] %v8295_v8  ;;  %v8297_v14 = vld [vmem:[#allocation10 + $0x14] ss:$24 sps:$4 sm:$0xff]  }
 0x1ed   : > { %13413 = vst [vmem:[#allocation40_spill] sm:$0xff] %v8297_v14 }
 0x1ee   : > { %1357 = vmatpush1.bf16.msra.mxu1 %v8273_v44  ;;  %2028 = vmatpush1.bf16.msra.mxu0 %v8275_v52  ;;  %v8305_v44 = vld [vmem:[#allocation10] ss:$24 sps:$4 sm:$0xff]   ;;  %v8307_v52 = vld [vmem:[#allocation10 + $0x10] ss:$24 sps:$4 sm:$0xff]  }
 0x1ef   : > { %1358 = vmatprep.subr.bf16.mxu1 %v8279_v57  ;;  %2029 = vmatprep.subr.bf16.mxu0 %v8281_v7  ;;  %13414 = vst [vmem:[#allocation41_spill] sm:$0xff] %v8305_v44  ;;  %v8311_v57 = vld [vmem:[#allocation10 + $0x34] ss:$24 sps:$4 sm:$0xff]   ;;  %v8313_v7 = vld [vmem:[#allocation10 + $0x44] ss:$24 sps:$4 sm:$0xff]  }
 0x1f0   : > { %13415 = vst [vmem:[#allocation42_spill] sm:$0xff] %v8311_v57  ;;  %13416 = vst [vmem:[#allocation43_spill] sm:$0xff] %v8313_v7 }
 0x1f2   : > { %1359 = vmatpush1.bf16.msra.mxu1 %v8289_v63  ;;  %2030 = vmatpush1.bf16.msra.mxu0 %v8291_v3  ;;  %v8319_v63 = vld [vmem:[#allocation10 + $0x30] ss:$24 sps:$4 sm:$0xff]   ;;  %v8321_v3 = vld [vmem:[#allocation10 + $0x40] ss:$24 sps:$4 sm:$0xff]  }
 0x1f3   : > { %1958 = vmatprep.subr.bf16.mxu1 %v8295_v8  ;;  %2040 = vmatprep.subr.bf16.mxu0 %v8297_v14  ;;  %13417 = vst [vmem:[#allocation44_spill] sm:$0xff] %v8319_v63  ;;  %13418 = vst [vmem:[#allocation45_spill] sm:$0xff] %v8321_v3  ;;  %v8325_v8 = vld [vmem:[#allocation10 + $0x64] ss:$24 sps:$4 sm:$0xff]   ;;  %v8327_v14 = vld [vmem:[#allocation10 + $0x74] ss:$24 sps:$4 sm:$0xff]  }
 0x1f4   : > { %13419 = vst [vmem:[#allocation46_spill] sm:$0xff] %v8325_v8  ;;  %13420 = vst [vmem:[#allocation47_spill] sm:$0xff] %v8327_v14 }
 0x1f5   : > { %1361 = vmatmul.mubr.bf16.vlgmr.msra.gmra.mrb[4].mxu1 %v8179_v59  ;;  %2032 = vmatmul.mubr.bf16.vlgmr.msra.gmra.mrb[4].mxu0 %v8301_v48  ;;  %v8333_v59 = vld [vmem:[#allocation10 + $0x60] ss:$24 sps:$4 sm:$0xff]  }
 0x1f6   : > { %1959 = vmatpush1.bf16.msra.mxu1 %v8305_v44  ;;  %2041 = vmatpush1.bf16.msra.mxu0 %v8307_v52  ;;  %13421 = vst [vmem:[#allocation48_spill] sm:$0xff] %v8333_v59  ;;  %v8335_v44 = vld [vmem:[#allocation10 + $0x70] ss:$24 sps:$4 sm:$0xff]  }
 0x1f7   : > { %1960 = vmatprep.subr.bf16.mxu1 %v8311_v57  ;;  %2042 = vmatprep.subr.bf16.mxu0 %v8313_v7  ;;  %13422 = vst [vmem:[#allocation49_spill] sm:$0xff] %v8335_v44  ;;  %v8339_v57 = vld [vmem:[#allocation10 + $0x94] ss:$24 sps:$4 sm:$0xff]   ;;  %v8341_v7 = vld [vmem:[#allocation10 + $0xa4] ss:$24 sps:$4 sm:$0xff]  }
 0x1f8   : > { %1990 = vmatprep.mubr.bf16.mxu1 %v8183_v62  ;;  %2072 = vmatprep.mubr.bf16.mxu0 %v8183_v62  ;;  %13423 = vst [vmem:[#allocation50_spill] sm:$0xff] %v8339_v57  ;;  %13424 = vst [vmem:[#allocation51_spill] sm:$0xff] %v8341_v7  ;;  %v8345_v62 = vld [vmem:[#allocation10 + $0x90] ss:$24 sps:$4 sm:$0xff]  }
 0x1f9   : > { %13425 = vst [vmem:[#allocation52_spill] sm:$0xff] %v8345_v62 }
 0x1fa   : > { %1961 = vmatpush1.bf16.msra.mxu1 %v8319_v63  ;;  %2043 = vmatpush1.bf16.msra.mxu0 %v8321_v3  ;;  %v8347_v63 = vld [vmem:[#allocation10 + $0xa0] ss:$24 sps:$4 sm:$0xff]   ;;  %v8351_v3 = vld [vmem:[#allocation10 + $0xc4] ss:$24 sps:$4 sm:$0xff]  }
 0x1fb   : > { %1962 = vmatprep.subr.bf16.mxu1 %v8325_v8  ;;  %2044 = vmatprep.subr.bf16.mxu0 %v8327_v14  ;;  %13426 = vst [vmem:[#allocation53_spill] sm:$0xff] %v8347_v63  ;;  %13427 = vst [vmem:[#allocation54_spill] sm:$0xff] %v8351_v3  ;;  %v8353_v8 = vld [vmem:[#allocation10 + $0xd4] ss:$24 sps:$4 sm:$0xff]   ;;  %v8357_v14 = vld [vmem:[#allocation10 + $0xc0] ss:$24 sps:$4 sm:$0xff]  }
 0x1fc   : > { %13428 = vst [vmem:[#allocation55_spill] sm:$0xff] %v8353_v8  ;;  %13429 = vst [vmem:[#allocation56_spill] sm:$0xff] %v8357_v14 }
 0x1fe   : > { %1963 = vmatpush1.bf16.msra.mxu1 %v8333_v59  ;;  %2045 = vmatpush1.bf16.msra.mxu0 %v8335_v44  ;;  %v8359_v59 = vld [vmem:[#allocation10 + $0xd0] ss:$24 sps:$4 sm:$0xff]   ;;  %v8363_v44 = vld [vmem:[#allocation10 + $0xf4] ss:$24 sps:$4 sm:$0xff]  }
 0x1ff   : > { %1964 = vmatprep.subr.bf16.mxu1 %v8339_v57  ;;  %2046 = vmatprep.subr.bf16.mxu0 %v8341_v7  ;;  %13430 = vst [vmem:[#allocation57_spill] sm:$0xff] %v8359_v59  ;;  %13431 = vst [vmem:[#allocation58_spill] sm:$0xff] %v8363_v44  ;;  %v8365_v57 = vld [vmem:[#allocation10 + $0x104] ss:$24 sps:$4 sm:$0xff]   ;;  %v8369_v7 = vld [vmem:[#allocation10 + $0xf0] ss:$24 sps:$4 sm:$0xff]  }
 0x200   : > { %13432 = vst [vmem:[#allocation59_spill] sm:$0xff] %v8365_v57  ;;  %13433 = vst [vmem:[#allocation60_spill] sm:$0xff] %v8369_v7 }
 0x202   : > { %1965 = vmatpush1.bf16.msra.mxu1 %v8345_v62  ;;  %2047 = vmatpush1.bf16.msra.mxu0 %v8347_v63  ;;  %v8371_v62 = vld [vmem:[#allocation10 + $0x100] ss:$24 sps:$4 sm:$0xff]   ;;  %v8375_v63 = vld [vmem:[#allocation10 + $0x124] ss:$24 sps:$4 sm:$0xff]  }
 0x203   : > { %1966 = vmatprep.subr.bf16.mxu1 %v8351_v3  ;;  %2048 = vmatprep.subr.bf16.mxu0 %v8353_v8  ;;  %13434 = vst [vmem:[#allocation61_spill] sm:$0xff] %v8371_v62  ;;  %13435 = vst [vmem:[#allocation62_spill] sm:$0xff] %v8375_v63  ;;  %v8377_v3 = vld [vmem:[#allocation10 + $0x134] ss:$24 sps:$4 sm:$0xff]   ;;  %v8381_v8 = vld [vmem:[#allocation10 + $0x120] ss:$24 sps:$4 sm:$0xff]  }
 0x204   : > { %13436 = vst [vmem:[#allocation63_spill] sm:$0xff] %v8377_v3  ;;  %13437 = vst [vmem:[#allocation64_spill] sm:$0xff] %v8381_v8 }
 0x206   : > { %1967 = vmatpush1.bf16.msra.mxu1 %v8357_v14  ;;  %2049 = vmatpush1.bf16.msra.mxu0 %v8359_v59  ;;  %v8383_v14 = vld [vmem:[#allocation10 + $0x130] ss:$24 sps:$4 sm:$0xff]   ;;  %v8387_v59 = vld [vmem:[#allocation10 + $0x154] ss:$24 sps:$4 sm:$0xff]  }
 0x207   : > { %1968 = vmatprep.subr.bf16.mxu1 %v8363_v44  ;;  %2050 = vmatprep.subr.bf16.mxu0 %v8365_v57  ;;  %13438 = vst [vmem:[#allocation65_spill] sm:$0xff] %v8383_v14  ;;  %13439 = vst [vmem:[#allocation66_spill] sm:$0xff] %v8387_v59  ;;  %v8389_v44 = vld [vmem:[#allocation10 + $0x164] ss:$24 sps:$4 sm:$0xff]   ;;  %v8393_v57 = vld [vmem:[#allocation10 + $0x150] ss:$24 sps:$4 sm:$0xff]  }
 0x208   : > { %13440 = vst [vmem:[#allocation67_spill] sm:$0xff] %v8389_v44  ;;  %13441 = vst [vmem:[#allocation68_spill] sm:$0xff] %v8393_v57 }
 0x20a   : > { %1969 = vmatpush1.bf16.msra.mxu1 %v8369_v7  ;;  %2051 = vmatpush1.bf16.msra.mxu0 %v8371_v62  ;;  %v8395_v7 = vld [vmem:[#allocation10 + $0x160] ss:$24 sps:$4 sm:$0xff]   ;;  %v8399_v62 = vld [vmem:[#allocation10 + $0x184] ss:$24 sps:$4 sm:$0xff]  }
 0x20b   : > { %1970 = vmatprep.subr.bf16.mxu1 %v8375_v63  ;;  %2052 = vmatprep.subr.bf16.mxu0 %v8377_v3  ;;  %13442 = vst [vmem:[#allocation69_spill] sm:$0xff] %v8395_v7  ;;  %13443 = vst [vmem:[#allocation70_spill] sm:$0xff] %v8399_v62  ;;  %v8401_v63 = vld [vmem:[#allocation10 + $0x194] ss:$24 sps:$4 sm:$0xff]   ;;  %v8405_v3 = vld [vmem:[#allocation10 + $0x180] ss:$24 sps:$4 sm:$0xff]  }
 0x20c   : > { %13444 = vst [vmem:[#allocation71_spill] sm:$0xff] %v8401_v63  ;;  %13445 = vst [vmem:[#allocation72_spill] sm:$0xff] %v8405_v3 }
 0x20e   : > { %1971 = vmatpush1.bf16.msra.mxu1 %v8381_v8  ;;  %2053 = vmatpush1.bf16.msra.mxu0 %v8383_v14  ;;  %v8407_v8 = vld [vmem:[#allocation10 + $0x190] ss:$24 sps:$4 sm:$0xff]   ;;  %v8411_v14 = vld [vmem:[#allocation10 + $0x1b4] ss:$24 sps:$4 sm:$0xff]  }
 0x20f   : > { %1972 = vmatprep.subr.bf16.mxu1 %v8387_v59  ;;  %2054 = vmatprep.subr.bf16.mxu0 %v8389_v44  ;;  %13446 = vst [vmem:[#allocation73_spill] sm:$0xff] %v8407_v8  ;;  %13447 = vst [vmem:[#allocation74_spill] sm:$0xff] %v8411_v14  ;;  %v8413_v59 = vld [vmem:[#allocation10 + $0x1c4] ss:$24 sps:$4 sm:$0xff]   ;;  %v8417_v44 = vld [vmem:[#allocation10 + $0x1b0] ss:$24 sps:$4 sm:$0xff]  }
 0x210   : > { %13448 = vst [vmem:[#allocation75_spill] sm:$0xff] %v8413_v59  ;;  %13449 = vst [vmem:[#allocation76_spill] sm:$0xff] %v8417_v44 }
 0x212   : > { %1973 = vmatpush1.bf16.msra.mxu1 %v8393_v57  ;;  %2055 = vmatpush1.bf16.msra.mxu0 %v8395_v7  ;;  %v8419_v57 = vld [vmem:[#allocation10 + $0x1c0] ss:$24 sps:$4 sm:$0xff]   ;;  %v8423_v7 = vld [vmem:[#allocation10 + $0x1e4] ss:$24 sps:$4 sm:$0xff]  }
 0x213   : > { %1974 = vmatprep.subr.bf16.mxu1 %v8399_v62  ;;  %2056 = vmatprep.subr.bf16.mxu0 %v8401_v63  ;;  %13450 = vst [vmem:[#allocation77_spill] sm:$0xff] %v8419_v57  ;;  %13451 = vst [vmem:[#allocation78_spill] sm:$0xff] %v8423_v7  ;;  %v8425_v62 = vld [vmem:[#allocation10 + $0x1f4] ss:$24 sps:$4 sm:$0xff]   ;;  %v8429_v63 = vld [vmem:[#allocation10 + $0x1e0] ss:$24 sps:$4 sm:$0xff]  }
 0x214   : > { %13452 = vst [vmem:[#allocation79_spill] sm:$0xff] %v8425_v62  ;;  %13453 = vst [vmem:[#allocation80_spill] sm:$0xff] %v8429_v63 }
 0x216   : > { %1975 = vmatpush1.bf16.msra.mxu1 %v8405_v3  ;;  %2057 = vmatpush1.bf16.msra.mxu0 %v8407_v8  ;;  %v8431_v3 = vld [vmem:[#allocation10 + $0x1f0] ss:$24 sps:$4 sm:$0xff]   ;;  %v12731_v8 = vstv %s8466_s20 }
 0x217   : > { %1976 = vmatprep.subr.bf16.mxu1 %v8411_v14  ;;  %2058 = vmatprep.subr.bf16.mxu0 %v8413_v59  ;;  %13454 = vst [vmem:[#allocation81_spill] sm:$0xff] %v8431_v3  ;;  %v8435_v14 = vld [vmem:[#allocation10 + $0x214] ss:$24 sps:$4 sm:$0xff]   ;;  %v8437_v59 = vld [vmem:[#allocation10 + $0x224] ss:$24 sps:$4 sm:$0xff]   ;;  %vm2414_vm5 = vcmp.eq.s32.totalorder %v8078_v13, %v12731_v8 }
 0x218   : > { %13455 = vst [vmem:[#allocation82_spill] sm:$0xff] %v8435_v14  ;;  %13456 = vst [vmem:[#allocation83_spill] sm:$0xff] %v8437_v59  ;;  %v8515_v8 = vld [vmem:[#allocation5 + $0x14] ss:$8 sps:$4 sm:$0xff]   ;;  %v8574_v13 = vld [vmem:[#allocation11] ss:$8 sps:$4 sm:$0xff]  }
 0x219   : > { %vm5835_vm6 = vmpackc.low %vm2414_vm5, %vm2414_vm5  ;;  %13476 = vst [vmem:[#allocation102_spill] sm:$0xff] %v8515_v8 }
 0x21a   : > { %1977 = vmatpush1.bf16.msra.mxu1 %v8417_v44  ;;  %2059 = vmatpush1.bf16.msra.mxu0 %v8419_v57  ;;  %v8441_v44 = vld [vmem:[#allocation10 + $0x210] ss:$24 sps:$4 sm:$0xff]   ;;  %v8443_v57 = vld [vmem:[#allocation10 + $0x220] ss:$24 sps:$4 sm:$0xff]   ;;  %13496 = vst [vmem:[#allocation122_spill] sm:$0xff] %v8574_v13 }
 0x21b   : > { %1978 = vmatprep.subr.bf16.mxu1 %v8423_v7  ;;  %2060 = vmatprep.subr.bf16.mxu0 %v8425_v62  ;;  %13457 = vst [vmem:[#allocation84_spill] sm:$0xff] %v8441_v44  ;;  %13458 = vst [vmem:[#allocation85_spill] sm:$0xff] %v8443_v57  ;;  %v8447_v7 = vld [vmem:[#allocation10 + $0x244] ss:$24 sps:$4 sm:$0xff]   ;;  %v8449_v62 = vld [vmem:[#allocation10 + $0x254] ss:$24 sps:$4 sm:$0xff]  }
 0x21c   : > { %13459 = vst [vmem:[#allocation86_spill] sm:$0xff] %v8447_v7  ;;  %13460 = vst [vmem:[#allocation87_spill] sm:$0xff] %v8449_v62 }
 0x21e   : > { %1979 = vmatpush1.bf16.msra.mxu1 %v8429_v63  ;;  %2061 = vmatpush1.bf16.msra.mxu0 %v8431_v3  ;;  %v8453_v63 = vld [vmem:[#allocation10 + $0x240] ss:$24 sps:$4 sm:$0xff]   ;;  %v8455_v3 = vld [vmem:[#allocation10 + $0x250] ss:$24 sps:$4 sm:$0xff]  }
 0x21f   : > { %1980 = vmatprep.subr.bf16.mxu1 %v8435_v14  ;;  %2062 = vmatprep.subr.bf16.mxu0 %v8437_v59  ;;  %13461 = vst [vmem:[#allocation88_spill] sm:$0xff] %v8453_v63  ;;  %13462 = vst [vmem:[#allocation89_spill] sm:$0xff] %v8455_v3  ;;  %v8460_v14 = vld [vmem:[#allocation10 + $0x274] ss:$24 sps:$4 sm:$0xff]   ;;  %v8462_v59 = vld [vmem:[#allocation10 + $0x284] ss:$24 sps:$4 sm:$0xff]  }
 0x220   : > { %13463 = vst [vmem:[#allocation90_spill] sm:$0xff] %v8460_v14  ;;  %13464 = vst [vmem:[#allocation91_spill] sm:$0xff] %v8462_v59 }
 0x222   : > { %1981 = vmatpush1.bf16.msra.mxu1 %v8441_v44  ;;  %2063 = vmatpush1.bf16.msra.mxu0 %v8443_v57  ;;  %v8470_v44 = vld [vmem:[#allocation10 + $0x270] ss:$24 sps:$4 sm:$0xff]   ;;  %v8472_v57 = vld [vmem:[#allocation10 + $0x280] ss:$24 sps:$4 sm:$0xff]  }
 0x223   : > { %1982 = vmatprep.subr.bf16.mxu1 %v8447_v7  ;;  %2064 = vmatprep.subr.bf16.mxu0 %v8449_v62  ;;  %13465 = vst [vmem:[#allocation92_spill] sm:$0xff] %v8470_v44  ;;  %13466 = vst [vmem:[#allocation93_spill] sm:$0xff] %v8472_v57  ;;  %v8476_v7 = vld [vmem:[#allocation10 + $0x2a4] ss:$24 sps:$4 sm:$0xff]   ;;  %v8478_v62 = vld [vmem:[#allocation10 + $0x2b4] ss:$24 sps:$4 sm:$0xff]  }
 0x224   : > { %13467 = vst [vmem:[#allocation94_spill] sm:$0xff] %v8476_v7 }
 0x226   : > { %1983 = vmatpush1.bf16.msra.mxu1 %v8453_v63  ;;  %2065 = vmatpush1.bf16.msra.mxu0 %v8455_v3  ;;  %v8482_v63 = vld [vmem:[#allocation10 + $0x2a0] ss:$24 sps:$4 sm:$0xff]   ;;  %v8484_v3 = vld [vmem:[#allocation10 + $0x2b0] ss:$24 sps:$4 sm:$0xff]  }
 0x227   : > { %1984 = vmatprep.subr.bf16.mxu1 %v8460_v14  ;;  %2066 = vmatprep.subr.bf16.mxu0 %v8462_v59  ;;  %13468 = vst [vmem:[#allocation95_spill] sm:$0xff] %v8482_v63  ;;  %v8488_v14 = vld [vmem:[#allocation10 + $0x2d4] ss:$24 sps:$4 sm:$0xff]   ;;  %v8490_v59 = vld [vmem:[#allocation10 + $0x2e4] ss:$24 sps:$4 sm:$0xff]  }
 0x228   : > { %13469 = vst [vmem:[#allocation96_spill] sm:$0xff] %v8488_v14  ;;  %13470 = vst [vmem:[#allocation97_spill] sm:$0xff] %v8490_v59 }
 0x22a   : > { %1985 = vmatpush1.bf16.msra.mxu1 %v8470_v44  ;;  %2067 = vmatpush1.bf16.msra.mxu0 %v8472_v57  ;;  %v8495_v44 = vld [vmem:[#allocation10 + $0x2d0] ss:$24 sps:$4 sm:$0xff]   ;;  %v8497_v57 = vld [vmem:[#allocation10 + $0x2e0] ss:$24 sps:$4 sm:$0xff]  }
 0x22b   : > { %1986 = vmatprep.subr.bf16.mxu1 %v8476_v7  ;;  %2068 = vmatprep.subr.bf16.mxu0 %v8478_v62  ;;  %13471 = vst [vmem:[#allocation98_spill] sm:$0xff] %v8495_v44  ;;  %13472 = vst [vmem:[#allocation99_spill] sm:$0xff] %v8497_v57  ;;  %v8506_v7 = vld [vmem:[#allocation5 + $0x4] ss:$8 sps:$4 sm:$0xff]  }
 0x22c   : > { %13473 = vst [vmem:[#allocation100_spill] sm:$0xff] %v8506_v7 }
 0x22e   : > { %1987 = vmatpush1.bf16.msra.mxu1 %v8482_v63  ;;  %2069 = vmatpush1.bf16.msra.mxu0 %v8484_v3  ;;  %v8511_v63 = vld [vmem:[#allocation5] ss:$8 sps:$4 sm:$0xff]  }
 0x22f   : > { %1988 = vmatprep.subr.bf16.mxu1 %v8488_v14  ;;  %2070 = vmatprep.subr.bf16.mxu0 %v8490_v59  ;;  %13474 = vst [vmem:[#allocation101_spill] sm:$0xff] %v8511_v63  ;;  %v13475_v14 = vmov 1.0|1.0   ;;  %v8591_v59 = vld [vmem:[#allocation5 + $0xb0] ss:$8 sps:$4 sm:$0xff]  }
 0x230   : > { %13501 = vst [vmem:[#allocation127_spill] sm:$0xff] %v8591_v59 }
 0x232   : > { %1989 = vmatpush1.bf16.msra.mxu1 %v8495_v44  ;;  %2071 = vmatpush1.bf16.msra.mxu0 %v8497_v57  ;;  %v8518_v44 = vld [vmem:[#allocation5 + $0x10] ss:$8 sps:$4 sm:$0xff]   ;;  %v8524_v57 = vld [vmem:[#allocation5 + $0x20] ss:$8 sps:$4 sm:$0xff]  }
 0x233   : > { %2421 = vmatprep.subr.bf16.mxu0 %v8506_v7  ;;  %13477 = vst [vmem:[#allocation103_spill] sm:$0xff] %v8518_v44  ;;  %v8521_v7 = vld [vmem:[#allocation5 + $0x24] ss:$8 sps:$4 sm:$0xff]   ;;  %13479 = vst [vmem:[#allocation105_spill] sm:$0xff] %v8524_v57 }
 0x234   : > { %13478 = vst [vmem:[#allocation104_spill] sm:$0xff] %v8521_v7 }
 0x235   : > { %1991 = vmatmul.mubr.bf16.vlgmr.msra.gmra.mrb[0].mxu1 %v8301_v48  ;;  %2073 = vmatmul.mubr.bf16.vlgmr.msra.gmra.mrb[8].mxu0 %v8301_v48  ;;  %v8527_v48 = vld [vmem:[#allocation5 + $0x34] ss:$8 sps:$4 sm:$0xff]  }
 0x236   : > { %2422 = vmatpush1.bf16.msra.mxu0 %v8511_v63  ;;  %5836 = vmatprep.mubr.msk.bf16.mxu0 %vm5835_vm6, %v13475_v14  ;;  %13480 = vst [vmem:[#allocation106_spill] sm:$0xff] %v8527_v48  ;;  %v8530_v63 = vld [vmem:[#allocation5 + $0x30] ss:$8 sps:$4 sm:$0xff]  }
 0x237   : > { %2423 = vmatprep.subr.bf16.mxu0 %v8515_v8  ;;  %13481 = vst [vmem:[#allocation107_spill] sm:$0xff] %v8530_v63  ;;  %v8533_v8 = vld [vmem:[#allocation5 + $0x44] ss:$8 sps:$4 sm:$0xff]  }
 0x238   : > { %13482 = vst [vmem:[#allocation108_spill] sm:$0xff] %v8533_v8 }
 0x23a   : > { %2424 = vmatpush1.bf16.msra.mxu0 %v8518_v44  ;;  %v8536_v44 = vld [vmem:[#allocation5 + $0x40] ss:$8 sps:$4 sm:$0xff]  }
 0x23b   : > { %2425 = vmatprep.subr.bf16.mxu0 %v8521_v7  ;;  %13483 = vst [vmem:[#allocation109_spill] sm:$0xff] %v8536_v44  ;;  %v8539_v7 = vld [vmem:[#allocation5 + $0x54] ss:$8 sps:$4 sm:$0xff]  }
 0x23c   : > { %13484 = vst [vmem:[#allocation110_spill] sm:$0xff] %v8539_v7 }
 0x23e   : > { %2426 = vmatpush1.bf16.msra.mxu0 %v8524_v57  ;;  %v8542_v57 = vld [vmem:[#allocation5 + $0x50] ss:$8 sps:$4 sm:$0xff]  }
 0x23f   : > { %2427 = vmatprep.subr.bf16.mxu0 %v8527_v48  ;;  %13485 = vst [vmem:[#allocation111_spill] sm:$0xff] %v8542_v57  ;;  %v8545_v48 = vld [vmem:[#allocation5 + $0x64] ss:$8 sps:$4 sm:$0xff]  }
 0x240   : > { %13486 = vst [vmem:[#allocation112_spill] sm:$0xff] %v8545_v48 }
 0x242   : > { %2428 = vmatpush1.bf16.msra.mxu0 %v8530_v63  ;;  %v8548_v63 = vld [vmem:[#allocation5 + $0x60] ss:$8 sps:$4 sm:$0xff]  }
 0x243   : > { %2429 = vmatprep.subr.bf16.mxu0 %v8533_v8  ;;  %13487 = vst [vmem:[#allocation113_spill] sm:$0xff] %v8548_v63  ;;  %v8551_v8 = vld [vmem:[#allocation5 + $0x74] ss:$8 sps:$4 sm:$0xff]  }
 0x244   : > { %13488 = vst [vmem:[#allocation114_spill] sm:$0xff] %v8551_v8 }
 0x246   : > { %2430 = vmatpush1.bf16.msra.mxu0 %v8536_v44  ;;  %v8554_v44 = vld [vmem:[#allocation5 + $0x70] ss:$8 sps:$4 sm:$0xff]  }
 0x247   : > { %2431 = vmatprep.subr.bf16.mxu0 %v8539_v7  ;;  %13489 = vst [vmem:[#allocation115_spill] sm:$0xff] %v8554_v44  ;;  %v8557_v7 = vld [vmem:[#allocation5 + $0x84] ss:$8 sps:$4 sm:$0xff]  }
 0x248   : > { %13490 = vst [vmem:[#allocation116_spill] sm:$0xff] %v8557_v7 }
 0x24a   : > { %2432 = vmatpush1.bf16.msra.mxu0 %v8542_v57  ;;  %v8560_v57 = vld [vmem:[#allocation5 + $0x80] ss:$8 sps:$4 sm:$0xff]  }
 0x24b   : > { %2433 = vmatprep.subr.bf16.mxu0 %v8545_v48  ;;  %13491 = vst [vmem:[#allocation117_spill] sm:$0xff] %v8560_v57  ;;  %v8563_v48 = vld [vmem:[#allocation5 + $0x94] ss:$8 sps:$4 sm:$0xff]  }
 0x24c   : > { %13492 = vst [vmem:[#allocation118_spill] sm:$0xff] %v8563_v48 }
 0x24e   : > { %2434 = vmatpush1.bf16.msra.mxu0 %v8548_v63  ;;  %v8566_v63 = vld [vmem:[#allocation5 + $0x90] ss:$8 sps:$4 sm:$0xff]  }
 0x24f   : > { %2435 = vmatprep.subr.bf16.mxu0 %v8551_v8  ;;  %13493 = vst [vmem:[#allocation119_spill] sm:$0xff] %v8566_v63  ;;  %v8569_v8 = vld [vmem:[#allocation5 + $0xa4] ss:$8 sps:$4 sm:$0xff]  }
 0x250   : > { %13494 = vst [vmem:[#allocation120_spill] sm:$0xff] %v8569_v8 }
 0x252   : > { %2436 = vmatpush1.bf16.msra.mxu0 %v8554_v44  ;;  %v8572_v44 = vld [vmem:[#allocation11 + $0x4] ss:$8 sps:$4 sm:$0xff]  }
 0x253   : > { %2437 = vmatprep.subr.bf16.mxu0 %v8557_v7  ;;  %13495 = vst [vmem:[#allocation121_spill] sm:$0xff] %v8572_v44  ;;  %v8576_v7 = vld [vmem:[#allocation11 + $0x14] ss:$8 sps:$4 sm:$0xff]   ;;  %2341 = vmatprep.subr.bf16.mxu1 %v8572_v44  ;;  %v8595_v44 = vld [vmem:[#allocation11 + $0x20] ss:$8 sps:$4 sm:$0xff]  }
 0x254   : > { %13497 = vst [vmem:[#allocation123_spill] sm:$0xff] %v8576_v7  ;;  %2342 = vmatpush1.bf16.msra.mxu1 %v8574_v13  ;;  %13502 = vst [vmem:[#allocation128_spill] sm:$0xff] %v8595_v44  ;;  %v8601_v13 = vld [vmem:[#allocation11 + $0x34] ss:$8 sps:$4 sm:$0xff]  }
 0x255   : > { %2343 = vmatprep.subr.bf16.mxu1 %v8576_v7  ;;  %13504 = vst [vmem:[#allocation130_spill] sm:$0xff] %v8601_v13  ;;  %v8603_v7 = vld [vmem:[#allocation5 + $0xc0] ss:$8 sps:$4 sm:$0xff]  }
 0x256   : > { %2438 = vmatpush1.bf16.msra.mxu0 %v8560_v57  ;;  %v8579_v57 = vld [vmem:[#allocation5 + $0xa0] ss:$8 sps:$4 sm:$0xff]   ;;  %13505 = vst [vmem:[#allocation131_spill] sm:$0xff] %v8603_v7 }
 0x257   : > { %2439 = vmatprep.subr.bf16.mxu0 %v8563_v48  ;;  %13498 = vst [vmem:[#allocation124_spill] sm:$0xff] %v8579_v57  ;;  %v8583_v48 = vld [vmem:[#allocation11 + $0x10] ss:$8 sps:$4 sm:$0xff]  }
 0x258   : > { %13499 = vst [vmem:[#allocation125_spill] sm:$0xff] %v8583_v48  ;;  %2344 = vmatpush1.bf16.msra.mxu1 %v8583_v48  ;;  %v8611_v48 = vld [vmem:[#allocation5 + $0xd0] ss:$8 sps:$4 sm:$0xff]  }
 0x259   : > { %13506 = vst [vmem:[#allocation132_spill] sm:$0xff] %v8611_v48 }
 0x25a   : > { %2440 = vmatpush1.bf16.msra.mxu0 %v8566_v63  ;;  %v8585_v63 = vld [vmem:[#allocation5 + $0xb4] ss:$8 sps:$4 sm:$0xff]  }
 0x25b   : > { %2441 = vmatprep.subr.bf16.mxu0 %v8569_v8  ;;  %v8589_v8 = vld [vmem:[#allocation11 + $0x24] ss:$8 sps:$4 sm:$0xff]  }
 0x25c   : > { %13500 = vst [vmem:[#allocation126_spill] sm:$0xff] %v8589_v8  ;;  %2345 = vmatprep.subr.bf16.mxu1 %v8589_v8  ;;  %v8614_v8 = vld [vmem:[#allocation5 + $0xe4] ss:$8 sps:$4 sm:$0xff]  }
 0x25d   : > { %2346 = vmatpush1.bf16.msra.mxu1 %v8595_v44  ;;  %13507 = vst [vmem:[#allocation133_spill] sm:$0xff] %v8614_v8  ;;  %v13510_v44 = vstv %s8466_s20  ;;  %s3241_s20 = scalar_select %p3240_p7, 1, 0 }
 0x25e   : > { %2442 = vmatpush1.bf16.msra.mxu0 %v8579_v57  ;;  %v8597_v57 = vld [vmem:[#allocation5 + $0xc4] ss:$8 sps:$4 sm:$0xff]   ;;  %2347 = vmatprep.subr.bf16.mxu1 %v8601_v13  ;;  %vm2413_vm7 = vcmp.eq.s32.totalorder %v8075_v10, %v13510_v44  ;;  %v8626_v13 = vld [vmem:[#allocation5 + $0xf0] ss:$8 sps:$4 sm:$0xff]   ;;  %v8645_v10 = vld [vmem:[#allocation8 + $0x68] ss:$24 sps:$4 sm:$0xff]  }
 0x25f   : > { %2443 = vmatprep.subr.bf16.mxu0 %v8585_v63  ;;  %13503 = vst [vmem:[#allocation129_spill] sm:$0xff] %v8597_v57  ;;  %13511 = vst [vmem:[#allocation136_spill] sm:$0xff] %v8626_v13  ;;  %v8639_v44 = vld [vmem:[#allocation8 + $0x38] ss:$24 sps:$4 sm:$0xff]  }
 0x260   : > { %vm5837_vm8 = vmpackc.low %vm2413_vm7, %vm2413_vm7  ;;  %13515 = vst [vmem:[#allocation140_spill] sm:$0xff] %v8639_v44 }
 0x261   : > { %13517 = vst [vmem:[#allocation142_spill] sm:$0xff] %v8645_v10 }
 0x262   : > { %2444 = vmatpush1.bf16.msra.mxu0 %v8591_v59  ;;  %v8607_v59 = vld [vmem:[#allocation5 + $0xd4] ss:$8 sps:$4 sm:$0xff]  }
 0x263   : > { %2445 = vmatprep.subr.bf16.mxu0 %v8597_v57  ;;  %v8617_v57 = vld [vmem:[#allocation5 + $0xe0] ss:$8 sps:$4 sm:$0xff]  }
 0x264   : > { %13508 = vst [vmem:[#allocation134_spill] sm:$0xff] %v8617_v57 }
 0x266   : > { %2446 = vmatpush1.bf16.msra.mxu0 %v8603_v7  ;;  %v8620_v7 = vld [vmem:[#allocation5 + $0xf4] ss:$8 sps:$4 sm:$0xff]  }
 0x267   : > { %2447 = vmatprep.subr.bf16.mxu0 %v8607_v59  ;;  %13509 = vst [vmem:[#allocation135_spill] sm:$0xff] %v8620_v7 }
 0x26a   : > { %2448 = vmatpush1.bf16.msra.mxu0 %v8611_v48  ;;  %v8629_v48 = vld [vmem:[#allocation8 + $0xc] ss:$24 sps:$4 sm:$0xff]  }
 0x26b   : > { %2449 = vmatprep.subr.bf16.mxu0 %v8614_v8  ;;  %13512 = vst [vmem:[#allocation137_spill] sm:$0xff] %v8629_v48  ;;  %v8633_v8 = vld [vmem:[#allocation8 + $0x8] ss:$24 sps:$4 sm:$0xff]  }
 0x26c   : > { %13513 = vst [vmem:[#allocation138_spill] sm:$0xff] %v8633_v8 }
 0x26e   : > { %2450 = vmatpush1.bf16.msra.mxu0 %v8617_v57  ;;  %v8636_v57 = vld [vmem:[#allocation8 + $0x3c] ss:$24 sps:$4 sm:$0xff]  }
 0x26f   : > { %2451 = vmatprep.subr.bf16.mxu0 %v8620_v7  ;;  %13514 = vst [vmem:[#allocation139_spill] sm:$0xff] %v8636_v57  ;;  %v8659_v7 = vld [vmem:[#allocation8 + $0xc8] ss:$24 sps:$4 sm:$0xff]  }
 0x270   : > { %13521 = vst [vmem:[#allocation146_spill] sm:$0xff] %v8659_v7 }
 0x272   : > { %2452 = vmatpush1.bf16.msra.mxu0 %v8626_v13  ;;  %v8642_v13 = vld [vmem:[#allocation8 + $0x6c] ss:$24 sps:$4 sm:$0xff]  }
 0x273   : > { %2507 = vmatprep.subr.bf16.mxu0 %v8629_v48  ;;  %13516 = vst [vmem:[#allocation141_spill] sm:$0xff] %v8642_v13  ;;  %v8648_v48 = vld [vmem:[#allocation8 + $0x9c] ss:$24 sps:$4 sm:$0xff]  }
 0x274   : > { %13518 = vst [vmem:[#allocation143_spill] sm:$0xff] %v8648_v48 }
 0x275   : > { %5838 = vmatmul.mubr.msk.bf16.vlgmr.msra.gmra.mrb[12].mxu0 %vm5837_vm8, %v13475_v14 }
 0x276   : > { %2508 = vmatpush1.bf16.msra.mxu0 %v8633_v8  ;;  %v8651_v8 = vld [vmem:[#allocation8 + $0x98] ss:$24 sps:$4 sm:$0xff]  }
 0x277   : > { %2509 = vmatprep.subr.bf16.mxu0 %v8636_v57  ;;  %13519 = vst [vmem:[#allocation144_spill] sm:$0xff] %v8651_v8  ;;  %v8654_v57 = vld [vmem:[#allocation8 + $0xcc] ss:$24 sps:$4 sm:$0xff]  }
 0x278   : > { %13520 = vst [vmem:[#allocation145_spill] sm:$0xff] %v8654_v57 }
 0x27a   : > { %2510 = vmatpush1.bf16.msra.mxu0 %v8639_v44  ;;  %v8657_v44 = vld [vmem:[#allocation11 + $0x30] ss:$8 sps:$4 sm:$0xff]  }
 0x27b   : > { %2511 = vmatprep.subr.bf16.mxu0 %v8642_v13  ;;  %v8662_v13 = vld [vmem:[#allocation8 + $0xfc] ss:$24 sps:$4 sm:$0xff]   ;;  %2348 = vmatpush1.bf16.msra.mxu1 %v8657_v44 }
 0x27c   : > { %13522 = vst [vmem:[#allocation147_spill] sm:$0xff] %v8662_v13 }
 0x27e   : > { %2512 = vmatpush1.bf16.msra.mxu0 %v8645_v10  ;;  %v8668_v10 = vld [vmem:[#allocation11 + $0x40] ss:$8 sps:$4 sm:$0xff]  }
 0x27f   : > { %2513 = vmatprep.subr.bf16.mxu0 %v8648_v48  ;;  %v8666_v48 = vld [vmem:[#allocation11 + $0x44] ss:$8 sps:$4 sm:$0xff]  }
 0x280   : > { %2349 = vmatprep.subr.bf16.mxu1 %v8666_v48 }
 0x281   : > { %2350 = vmatpush1.bf16.msra.mxu1 %v8668_v10 }
 0x282   : > { %2514 = vmatpush1.bf16.msra.mxu0 %v8651_v8 }
 0x283   : > { %2515 = vmatprep.subr.bf16.mxu0 %v8654_v57  ;;  %v8674_v57 = vld [vmem:[#allocation11 + $0x54] ss:$8 sps:$4 sm:$0xff]  }
 0x284   : > { %13523 = vst [vmem:[#allocation148_spill] sm:$0xff] %v8674_v57  ;;  %2351 = vmatprep.subr.bf16.mxu1 %v8674_v57 }
 0x286   : > { %2516 = vmatpush1.bf16.msra.mxu0 %v8659_v7  ;;  %v8676_v7 = vld [vmem:[#allocation11 + $0x50] ss:$8 sps:$4 sm:$0xff]  }
 0x287   : > { %2517 = vmatprep.subr.bf16.mxu0 %v8662_v13  ;;  %13524 = vst [vmem:[#allocation149_spill] sm:$0xff] %v8676_v7  ;;  %2352 = vmatpush1.bf16.msra.mxu1 %v8676_v7  ;;  %v8682_v13 = vld [vmem:[#allocation11 + $0x64] ss:$8 sps:$4 sm:$0xff]  }
 0x288   : > { %13525 = vst [vmem:[#allocation150_spill] sm:$0xff] %v8682_v13  ;;  %2353 = vmatprep.subr.bf16.mxu1 %v8682_v13 }
 0x28a   : > { %2518 = vmatpush1.bf16.msra.mxu0 %v8101_v21  ;;  %v8684_v21 = vld [vmem:[#allocation11 + $0x60] ss:$8 sps:$4 sm:$0xff]  }
 0x28b   : > { %2519 = vmatprep.subr.bf16.mxu0 %v8103_v22  ;;  %13526 = vst [vmem:[#allocation151_spill] sm:$0xff] %v8684_v21  ;;  %2354 = vmatpush1.bf16.msra.mxu1 %v8684_v21  ;;  %v8690_v22 = vld [vmem:[#allocation11 + $0x74] ss:$8 sps:$4 sm:$0xff]  }
 0x28c   : > { %13527 = vst [vmem:[#allocation152_spill] sm:$0xff] %v8690_v22  ;;  %2355 = vmatprep.subr.bf16.mxu1 %v8690_v22 }
 0x28e   : > { %2520 = vmatpush1.bf16.msra.mxu0 %v8105_v23  ;;  %v8692_v23 = vld [vmem:[#allocation11 + $0x70] ss:$8 sps:$4 sm:$0xff]  }
 0x28f   : > { %2521 = vmatprep.subr.bf16.mxu0 %v8107_v24  ;;  %13528 = vst [vmem:[#allocation153_spill] sm:$0xff] %v8692_v23  ;;  %2356 = vmatpush1.bf16.msra.mxu1 %v8692_v23  ;;  %v8698_v24 = vld [vmem:[#allocation11 + $0x84] ss:$8 sps:$4 sm:$0xff]  }
 0x290   : > { %13529 = vst [vmem:[#allocation154_spill] sm:$0xff] %v8698_v24  ;;  %2357 = vmatprep.subr.bf16.mxu1 %v8698_v24 }
 0x292   : > { %2522 = vmatpush1.bf16.msra.mxu0 %v8111_v25  ;;  %v8700_v25 = vld [vmem:[#allocation11 + $0x80] ss:$8 sps:$4 sm:$0xff]  }
 0x293   : > { %2523 = vmatprep.subr.bf16.mxu0 %v8113_v26  ;;  %13530 = vst [vmem:[#allocation155_spill] sm:$0xff] %v8700_v25  ;;  %2358 = vmatpush1.bf16.msra.mxu1 %v8700_v25  ;;  %v8706_v26 = vld [vmem:[#allocation11 + $0x94] ss:$8 sps:$4 sm:$0xff]  }
 0x294   : > { %13531 = vst [vmem:[#allocation156_spill] sm:$0xff] %v8706_v26  ;;  %2359 = vmatprep.subr.bf16.mxu1 %v8706_v26 }
 0x296   : > { %2524 = vmatpush1.bf16.msra.mxu0 %v8117_v27  ;;  %v8708_v27 = vld [vmem:[#allocation11 + $0x90] ss:$8 sps:$4 sm:$0xff]  }
 0x297   : > { %2525 = vmatprep.subr.bf16.mxu0 %v8119_v28  ;;  %13532 = vst [vmem:[#allocation157_spill] sm:$0xff] %v8708_v27  ;;  %2360 = vmatpush1.bf16.msra.mxu1 %v8708_v27  ;;  %v8714_v28 = vld [vmem:[#allocation11 + $0xa4] ss:$8 sps:$4 sm:$0xff]  }
 0x298   : > { %13533 = vst [vmem:[#allocation158_spill] sm:$0xff] %v8714_v28  ;;  %2361 = vmatprep.subr.bf16.mxu1 %v8714_v28  ;;  %v8734_v28 = vld [vmem:[#allocation11 + $0xd4] ss:$8 sps:$4 sm:$0xff]  }
 0x299   : > { %13539 = vst [vmem:[#allocation164_spill] sm:$0xff] %v8734_v28 }
 0x29a   : > { %2526 = vmatpush1.bf16.msra.mxu0 %v8123_v29  ;;  %v8716_v29 = vld [vmem:[#allocation11 + $0xa0] ss:$8 sps:$4 sm:$0xff]  }
 0x29b   : > { %2527 = vmatprep.subr.bf16.mxu0 %v8125_v30  ;;  %13534 = vst [vmem:[#allocation159_spill] sm:$0xff] %v8716_v29  ;;  %2362 = vmatpush1.bf16.msra.mxu1 %v8716_v29  ;;  %v8722_v30 = vld [vmem:[#allocation11 + $0xb4] ss:$8 sps:$4 sm:$0xff]  }
 0x29c   : > { %13535 = vst [vmem:[#allocation160_spill] sm:$0xff] %v8722_v30  ;;  %2363 = vmatprep.subr.bf16.mxu1 %v8722_v30 }
 0x29e   : > { %2528 = vmatpush1.bf16.msra.mxu0 %v8129_v31  ;;  %v8724_v31 = vld [vmem:[#allocation11 + $0xb0] ss:$8 sps:$4 sm:$0xff]  }
 0x29f   : > { %2529 = vmatprep.subr.bf16.mxu0 %v8131_v32  ;;  %13536 = vst [vmem:[#allocation161_spill] sm:$0xff] %v8724_v31  ;;  %2364 = vmatpush1.bf16.msra.mxu1 %v8724_v31  ;;  %v8730_v32 = vld [vmem:[#allocation11 + $0xc4] ss:$8 sps:$4 sm:$0xff]   ;;  %v1230_v31 = vsub.s32 3, %v8168_v46 }
 0x2a0   : > { %13537 = vst [vmem:[#allocation162_spill] sm:$0xff] %v8730_v32  ;;  %2365 = vmatprep.subr.bf16.mxu1 %v8730_v32 }
 0x2a2   : > { %2530 = vmatpush1.bf16.msra.mxu0 %v8135_v33  ;;  %v8732_v33 = vld [vmem:[#allocation11 + $0xc0] ss:$8 sps:$4 sm:$0xff]  }
 0x2a3   : > { %2531 = vmatprep.subr.bf16.mxu0 %v8137_v34  ;;  %13538 = vst [vmem:[#allocation163_spill] sm:$0xff] %v8732_v33  ;;  %2366 = vmatpush1.bf16.msra.mxu1 %v8732_v33  ;;  %v8740_v34 = vld [vmem:[#allocation11 + $0xd0] ss:$8 sps:$4 sm:$0xff]  }
 0x2a4   : > { %13540 = vst [vmem:[#allocation165_spill] sm:$0xff] %v8740_v34  ;;  %2367 = vmatprep.subr.bf16.mxu1 %v8734_v28 }
 0x2a6   : > { %2532 = vmatpush1.bf16.msra.mxu0 %v8141_v35  ;;  %v8743_v35 = vld [vmem:[#allocation11 + $0xe4] ss:$8 sps:$4 sm:$0xff]  }
 0x2a7   : > { %2533 = vmatprep.subr.bf16.mxu0 %v8143_v36  ;;  %13541 = vst [vmem:[#allocation166_spill] sm:$0xff] %v8743_v35  ;;  %2368 = vmatpush1.bf16.msra.mxu1 %v8740_v34  ;;  %v8748_v36 = vld [vmem:[#allocation11 + $0xe0] ss:$8 sps:$4 sm:$0xff]  }
 0x2a8   : > { %13542 = vst [vmem:[#allocation167_spill] sm:$0xff] %v8748_v36  ;;  %2369 = vmatprep.subr.bf16.mxu1 %v8743_v35 }
 0x2aa   : > { %2534 = vmatpush1.bf16.msra.mxu0 %v8147_v37  ;;  %v8751_v37 = vld [vmem:[#allocation11 + $0xf4] ss:$8 sps:$4 sm:$0xff]  }
 0x2ab   : > { %2535 = vmatprep.subr.bf16.mxu0 %v8151_v38  ;;  %13543 = vst [vmem:[#allocation168_spill] sm:$0xff] %v8751_v37  ;;  %2370 = vmatpush1.bf16.msra.mxu1 %v8748_v36  ;;  %v8756_v38 = vld [vmem:[#allocation11 + $0xf0] ss:$8 sps:$4 sm:$0xff]   ;;  %v389_v36 = vld [vmem:[%s12643_s5] sm:$0x3f] }
 0x2ac   : > { %13544 = vst [vmem:[#allocation169_spill] sm:$0xff] %v8756_v38  ;;  %2371 = vmatprep.subr.bf16.mxu1 %v8751_v37  ;;  %v1226_v37 = vsub.s32 2, %v8168_v46 }
 0x2ae   : > { %2536 = vmatpush1.bf16.msra.mxu0 %v8154_v39  ;;  %v8760_v39 = vld [vmem:[#allocation8 + $0x4] ss:$24 sps:$4 sm:$0xff]   ;;  %v8774_v30 = vrot.slane %v389_v36, %v1226_v37 }
 0x2af   : > { %2537 = vmatprep.subr.bf16.mxu0 %v8158_v41  ;;  %2372 = vmatpush1.bf16.msra.mxu1 %v8756_v38  ;;  %13545 = vst [vmem:[#allocation170_spill] sm:$0xff] %v8760_v39  ;;  %v8768_v38 = vrot.slane %v389_v36, %v8269_v18 }
 0x2b0   : > { %2466 = vmatprep.subr.bf16.mxu1 %v8760_v39  ;;  %v8772_v39 = vrot.slane %v389_v36, %v8171_v47  ;;  %13547 = vst [vmem:[#allocation172_spill] sm:$0xff] %v8774_v30 }
 0x2b1   : > { %13546 = vst [vmem:[#allocation171_spill] sm:$0xff] %v8768_v38 }
 0x2b2   : > { %2538 = vmatpush1.bf16.msra.mxu0 %v8160_v43 }
 0x2b3   : > { %2632 = vmatprep.subr.bf16.mxu0 %v8164_v45 }
 0x2c8   : > { %v1362_v41 = vpop.f32.mrb[4].mxu1  ;;  %v2033_v35 = vpop.f32.mrb[4].mxu0 }
 0x2c9   : > { %v1364_v34 = vpop.f32.mrb[5].mxu1  ;;  %v2035_v28 = vpop.f32.mrb[5].mxu0  ;;  %v5914_v21 = vadd.f32 %v2033_v35, %v8774_v30 }
 0x2ca   : > { %v1366_v33 = vpop.f32.mrb[6].mxu1  ;;  %v2037_v43 = vpop.f32.mrb[6].mxu0 }
 0x2cb   : > { %v1367_v32 = vpop.f32.mrb[7].mxu1  ;;  %v2038_v45 = vpop.f32.mrb[7].mxu0 }
 0x2cc   : > { %v8776_v32 = vrot.slane %v389_v36, %v1230_v31  ;;  %v5799_v31 = vmul.f32 -1.442695, %v5914_v21 }
 0x2ce   : > { %13548 = vst [vmem:[#allocation173_spill] sm:$0xff] %v8776_v32  ;;  %v5915_v37 = vadd.f32 %v2035_v28, %v8776_v32 }
 0x2d0   : > { %v5800_v7 = vmul.f32 -1.442695, %v5915_v37 }
 0x308   : > { %v1992_v33 = vpop.f32.mrb[0].mxu1  ;;  %v2074_v43 = vpop.f32.mrb[8].mxu0 }
 0x309   : > { %v5912_v45 = vadd.f32 %v1992_v33, %v8768_v38  ;;  %v1994_v29 = vpop.f32.mrb[1].mxu1  ;;  %v2076_v27 = vpop.f32.mrb[9].mxu0 }
 0x30a   : > { %v5913_v26 = vadd.f32 %v1994_v29, %v8772_v39  ;;  %v1996_v25 = vpop.f32.mrb[2].mxu1  ;;  %v2078_v8 = vpop.f32.mrb[10].mxu0 }
 0x30b   : > { %v5797_v24 = vmul.f32 -1.442695, %v5912_v45  ;;  %v1997_v23 = vpop.f32.mrb[3].mxu1  ;;  %v2079_v22 = vpop.f32.mrb[11].mxu0  ;;  %v390_v8 = vld [vmem:[%s12644_s6] sm:$0x3] }
 0x30c   : > { %v5798_v13 = vmul.f32 -1.442695, %v5913_v26  ;;  %v8786_v22 = vrot.slane %v390_v8, %v8269_v18  ;;  %v1234_v23 = vsub.s32 4, %v8168_v46  ;;  %v8790_v21 = vrot.slane %v390_v8, %v8171_v47 }
 0x30d   : > { %6486 = vpow2.f32 %v5797_v24 }
 0x30e   : > { %6488 = vpow2.f32 %v5798_v13  ;;  %13549 = vst [vmem:[#allocation174_spill] sm:$0xff] %v8790_v21  ;;  %v8793_v25 = vrot.slane %v389_v36, %v1234_v23  ;;  %v2120_v28 = vadd.f32 %v8786_v22, %v2074_v43 }
 0x30f   : > { %6490 = vpow2.f32 %v5799_v31 }
 0x310   : > { %6492 = vpow2.f32 %v5800_v7  ;;  %v1238_v7 = vsub.s32 5, %v8168_v46  ;;  %13550 = vst [vmem:[#allocation175_spill] sm:$0xff] %v8793_v25  ;;  %v1363_v31 = vadd.f32 %v1362_v41, %v8793_v25 }
 0x312   : > { %v8796_v35 = vrot.slane %v389_v36, %v1238_v7 }
 0x314   : > { %13551 = vst [vmem:[#allocation176_spill] sm:$0xff] %v8796_v35 }
 0x317   : > { %v6487_v33 = vpop.eup %6486 }
 0x318   : > { %v6489_v38 = vpop.eup %6488  ;;  %v2089_v57 = vadd.f32 1.0, %v6487_v33 }
 0x319   : > { %v2090_v29 = vadd.f32 1.0, %v6489_v38  ;;  %v6491_v13 = vpop.eup %6490  ;;  %v2121_v38 = vadd.f32 %v8790_v21, %v2076_v27 }
 0x31a   : > { %6494 = vrcp.f32 %v2089_v57  ;;  %v6493_v24 = vpop.eup %6492  ;;  %v2103_v26 = vadd.f32 1.0, %v6491_v13 }
 0x31b   : > { %6496 = vrcp.f32 %v2090_v29  ;;  %v2104_v57 = vadd.f32 1.0, %v6493_v24  ;;  %v1365_v29 = vadd.f32 %v1364_v34, %v8796_v35 }
 0x31c   : > { %6498 = vrcp.f32 %v2103_v26 }
 0x31d   : > { %6500 = vrcp.f32 %v2104_v57 }
 0x324   : > { %v6495_v45 = vpop.eup %6494 }
 0x325   : > { %v6497_v37 = vpop.eup %6496  ;;  %v2122_v33 = vmul.f32 %v6495_v45, %v2120_v28  ;;  %v8807_v45 = vld [vmem:[#allocation8] ss:$24 sps:$4 sm:$0xff]  }
 0x326   : > { %v2123_v8 = vmul.f32 %v6497_v37, %v2121_v38  ;;  %v6499_v43 = vpop.eup %6498  ;;  %v8811_v37 = vld [vmem:[#allocation8 + $0x34] ss:$24 sps:$4 sm:$0xff]  }
 0x327   : > { %v2124_v23 = vadd.f32 %v2122_v33, %v1363_v31  ;;  %v6501_v36 = vpop.eup %6500  ;;  %v2128_v13 = vsub.f32 1.0, %v6499_v43  ;;  %v2132_v41 = vmul.f32 %v6499_v43, %v8285_v19  ;;  %v8814_v31 = vld [vmem:[#allocation8 + $0x30] ss:$24 sps:$4 sm:$0xff]   ;;  %v8820_v33 = vld [vmem:[#allocation8 + $0x60] ss:$24 sps:$4 sm:$0xff]  }
 0x328   : > { %v2125_v46 = vadd.f32 %v2123_v8, %v1365_v29  ;;  %v2129_v27 = vsub.f32 1.0, %v6501_v36  ;;  %v2133_v28 = vmul.f32 %v6501_v36, %v8177_v54  ;;  %v2406_v29 = vstv %s2405_s29  ;;  %v8823_v8 = vld [vmem:[#allocation8 + $0x94] ss:$24 sps:$4 sm:$0xff]   ;;  %s10724_s29 = sld [smem:[#allocation4 + %s4082_s13]] }
 0x329   : > { %6502 = vtanh.f32 %v2124_v23  ;;  %vm8826_vm9 = vcmp.eq.s32.totalorder %v2406_v29, 1  ;;  %v8845_v29 = vld [vmem:[#allocation8 + $0xc0] ss:$24 sps:$4 sm:$0xff]   ;;  %v9010_v43 = vld [vmem:[#allocation8 + $0x134] ss:$24 sps:$4 sm:$0xff]  }
 0x32a   : > { %6504 = vtanh.f32 %v2125_v46 }
 0x333   : > { %v6503_v7 = vpop.eup %6502 }
 0x334   : > { %v6505_v24 = vpop.eup %6504  ;;  %v2130_v21 = vmul.f32 %v6503_v7, %v2128_v13  ;;  %v8830_v13 = vld [vmem:[#allocation8 + $0x90] ss:$24 sps:$4 sm:$0xff]  }
 0x335   : > { %v2131_v26 = vmul.f32 %v6505_v24, %v2129_v27  ;;  %v8833_v24 = vld [vmem:[#allocation8 + $0xc4] ss:$24 sps:$4 sm:$0xff]  }
 0x336   : > { %v8803_v34 = vadd.f32 %v2132_v41, %v2130_v21  ;;  %v8817_v21 = vld [vmem:[#allocation8 + $0x64] ss:$24 sps:$4 sm:$0xff]  }
 0x337   : > { %v2135_v57 = vadd.f32 %v2133_v28, %v2131_v26 }
 0x338   : > { %v2136_v46 = vpack.c.bf16 %v8803_v34, %v8803_v34 }
 0x339   : > { %v2137_v38 = vpack.c.bf16 %v2135_v57, %v2135_v57  ;;  %v8841_v28 = vsel %vm8826_vm9, %v2135_v57, %v8177_v54  ;;  %v8858_v54 = vld [vmem:[#allocation10 + $0x8] ss:$24 sps:$4 sm:$0xff]  }
 0x33a   : > { %v8862_v57 = vld [vmem:[#allocation8 + $0xf0] ss:$24 sps:$4 sm:$0xff]  }
 0x33b   : > { %2373 = vmatprep.mubr.bf16.mxu1 %v2137_v38  ;;  %13554 = vst [vmem:[#allocation177_spill] sm:$0xff] %v8862_v57 }
 0x33c   : > { %2374 = vmatmul.mubr.bf16.vlgmr.msra.gmra.mrb[8].mxu1 %v2136_v46 }
 0x33d   : > { %2467 = vmatpush1.bf16.msra.mxu1 %v8807_v45 }
 0x33e   : > { %2468 = vmatprep.subr.bf16.mxu1 %v8811_v37 }
 0x341   : > { %2469 = vmatpush1.bf16.msra.mxu1 %v8814_v31 }
 0x342   : > { %2470 = vmatprep.subr.bf16.mxu1 %v8817_v21 }
 0x345   : > { %2471 = vmatpush1.bf16.msra.mxu1 %v8820_v33 }
 0x346   : > { %2472 = vmatprep.subr.bf16.mxu1 %v8823_v8 }
 0x348   : > { %v2455_v23 = vpop.f32.mrb[12].mxu0 }
 0x349   : > { %v2462_v36 = vmax.f32 %v2455_v23, 0.0  ;;  %2473 = vmatpush1.bf16.msra.mxu1 %v8830_v13  ;;  %v2457_v7 = vpop.f32.mrb[13].mxu0  ;;  %v8849_v23 = vld [vmem:[#allocation8 + $0xf4] ss:$24 sps:$4 sm:$0xff]  }
 0x34a   : > { %v2463_v27 = vmax.f32 %v2457_v7, 0.0  ;;  %2474 = vmatprep.subr.bf16.mxu1 %v8833_v24  ;;  %v2459_v41 = vpop.f32.mrb[14].mxu0  ;;  %v8865_v7 = vld [vmem:[#allocation10 + $0x3c] ss:$24 sps:$4 sm:$0xff]  }
 0x34b   : > { %v8836_v26 = vpack.c.bf16 %v2462_v36, %v2462_v36  ;;  %v2460_v38 = vpop.f32.mrb[15].mxu0  ;;  %v8854_v36 = vpack.c.bf16 %v8841_v28, %v8841_v28  ;;  %v8872_v41 = vld [vmem:[#allocation8 + $0x120] ss:$24 sps:$4 sm:$0xff]  }
 0x34c   : > { %v8843_v46 = vpack.c.bf16 %v2463_v27, %v2463_v27  ;;  %v8868_v27 = vld [vmem:[#allocation8 + $0x124] ss:$24 sps:$4 sm:$0xff]   ;;  %v8876_v38 = vld [vmem:[#allocation8 + $0x154] ss:$24 sps:$4 sm:$0xff]  }
 0x34d   : > { %2475 = vmatpush1.bf16.msra.mxu1 %v8845_v29  ;;  %13555 = vst [vmem:[#allocation178_spill] sm:$0xff] %v8868_v27 }
 0x34e   : > { %2539 = vmatprep.mubr.bf16.mxu0 %v8843_v46  ;;  %2476 = vmatprep.subr.bf16.mxu1 %v8849_v23 }
 0x34f   : > { %2540 = vmatmul.mubr.bf16.vlgmr.msra.gmra.mrb[16].mxu0 %v8836_v26  ;;  %2498 = vmatprep.mubr.bf16.mxu1 %v8843_v46 }
 0x350   : > { %2633 = vmatpush1.bf16.msra.mxu0 %v8858_v54  ;;  %2664 = vmatprep.mubr.bf16.mxu0 %v8854_v36 }
 0x351   : > { %2477 = vmatpush1.bf16.msra.mxu1 %v8862_v57  ;;  %2634 = vmatprep.subr.bf16.mxu0 %v8865_v7  ;;  %v8880_v57 = vld [vmem:[#allocation8 + $0x150] ss:$24 sps:$4 sm:$0xff]  }
 0x352   : > { %2478 = vmatprep.subr.bf16.mxu1 %v8868_v27  ;;  %v8884_v27 = vld [vmem:[#allocation8 + $0x184] ss:$24 sps:$4 sm:$0xff]  }
 0x354   : > { %2635 = vmatpush1.bf16.msra.mxu0 %v8187_v0  ;;  %v8888_v0 = vld [vmem:[#allocation8 + $0x180] ss:$24 sps:$4 sm:$0xff]  }
 0x355   : > { %2479 = vmatpush1.bf16.msra.mxu1 %v8872_v41  ;;  %2636 = vmatprep.subr.bf16.mxu0 %v8189_v2  ;;  %v8892_v2 = vld [vmem:[#allocation8 + $0x1b4] ss:$24 sps:$4 sm:$0xff]  }
 0x356   : > { %2480 = vmatprep.subr.bf16.mxu1 %v8876_v38 }
 0x358   : > { %2637 = vmatpush1.bf16.msra.mxu0 %v8193_v4  ;;  %v8896_v4 = vld [vmem:[#allocation8 + $0x1b0] ss:$24 sps:$4 sm:$0xff]  }
 0x359   : > { %2481 = vmatpush1.bf16.msra.mxu1 %v8880_v57  ;;  %2638 = vmatprep.subr.bf16.mxu0 %v8196_v6  ;;  %v8900_v6 = vld [vmem:[#allocation8 + $0x1e4] ss:$24 sps:$4 sm:$0xff]  }
 0x35a   : > { %2482 = vmatprep.subr.bf16.mxu1 %v8884_v27 }
 0x35c   : > { %2639 = vmatpush1.bf16.msra.mxu0 %v8199_v9  ;;  %v8904_v9 = vld [vmem:[#allocation8 + $0x1e0] ss:$24 sps:$4 sm:$0xff]  }
 0x35d   : > { %2483 = vmatpush1.bf16.msra.mxu1 %v8888_v0  ;;  %2640 = vmatprep.subr.bf16.mxu0 %v8202_v12  ;;  %v8908_v12 = vld [vmem:[#allocation8 + $0x214] ss:$24 sps:$4 sm:$0xff]  }
 0x35e   : > { %2484 = vmatprep.subr.bf16.mxu1 %v8892_v2 }
 0x360   : > { %2641 = vmatpush1.bf16.msra.mxu0 %v8205_v15  ;;  %v8912_v15 = vld [vmem:[#allocation8 + $0x210] ss:$24 sps:$4 sm:$0xff]  }
 0x361   : > { %2485 = vmatpush1.bf16.msra.mxu1 %v8896_v4  ;;  %2642 = vmatprep.subr.bf16.mxu0 %v8208_v17  ;;  %v8916_v17 = vld [vmem:[#allocation8 + $0x244] ss:$24 sps:$4 sm:$0xff]  }
 0x362   : > { %2486 = vmatprep.subr.bf16.mxu1 %v8900_v6 }
 0x364   : > { %2643 = vmatpush1.bf16.msra.mxu0 %v8211_v20  ;;  %v8920_v20 = vld [vmem:[#allocation8 + $0x240] ss:$24 sps:$4 sm:$0xff]  }
 0x365   : > { %2487 = vmatpush1.bf16.msra.mxu1 %v8904_v9  ;;  %2644 = vmatprep.subr.bf16.mxu0 %v8214_v42  ;;  %v8924_v42 = vld [vmem:[#allocation8 + $0x274] ss:$24 sps:$4 sm:$0xff]  }
 0x366   : > { %2488 = vmatprep.subr.bf16.mxu1 %v8908_v12 }
 0x368   : > { %2645 = vmatpush1.bf16.msra.mxu0 %v8217_v49  ;;  %v8928_v49 = vld [vmem:[#allocation8 + $0x270] ss:$24 sps:$4 sm:$0xff]  }
 0x369   : > { %2489 = vmatpush1.bf16.msra.mxu1 %v8912_v15  ;;  %2646 = vmatprep.subr.bf16.mxu0 %v8220_v51  ;;  %v8932_v51 = vld [vmem:[#allocation8 + $0x2a4] ss:$24 sps:$4 sm:$0xff]  }
 0x36a   : > { %2490 = vmatprep.subr.bf16.mxu1 %v8916_v17 }
 0x36c   : > { %2647 = vmatpush1.bf16.msra.mxu0 %v8223_v53  ;;  %v8936_v53 = vld [vmem:[#allocation8 + $0x2a0] ss:$24 sps:$4 sm:$0xff]  }
 0x36d   : > { %2491 = vmatpush1.bf16.msra.mxu1 %v8920_v20  ;;  %2648 = vmatprep.subr.bf16.mxu0 %v8226_v56  ;;  %v8940_v56 = vld [vmem:[#allocation8 + $0x2d4] ss:$24 sps:$4 sm:$0xff]  }
 0x36e   : > { %2492 = vmatprep.subr.bf16.mxu1 %v8924_v42 }
 0x370   : > { %2649 = vmatpush1.bf16.msra.mxu0 %v8229_v58  ;;  %v8944_v58 = vld [vmem:[#allocation8 + $0x2d0] ss:$24 sps:$4 sm:$0xff]  }
 0x371   : > { %2493 = vmatpush1.bf16.msra.mxu1 %v8928_v49  ;;  %2650 = vmatprep.subr.bf16.mxu0 %v8232_v61  ;;  %v8948_v61 = vld [vmem:[#allocation8 + $0x14] ss:$24 sps:$4 sm:$0xff]  }
 0x372   : > { %2494 = vmatprep.subr.bf16.mxu1 %v8932_v51 }
 0x374   : > { %2651 = vmatpush1.bf16.msra.mxu0 %v8235_v1  ;;  %v8953_v1 = vld [vmem:[#allocation8 + $0x10] ss:$24 sps:$4 sm:$0xff]  }
 0x375   : > { %2495 = vmatpush1.bf16.msra.mxu1 %v8936_v53  ;;  %2652 = vmatprep.subr.bf16.mxu0 %v8238_v5  ;;  %v8958_v5 = vld [vmem:[#allocation8 + $0x44] ss:$24 sps:$4 sm:$0xff]  }
 0x376   : > { %2496 = vmatprep.subr.bf16.mxu1 %v8940_v56  ;;  %13556 = vst [vmem:[#allocation179_spill] sm:$0xff] %v8958_v5 }
 0x378   : > { %2653 = vmatpush1.bf16.msra.mxu0 %v8241_v11  ;;  %v8962_v11 = vld [vmem:[#allocation8 + $0x40] ss:$24 sps:$4 sm:$0xff]  }
 0x379   : > { %2497 = vmatpush1.bf16.msra.mxu1 %v8944_v58  ;;  %2654 = vmatprep.subr.bf16.mxu0 %v8244_v16  ;;  %13557 = vst [vmem:[#allocation180_spill] sm:$0xff] %v8962_v11  ;;  %v8966_v16 = vld [vmem:[#allocation8 + $0x74] ss:$24 sps:$4 sm:$0xff]  }
 0x37a   : > { %2548 = vmatprep.subr.bf16.mxu1 %v8948_v61  ;;  %13558 = vst [vmem:[#allocation181_spill] sm:$0xff] %v8966_v16 }
 0x37c   : > { %2499 = vmatmul.mubr.bf16.vlgmr.msra.gmra.mrb[12].mxu1 %v8836_v26  ;;  %2655 = vmatpush1.bf16.msra.mxu0 %v8247_v40  ;;  %v13559_v40 = vld [vmem:[#allocation30_spill] sm:$0xff] }
 0x37d   : > { %2549 = vmatpush1.bf16.msra.mxu1 %v8953_v1  ;;  %2580 = vmatprep.mubr.bf16.mxu1 %v8843_v46  ;;  %v8970_v46 = vld [vmem:[#allocation8 + $0x70] ss:$24 sps:$4 sm:$0xff]  }
 0x37e   : > { %2656 = vmatprep.subr.bf16.mxu0 %v8250_v50  ;;  %2550 = vmatprep.subr.bf16.mxu1 %v8958_v5  ;;  %13560 = vst [vmem:[#allocation30_spill] sm:$0xff] %v8970_v46  ;;  %v13561_v50 = vld [vmem:[#allocation32_spill] sm:$0xff]  ;;  %v8974_v5 = vld [vmem:[#allocation8 + $0xa4] ss:$24 sps:$4 sm:$0xff]  }
 0x37f   : > { %13562 = vst [vmem:[#allocation32_spill] sm:$0xff] %v8974_v5 }
 0x380   : > { %2657 = vmatpush1.bf16.msra.mxu0 %v8253_v55  ;;  %v13563_v55 = vld [vmem:[#allocation34_spill] sm:$0xff] }
 0x381   : > { %2551 = vmatpush1.bf16.msra.mxu1 %v8962_v11  ;;  %2658 = vmatprep.subr.bf16.mxu0 %v8256_v60  ;;  %v8978_v11 = vld [vmem:[#allocation8 + $0xa0] ss:$24 sps:$4 sm:$0xff]  }
 0x382   : > { %2552 = vmatprep.subr.bf16.mxu1 %v8966_v16  ;;  %13564 = vst [vmem:[#allocation34_spill] sm:$0xff] %v8978_v11  ;;  %v13565_v60 = vld [vmem:[#allocation36_spill] sm:$0xff] }
 0x383   : > { %v8982_v16 = vld [vmem:[#allocation8 + $0xd4] ss:$24 sps:$4 sm:$0xff]  }
 0x384   : > { %2659 = vmatpush1.bf16.msra.mxu0 %v13559_v40  ;;  %13566 = vst [vmem:[#allocation36_spill] sm:$0xff] %v8982_v16  ;;  %v8989_v40 = vsel %vm8826_vm9, %v8803_v34, %v8285_v19  ;;  %v9006_v19 = vld [vmem:[#allocation8 + $0x100] ss:$24 sps:$4 sm:$0xff]   ;;  %v13572_v34 = vld [vmem:[#allocation43_spill] sm:$0xff] }
 0x385   : > { %2553 = vmatpush1.bf16.msra.mxu1 %v8970_v46  ;;  %2660 = vmatprep.subr.bf16.mxu0 %v13561_v50  ;;  %v13567_v50 = vld [vmem:[#allocation38_spill] sm:$0xff]  ;;  %13571 = vst [vmem:[#allocation182_spill] sm:$0xff] %v9006_v19  ;;  %13573 = vst [vmem:[#allocation43_spill] sm:$0xff] %v9010_v43  ;;  %v13610_v46 = vld [vmem:[#allocation81_spill] sm:$0xff] }
 0x386   : > { %2554 = vmatprep.subr.bf16.mxu1 %v8974_v5  ;;  %v8992_v5 = vld [vmem:[#allocation8 + $0xd0] ss:$24 sps:$4 sm:$0xff]  }
 0x387   : > { %13568 = vst [vmem:[#allocation38_spill] sm:$0xff] %v8992_v5 }
 0x388   : > { %2661 = vmatpush1.bf16.msra.mxu0 %v13563_v55  ;;  %v8997_v55 = vpack.c.bf16 %v8989_v40, %v8989_v40 }
 0x389   : > { %2555 = vmatpush1.bf16.msra.mxu1 %v8978_v11  ;;  %2662 = vmatprep.subr.bf16.mxu0 %v13565_v60  ;;  %v13569_v60 = vld [vmem:[#allocation40_spill] sm:$0xff]  ;;  %v9000_v11 = vld [vmem:[#allocation8 + $0x104] ss:$24 sps:$4 sm:$0xff]  }
 0x38a   : > { %2556 = vmatprep.subr.bf16.mxu1 %v8982_v16  ;;  %13570 = vst [vmem:[#allocation40_spill] sm:$0xff] %v9000_v11  ;;  %v13607_v16 = vld [vmem:[#allocation33_spill] sm:$0xff] }
 0x38c   : > { %2663 = vmatpush1.bf16.msra.mxu0 %v13567_v50  ;;  %v13574_v50 = vld [vmem:[#allocation45_spill] sm:$0xff] }
 0x38d   : > { %2557 = vmatpush1.bf16.msra.mxu1 %v8992_v5  ;;  %2673 = vmatprep.subr.bf16.mxu0 %v13569_v60  ;;  %v9014_v60 = vld [vmem:[#allocation8 + $0x130] ss:$24 sps:$4 sm:$0xff]   ;;  %v13578_v5 = vld [vmem:[#allocation49_spill] sm:$0xff] }
 0x38e   : > { %2558 = vmatprep.subr.bf16.mxu1 %v9000_v11  ;;  %13575 = vst [vmem:[#allocation45_spill] sm:$0xff] %v9014_v60  ;;  %v13576_v11 = vld [vmem:[#allocation47_spill] sm:$0xff] }
 0x38f   : > { %2665 = vmatmul.mubr.bf16.vlgmr.msra.gmra.mrb[16].mxu0 %v8997_v55 }
 0x390   : > { %2674 = vmatpush1.bf16.msra.mxu0 %v8307_v52  ;;  %2705 = vmatprep.mubr.bf16.mxu0 %v8854_v36  ;;  %v9018_v52 = vld [vmem:[#allocation8 + $0x164] ss:$24 sps:$4 sm:$0xff]  }
 0x391   : > { %2559 = vmatpush1.bf16.msra.mxu1 %v9006_v19  ;;  %2675 = vmatprep.subr.bf16.mxu0 %v13572_v34  ;;  %13577 = vst [vmem:[#allocation47_spill] sm:$0xff] %v9018_v52  ;;  %v9022_v19 = vld [vmem:[#allocation8 + $0x160] ss:$24 sps:$4 sm:$0xff]   ;;  %v13580_v34 = vld [vmem:[#allocation51_spill] sm:$0xff] }
 0x392   : > { %2560 = vmatprep.subr.bf16.mxu1 %v9010_v43  ;;  %13579 = vst [vmem:[#allocation49_spill] sm:$0xff] %v9022_v19  ;;  %v9026_v43 = vld [vmem:[#allocation8 + $0x194] ss:$24 sps:$4 sm:$0xff]  }
 0x393   : > { %13581 = vst [vmem:[#allocation51_spill] sm:$0xff] %v9026_v43 }
 0x394   : > { %2676 = vmatpush1.bf16.msra.mxu0 %v13574_v50  ;;  %v13582_v50 = vld [vmem:[#allocation53_spill] sm:$0xff] }
 0x395   : > { %2561 = vmatpush1.bf16.msra.mxu1 %v9014_v60  ;;  %2677 = vmatprep.subr.bf16.mxu0 %v13576_v11  ;;  %v9030_v60 = vld [vmem:[#allocation8 + $0x190] ss:$24 sps:$4 sm:$0xff]  }
 0x396   : > { %2562 = vmatprep.subr.bf16.mxu1 %v9018_v52  ;;  %13583 = vst [vmem:[#allocation53_spill] sm:$0xff] %v9030_v60  ;;  %v13584_v11 = vld [vmem:[#allocation55_spill] sm:$0xff]  ;;  %v9034_v52 = vld [vmem:[#allocation8 + $0x1c4] ss:$24 sps:$4 sm:$0xff]  }
 0x397   : > { %13585 = vst [vmem:[#allocation55_spill] sm:$0xff] %v9034_v52 }
 0x398   : > { %2678 = vmatpush1.bf16.msra.mxu0 %v13578_v5  ;;  %v13586_v5 = vld [vmem:[#allocation57_spill] sm:$0xff] }
 0x399   : > { %2563 = vmatpush1.bf16.msra.mxu1 %v9022_v19  ;;  %2679 = vmatprep.subr.bf16.mxu0 %v13580_v34  ;;  %v9038_v19 = vld [vmem:[#allocation8 + $0x1c0] ss:$24 sps:$4 sm:$0xff]   ;;  %v13588_v34 = vld [vmem:[#allocation59_spill] sm:$0xff] }
 0x39a   : > { %2564 = vmatprep.subr.bf16.mxu1 %v9026_v43  ;;  %13587 = vst [vmem:[#allocation57_spill] sm:$0xff] %v9038_v19  ;;  %v9042_v43 = vld [vmem:[#allocation8 + $0x1f4] ss:$24 sps:$4 sm:$0xff]  }
 0x39b   : > { %13589 = vst [vmem:[#allocation59_spill] sm:$0xff] %v9042_v43 }
 0x39c   : > { %2680 = vmatpush1.bf16.msra.mxu0 %v13582_v50  ;;  %v13590_v50 = vld [vmem:[#allocation61_spill] sm:$0xff] }
 0x39d   : > { %2565 = vmatpush1.bf16.msra.mxu1 %v9030_v60  ;;  %2681 = vmatprep.subr.bf16.mxu0 %v13584_v11  ;;  %v9046_v60 = vld [vmem:[#allocation8 + $0x1f0] ss:$24 sps:$4 sm:$0xff]  }
 0x39e   : > { %2566 = vmatprep.subr.bf16.mxu1 %v9034_v52  ;;  %13591 = vst [vmem:[#allocation61_spill] sm:$0xff] %v9046_v60  ;;  %v13592_v11 = vld [vmem:[#allocation63_spill] sm:$0xff]  ;;  %v9050_v52 = vld [vmem:[#allocation8 + $0x224] ss:$24 sps:$4 sm:$0xff]  }
 0x39f   : > { %13593 = vst [vmem:[#allocation63_spill] sm:$0xff] %v9050_v52 }
 0x3a0   : > { %2682 = vmatpush1.bf16.msra.mxu0 %v13586_v5  ;;  %v13594_v5 = vld [vmem:[#allocation65_spill] sm:$0xff] }
 0x3a1   : > { %2567 = vmatpush1.bf16.msra.mxu1 %v9038_v19  ;;  %2683 = vmatprep.subr.bf16.mxu0 %v13588_v34  ;;  %v9054_v19 = vld [vmem:[#allocation8 + $0x220] ss:$24 sps:$4 sm:$0xff]   ;;  %v13596_v34 = vld [vmem:[#allocation67_spill] sm:$0xff] }
 0x3a2   : > { %2568 = vmatprep.subr.bf16.mxu1 %v9042_v43  ;;  %13595 = vst [vmem:[#allocation65_spill] sm:$0xff] %v9054_v19  ;;  %v9058_v43 = vld [vmem:[#allocation8 + $0x254] ss:$24 sps:$4 sm:$0xff]  }
 0x3a3   : > { %13597 = vst [vmem:[#allocation67_spill] sm:$0xff] %v9058_v43 }
 0x3a4   : > { %2684 = vmatpush1.bf16.msra.mxu0 %v13590_v50  ;;  %v13598_v50 = vld [vmem:[#allocation69_spill] sm:$0xff] }
 0x3a5   : > { %2569 = vmatpush1.bf16.msra.mxu1 %v9046_v60  ;;  %2685 = vmatprep.subr.bf16.mxu0 %v13592_v11  ;;  %v9062_v60 = vld [vmem:[#allocation8 + $0x250] ss:$24 sps:$4 sm:$0xff]  }
 0x3a6   : > { %2570 = vmatprep.subr.bf16.mxu1 %v9050_v52  ;;  %13599 = vst [vmem:[#allocation69_spill] sm:$0xff] %v9062_v60  ;;  %v13600_v11 = vld [vmem:[#allocation71_spill] sm:$0xff]  ;;  %v9066_v52 = vld [vmem:[#allocation8 + $0x284] ss:$24 sps:$4 sm:$0xff]  }
 0x3a7   : > { %13601 = vst [vmem:[#allocation71_spill] sm:$0xff] %v9066_v52 }
 0x3a8   : > { %2686 = vmatpush1.bf16.msra.mxu0 %v13594_v5  ;;  %v13602_v5 = vld [vmem:[#allocation73_spill] sm:$0xff] }
 0x3a9   : > { %2571 = vmatpush1.bf16.msra.mxu1 %v9054_v19  ;;  %2687 = vmatprep.subr.bf16.mxu0 %v13596_v34  ;;  %v13603_v34 = vld [vmem:[#allocation29_spill] sm:$0xff]  ;;  %v13604_v19 = vld [vmem:[#allocation75_spill] sm:$0xff] }
 0x3aa   : > { %2572 = vmatprep.subr.bf16.mxu1 %v9058_v43  ;;  %v13605_v43 = vld [vmem:[#allocation31_spill] sm:$0xff] }
 0x3ac   : > { %2688 = vmatpush1.bf16.msra.mxu0 %v13598_v50  ;;  %v13606_v50 = vld [vmem:[#allocation77_spill] sm:$0xff] }
 0x3ad   : > { %2573 = vmatpush1.bf16.msra.mxu1 %v9062_v60  ;;  %2689 = vmatprep.subr.bf16.mxu0 %v13600_v11  ;;  %v13608_v60 = vld [vmem:[#allocation79_spill] sm:$0xff] }
 0x3ae   : > { %2574 = vmatprep.subr.bf16.mxu1 %v9066_v52  ;;  %v13609_v11 = vld [vmem:[#allocation35_spill] sm:$0xff]  ;;  %v13611_v52 = vld [vmem:[#allocation37_spill] sm:$0xff] }
 0x3b0   : > { %2690 = vmatpush1.bf16.msra.mxu0 %v13602_v5  ;;  %v13612_v5 = vld [vmem:[#allocation83_spill] sm:$0xff] }
 0x3b1   : > { %2575 = vmatpush1.bf16.msra.mxu1 %v13603_v34  ;;  %2691 = vmatprep.subr.bf16.mxu0 %v13604_v19  ;;  %v13613_v34 = vld [vmem:[#allocation39_spill] sm:$0xff]  ;;  %v13614_v19 = vld [vmem:[#allocation85_spill] sm:$0xff] }
 0x3b2   : > { %2576 = vmatprep.subr.bf16.mxu1 %v13605_v43  ;;  %v13615_v43 = vld [vmem:[#allocation41_spill] sm:$0xff] }
 0x3b4   : > { %2692 = vmatpush1.bf16.msra.mxu0 %v13606_v50  ;;  %v13621_v50 = vld [vmem:[#allocation46_spill] sm:$0xff] }
 0x3b5   : > { %2577 = vmatpush1.bf16.msra.mxu1 %v13607_v16  ;;  %2693 = vmatprep.subr.bf16.mxu0 %v13608_v60  ;;  %v13616_v16 = vld [vmem:[#allocation87_spill] sm:$0xff]  ;;  %v13617_v60 = vld [vmem:[#allocation42_spill] sm:$0xff] }
 0x3b6   : > { %2578 = vmatprep.subr.bf16.mxu1 %v13609_v11  ;;  %v13622_v11 = vld [vmem:[#allocation93_spill] sm:$0xff] }
 0x3b8   : > { %2694 = vmatpush1.bf16.msra.mxu0 %v13610_v46  ;;  %v13618_v46 = vld [vmem:[#allocation89_spill] sm:$0xff] }
 0x3b9   : > { %2579 = vmatpush1.bf16.msra.mxu1 %v13611_v52  ;;  %2695 = vmatprep.subr.bf16.mxu0 %v13612_v5  ;;  %v13619_v52 = vld [vmem:[#allocation44_spill] sm:$0xff]  ;;  %v13624_v5 = vld [vmem:[#allocation50_spill] sm:$0xff] }
 0x3ba   : > { %2591 = vmatprep.subr.bf16.mxu1 %v13613_v34  ;;  %v2830_v34 = vstv %s9090_s3  ;;  %s4500_s3 = sadd.s32 6, %s8069_s22 }
 0x3bb   : > { %s11365_s27 = sld [smem:[#allocation4 + %s4500_s3]]  ;;  %p4912_p5 = scmp.lt.s32.totalorder %s4500_s3, 13 }
 0x3bc   : > { %2581 = vmatmul.mubr.bf16.vlgmr.msra.gmra.mrb[16].mxu1 %v8836_v26  ;;  %2696 = vmatpush1.bf16.msra.mxu0 %v13614_v19  ;;  %v13620_v26 = vld [vmem:[#allocation91_spill] sm:$0xff]  ;;  %v13625_v19 = vld [vmem:[#allocation52_spill] sm:$0xff] }
 0x3bd   : > { %2592 = vmatpush1.bf16.msra.mxu1 %v13615_v43  ;;  %2623 = vmatprep.mubr.bf16.mxu1 %v8854_v36  ;;  %v13623_v36 = vld [vmem:[#allocation48_spill] sm:$0xff]  ;;  %v13626_v43 = vld [vmem:[#allocation97_spill] sm:$0xff]  ;;  %s4913_s21 = scalar_select %p4912_p5, 1, 0 }
 0x3be   : > { %2697 = vmatprep.subr.bf16.mxu0 %v13616_v16  ;;  %2593 = vmatprep.subr.bf16.mxu1 %v13617_v60  ;;  %v13627_v16 = vld [vmem:[#allocation54_spill] sm:$0xff]  ;;  %v13628_v60 = vld [vmem:[#allocation27_spill] sm:$0xff] }
 0x3bf   : > { %vm2832_vm10 = vcmp.eq.s32.totalorder %v13628_v60, %v2830_v34 }
 0x3c0   : > { %2698 = vmatpush1.bf16.msra.mxu0 %v13618_v46  ;;  %v13629_v46 = vld [vmem:[#allocation99_spill] sm:$0xff]  ;;  %vm5845_vm11 = vmpackc.low %vm2832_vm10, %vm2832_vm10 }
 0x3c1   : > { %2594 = vmatpush1.bf16.msra.mxu1 %v13619_v52  ;;  %2699 = vmatprep.subr.bf16.mxu0 %v13620_v26  ;;  %v13630_v52 = vld [vmem:[#allocation56_spill] sm:$0xff] }
 0x3c2   : > { %2595 = vmatprep.subr.bf16.mxu1 %v13621_v50  ;;  %v13631_v26 = vld [vmem:[#allocation100_spill] sm:$0xff] }
 0x3c3   : > { %v13634_v50 = vld [vmem:[#allocation60_spill] sm:$0xff] }
 0x3c4   : > { %2700 = vmatpush1.bf16.msra.mxu0 %v13622_v11  ;;  %v13635_v11 = vld [vmem:[#allocation102_spill] sm:$0xff] }
 0x3c5   : > { %2596 = vmatpush1.bf16.msra.mxu1 %v13623_v36  ;;  %2701 = vmatprep.subr.bf16.mxu0 %v8478_v62  ;;  %v13632_v62 = vld [vmem:[#allocation58_spill] sm:$0xff] }
 0x3c6   : > { %2597 = vmatprep.subr.bf16.mxu1 %v13624_v5  ;;  %v13636_v36 = vld [vmem:[#allocation62_spill] sm:$0xff]  ;;  %v13637_v5 = vld [vmem:[#allocation103_spill] sm:$0xff] }
 0x3c8   : > { %2702 = vmatpush1.bf16.msra.mxu0 %v8484_v3  ;;  %v13633_v3 = vld [vmem:[#allocation101_spill] sm:$0xff] }
 0x3c9   : > { %2598 = vmatpush1.bf16.msra.mxu1 %v13625_v19  ;;  %2703 = vmatprep.subr.bf16.mxu0 %v13626_v43  ;;  %v13638_v19 = vld [vmem:[#allocation64_spill] sm:$0xff] }
 0x3ca   : > { %2599 = vmatprep.subr.bf16.mxu1 %v13627_v16  ;;  %v13639_v43 = vld [vmem:[#allocation104_spill] sm:$0xff]  ;;  %v13640_v16 = vld [vmem:[#allocation66_spill] sm:$0xff] }
 0x3cc   : > { %2704 = vmatpush1.bf16.msra.mxu0 %v13629_v46  ;;  %v13641_v46 = vld [vmem:[#allocation105_spill] sm:$0xff] }
 0x3cd   : > { %2600 = vmatpush1.bf16.msra.mxu1 %v13630_v52  ;;  %2839 = vmatprep.subr.bf16.mxu0 %v13631_v26  ;;  %v13642_v52 = vld [vmem:[#allocation68_spill] sm:$0xff]  ;;  %v13643_v26 = vld [vmem:[#allocation106_spill] sm:$0xff] }
 0x3ce   : > { %2601 = vmatprep.subr.bf16.mxu1 %v13632_v62  ;;  %v13644_v62 = vld [vmem:[#allocation70_spill] sm:$0xff] }
 0x3cf   : > { %2706 = vmatmul.mubr.bf16.vlgmr.msra.gmra.mrb[20].mxu0 %v8997_v55 }
 0x3d0   : > { %2840 = vmatpush1.bf16.msra.mxu0 %v13633_v3  ;;  %5846 = vmatprep.mubr.msk.bf16.mxu0 %vm5845_vm11, %v13475_v14  ;;  %v13645_v3 = vld [vmem:[#allocation107_spill] sm:$0xff] }
 0x3d1   : > { %2602 = vmatpush1.bf16.msra.mxu1 %v13634_v50  ;;  %2841 = vmatprep.subr.bf16.mxu0 %v13635_v11  ;;  %v13646_v50 = vld [vmem:[#allocation72_spill] sm:$0xff] }
 0x3d2   : > { %2603 = vmatprep.subr.bf16.mxu1 %v13636_v36  ;;  %v13647_v11 = vld [vmem:[#allocation108_spill] sm:$0xff]  ;;  %v13648_v36 = vld [vmem:[#allocation74_spill] sm:$0xff] }
 0x3d4   : > { %2842 = vmatpush1.bf16.msra.mxu0 %v13637_v5  ;;  %v13649_v5 = vld [vmem:[#allocation109_spill] sm:$0xff] }
 0x3d5   : > { %2604 = vmatpush1.bf16.msra.mxu1 %v13638_v19  ;;  %2843 = vmatprep.subr.bf16.mxu0 %v13639_v43  ;;  %v13650_v19 = vld [vmem:[#allocation76_spill] sm:$0xff]  ;;  %v13651_v43 = vld [vmem:[#allocation110_spill] sm:$0xff] }
 0x3d6   : > { %2605 = vmatprep.subr.bf16.mxu1 %v13640_v16  ;;  %v13652_v16 = vld [vmem:[#allocation78_spill] sm:$0xff] }
 0x3d8   : > { %2844 = vmatpush1.bf16.msra.mxu0 %v13641_v46  ;;  %v13653_v46 = vld [vmem:[#allocation111_spill] sm:$0xff] }
 0x3d9   : > { %2606 = vmatpush1.bf16.msra.mxu1 %v13642_v52  ;;  %2845 = vmatprep.subr.bf16.mxu0 %v13643_v26  ;;  %v13654_v52 = vld [vmem:[#allocation80_spill] sm:$0xff] }
 0x3da   : > { %2607 = vmatprep.subr.bf16.mxu1 %v13644_v62  ;;  %v13655_v26 = vld [vmem:[#allocation112_spill] sm:$0xff]  ;;  %v13656_v62 = vld [vmem:[#allocation82_spill] sm:$0xff] }
 0x3dc   : > { %2846 = vmatpush1.bf16.msra.mxu0 %v13645_v3  ;;  %v13657_v3 = vld [vmem:[#allocation113_spill] sm:$0xff] }
 0x3dd   : > { %2608 = vmatpush1.bf16.msra.mxu1 %v13646_v50  ;;  %2847 = vmatprep.subr.bf16.mxu0 %v13647_v11  ;;  %v13658_v50 = vld [vmem:[#allocation84_spill] sm:$0xff]  ;;  %v13659_v11 = vld [vmem:[#allocation114_spill] sm:$0xff] }
 0x3de   : > { %2609 = vmatprep.subr.bf16.mxu1 %v13648_v36  ;;  %v13660_v36 = vld [vmem:[#allocation86_spill] sm:$0xff] }
 0x3e0   : > { %2848 = vmatpush1.bf16.msra.mxu0 %v13649_v5  ;;  %v13661_v5 = vld [vmem:[#allocation115_spill] sm:$0xff] }
 0x3e1   : > { %2610 = vmatpush1.bf16.msra.mxu1 %v13650_v19  ;;  %2849 = vmatprep.subr.bf16.mxu0 %v13651_v43  ;;  %v13662_v19 = vld [vmem:[#allocation88_spill] sm:$0xff] }
 0x3e2   : > { %2611 = vmatprep.subr.bf16.mxu1 %v13652_v16  ;;  %v13663_v43 = vld [vmem:[#allocation116_spill] sm:$0xff]  ;;  %v13664_v16 = vld [vmem:[#allocation90_spill] sm:$0xff] }
 0x3e4   : > { %2850 = vmatpush1.bf16.msra.mxu0 %v13653_v46  ;;  %v13665_v46 = vld [vmem:[#allocation117_spill] sm:$0xff] }
 0x3e5   : > { %2612 = vmatpush1.bf16.msra.mxu1 %v13654_v52  ;;  %2851 = vmatprep.subr.bf16.mxu0 %v13655_v26  ;;  %v13666_v52 = vld [vmem:[#allocation92_spill] sm:$0xff]  ;;  %v13667_v26 = vld [vmem:[#allocation118_spill] sm:$0xff] }
 0x3e6   : > { %2613 = vmatprep.subr.bf16.mxu1 %v13656_v62  ;;  %v13668_v62 = vld [vmem:[#allocation94_spill] sm:$0xff] }
 0x3e8   : > { %2852 = vmatpush1.bf16.msra.mxu0 %v13657_v3  ;;  %v13669_v3 = vld [vmem:[#allocation119_spill] sm:$0xff] }
 0x3e9   : > { %2614 = vmatpush1.bf16.msra.mxu1 %v13658_v50  ;;  %2853 = vmatprep.subr.bf16.mxu0 %v13659_v11  ;;  %v13670_v50 = vld [vmem:[#allocation95_spill] sm:$0xff]  ;;  %v13671_v11 = vld [vmem:[#allocation120_spill] sm:$0xff] }
 0x3ea   : > { %2615 = vmatprep.subr.bf16.mxu1 %v13660_v36  ;;  %v13672_v36 = vld [vmem:[#allocation96_spill] sm:$0xff] }
 0x3ec   : > { %2854 = vmatpush1.bf16.msra.mxu0 %v13661_v5  ;;  %v13673_v5 = vld [vmem:[#allocation124_spill] sm:$0xff] }
 0x3ed   : > { %2616 = vmatpush1.bf16.msra.mxu1 %v13662_v19  ;;  %2855 = vmatprep.subr.bf16.mxu0 %v13663_v43  ;;  %v13674_v19 = vld [vmem:[#allocation98_spill] sm:$0xff]  ;;  %v13675_v43 = vld [vmem:[#allocation121_spill] sm:$0xff] }
 0x3ee   : > { %2617 = vmatprep.subr.bf16.mxu1 %v13664_v16  ;;  %v13676_v16 = vld [vmem:[#allocation127_spill] sm:$0xff] }
 0x3f0   : > { %2856 = vmatpush1.bf16.msra.mxu0 %v13665_v46  ;;  %v13677_v46 = vld [vmem:[#allocation129_spill] sm:$0xff] }
 0x3f1   : > { %2618 = vmatpush1.bf16.msra.mxu1 %v13666_v52  ;;  %2857 = vmatprep.subr.bf16.mxu0 %v13667_v26  ;;  %v13678_v52 = vld [vmem:[#allocation122_spill] sm:$0xff]  ;;  %v13679_v26 = vld [vmem:[#allocation123_spill] sm:$0xff] }
 0x3f2   : > { %2619 = vmatprep.subr.bf16.mxu1 %v13668_v62  ;;  %v13680_v62 = vld [vmem:[#allocation131_spill] sm:$0xff] }
 0x3f4   : > { %2858 = vmatpush1.bf16.msra.mxu0 %v13669_v3  ;;  %v13681_v3 = vld [vmem:[#allocation125_spill] sm:$0xff] }
 0x3f5   : > { %2620 = vmatpush1.bf16.msra.mxu1 %v13670_v50  ;;  %2859 = vmatprep.subr.bf16.mxu0 %v13671_v11  ;;  %v13683_v50 = vld [vmem:[#allocation132_spill] sm:$0xff] }
 0x3f6   : > { %2621 = vmatprep.subr.bf16.mxu1 %v13672_v36  ;;  %v13685_v11 = vld [vmem:[#allocation128_spill] sm:$0xff]  ;;  %v13686_v36 = vld [vmem:[#allocation130_spill] sm:$0xff] }
 0x3f8   : > { %2860 = vmatpush1.bf16.msra.mxu0 %v13673_v5  ;;  %v13687_v5 = vld [vmem:[#allocation134_spill] sm:$0xff] }
 0x3f9   : > { %2622 = vmatpush1.bf16.msra.mxu1 %v13674_v19  ;;  %2861 = vmatprep.subr.bf16.mxu0 %v8585_v63  ;;  %v13682_v63 = vld [vmem:[#allocation126_spill] sm:$0xff]  ;;  %v391_v19 = vld [vmem:[%s12646_s8] sm:$0x3] }
 0x3fa   : > { %2760 = vmatprep.subr.bf16.mxu1 %v13675_v43  ;;  %v13688_v43 = vld [vmem:[#allocation135_spill] sm:$0xff] }
 0x3fc   : > { %2624 = vmatmul.mubr.bf16.vlgmr.msra.gmra.mrb[12].mxu1 %v8997_v55  ;;  %2862 = vmatpush1.bf16.msra.mxu0 %v13676_v16  ;;  %v13684_v55 = vld [vmem:[#allocation133_spill] sm:$0xff]  ;;  %v9182_v16 = vrot.slane %v391_v19, %v8269_v18 }
 0x3fd   : > { %2863 = vmatprep.subr.bf16.mxu0 %v13677_v46  ;;  %2761 = vmatpush1.bf16.msra.mxu1 %v13678_v52  ;;  %v13691_v46 = vld [vmem:[#allocation136_spill] sm:$0xff]  ;;  %v9186_v52 = vrot.slane %v391_v19, %v8171_v47 }
 0x3fe   : > { %2762 = vmatprep.subr.bf16.mxu1 %v13679_v26  ;;  %13690 = vst [vmem:[#allocation73_spill] sm:$0xff] %v9182_v16  ;;  %v13693_v26 = vld [vmem:[#allocation137_spill] sm:$0xff]  ;;  %v13701_v19 = vld [vmem:[#allocation140_spill] sm:$0xff] }
 0x3ff   : > { %13692 = vst [vmem:[#allocation29_spill] sm:$0xff] %v9186_v52 }
 0x400   : > { %2864 = vmatpush1.bf16.msra.mxu0 %v13680_v62  ;;  %v13694_v62 = vld [vmem:[#allocation148_spill] sm:$0xff] }
 0x401   : > { %2865 = vmatprep.subr.bf16.mxu0 %v8607_v59  ;;  %2763 = vmatpush1.bf16.msra.mxu1 %v13681_v3  ;;  %v13689_v59 = vld [vmem:[#allocation26_spill] sm:$0xff] }
 0x402   : > { %2764 = vmatprep.subr.bf16.mxu1 %v13682_v63  ;;  %vm2831_vm12 = vcmp.eq.s32.totalorder %v13689_v59, %v2830_v34  ;;  %v13696_v34 = vld [vmem:[#allocation138_spill] sm:$0xff]  ;;  %v13698_v63 = vld [vmem:[#allocation139_spill] sm:$0xff] }
 0x403   : > { %vm5847_vm13 = vmpackc.low %vm2831_vm12, %vm2831_vm12 }
 0x404   : > { %2866 = vmatpush1.bf16.msra.mxu0 %v13683_v50  ;;  %v13699_v50 = vld [vmem:[#allocation149_spill] sm:$0xff] }
 0x405   : > { %2867 = vmatprep.subr.bf16.mxu0 %v13684_v55  ;;  %2765 = vmatpush1.bf16.msra.mxu1 %v13685_v11  ;;  %v13700_v11 = vld [vmem:[#allocation150_spill] sm:$0xff] }
 0x406   : > { %2766 = vmatprep.subr.bf16.mxu1 %v13686_v36 }
 0x408   : > { %2868 = vmatpush1.bf16.msra.mxu0 %v13687_v5 }
 0x409   : > { %2869 = vmatprep.subr.bf16.mxu0 %v13688_v43  ;;  %2767 = vmatpush1.bf16.msra.mxu1 %v8657_v44  ;;  %v13702_v43 = vld [vmem:[#allocation141_spill] sm:$0xff] }
 0x40a   : > { %2768 = vmatprep.subr.bf16.mxu1 %v8666_v48 }
 0x40c   : > { %2870 = vmatpush1.bf16.msra.mxu0 %v13691_v46  ;;  %v13703_v46 = vld [vmem:[#allocation151_spill] sm:$0xff] }
 0x40d   : > { %2925 = vmatprep.subr.bf16.mxu0 %v13693_v26  ;;  %2769 = vmatpush1.bf16.msra.mxu1 %v8668_v10  ;;  %v13704_v26 = vld [vmem:[#allocation152_spill] sm:$0xff] }
 0x40e   : > { %2770 = vmatprep.subr.bf16.mxu1 %v13694_v62  ;;  %v13705_v62 = vld [vmem:[#allocation142_spill] sm:$0xff] }
 0x40f   : > { %5848 = vmatmul.mubr.msk.bf16.vlgmr.msra.gmra.mrb[24].mxu0 %vm5847_vm13, %v13475_v14  ;;  %v2375_v44 = vpop.f32.mrb[8].mxu1 }
 0x410   : > { %v9193_v48 = vadd.f32 %v2375_v44, %v9182_v16  ;;  %v2377_v18 = vpop.f32.mrb[9].mxu1  ;;  %2926 = vmatpush1.bf16.msra.mxu0 %v13696_v34  ;;  %v13706_v44 = vld [vmem:[#allocation143_spill] sm:$0xff]  ;;  %v13708_v34 = vld [vmem:[#allocation154_spill] sm:$0xff] }
 0x411   : > { %v9197_v3 = vadd.f32 %v2377_v18, %v9186_v52  ;;  %v2379_v47 = vpop.f32.mrb[10].mxu1  ;;  %2927 = vmatprep.subr.bf16.mxu0 %v13698_v63  ;;  %2771 = vmatpush1.bf16.msra.mxu1 %v13699_v50  ;;  %v13707_v18 = vld [vmem:[#allocation153_spill] sm:$0xff]  ;;  %v13711_v50 = vld [vmem:[#allocation155_spill] sm:$0xff] }
 0x412   : > { %13695 = vst [vmem:[#allocation75_spill] sm:$0xff] %v9193_v48  ;;  %v2380_v10 = vpop.f32.mrb[11].mxu1  ;;  %v2383_v55 = vsel %vm2382_vm14, %v9193_v48, -inf  ;;  %2772 = vmatprep.subr.bf16.mxu1 %v13700_v11  ;;  %v13709_v47 = vld [vmem:[#allocation144_spill] sm:$0xff]  ;;  %v13710_v63 = vld [vmem:[#allocation145_spill] sm:$0xff]  ;;  %v13714_v11 = vld [vmem:[#allocation147_spill] sm:$0xff] }
 0x413   : > { %13697 = vst [vmem:[#allocation31_spill] sm:$0xff] %v9197_v3  ;;  %v2384_v36 = vsel %vm2382_vm14, %v9197_v3, -inf  ;;  %v13712_v10 = vld [vmem:[#allocation156_spill] sm:$0xff]  ;;  %v9273_v48 = vld [vmem:[#allocation8 + $0x24c] ss:$24 sps:$4 sm:$0xff]  }
 0x414   : > { %v2385_v5 = vmax.f32 %v2383_v55, %v2384_v36  ;;  %2928 = vmatpush1.bf16.msra.mxu0 %v13701_v19  ;;  %v13713_v55 = vld [vmem:[#allocation146_spill] sm:$0xff]  ;;  %v13715_v36 = vld [vmem:[#allocation157_spill] sm:$0xff]  ;;  %13742 = vst [vmem:[#allocation44_spill] sm:$0xff] %v9273_v48 }
 0x415   : > { %2929 = vmatprep.subr.bf16.mxu0 %v13702_v43  ;;  %2773 = vmatpush1.bf16.msra.mxu1 %v13703_v46  ;;  %v9222_v19 = vld [vmem:[#allocation8 + $0xf8] ss:$24 sps:$4 sm:$0xff]   ;;  %v9225_v43 = vld [vmem:[#allocation8 + $0x12c] ss:$24 sps:$4 sm:$0xff]  }
 0x416   : > { %2386 = vmax.xlane.f32.xlu1 %v2385_v5  ;;  %2774 = vmatprep.subr.bf16.mxu1 %v13704_v26  ;;  %v13716_v5 = vld [vmem:[#allocation158_spill] sm:$0xff]  ;;  %13717 = vst [vmem:[#allocation77_spill] sm:$0xff] %v9222_v19  ;;  %13718 = vst [vmem:[#allocation33_spill] sm:$0xff] %v9225_v43  ;;  %v13719_v46 = vld [vmem:[#allocation159_spill] sm:$0xff] }
 0x417   : > { %v13720_v26 = vld [vmem:[#allocation160_spill] sm:$0xff] }
 0x418   : > { %2930 = vmatpush1.bf16.msra.mxu0 %v13705_v62  ;;  %v9230_v62 = vld [vmem:[#allocation8 + $0x128] ss:$24 sps:$4 sm:$0xff]   ;;  %v9270_v3 = vld [vmem:[#allocation8 + $0x218] ss:$24 sps:$4 sm:$0xff]  }
 0x419   : > { %2931 = vmatprep.subr.bf16.mxu0 %v13706_v44  ;;  %2775 = vmatpush1.bf16.msra.mxu1 %v13707_v18  ;;  %13721 = vst [vmem:[#allocation79_spill] sm:$0xff] %v9230_v62  ;;  %v9233_v44 = vld [vmem:[#allocation8 + $0x15c] ss:$24 sps:$4 sm:$0xff]   ;;  %13741 = vst [vmem:[#allocation89_spill] sm:$0xff] %v9270_v3  ;;  %v9282_v52 = vld [vmem:[#allocation8 + $0x278] ss:$24 sps:$4 sm:$0xff]  }
 0x41a   : > { %2776 = vmatprep.subr.bf16.mxu1 %v13708_v34  ;;  %13722 = vst [vmem:[#allocation35_spill] sm:$0xff] %v9233_v44  ;;  %v13723_v18 = vld [vmem:[#allocation161_spill] sm:$0xff]  ;;  %v13724_v34 = vld [vmem:[#allocation162_spill] sm:$0xff]  ;;  %13745 = vst [vmem:[#allocation93_spill] sm:$0xff] %v9282_v52 }
 0x41c   : > { %2932 = vmatpush1.bf16.msra.mxu0 %v13709_v47  ;;  %v9238_v47 = vld [vmem:[#allocation8 + $0x158] ss:$24 sps:$4 sm:$0xff]  }
 0x41d   : > { %2933 = vmatprep.subr.bf16.mxu0 %v13710_v63  ;;  %2777 = vmatpush1.bf16.msra.mxu1 %v13711_v50  ;;  %13725 = vst [vmem:[#allocation81_spill] sm:$0xff] %v9238_v47  ;;  %v9241_v63 = vld [vmem:[#allocation8 + $0x18c] ss:$24 sps:$4 sm:$0xff]  }
 0x41e   : > { %2778 = vmatprep.subr.bf16.mxu1 %v13712_v10  ;;  %13726 = vst [vmem:[#allocation37_spill] sm:$0xff] %v9241_v63  ;;  %v13727_v50 = vld [vmem:[#allocation163_spill] sm:$0xff]  ;;  %v13728_v10 = vld [vmem:[#allocation164_spill] sm:$0xff] }
 0x420   : > { %2934 = vmatpush1.bf16.msra.mxu0 %v13713_v55  ;;  %v9246_v55 = vld [vmem:[#allocation8 + $0x188] ss:$24 sps:$4 sm:$0xff]  }
 0x421   : > { %2935 = vmatprep.subr.bf16.mxu0 %v13714_v11  ;;  %2779 = vmatpush1.bf16.msra.mxu1 %v13715_v36  ;;  %13729 = vst [vmem:[#allocation83_spill] sm:$0xff] %v9246_v55  ;;  %v9249_v11 = vld [vmem:[#allocation8 + $0x1bc] ss:$24 sps:$4 sm:$0xff]  }
 0x422   : > { %2780 = vmatprep.subr.bf16.mxu1 %v13716_v5  ;;  %13730 = vst [vmem:[#allocation39_spill] sm:$0xff] %v9249_v11  ;;  %v13731_v36 = vld [vmem:[#allocation165_spill] sm:$0xff]  ;;  %v13732_v5 = vld [vmem:[#allocation166_spill] sm:$0xff] }
 0x424   : > { %2936 = vmatpush1.bf16.msra.mxu0 %v9222_v19 }
 0x425   : > { %2937 = vmatprep.subr.bf16.mxu0 %v9225_v43  ;;  %2781 = vmatpush1.bf16.msra.mxu1 %v13719_v46  ;;  %v9254_v46 = vld [vmem:[#allocation8 + $0x1b8] ss:$24 sps:$4 sm:$0xff]  }
 0x426   : > { %2782 = vmatprep.subr.bf16.mxu1 %v13720_v26  ;;  %13733 = vst [vmem:[#allocation85_spill] sm:$0xff] %v9254_v46  ;;  %v9257_v26 = vld [vmem:[#allocation8 + $0x1ec] ss:$24 sps:$4 sm:$0xff]  }
 0x427   : > { %13734 = vst [vmem:[#allocation41_spill] sm:$0xff] %v9257_v26 }
 0x428   : > { %2938 = vmatpush1.bf16.msra.mxu0 %v9230_v62 }
 0x429   : > { %2939 = vmatprep.subr.bf16.mxu0 %v9233_v44  ;;  %2783 = vmatpush1.bf16.msra.mxu1 %v13723_v18  ;;  %v13735_v18 = vld [vmem:[#allocation167_spill] sm:$0xff] }
 0x42a   : > { %2784 = vmatprep.subr.bf16.mxu1 %v13724_v34  ;;  %v13736_v34 = vld [vmem:[#allocation168_spill] sm:$0xff] }
 0x42c   : > { %2940 = vmatpush1.bf16.msra.mxu0 %v9238_v47  ;;  %v13751_v47 = vld [vmem:[#allocation171_spill] sm:$0xff] }
 0x42d   : > { %2941 = vmatprep.subr.bf16.mxu0 %v9241_v63  ;;  %2785 = vmatpush1.bf16.msra.mxu1 %v13727_v50  ;;  %v9262_v50 = vld [vmem:[#allocation8 + $0x1e8] ss:$24 sps:$4 sm:$0xff]  }
 0x42e   : > { %2786 = vmatprep.subr.bf16.mxu1 %v13728_v10  ;;  %13737 = vst [vmem:[#allocation87_spill] sm:$0xff] %v9262_v50  ;;  %v9265_v10 = vld [vmem:[#allocation8 + $0x21c] ss:$24 sps:$4 sm:$0xff]  }
 0x42f   : > { %13738 = vst [vmem:[#allocation42_spill] sm:$0xff] %v9265_v10 }
 0x430   : > { %2942 = vmatpush1.bf16.msra.mxu0 %v9246_v55 }
 0x431   : > { %2943 = vmatprep.subr.bf16.mxu0 %v9249_v11  ;;  %2787 = vmatpush1.bf16.msra.mxu1 %v13731_v36  ;;  %v13739_v36 = vld [vmem:[#allocation169_spill] sm:$0xff] }
 0x432   : > { %2788 = vmatprep.subr.bf16.mxu1 %v13732_v5  ;;  %v13740_v5 = vld [vmem:[#allocation170_spill] sm:$0xff] }
 0x434   : > { %2944 = vmatpush1.bf16.msra.mxu0 %v9254_v46 }
 0x435   : > { %2945 = vmatprep.subr.bf16.mxu0 %v9257_v26  ;;  %2789 = vmatpush1.bf16.msra.mxu1 %v13735_v18  ;;  %v9276_v18 = vld [vmem:[#allocation8 + $0x248] ss:$24 sps:$4 sm:$0xff]  }
 0x436   : > { %2790 = vmatprep.subr.bf16.mxu1 %v13736_v34  ;;  %13743 = vst [vmem:[#allocation91_spill] sm:$0xff] %v9276_v18  ;;  %v9279_v34 = vld [vmem:[#allocation8 + $0x27c] ss:$24 sps:$4 sm:$0xff]  }
 0x437   : > { %13744 = vst [vmem:[#allocation46_spill] sm:$0xff] %v9279_v34 }
 0x438   : > { %2946 = vmatpush1.bf16.msra.mxu0 %v9262_v50 }
 0x439   : > { %2947 = vmatprep.subr.bf16.mxu0 %v9265_v10  ;;  %2791 = vmatpush1.bf16.msra.mxu1 %v13739_v36  ;;  %v9285_v36 = vld [vmem:[#allocation8 + $0x2ac] ss:$24 sps:$4 sm:$0xff]  }
 0x43a   : > { %2884 = vmatprep.subr.bf16.mxu1 %v13740_v5  ;;  %13746 = vst [vmem:[#allocation48_spill] sm:$0xff] %v9285_v36  ;;  %v9288_v5 = vld [vmem:[#allocation8 + $0x2a8] ss:$24 sps:$4 sm:$0xff]  }
 0x43b   : > { %13747 = vst [vmem:[#allocation50_spill] sm:$0xff] %v9288_v5 }
 0x43c   : > { %2948 = vmatpush1.bf16.msra.mxu0 %v9270_v3 }
 0x43d   : > { %2949 = vmatprep.subr.bf16.mxu0 %v9273_v48  ;;  %v9291_v48 = vld [vmem:[#allocation8 + $0x2dc] ss:$24 sps:$4 sm:$0xff]  }
 0x43e   : > { %13748 = vst [vmem:[#allocation52_spill] sm:$0xff] %v9291_v48 }
 0x440   : > { %2950 = vmatpush1.bf16.msra.mxu0 %v9276_v18  ;;  %v9294_v18 = vld [vmem:[#allocation8 + $0x2d8] ss:$24 sps:$4 sm:$0xff]  }
 0x441   : > { %2951 = vmatprep.subr.bf16.mxu0 %v9279_v34  ;;  %13749 = vst [vmem:[#allocation97_spill] sm:$0xff] %v9294_v18  ;;  %v9297_v34 = vld [vmem:[#allocation10 + $0xc] ss:$24 sps:$4 sm:$0xff]  }
 0x442   : > { %13750 = vst [vmem:[#allocation54_spill] sm:$0xff] %v9297_v34 }
 0x444   : > { %2952 = vmatpush1.bf16.msra.mxu0 %v9282_v52 }
 0x445   : > { %2953 = vmatprep.subr.bf16.mxu0 %v9285_v36 }
 0x448   : > { %2954 = vmatpush1.bf16.msra.mxu0 %v9288_v5 }
 0x449   : > { %2955 = vmatprep.subr.bf16.mxu0 %v9291_v48 }
 0x44c   : > { %2956 = vmatpush1.bf16.msra.mxu0 %v9294_v18 }
 0x44d   : > { %3050 = vmatprep.subr.bf16.mxu0 %v9297_v34 }
 0x462   : > { %v2666_v52 = vpop.f32.mrb[16].mxu0 }
 0x463   : > { %v2668_v16 = vpop.f32.mrb[17].mxu0 }
 0x464   : > { %v2670_v3 = vpop.f32.mrb[18].mxu0  ;;  %v5919_v59 = vadd.f32 %v2668_v16, %v8776_v32 }
 0x465   : > { %v2671_v36 = vpop.f32.mrb[19].mxu0  ;;  %v5918_v3 = vadd.f32 %v2666_v52, %v8774_v30 }
 0x48f   : > { %v2582_v10 = vpop.f32.mrb[16].mxu1 }
 0x490   : > { %v2584_v50 = vpop.f32.mrb[17].mxu1 }
 0x491   : > { %v2586_v26 = vpop.f32.mrb[18].mxu1 }
 0x492   : > { %v2587_v5 = vpop.f32.mrb[19].mxu1  ;;  %v5841_v26 = vmul.f32 -1.442695, %v5918_v3 }
 0x493   : > { %v5842_v5 = vmul.f32 -1.442695, %v5919_v59 }
 0x4a2   : > { %v2707_v46 = vpop.f32.mrb[20].mxu0 }
 0x4a3   : > { %v2709_v11 = vpop.f32.mrb[21].mxu0 }
 0x4a4   : > { %v2711_v55 = vpop.f32.mrb[22].mxu0 }
 0x4a5   : > { %v2712_v48 = vpop.f32.mrb[23].mxu0 }
 0x4cf   : > { %v2625_v63 = vpop.f32.mrb[12].mxu1 }
 0x4d0   : > { %v5916_v44 = vadd.f32 %v2625_v63, %v13751_v47  ;;  %v2627_v18 = vpop.f32.mrb[13].mxu1 }
 0x4d1   : > { %v5917_v62 = vadd.f32 %v2627_v18, %v8772_v39  ;;  %v2629_v43 = vpop.f32.mrb[14].mxu1 }
 0x4d2   : > { %v5839_v34 = vmul.f32 -1.442695, %v5916_v44  ;;  %v2630_v19 = vpop.f32.mrb[15].mxu1 }
 0x4d3   : > { %v5840_v36 = vmul.f32 -1.442695, %v5917_v62 }
 0x4d4   : > { %6506 = vpow2.f32 %v5839_v34 }
 0x4d5   : > { %6508 = vpow2.f32 %v5840_v36 }
 0x4d6   : > { %6510 = vpow2.f32 %v5841_v26 }
 0x4d7   : > { %6512 = vpow2.f32 %v5842_v5  ;;  %v13752_v5 = vld [vmem:[#allocation174_spill] sm:$0xff] }
 0x4de   : > { %v6507_v48 = vpop.eup %6506 }
 0x4df   : > { %v6509_v55 = vpop.eup %6508  ;;  %v2722_v63 = vadd.f32 1.0, %v6507_v48  ;;  %v2743_v48 = vadd.f32 %v2709_v11, %v13752_v5  ;;  %v9331_v11 = vld [vmem:[#allocation10 + $0x9c] ss:$24 sps:$4 sm:$0xff]  }
 0x4e0   : > { %v2723_v47 = vadd.f32 1.0, %v6509_v55  ;;  %v6511_v62 = vpop.eup %6510 }
 0x4e1   : > { %6514 = vrcp.f32 %v2722_v63  ;;  %v6513_v34 = vpop.eup %6512  ;;  %v2736_v59 = vadd.f32 1.0, %v6511_v62  ;;  %v2583_v63 = vadd.f32 %v2582_v10, %v8793_v25  ;;  %v9336_v10 = vld [vmem:[#allocation10 + $0x98] ss:$24 sps:$4 sm:$0xff]   ;;  %v9353_v25 = vld [vmem:[#allocation10 + $0x12c] ss:$24 sps:$4 sm:$0xff]  }
 0x4e2   : > { %6516 = vrcp.f32 %v2723_v47  ;;  %v2873_v43 = vpop.f32.mrb[24].mxu0  ;;  %v2737_v36 = vadd.f32 1.0, %v6513_v34  ;;  %v2742_v47 = vadd.f32 %v2707_v46, %v8786_v22  ;;  %v9319_v46 = vld [vmem:[#allocation10 + $0x6c] ss:$24 sps:$4 sm:$0xff]  }
 0x4e3   : > { %v2880_v44 = vmax.f32 %v2873_v43, 0.0  ;;  %v2875_v19 = vpop.f32.mrb[25].mxu0  ;;  %6518 = vrcp.f32 %v2736_v59  ;;  %v2824_v59 = vstv %s2823_s18  ;;  %s11923_s18 = sld [smem:[#allocation4 + %s4918_s28]] }
 0x4e4   : > { %v2881_v18 = vmax.f32 %v2875_v19, 0.0  ;;  %v2877_v52 = vpop.f32.mrb[26].mxu0  ;;  %6520 = vrcp.f32 %v2737_v36  ;;  %vm2825_vm15 = vcmp.eq.s32.totalorder %v2824_v59, 1  ;;  %v9366_v59 = vld [vmem:[#allocation10 + $0x128] ss:$24 sps:$4 sm:$0xff]  }
 0x4e5   : > { %v9304_v30 = vpack.c.bf16 %v2880_v44, %v2880_v44  ;;  %v2878_v16 = vpop.f32.mrb[27].mxu0  ;;  %v2585_v44 = vadd.f32 %v2584_v50, %v8796_v35  ;;  %v9316_v52 = vld [vmem:[#allocation10 + $0x38] ss:$24 sps:$4 sm:$0xff]  }
 0x4e6   : > { %v9306_v3 = vpack.c.bf16 %v2881_v18, %v2881_v18  ;;  %v9339_v16 = vld [vmem:[#allocation10 + $0xcc] ss:$24 sps:$4 sm:$0xff]  }
 0x4e8   : > { %2957 = vmatprep.mubr.bf16.mxu0 %v9306_v3 }
 0x4e9   : > { %2958 = vmatmul.mubr.bf16.vlgmr.msra.gmra.mrb[28].mxu0 %v9304_v30 }
 0x4ea   : > { %3051 = vmatpush1.bf16.msra.mxu0 %v8858_v54 }
 0x4eb   : > { %v6515_v26 = vpop.eup %6514  ;;  %3052 = vmatprep.subr.bf16.mxu0 %v8865_v7  ;;  %v9328_v7 = vld [vmem:[#allocation10 + $0x68] ss:$24 sps:$4 sm:$0xff]  }
 0x4ec   : > { %v6517_v55 = vpop.eup %6516  ;;  %v2744_v43 = vmul.f32 %v6515_v26, %v2742_v47  ;;  %v9342_v47 = vld [vmem:[#allocation10 + $0xc8] ss:$24 sps:$4 sm:$0xff]  }
 0x4ed   : > { %v2745_v19 = vmul.f32 %v6517_v55, %v2743_v48  ;;  %v6519_v50 = vpop.eup %6518  ;;  %v9345_v55 = vld [vmem:[#allocation10 + $0xfc] ss:$24 sps:$4 sm:$0xff]  }
 0x4ee   : > { %v2746_v18 = vadd.f32 %v2744_v43, %v2583_v63  ;;  %3053 = vmatpush1.bf16.msra.mxu0 %v9316_v52  ;;  %v6521_v62 = vpop.eup %6520  ;;  %v2750_v34 = vsub.f32 1.0, %v6519_v50  ;;  %v2754_v43 = vmul.f32 %v6519_v50, %v8989_v40 }
 0x4ef   : > { %v2747_v54 = vadd.f32 %v2745_v19, %v2585_v44  ;;  %3054 = vmatprep.subr.bf16.mxu0 %v9319_v46  ;;  %v2751_v26 = vsub.f32 1.0, %v6521_v62  ;;  %v2755_v19 = vmul.f32 %v6521_v62, %v8841_v28 }
 0x4f0   : > { %6522 = vtanh.f32 %v2746_v18 }
 0x4f1   : > { %6524 = vtanh.f32 %v2747_v54  ;;  %v9350_v54 = vld [vmem:[#allocation10 + $0xf8] ss:$24 sps:$4 sm:$0xff]  }
 0x4f2   : > { %3055 = vmatpush1.bf16.msra.mxu0 %v9328_v7 }
 0x4f3   : > { %3056 = vmatprep.subr.bf16.mxu0 %v9331_v11 }
 0x4f6   : > { %3057 = vmatpush1.bf16.msra.mxu0 %v9336_v10 }
 0x4f7   : > { %3058 = vmatprep.subr.bf16.mxu0 %v9339_v16 }
 0x4fa   : > { %v6523_v36 = vpop.eup %6522  ;;  %3059 = vmatpush1.bf16.msra.mxu0 %v9342_v47 }
 0x4fb   : > { %v6525_v48 = vpop.eup %6524  ;;  %3060 = vmatprep.subr.bf16.mxu0 %v9345_v55  ;;  %v2752_v63 = vmul.f32 %v6523_v36, %v2750_v34 }
 0x4fc   : > { %v2753_v44 = vmul.f32 %v6525_v48, %v2751_v26  ;;  %v9387_v26 = vld [vmem:[#allocation10 + $0x1bc] ss:$24 sps:$4 sm:$0xff]   ;;  %v9395_v48 = vld [vmem:[#allocation10 + $0x1ec] ss:$24 sps:$4 sm:$0xff]  }
 0x4fd   : > { %v2756_v18 = vadd.f32 %v2754_v43, %v2752_v63  ;;  %v9416_v63 = vld [vmem:[#allocation10 + $0x248] ss:$24 sps:$4 sm:$0xff]   ;;  %v9419_v43 = vld [vmem:[#allocation10 + $0x27c] ss:$24 sps:$4 sm:$0xff]  }
 0x4fe   : > { %3061 = vmatpush1.bf16.msra.mxu0 %v9350_v54  ;;  %v2757_v35 = vadd.f32 %v2755_v19, %v2753_v44  ;;  %v9432_v44 = vld [vmem:[#allocation10 + $0x2a8] ss:$24 sps:$4 sm:$0xff]   ;;  %v9435_v19 = vld [vmem:[#allocation10 + $0x2dc] ss:$24 sps:$4 sm:$0xff]  }
 0x4ff   : > { %3062 = vmatprep.subr.bf16.mxu0 %v9353_v25  ;;  %v9357_v5 = vsel %vm2825_vm15, %v2756_v18, %v8989_v40  ;;  %v2758_v36 = vpack.c.bf16 %v2756_v18, %v2756_v18  ;;  %v9371_v40 = vld [vmem:[#allocation10 + $0x15c] ss:$24 sps:$4 sm:$0xff]  }
 0x500   : > { %v2759_v34 = vpack.c.bf16 %v2757_v35, %v2757_v35  ;;  %v9360_v50 = vsel %vm2825_vm15, %v2757_v35, %v8841_v28  ;;  %v9376_v35 = vld [vmem:[#allocation10 + $0x158] ss:$24 sps:$4 sm:$0xff]   ;;  %v9379_v28 = vld [vmem:[#allocation10 + $0x18c] ss:$24 sps:$4 sm:$0xff]  }
 0x501   : > { %v9364_v62 = vpack.c.bf16 %v9360_v50, %v9360_v50  ;;  %v9473_v18 = vld [vmem:[#allocation10 + $0xa4] ss:$24 sps:$4 sm:$0xff]  }
 0x502   : > { %3063 = vmatpush1.bf16.msra.mxu0 %v9366_v59  ;;  %2792 = vmatprep.mubr.bf16.mxu1 %v2759_v34  ;;  %v13763_v34 = vld [vmem:[#allocation181_spill] sm:$0xff] }
 0x503   : > { %2793 = vmatmul.mubr.bf16.vlgmr.msra.gmra.mrb[20].mxu1 %v2758_v36  ;;  %3082 = vmatprep.mubr.bf16.mxu0 %v9364_v62  ;;  %v9520_v36 = vld [vmem:[#allocation10 + $0x190] ss:$24 sps:$4 sm:$0xff]  }
 0x504   : > { %2885 = vmatpush1.bf16.msra.mxu1 %v8807_v45  ;;  %3064 = vmatprep.subr.bf16.mxu0 %v9371_v40  ;;  %v9384_v45 = vld [vmem:[#allocation10 + $0x188] ss:$24 sps:$4 sm:$0xff]   ;;  %13764 = vst [vmem:[#allocation60_spill] sm:$0xff] %v9520_v36 }
 0x505   : > { %2886 = vmatprep.subr.bf16.mxu1 %v8811_v37  ;;  %2916 = vmatprep.mubr.bf16.mxu1 %v9306_v3  ;;  %v9392_v37 = vld [vmem:[#allocation10 + $0x1b8] ss:$24 sps:$4 sm:$0xff]  }
 0x506   : > { %3065 = vmatpush1.bf16.msra.mxu0 %v9376_v35 }
 0x507   : > { %3066 = vmatprep.subr.bf16.mxu0 %v9379_v28 }
 0x508   : > { %2887 = vmatpush1.bf16.msra.mxu1 %v8814_v31  ;;  %v9400_v31 = vld [vmem:[#allocation10 + $0x1e8] ss:$24 sps:$4 sm:$0xff]  }
 0x509   : > { %2888 = vmatprep.subr.bf16.mxu1 %v8817_v21  ;;  %v9403_v21 = vld [vmem:[#allocation10 + $0x21c] ss:$24 sps:$4 sm:$0xff]  }
 0x50a   : > { %3067 = vmatpush1.bf16.msra.mxu0 %v9384_v45 }
 0x50b   : > { %3068 = vmatprep.subr.bf16.mxu0 %v9387_v26 }
 0x50c   : > { %2889 = vmatpush1.bf16.msra.mxu1 %v8820_v33  ;;  %v9408_v33 = vld [vmem:[#allocation10 + $0x218] ss:$24 sps:$4 sm:$0xff]  }
 0x50d   : > { %2890 = vmatprep.subr.bf16.mxu1 %v8823_v8  ;;  %v9411_v8 = vld [vmem:[#allocation10 + $0x24c] ss:$24 sps:$4 sm:$0xff]  }
 0x50e   : > { %3069 = vmatpush1.bf16.msra.mxu0 %v9392_v37 }
 0x50f   : > { %3070 = vmatprep.subr.bf16.mxu0 %v9395_v48 }
 0x510   : > { %2891 = vmatpush1.bf16.msra.mxu1 %v8830_v13  ;;  %v13754_v13 = vld [vmem:[#allocation177_spill] sm:$0xff] }
 0x511   : > { %2892 = vmatprep.subr.bf16.mxu1 %v8833_v24  ;;  %v13755_v24 = vld [vmem:[#allocation178_spill] sm:$0xff] }
 0x512   : > { %3071 = vmatpush1.bf16.msra.mxu0 %v9400_v31 }
 0x513   : > { %3072 = vmatprep.subr.bf16.mxu0 %v9403_v21 }
 0x514   : > { %2893 = vmatpush1.bf16.msra.mxu1 %v8845_v29  ;;  %v9424_v29 = vld [vmem:[#allocation10 + $0x278] ss:$24 sps:$4 sm:$0xff]  }
 0x515   : > { %2894 = vmatprep.subr.bf16.mxu1 %v8849_v23  ;;  %v9427_v23 = vld [vmem:[#allocation10 + $0x2ac] ss:$24 sps:$4 sm:$0xff]  }
 0x516   : > { %3073 = vmatpush1.bf16.msra.mxu0 %v9408_v33 }
 0x517   : > { %3074 = vmatprep.subr.bf16.mxu0 %v9411_v8 }
 0x518   : > { %2895 = vmatpush1.bf16.msra.mxu1 %v13754_v13  ;;  %v13767_v13 = vld [vmem:[#allocation32_spill] sm:$0xff] }
 0x519   : > { %2896 = vmatprep.subr.bf16.mxu1 %v13755_v24  ;;  %v9528_v24 = vld [vmem:[#allocation10 + $0x1c0] ss:$24 sps:$4 sm:$0xff]  }
 0x51a   : > { %3075 = vmatpush1.bf16.msra.mxu0 %v9416_v63  ;;  %13768 = vst [vmem:[#allocation62_spill] sm:$0xff] %v9528_v24 }
 0x51b   : > { %3076 = vmatprep.subr.bf16.mxu0 %v9419_v43 }
 0x51c   : > { %2897 = vmatpush1.bf16.msra.mxu1 %v8872_v41  ;;  %v9440_v41 = vld [vmem:[#allocation10 + $0x2d8] ss:$24 sps:$4 sm:$0xff]  }
 0x51d   : > { %2898 = vmatprep.subr.bf16.mxu1 %v8876_v38  ;;  %v9453_v38 = vld [vmem:[#allocation10 + $0x10] ss:$24 sps:$4 sm:$0xff]  }
 0x51e   : > { %3077 = vmatpush1.bf16.msra.mxu0 %v9424_v29 }
 0x51f   : > { %3078 = vmatprep.subr.bf16.mxu0 %v9427_v23 }
 0x520   : > { %2899 = vmatpush1.bf16.msra.mxu1 %v8880_v57  ;;  %v9445_v57 = vpack.c.bf16 %v9357_v5, %v9357_v5 }
 0x521   : > { %2900 = vmatprep.subr.bf16.mxu1 %v8884_v27  ;;  %v9447_v27 = vld [vmem:[#allocation10 + $0x14] ss:$24 sps:$4 sm:$0xff]  }
 0x522   : > { %3079 = vmatpush1.bf16.msra.mxu0 %v9432_v44 }
 0x523   : > { %3080 = vmatprep.subr.bf16.mxu0 %v9435_v19 }
 0x524   : > { %2901 = vmatpush1.bf16.msra.mxu1 %v8888_v0  ;;  %v9457_v0 = vld [vmem:[#allocation10 + $0x44] ss:$24 sps:$4 sm:$0xff]  }
 0x525   : > { %2902 = vmatprep.subr.bf16.mxu1 %v8892_v2  ;;  %v9462_v2 = vld [vmem:[#allocation10 + $0x40] ss:$24 sps:$4 sm:$0xff]  }
 0x526   : > { %3081 = vmatpush1.bf16.msra.mxu0 %v9440_v41 }
 0x527   : > { %3091 = vmatprep.subr.bf16.mxu0 %v9447_v27 }
 0x528   : > { %2903 = vmatpush1.bf16.msra.mxu1 %v8896_v4  ;;  %v9465_v4 = vld [vmem:[#allocation10 + $0x74] ss:$24 sps:$4 sm:$0xff]  }
 0x529   : > { %3083 = vmatmul.mubr.bf16.vlgmr.msra.gmra.mrb[28].mxu0 %v9445_v57  ;;  %2904 = vmatprep.subr.bf16.mxu1 %v8900_v6  ;;  %v9470_v6 = vld [vmem:[#allocation10 + $0x70] ss:$24 sps:$4 sm:$0xff]  }
 0x52a   : > { %3092 = vmatpush1.bf16.msra.mxu0 %v9453_v38  ;;  %3123 = vmatprep.mubr.bf16.mxu0 %v9364_v62 }
 0x52b   : > { %3093 = vmatprep.subr.bf16.mxu0 %v9457_v0 }
 0x52c   : > { %2905 = vmatpush1.bf16.msra.mxu1 %v8904_v9  ;;  %v9478_v9 = vld [vmem:[#allocation10 + $0xa0] ss:$24 sps:$4 sm:$0xff]  }
 0x52d   : > { %2906 = vmatprep.subr.bf16.mxu1 %v8908_v12  ;;  %v9481_v12 = vld [vmem:[#allocation10 + $0xd4] ss:$24 sps:$4 sm:$0xff]  }
 0x52e   : > { %3094 = vmatpush1.bf16.msra.mxu0 %v9462_v2 }
 0x52f   : > { %3095 = vmatprep.subr.bf16.mxu0 %v9465_v4 }
 0x530   : > { %2907 = vmatpush1.bf16.msra.mxu1 %v8912_v15  ;;  %v9486_v15 = vld [vmem:[#allocation10 + $0xd0] ss:$24 sps:$4 sm:$0xff]  }
 0x531   : > { %2908 = vmatprep.subr.bf16.mxu1 %v8916_v17  ;;  %v9489_v17 = vld [vmem:[#allocation10 + $0x104] ss:$24 sps:$4 sm:$0xff]  }
 0x532   : > { %3096 = vmatpush1.bf16.msra.mxu0 %v9470_v6 }
 0x533   : > { %3097 = vmatprep.subr.bf16.mxu0 %v9473_v18 }
 0x534   : > { %2909 = vmatpush1.bf16.msra.mxu1 %v8920_v20  ;;  %v9494_v20 = vld [vmem:[#allocation10 + $0x100] ss:$24 sps:$4 sm:$0xff]  }
 0x535   : > { %2910 = vmatprep.subr.bf16.mxu1 %v8924_v42  ;;  %v9497_v42 = vld [vmem:[#allocation10 + $0x134] ss:$24 sps:$4 sm:$0xff]  }
 0x536   : > { %3098 = vmatpush1.bf16.msra.mxu0 %v9478_v9  ;;  %13756 = vst [vmem:[#allocation99_spill] sm:$0xff] %v9497_v42 }
 0x537   : > { %3099 = vmatprep.subr.bf16.mxu0 %v9481_v12 }
 0x538   : > { %2911 = vmatpush1.bf16.msra.mxu1 %v8928_v49  ;;  %v9502_v49 = vld [vmem:[#allocation10 + $0x130] ss:$24 sps:$4 sm:$0xff]  }
 0x539   : > { %2912 = vmatprep.subr.bf16.mxu1 %v8932_v51  ;;  %13757 = vst [vmem:[#allocation56_spill] sm:$0xff] %v9502_v49  ;;  %v9506_v51 = vld [vmem:[#allocation10 + $0x164] ss:$24 sps:$4 sm:$0xff]  }
 0x53a   : > { %3100 = vmatpush1.bf16.msra.mxu0 %v9486_v15  ;;  %13758 = vst [vmem:[#allocation100_spill] sm:$0xff] %v9506_v51 }
 0x53b   : > { %3101 = vmatprep.subr.bf16.mxu0 %v9489_v17 }
 0x53c   : > { %2913 = vmatpush1.bf16.msra.mxu1 %v8936_v53  ;;  %v13759_v53 = vld [vmem:[#allocation179_spill] sm:$0xff] }
 0x53d   : > { %2914 = vmatprep.subr.bf16.mxu1 %v8940_v56  ;;  %v9512_v56 = vld [vmem:[#allocation10 + $0x160] ss:$24 sps:$4 sm:$0xff]  }
 0x53e   : > { %3102 = vmatpush1.bf16.msra.mxu0 %v9494_v20  ;;  %13760 = vst [vmem:[#allocation58_spill] sm:$0xff] %v9512_v56 }
 0x53f   : > { %3103 = vmatprep.subr.bf16.mxu0 %v9497_v42 }
 0x540   : > { %2915 = vmatpush1.bf16.msra.mxu1 %v8944_v58  ;;  %v9515_v58 = vld [vmem:[#allocation10 + $0x194] ss:$24 sps:$4 sm:$0xff]  }
 0x541   : > { %2966 = vmatprep.subr.bf16.mxu1 %v8948_v61  ;;  %13761 = vst [vmem:[#allocation101_spill] sm:$0xff] %v9515_v58  ;;  %v13762_v61 = vld [vmem:[#allocation180_spill] sm:$0xff] }
 0x542   : > { %3104 = vmatpush1.bf16.msra.mxu0 %v9502_v49 }
 0x543   : > { %2917 = vmatmul.mubr.bf16.vlgmr.msra.gmra.mrb[24].mxu1 %v9304_v30  ;;  %3105 = vmatprep.subr.bf16.mxu0 %v9506_v51 }
 0x544   : > { %2967 = vmatpush1.bf16.msra.mxu1 %v8953_v1  ;;  %2998 = vmatprep.mubr.bf16.mxu1 %v9306_v3  ;;  %v9523_v1 = vld [vmem:[#allocation10 + $0x1c4] ss:$24 sps:$4 sm:$0xff]  }
 0x545   : > { %2968 = vmatprep.subr.bf16.mxu1 %v13759_v53  ;;  %13765 = vst [vmem:[#allocation102_spill] sm:$0xff] %v9523_v1  ;;  %v13766_v3 = vld [vmem:[#allocation30_spill] sm:$0xff]  ;;  %v9531_v53 = vld [vmem:[#allocation10 + $0x1f4] ss:$24 sps:$4 sm:$0xff]  }
 0x546   : > { %3106 = vmatpush1.bf16.msra.mxu0 %v9512_v56  ;;  %13769 = vst [vmem:[#allocation103_spill] sm:$0xff] %v9531_v53 }
 0x547   : > { %3107 = vmatprep.subr.bf16.mxu0 %v9515_v58  ;;  %v9574_v58 = vld [vmem:[#allocation10 + $0x2b0] ss:$24 sps:$4 sm:$0xff]  }
 0x548   : > { %2969 = vmatpush1.bf16.msra.mxu1 %v13762_v61  ;;  %v13770_v61 = vld [vmem:[#allocation34_spill] sm:$0xff]  ;;  %13788 = vst [vmem:[#allocation72_spill] sm:$0xff] %v9574_v58 }
 0x549   : > { %2970 = vmatprep.subr.bf16.mxu1 %v13763_v34  ;;  %v13771_v34 = vld [vmem:[#allocation36_spill] sm:$0xff] }
 0x54a   : > { %3108 = vmatpush1.bf16.msra.mxu0 %v9520_v36  ;;  %v9536_v36 = vld [vmem:[#allocation10 + $0x1f0] ss:$24 sps:$4 sm:$0xff]  }
 0x54b   : > { %3109 = vmatprep.subr.bf16.mxu0 %v9523_v1  ;;  %13772 = vst [vmem:[#allocation64_spill] sm:$0xff] %v9536_v36  ;;  %v9544_v1 = vld [vmem:[#allocation10 + $0x220] ss:$24 sps:$4 sm:$0xff]  }
 0x54c   : > { %2971 = vmatpush1.bf16.msra.mxu1 %v13766_v3  ;;  %v9539_v3 = vld [vmem:[#allocation10 + $0x224] ss:$24 sps:$4 sm:$0xff]   ;;  %13776 = vst [vmem:[#allocation66_spill] sm:$0xff] %v9544_v1 }
 0x54d   : > { %2972 = vmatprep.subr.bf16.mxu1 %v13767_v13  ;;  %13773 = vst [vmem:[#allocation104_spill] sm:$0xff] %v9539_v3  ;;  %v13774_v13 = vld [vmem:[#allocation38_spill] sm:$0xff] }
 0x54e   : > { %3110 = vmatpush1.bf16.msra.mxu0 %v9528_v24  ;;  %v13775_v24 = vld [vmem:[#allocation40_spill] sm:$0xff] }
 0x54f   : > { %3111 = vmatprep.subr.bf16.mxu0 %v9531_v53  ;;  %v12891_v53 = vstv %s9555_s15 }
 0x550   : > { %2973 = vmatpush1.bf16.msra.mxu1 %v13770_v61  ;;  %v9548_v61 = vld [vmem:[#allocation10 + $0x254] ss:$24 sps:$4 sm:$0xff]   ;;  %vm3250_vm0 = vcmp.eq.s32.totalorder %v13628_v60, %v12891_v53  ;;  %v13798_v53 = vld [vmem:[#allocation61_spill] sm:$0xff] }
 0x551   : > { %2974 = vmatprep.subr.bf16.mxu1 %v13771_v34  ;;  %13777 = vst [vmem:[#allocation105_spill] sm:$0xff] %v9548_v61  ;;  %v13778_v34 = vld [vmem:[#allocation182_spill] sm:$0xff]  ;;  %vm5855_vm1 = vmpackc.low %vm3250_vm0, %vm3250_vm0 }
 0x552   : > { %3112 = vmatpush1.bf16.msra.mxu0 %v9536_v36  ;;  %v13779_v36 = vld [vmem:[#allocation43_spill] sm:$0xff] }
 0x553   : > { %3113 = vmatprep.subr.bf16.mxu0 %v9539_v3  ;;  %v13786_v3 = vld [vmem:[#allocation49_spill] sm:$0xff] }
 0x554   : > { %2975 = vmatpush1.bf16.msra.mxu1 %v13774_v13  ;;  %v9557_v13 = vld [vmem:[#allocation10 + $0x250] ss:$24 sps:$4 sm:$0xff]  }
 0x555   : > { %2976 = vmatprep.subr.bf16.mxu1 %v13775_v24  ;;  %13780 = vst [vmem:[#allocation68_spill] sm:$0xff] %v9557_v13  ;;  %v9560_v24 = vld [vmem:[#allocation10 + $0x284] ss:$24 sps:$4 sm:$0xff]   ;;  %v9611_v60 = vld [vmem:[#allocation5 + $0x20] ss:$8 sps:$4 sm:$0xff]  }
 0x556   : > { %3114 = vmatpush1.bf16.msra.mxu0 %v9544_v1  ;;  %13781 = vst [vmem:[#allocation106_spill] sm:$0xff] %v9560_v24  ;;  %v13782_v1 = vld [vmem:[#allocation45_spill] sm:$0xff]  ;;  %13804 = vst [vmem:[#allocation80_spill] sm:$0xff] %v9611_v60 }
 0x557   : > { %3115 = vmatprep.subr.bf16.mxu0 %v9548_v61  ;;  %v13783_v61 = vld [vmem:[#allocation47_spill] sm:$0xff] }
 0x558   : > { %2977 = vmatpush1.bf16.msra.mxu1 %v13778_v34  ;;  %v9565_v34 = vld [vmem:[#allocation10 + $0x280] ss:$24 sps:$4 sm:$0xff]  }
 0x559   : > { %2978 = vmatprep.subr.bf16.mxu1 %v13779_v36  ;;  %13784 = vst [vmem:[#allocation70_spill] sm:$0xff] %v9565_v34  ;;  %v9568_v36 = vld [vmem:[#allocation10 + $0x2b4] ss:$24 sps:$4 sm:$0xff]  }
 0x55a   : > { %3116 = vmatpush1.bf16.msra.mxu0 %v9557_v13  ;;  %13785 = vst [vmem:[#allocation107_spill] sm:$0xff] %v9568_v36  ;;  %v13787_v13 = vld [vmem:[#allocation51_spill] sm:$0xff] }
 0x55b   : > { %3117 = vmatprep.subr.bf16.mxu0 %v9560_v24 }
 0x55c   : > { %2979 = vmatpush1.bf16.msra.mxu1 %v13782_v1  ;;  %v9577_v1 = vld [vmem:[#allocation10 + $0x2e4] ss:$24 sps:$4 sm:$0xff]  }
 0x55d   : > { %2980 = vmatprep.subr.bf16.mxu1 %v13783_v61  ;;  %13789 = vst [vmem:[#allocation108_spill] sm:$0xff] %v9577_v1  ;;  %v13790_v61 = vld [vmem:[#allocation53_spill] sm:$0xff] }
 0x55e   : > { %3118 = vmatpush1.bf16.msra.mxu0 %v9565_v34  ;;  %v13791_v34 = vld [vmem:[#allocation55_spill] sm:$0xff] }
 0x55f   : > { %3119 = vmatprep.subr.bf16.mxu0 %v9568_v36  ;;  %v9585_v36 = vld [vmem:[#allocation10 + $0x2e0] ss:$24 sps:$4 sm:$0xff]  }
 0x560   : > { %2981 = vmatpush1.bf16.msra.mxu1 %v13786_v3  ;;  %13792 = vst [vmem:[#allocation74_spill] sm:$0xff] %v9585_v36  ;;  %v9588_v3 = vld [vmem:[#allocation5 + $0x4] ss:$8 sps:$4 sm:$0xff]  }
 0x561   : > { %2982 = vmatprep.subr.bf16.mxu1 %v13787_v13  ;;  %13793 = vst [vmem:[#allocation109_spill] sm:$0xff] %v9588_v3  ;;  %v13794_v13 = vld [vmem:[#allocation57_spill] sm:$0xff] }
 0x562   : > { %3120 = vmatpush1.bf16.msra.mxu0 %v9574_v58  ;;  %v9903_v58 = vld [vmem:[#allocation11 + $0x64] ss:$8 sps:$4 sm:$0xff]  }
 0x563   : > { %3121 = vmatprep.subr.bf16.mxu0 %v9577_v1  ;;  %v13795_v1 = vld [vmem:[#allocation59_spill] sm:$0xff]  ;;  %13913 = vst [vmem:[#allocation57_spill] sm:$0xff] %v9903_v58 }
 0x564   : > { %2983 = vmatpush1.bf16.msra.mxu1 %v13790_v61  ;;  %v9594_v61 = vld [vmem:[#allocation5] ss:$8 sps:$4 sm:$0xff]  }
 0x565   : > { %2984 = vmatprep.subr.bf16.mxu1 %v13791_v34  ;;  %13796 = vst [vmem:[#allocation76_spill] sm:$0xff] %v9594_v61  ;;  %v9598_v34 = vld [vmem:[#allocation5 + $0x14] ss:$8 sps:$4 sm:$0xff]  }
 0x566   : > { %3122 = vmatpush1.bf16.msra.mxu0 %v9585_v36  ;;  %13797 = vst [vmem:[#allocation110_spill] sm:$0xff] %v9598_v34  ;;  %v9603_v36 = vld [vmem:[#allocation5 + $0x10] ss:$8 sps:$4 sm:$0xff]  }
 0x567   : > { %3257 = vmatprep.subr.bf16.mxu0 %v9588_v3  ;;  %v13799_v3 = vld [vmem:[#allocation63_spill] sm:$0xff]  ;;  %13800 = vst [vmem:[#allocation78_spill] sm:$0xff] %v9603_v36 }
 0x568   : > { %2985 = vmatpush1.bf16.msra.mxu1 %v13794_v13  ;;  %v9606_v13 = vld [vmem:[#allocation5 + $0x24] ss:$8 sps:$4 sm:$0xff]  }
 0x569   : > { %3124 = vmatmul.mubr.bf16.vlgmr.msra.gmra.mrb[32].mxu0 %v9445_v57  ;;  %2986 = vmatprep.subr.bf16.mxu1 %v13795_v1  ;;  %13801 = vst [vmem:[#allocation111_spill] sm:$0xff] %v9606_v13  ;;  %v13802_v1 = vld [vmem:[#allocation65_spill] sm:$0xff] }
 0x56a   : > { %3258 = vmatpush1.bf16.msra.mxu0 %v9594_v61  ;;  %5856 = vmatprep.mubr.msk.bf16.mxu0 %vm5855_vm1, %v13475_v14  ;;  %v13803_v61 = vld [vmem:[#allocation67_spill] sm:$0xff] }
 0x56b   : > { %3259 = vmatprep.subr.bf16.mxu0 %v9598_v34  ;;  %v9614_v34 = vld [vmem:[#allocation5 + $0x34] ss:$8 sps:$4 sm:$0xff]  }
 0x56c   : > { %2987 = vmatpush1.bf16.msra.mxu1 %v13798_v53  ;;  %13805 = vst [vmem:[#allocation112_spill] sm:$0xff] %v9614_v34  ;;  %v13806_v53 = vld [vmem:[#allocation69_spill] sm:$0xff] }
 0x56d   : > { %2988 = vmatprep.subr.bf16.mxu1 %v13799_v3  ;;  %v13807_v3 = vld [vmem:[#allocation71_spill] sm:$0xff] }
 0x56e   : > { %3260 = vmatpush1.bf16.msra.mxu0 %v9603_v36  ;;  %v9619_v36 = vld [vmem:[#allocation5 + $0x30] ss:$8 sps:$4 sm:$0xff]  }
 0x56f   : > { %3261 = vmatprep.subr.bf16.mxu0 %v9606_v13  ;;  %13808 = vst [vmem:[#allocation82_spill] sm:$0xff] %v9619_v36  ;;  %v9622_v13 = vld [vmem:[#allocation5 + $0x44] ss:$8 sps:$4 sm:$0xff]  }
 0x570   : > { %2989 = vmatpush1.bf16.msra.mxu1 %v13802_v1  ;;  %13809 = vst [vmem:[#allocation113_spill] sm:$0xff] %v9622_v13  ;;  %v9628_v1 = vld [vmem:[#allocation8 + $0x2b4] ss:$24 sps:$4 sm:$0xff]  }
 0x571   : > { %2990 = vmatprep.subr.bf16.mxu1 %v13803_v61  ;;  %v9625_v61 = vld [vmem:[#allocation8 + $0x280] ss:$24 sps:$4 sm:$0xff]   ;;  %13811 = vst [vmem:[#allocation114_spill] sm:$0xff] %v9628_v1 }
 0x572   : > { %3262 = vmatpush1.bf16.msra.mxu0 %v9611_v60  ;;  %13810 = vst [vmem:[#allocation84_spill] sm:$0xff] %v9625_v61 }
 0x573   : > { %3263 = vmatprep.subr.bf16.mxu0 %v9614_v34  ;;  %v9631_v34 = vld [vmem:[#allocation5 + $0x40] ss:$8 sps:$4 sm:$0xff]  }
 0x574   : > { %2991 = vmatpush1.bf16.msra.mxu1 %v13806_v53  ;;  %13812 = vst [vmem:[#allocation86_spill] sm:$0xff] %v9631_v34  ;;  %v9634_v53 = vld [vmem:[#allocation5 + $0x54] ss:$8 sps:$4 sm:$0xff]  }
 0x575   : > { %2992 = vmatprep.subr.bf16.mxu1 %v13807_v3  ;;  %13813 = vst [vmem:[#allocation115_spill] sm:$0xff] %v9634_v53  ;;  %v9637_v3 = vld [vmem:[#allocation8 + $0x2b0] ss:$24 sps:$4 sm:$0xff]  }
 0x576   : > { %3264 = vmatpush1.bf16.msra.mxu0 %v9619_v36  ;;  %13814 = vst [vmem:[#allocation88_spill] sm:$0xff] %v9637_v3 }
 0x577   : > { %3265 = vmatprep.subr.bf16.mxu0 %v9622_v13  ;;  %v9640_v13 = vld [vmem:[#allocation8 + $0x2e4] ss:$24 sps:$4 sm:$0xff]  }
 0x578   : > { %2993 = vmatpush1.bf16.msra.mxu1 %v9625_v61  ;;  %13815 = vst [vmem:[#allocation116_spill] sm:$0xff] %v9640_v13  ;;  %v9643_v61 = vld [vmem:[#allocation5 + $0x50] ss:$8 sps:$4 sm:$0xff]  }
 0x579   : > { %2994 = vmatprep.subr.bf16.mxu1 %v9628_v1  ;;  %13816 = vst [vmem:[#allocation90_spill] sm:$0xff] %v9643_v61  ;;  %v9646_v1 = vld [vmem:[#allocation5 + $0x64] ss:$8 sps:$4 sm:$0xff]  }
 0x57a   : > { %3266 = vmatpush1.bf16.msra.mxu0 %v9631_v34  ;;  %13817 = vst [vmem:[#allocation117_spill] sm:$0xff] %v9646_v1  ;;  %v9649_v34 = vld [vmem:[#allocation8 + $0x2e0] ss:$24 sps:$4 sm:$0xff]  }
 0x57b   : > { %3267 = vmatprep.subr.bf16.mxu0 %v9634_v53  ;;  %13818 = vst [vmem:[#allocation92_spill] sm:$0xff] %v9649_v34  ;;  %v9652_v53 = vld [vmem:[#allocation10 + $0x4] ss:$24 sps:$4 sm:$0xff]  }
 0x57c   : > { %2995 = vmatpush1.bf16.msra.mxu1 %v9637_v3  ;;  %13819 = vst [vmem:[#allocation118_spill] sm:$0xff] %v9652_v53  ;;  %v9655_v3 = vld [vmem:[#allocation5 + $0x60] ss:$8 sps:$4 sm:$0xff]  }
 0x57d   : > { %2996 = vmatprep.subr.bf16.mxu1 %v9640_v13  ;;  %13820 = vst [vmem:[#allocation94_spill] sm:$0xff] %v9655_v3  ;;  %v9659_v13 = vld [vmem:[#allocation5 + $0x74] ss:$8 sps:$4 sm:$0xff]  }
 0x57e   : > { %3268 = vmatpush1.bf16.msra.mxu0 %v9643_v61  ;;  %13821 = vst [vmem:[#allocation119_spill] sm:$0xff] %v9659_v13  ;;  %v9662_v61 = vld [vmem:[#allocation10] ss:$24 sps:$4 sm:$0xff]  }
 0x57f   : > { %3269 = vmatprep.subr.bf16.mxu0 %v9646_v1  ;;  %13822 = vst [vmem:[#allocation95_spill] sm:$0xff] %v9662_v61  ;;  %v9852_v1 = vld [vmem:[#allocation11] ss:$8 sps:$4 sm:$0xff]  }
 0x580   : > { %2997 = vmatpush1.bf16.msra.mxu1 %v9649_v34  ;;  %v9666_v34 = vld [vmem:[#allocation10 + $0x34] ss:$24 sps:$4 sm:$0xff]   ;;  %13888 = vst [vmem:[#allocation32_spill] sm:$0xff] %v9852_v1 }
 0x581   : > { %3009 = vmatprep.subr.bf16.mxu1 %v9652_v53  ;;  %13823 = vst [vmem:[#allocation120_spill] sm:$0xff] %v9666_v34  ;;  %v9669_v53 = vld [vmem:[#allocation5 + $0x70] ss:$8 sps:$4 sm:$0xff]  }
 0x582   : > { %3270 = vmatpush1.bf16.msra.mxu0 %v9655_v3  ;;  %13824 = vst [vmem:[#allocation96_spill] sm:$0xff] %v9669_v53  ;;  %v9672_v3 = vld [vmem:[#allocation5 + $0x84] ss:$8 sps:$4 sm:$0xff]  }
 0x583   : > { %2999 = vmatmul.mubr.bf16.vlgmr.msra.gmra.mrb[28].mxu1 %v9304_v30  ;;  %3271 = vmatprep.subr.bf16.mxu0 %v9659_v13  ;;  %13825 = vst [vmem:[#allocation124_spill] sm:$0xff] %v9672_v3  ;;  %v9675_v30 = vld [vmem:[#allocation10 + $0x30] ss:$24 sps:$4 sm:$0xff]   ;;  %v9678_v13 = vld [vmem:[#allocation10 + $0x64] ss:$24 sps:$4 sm:$0xff]  }
 0x584   : > { %3010 = vmatpush1.bf16.msra.mxu1 %v9662_v61  ;;  %3041 = vmatprep.mubr.bf16.mxu1 %v9364_v62  ;;  %13826 = vst [vmem:[#allocation98_spill] sm:$0xff] %v9675_v30  ;;  %13827 = vst [vmem:[#allocation121_spill] sm:$0xff] %v9678_v13  ;;  %v9681_v62 = vld [vmem:[#allocation5 + $0x80] ss:$8 sps:$4 sm:$0xff]  }
 0x585   : > { %3011 = vmatprep.subr.bf16.mxu1 %v9666_v34  ;;  %13828 = vst [vmem:[#allocation127_spill] sm:$0xff] %v9681_v62  ;;  %v9684_v34 = vld [vmem:[#allocation5 + $0x94] ss:$8 sps:$4 sm:$0xff]   ;;  %v9687_v61 = vld [vmem:[#allocation10 + $0x60] ss:$24 sps:$4 sm:$0xff]  }
 0x586   : > { %3272 = vmatpush1.bf16.msra.mxu0 %v9669_v53  ;;  %13829 = vst [vmem:[#allocation129_spill] sm:$0xff] %v9684_v34  ;;  %13830 = vst [vmem:[#allocation122_spill] sm:$0xff] %v9687_v61  ;;  %v13855_v53 = vld [vmem:[#allocation26_spill] sm:$0xff] }
 0x587   : > { %3273 = vmatprep.subr.bf16.mxu0 %v9672_v3  ;;  %v9690_v3 = vld [vmem:[#allocation10 + $0x94] ss:$24 sps:$4 sm:$0xff]  }
 0x588   : > { %3012 = vmatpush1.bf16.msra.mxu1 %v9675_v30  ;;  %13831 = vst [vmem:[#allocation123_spill] sm:$0xff] %v9690_v3  ;;  %v9693_v30 = vld [vmem:[#allocation5 + $0x90] ss:$8 sps:$4 sm:$0xff]  }
 0x589   : > { %3013 = vmatprep.subr.bf16.mxu1 %v9678_v13  ;;  %13832 = vst [vmem:[#allocation131_spill] sm:$0xff] %v9693_v30  ;;  %v9696_v13 = vld [vmem:[#allocation5 + $0xa4] ss:$8 sps:$4 sm:$0xff]  }
 0x58a   : > { %3274 = vmatpush1.bf16.msra.mxu0 %v9681_v62  ;;  %13833 = vst [vmem:[#allocation125_spill] sm:$0xff] %v9696_v13  ;;  %v9699_v62 = vld [vmem:[#allocation10 + $0x90] ss:$24 sps:$4 sm:$0xff]  }
 0x58b   : > { %3275 = vmatprep.subr.bf16.mxu0 %v9684_v34  ;;  %13834 = vst [vmem:[#allocation126_spill] sm:$0xff] %v9699_v62  ;;  %v9702_v34 = vld [vmem:[#allocation10 + $0xc4] ss:$24 sps:$4 sm:$0xff]  }
 0x58c   : > { %3014 = vmatpush1.bf16.msra.mxu1 %v9687_v61  ;;  %13835 = vst [vmem:[#allocation132_spill] sm:$0xff] %v9702_v34  ;;  %v9705_v61 = vld [vmem:[#allocation5 + $0xa0] ss:$8 sps:$4 sm:$0xff]  }
 0x58d   : > { %3015 = vmatprep.subr.bf16.mxu1 %v9690_v3  ;;  %13836 = vst [vmem:[#allocation133_spill] sm:$0xff] %v9705_v61  ;;  %v9708_v3 = vld [vmem:[#allocation5 + $0xb4] ss:$8 sps:$4 sm:$0xff]  }
 0x58e   : > { %3276 = vmatpush1.bf16.msra.mxu0 %v9693_v30  ;;  %13837 = vst [vmem:[#allocation128_spill] sm:$0xff] %v9708_v3  ;;  %v9711_v30 = vld [vmem:[#allocation10 + $0xc0] ss:$24 sps:$4 sm:$0xff]  }
 0x58f   : > { %3277 = vmatprep.subr.bf16.mxu0 %v9696_v13  ;;  %13838 = vst [vmem:[#allocation130_spill] sm:$0xff] %v9711_v30  ;;  %v9714_v13 = vld [vmem:[#allocation10 + $0xf4] ss:$24 sps:$4 sm:$0xff]  }
 0x590   : > { %3016 = vmatpush1.bf16.msra.mxu1 %v9699_v62  ;;  %13839 = vst [vmem:[#allocation134_spill] sm:$0xff] %v9714_v13  ;;  %v9717_v62 = vld [vmem:[#allocation5 + $0xb0] ss:$8 sps:$4 sm:$0xff]  }
 0x591   : > { %3017 = vmatprep.subr.bf16.mxu1 %v9702_v34  ;;  %13840 = vst [vmem:[#allocation135_spill] sm:$0xff] %v9717_v62  ;;  %v9720_v34 = vld [vmem:[#allocation5 + $0xc4] ss:$8 sps:$4 sm:$0xff]  }
 0x592   : > { %3278 = vmatpush1.bf16.msra.mxu0 %v9705_v61  ;;  %13841 = vst [vmem:[#allocation136_spill] sm:$0xff] %v9720_v34  ;;  %v9723_v61 = vld [vmem:[#allocation10 + $0xf0] ss:$24 sps:$4 sm:$0xff]  }
 0x593   : > { %3279 = vmatprep.subr.bf16.mxu0 %v9708_v3  ;;  %13842 = vst [vmem:[#allocation137_spill] sm:$0xff] %v9723_v61  ;;  %v9726_v3 = vld [vmem:[#allocation10 + $0x124] ss:$24 sps:$4 sm:$0xff]  }
 0x594   : > { %3018 = vmatpush1.bf16.msra.mxu1 %v9711_v30  ;;  %13843 = vst [vmem:[#allocation148_spill] sm:$0xff] %v9726_v3  ;;  %v9729_v30 = vld [vmem:[#allocation5 + $0xc0] ss:$8 sps:$4 sm:$0xff]  }
 0x595   : > { %3019 = vmatprep.subr.bf16.mxu1 %v9714_v13  ;;  %13844 = vst [vmem:[#allocation138_spill] sm:$0xff] %v9729_v30  ;;  %v9732_v13 = vld [vmem:[#allocation5 + $0xd4] ss:$8 sps:$4 sm:$0xff]  }
 0x596   : > { %3280 = vmatpush1.bf16.msra.mxu0 %v9717_v62  ;;  %13845 = vst [vmem:[#allocation139_spill] sm:$0xff] %v9732_v13  ;;  %v9735_v62 = vld [vmem:[#allocation10 + $0x120] ss:$24 sps:$4 sm:$0xff]  }
 0x597   : > { %3281 = vmatprep.subr.bf16.mxu0 %v9720_v34  ;;  %13846 = vst [vmem:[#allocation149_spill] sm:$0xff] %v9735_v62  ;;  %v9738_v34 = vld [vmem:[#allocation10 + $0x154] ss:$24 sps:$4 sm:$0xff]  }
 0x598   : > { %3020 = vmatpush1.bf16.msra.mxu1 %v9723_v61  ;;  %13847 = vst [vmem:[#allocation150_spill] sm:$0xff] %v9738_v34  ;;  %v9741_v61 = vld [vmem:[#allocation5 + $0xd0] ss:$8 sps:$4 sm:$0xff]  }
 0x599   : > { %3021 = vmatprep.subr.bf16.mxu1 %v9726_v3  ;;  %13848 = vst [vmem:[#allocation140_spill] sm:$0xff] %v9741_v61  ;;  %v9744_v3 = vld [vmem:[#allocation5 + $0xe4] ss:$8 sps:$4 sm:$0xff]  }
 0x59a   : > { %3282 = vmatpush1.bf16.msra.mxu0 %v9729_v30  ;;  %13849 = vst [vmem:[#allocation141_spill] sm:$0xff] %v9744_v3  ;;  %v9747_v30 = vld [vmem:[#allocation10 + $0x150] ss:$24 sps:$4 sm:$0xff]  }
 0x59b   : > { %3283 = vmatprep.subr.bf16.mxu0 %v9732_v13  ;;  %13850 = vst [vmem:[#allocation151_spill] sm:$0xff] %v9747_v30  ;;  %v9750_v13 = vld [vmem:[#allocation10 + $0x184] ss:$24 sps:$4 sm:$0xff]  }
 0x59c   : > { %3022 = vmatpush1.bf16.msra.mxu1 %v9735_v62  ;;  %13851 = vst [vmem:[#allocation152_spill] sm:$0xff] %v9750_v13  ;;  %v9753_v62 = vld [vmem:[#allocation5 + $0xe0] ss:$8 sps:$4 sm:$0xff]  }
 0x59d   : > { %3023 = vmatprep.subr.bf16.mxu1 %v9738_v34  ;;  %13852 = vst [vmem:[#allocation142_spill] sm:$0xff] %v9753_v62  ;;  %v9756_v34 = vld [vmem:[#allocation5 + $0xf4] ss:$8 sps:$4 sm:$0xff]  }
 0x59e   : > { %3284 = vmatpush1.bf16.msra.mxu0 %v9741_v61  ;;  %13853 = vst [vmem:[#allocation143_spill] sm:$0xff] %v9756_v34  ;;  %v13854_v61 = vstv %s9555_s15  ;;  %s5331_s15 = scalar_select %p5330_p4, 1, 0 }
 0x59f   : > { %3285 = vmatprep.subr.bf16.mxu0 %v9744_v3  ;;  %vm3249_vm2 = vcmp.eq.s32.totalorder %v13855_v53, %v13854_v61  ;;  %v9762_v3 = vld [vmem:[#allocation10 + $0x180] ss:$24 sps:$4 sm:$0xff]   ;;  %v9777_v61 = vld [vmem:[#allocation10 + $0x1e4] ss:$24 sps:$4 sm:$0xff]  }
 0x5a0   : > { %3024 = vmatpush1.bf16.msra.mxu1 %v9747_v30  ;;  %13856 = vst [vmem:[#allocation153_spill] sm:$0xff] %v9762_v3  ;;  %v9765_v30 = vld [vmem:[#allocation10 + $0x1b4] ss:$24 sps:$4 sm:$0xff]   ;;  %vm5857_vm3 = vmpackc.low %vm3249_vm2, %vm3249_vm2  ;;  %v13883_v53 = vld [vmem:[#allocation33_spill] sm:$0xff] }
 0x5a1   : > { %3025 = vmatprep.subr.bf16.mxu1 %v9750_v13  ;;  %13857 = vst [vmem:[#allocation154_spill] sm:$0xff] %v9765_v30  ;;  %v9768_v13 = vld [vmem:[#allocation5 + $0xf0] ss:$8 sps:$4 sm:$0xff]   ;;  %13861 = vst [vmem:[#allocation156_spill] sm:$0xff] %v9777_v61 }
 0x5a2   : > { %3286 = vmatpush1.bf16.msra.mxu0 %v9753_v62  ;;  %13858 = vst [vmem:[#allocation144_spill] sm:$0xff] %v9768_v13  ;;  %v9771_v62 = vld [vmem:[#allocation8 + $0xc] ss:$24 sps:$4 sm:$0xff]  }
 0x5a3   : > { %3287 = vmatprep.subr.bf16.mxu0 %v9756_v34  ;;  %13859 = vst [vmem:[#allocation145_spill] sm:$0xff] %v9771_v62  ;;  %v9774_v34 = vld [vmem:[#allocation10 + $0x1b0] ss:$24 sps:$4 sm:$0xff]  }
 0x5a4   : > { %3026 = vmatpush1.bf16.msra.mxu1 %v9762_v3  ;;  %13860 = vst [vmem:[#allocation155_spill] sm:$0xff] %v9774_v34  ;;  %v9784_v3 = vld [vmem:[#allocation8 + $0x3c] ss:$24 sps:$4 sm:$0xff]  }
 0x5a5   : > { %3027 = vmatprep.subr.bf16.mxu1 %v9765_v30  ;;  %v9781_v30 = vld [vmem:[#allocation8 + $0x8] ss:$24 sps:$4 sm:$0xff]   ;;  %13863 = vst [vmem:[#allocation147_spill] sm:$0xff] %v9784_v3 }
 0x5a6   : > { %3288 = vmatpush1.bf16.msra.mxu0 %v9768_v13  ;;  %13862 = vst [vmem:[#allocation146_spill] sm:$0xff] %v9781_v30  ;;  %v9787_v13 = vld [vmem:[#allocation10 + $0x1e0] ss:$24 sps:$4 sm:$0xff]  }
 0x5a7   : > { %3343 = vmatprep.subr.bf16.mxu0 %v9771_v62  ;;  %13864 = vst [vmem:[#allocation157_spill] sm:$0xff] %v9787_v13  ;;  %v9790_v62 = vld [vmem:[#allocation10 + $0x214] ss:$24 sps:$4 sm:$0xff]  }
 0x5a8   : > { %3028 = vmatpush1.bf16.msra.mxu1 %v9774_v34  ;;  %13865 = vst [vmem:[#allocation158_spill] sm:$0xff] %v9790_v62  ;;  %v9793_v34 = vld [vmem:[#allocation8 + $0x38] ss:$24 sps:$4 sm:$0xff]  }
 0x5a9   : > { %3029 = vmatprep.subr.bf16.mxu1 %v9777_v61  ;;  %5858 = vmatmul.mubr.msk.bf16.vlgmr.msra.gmra.mrb[36].mxu0 %vm5857_vm3, %v13475_v14  ;;  %13866 = vst [vmem:[#allocation159_spill] sm:$0xff] %v9793_v34  ;;  %v9796_v61 = vld [vmem:[#allocation8 + $0x6c] ss:$24 sps:$4 sm:$0xff]   ;;  %v9898_v14 = vld [vmem:[#allocation11 + $0x50] ss:$8 sps:$4 sm:$0xff]  }
 0x5aa   : > { %3344 = vmatpush1.bf16.msra.mxu0 %v9781_v30  ;;  %13867 = vst [vmem:[#allocation160_spill] sm:$0xff] %v9796_v61  ;;  %v9799_v30 = vld [vmem:[#allocation10 + $0x210] ss:$24 sps:$4 sm:$0xff]   ;;  %13912 = vst [vmem:[#allocation55_spill] sm:$0xff] %v9898_v14 }
 0x5ab   : > { %3345 = vmatprep.subr.bf16.mxu0 %v9784_v3  ;;  %13868 = vst [vmem:[#allocation161_spill] sm:$0xff] %v9799_v30  ;;  %v9802_v3 = vld [vmem:[#allocation10 + $0x244] ss:$24 sps:$4 sm:$0xff]  }
 0x5ac   : > { %3030 = vmatpush1.bf16.msra.mxu1 %v9787_v13  ;;  %13869 = vst [vmem:[#allocation162_spill] sm:$0xff] %v9802_v3  ;;  %v9805_v13 = vld [vmem:[#allocation8 + $0x68] ss:$24 sps:$4 sm:$0xff]  }
 0x5ad   : > { %3031 = vmatprep.subr.bf16.mxu1 %v9790_v62  ;;  %13870 = vst [vmem:[#allocation163_spill] sm:$0xff] %v9805_v13  ;;  %v9808_v62 = vld [vmem:[#allocation8 + $0x9c] ss:$24 sps:$4 sm:$0xff]  }
 0x5ae   : > { %3346 = vmatpush1.bf16.msra.mxu0 %v9793_v34  ;;  %13871 = vst [vmem:[#allocation164_spill] sm:$0xff] %v9808_v62  ;;  %v9811_v34 = vld [vmem:[#allocation10 + $0x240] ss:$24 sps:$4 sm:$0xff]  }
 0x5af   : > { %3347 = vmatprep.subr.bf16.mxu0 %v9796_v61  ;;  %13872 = vst [vmem:[#allocation165_spill] sm:$0xff] %v9811_v34  ;;  %v9814_v61 = vld [vmem:[#allocation10 + $0x274] ss:$24 sps:$4 sm:$0xff]  }
 0x5b0   : > { %3032 = vmatpush1.bf16.msra.mxu1 %v9799_v30  ;;  %13873 = vst [vmem:[#allocation166_spill] sm:$0xff] %v9814_v61  ;;  %v9817_v30 = vld [vmem:[#allocation8 + $0x98] ss:$24 sps:$4 sm:$0xff]  }
 0x5b1   : > { %3033 = vmatprep.subr.bf16.mxu1 %v9802_v3  ;;  %13874 = vst [vmem:[#allocation167_spill] sm:$0xff] %v9817_v30  ;;  %v9820_v3 = vld [vmem:[#allocation8 + $0xcc] ss:$24 sps:$4 sm:$0xff]  }
 0x5b2   : > { %3348 = vmatpush1.bf16.msra.mxu0 %v9805_v13  ;;  %13875 = vst [vmem:[#allocation168_spill] sm:$0xff] %v9820_v3  ;;  %v9823_v13 = vld [vmem:[#allocation10 + $0x270] ss:$24 sps:$4 sm:$0xff]  }
 0x5b3   : > { %3349 = vmatprep.subr.bf16.mxu0 %v9808_v62  ;;  %13876 = vst [vmem:[#allocation169_spill] sm:$0xff] %v9823_v13  ;;  %v9826_v62 = vld [vmem:[#allocation10 + $0x2a4] ss:$24 sps:$4 sm:$0xff]  }
 0x5b4   : > { %3034 = vmatpush1.bf16.msra.mxu1 %v9811_v34  ;;  %13877 = vst [vmem:[#allocation170_spill] sm:$0xff] %v9826_v62  ;;  %v9829_v34 = vld [vmem:[#allocation8 + $0xc8] ss:$24 sps:$4 sm:$0xff]  }
 0x5b5   : > { %3035 = vmatprep.subr.bf16.mxu1 %v9814_v61  ;;  %13878 = vst [vmem:[#allocation177_spill] sm:$0xff] %v9829_v34  ;;  %v9832_v61 = vld [vmem:[#allocation8 + $0xfc] ss:$24 sps:$4 sm:$0xff]  }
 0x5b6   : > { %3350 = vmatpush1.bf16.msra.mxu0 %v9817_v30  ;;  %13879 = vst [vmem:[#allocation178_spill] sm:$0xff] %v9832_v61  ;;  %v9835_v30 = vld [vmem:[#allocation10 + $0x2a0] ss:$24 sps:$4 sm:$0xff]  }
 0x5b7   : > { %3351 = vmatprep.subr.bf16.mxu0 %v9820_v3  ;;  %13880 = vst [vmem:[#allocation179_spill] sm:$0xff] %v9835_v30  ;;  %v9838_v3 = vld [vmem:[#allocation10 + $0x2d4] ss:$24 sps:$4 sm:$0xff]  }
 0x5b8   : > { %3036 = vmatpush1.bf16.msra.mxu1 %v9823_v13  ;;  %13881 = vst [vmem:[#allocation180_spill] sm:$0xff] %v9838_v3  ;;  %v13882_v13 = vld [vmem:[#allocation77_spill] sm:$0xff] }
 0x5b9   : > { %3037 = vmatprep.subr.bf16.mxu1 %v9826_v62  ;;  %v9843_v62 = vld [vmem:[#allocation10 + $0x2d0] ss:$24 sps:$4 sm:$0xff]  }
 0x5ba   : > { %3352 = vmatpush1.bf16.msra.mxu0 %v9829_v34  ;;  %13884 = vst [vmem:[#allocation181_spill] sm:$0xff] %v9843_v62  ;;  %v9846_v34 = vld [vmem:[#allocation11 + $0x4] ss:$8 sps:$4 sm:$0xff]  }
 0x5bb   : > { %3353 = vmatprep.subr.bf16.mxu0 %v9832_v61  ;;  %13885 = vst [vmem:[#allocation30_spill] sm:$0xff] %v9846_v34  ;;  %v13886_v61 = vld [vmem:[#allocation79_spill] sm:$0xff] }
 0x5bc   : > { %3038 = vmatpush1.bf16.msra.mxu1 %v9835_v30  ;;  %v13887_v30 = vld [vmem:[#allocation35_spill] sm:$0xff] }
 0x5bd   : > { %3039 = vmatprep.subr.bf16.mxu1 %v9838_v3  ;;  %v9860_v3 = vld [vmem:[#allocation11 + $0x10] ss:$8 sps:$4 sm:$0xff]  }
 0x5be   : > { %3354 = vmatpush1.bf16.msra.mxu0 %v13882_v13  ;;  %v9855_v13 = vld [vmem:[#allocation11 + $0x14] ss:$8 sps:$4 sm:$0xff]   ;;  %13892 = vst [vmem:[#allocation36_spill] sm:$0xff] %v9860_v3 }
 0x5bf   : > { %3355 = vmatprep.subr.bf16.mxu0 %v13883_v53  ;;  %13889 = vst [vmem:[#allocation34_spill] sm:$0xff] %v9855_v13  ;;  %v13890_v53 = vld [vmem:[#allocation81_spill] sm:$0xff] }
 0x5c0   : > { %3040 = vmatpush1.bf16.msra.mxu1 %v9843_v62  ;;  %v13891_v62 = vld [vmem:[#allocation37_spill] sm:$0xff] }
 0x5c1   : > { %3178 = vmatprep.subr.bf16.mxu1 %v9846_v34 }
 0x5c2   : > { %3356 = vmatpush1.bf16.msra.mxu0 %v13886_v61  ;;  %v9863_v61 = vld [vmem:[#allocation11 + $0x24] ss:$8 sps:$4 sm:$0xff]  }
 0x5c3   : > { %3042 = vmatmul.mubr.bf16.vlgmr.msra.gmra.mrb[24].mxu1 %v9445_v57  ;;  %3357 = vmatprep.subr.bf16.mxu0 %v13887_v30  ;;  %13893 = vst [vmem:[#allocation38_spill] sm:$0xff] %v9863_v61  ;;  %v13894_v57 = vld [vmem:[#allocation83_spill] sm:$0xff] }
 0x5c4   : > { %3179 = vmatpush1.bf16.msra.mxu1 %v9852_v1  ;;  %v13895_v30 = vld [vmem:[#allocation39_spill] sm:$0xff] }
 0x5c5   : > { %3180 = vmatprep.subr.bf16.mxu1 %v9855_v13  ;;  %v9868_v1 = vld [vmem:[#allocation11 + $0x20] ss:$8 sps:$4 sm:$0xff]   ;;  %v9871_v13 = vld [vmem:[#allocation11 + $0x34] ss:$8 sps:$4 sm:$0xff]  }
 0x5c6   : > { %3358 = vmatpush1.bf16.msra.mxu0 %v13890_v53  ;;  %13896 = vst [vmem:[#allocation40_spill] sm:$0xff] %v9868_v1  ;;  %13897 = vst [vmem:[#allocation182_spill] sm:$0xff] %v9871_v13  ;;  %v13899_v53 = vld [vmem:[#allocation41_spill] sm:$0xff] }
 0x5c7   : > { %3359 = vmatprep.subr.bf16.mxu0 %v13891_v62  ;;  %v13898_v62 = vld [vmem:[#allocation85_spill] sm:$0xff] }
 0x5c8   : > { %3181 = vmatpush1.bf16.msra.mxu1 %v9860_v3  ;;  %v9876_v3 = vld [vmem:[#allocation11 + $0x30] ss:$8 sps:$4 sm:$0xff]  }
 0x5c9   : > { %3182 = vmatprep.subr.bf16.mxu1 %v9863_v61  ;;  %13900 = vst [vmem:[#allocation43_spill] sm:$0xff] %v9876_v3  ;;  %v9879_v61 = vld [vmem:[#allocation11 + $0x44] ss:$8 sps:$4 sm:$0xff]  }
 0x5ca   : > { %3360 = vmatpush1.bf16.msra.mxu0 %v13894_v57  ;;  %13901 = vst [vmem:[#allocation45_spill] sm:$0xff] %v9879_v61  ;;  %v13902_v57 = vld [vmem:[#allocation87_spill] sm:$0xff] }
 0x5cb   : > { %3361 = vmatprep.subr.bf16.mxu0 %v13895_v30  ;;  %v13903_v30 = vld [vmem:[#allocation42_spill] sm:$0xff] }
 0x5cc   : > { %3183 = vmatpush1.bf16.msra.mxu1 %v9868_v1  ;;  %v9884_v1 = vld [vmem:[#allocation11 + $0x40] ss:$8 sps:$4 sm:$0xff]  }
 0x5cd   : > { %3184 = vmatprep.subr.bf16.mxu1 %v9871_v13  ;;  %13904 = vst [vmem:[#allocation47_spill] sm:$0xff] %v9884_v1  ;;  %v9887_v13 = vld [vmem:[#allocation11 + $0x54] ss:$8 sps:$4 sm:$0xff]  }
 0x5ce   : > { %3362 = vmatpush1.bf16.msra.mxu0 %v13898_v62  ;;  %13905 = vst [vmem:[#allocation49_spill] sm:$0xff] %v9887_v13 }
 0x5cf   : > { %3363 = vmatprep.subr.bf16.mxu0 %v13899_v53  ;;  %v13906_v53 = vld [vmem:[#allocation89_spill] sm:$0xff] }
 0x5d0   : > { %3185 = vmatpush1.bf16.msra.mxu1 %v9876_v3  ;;  %v13907_v3 = vld [vmem:[#allocation73_spill] sm:$0xff] }
 0x5d1   : > { %3186 = vmatprep.subr.bf16.mxu1 %v9879_v61  ;;  %v13909_v61 = vld [vmem:[#allocation44_spill] sm:$0xff] }
 0x5d2   : > { %3364 = vmatpush1.bf16.msra.mxu0 %v13902_v57  ;;  %v13910_v57 = vld [vmem:[#allocation29_spill] sm:$0xff] }
 0x5d3   : > { %3365 = vmatprep.subr.bf16.mxu0 %v13903_v30 }
 0x5d4   : > { %3187 = vmatpush1.bf16.msra.mxu1 %v9884_v1 }
 0x5d5   : > { %3188 = vmatprep.subr.bf16.mxu1 %v9887_v13 }
 0x5d6   : > { %v2794_v62 = vpop.f32.mrb[20].mxu1  ;;  %3366 = vmatpush1.bf16.msra.mxu0 %v13906_v53  ;;  %v13915_v53 = vld [vmem:[#allocation46_spill] sm:$0xff] }
 0x5d7   : > { %v9892_v34 = vadd.f32 %v2794_v62, %v13907_v3  ;;  %v2796_v36 = vpop.f32.mrb[21].mxu1  ;;  %3367 = vmatprep.subr.bf16.mxu0 %v13909_v61  ;;  %v13914_v61 = vld [vmem:[#allocation91_spill] sm:$0xff] }
 0x5d8   : > { %v9896_v60 = vadd.f32 %v2796_v36, %v13910_v57  ;;  %v2798_v30 = vpop.f32.mrb[22].mxu1  ;;  %3189 = vmatpush1.bf16.msra.mxu1 %v9898_v14  ;;  %v9918_v14 = vld [vmem:[#allocation11 + $0x70] ss:$8 sps:$4 sm:$0xff]  }
 0x5d9   : > { %13908 = vst [vmem:[#allocation51_spill] sm:$0xff] %v9892_v34  ;;  %v2799_v1 = vpop.f32.mrb[23].mxu1  ;;  %v2801_v13 = vsel %vm2382_vm14, %v9892_v34, -inf  ;;  %3190 = vmatprep.subr.bf16.mxu1 %v9903_v58  ;;  %v9910_v30 = vld [vmem:[#allocation11 + $0x60] ss:$8 sps:$4 sm:$0xff]   ;;  %v13919_v58 = vld [vmem:[#allocation48_spill] sm:$0xff] }
 0x5da   : > { %13911 = vst [vmem:[#allocation53_spill] sm:$0xff] %v9896_v60  ;;  %v2802_v62 = vsel %vm2382_vm14, %v9896_v60, -inf  ;;  %3368 = vmatpush1.bf16.msra.mxu0 %v13914_v61  ;;  %13916 = vst [vmem:[#allocation59_spill] sm:$0xff] %v9910_v30  ;;  %v9913_v1 = vld [vmem:[#allocation11 + $0x74] ss:$8 sps:$4 sm:$0xff]  }
 0x5db   : > { %v2803_v36 = vmax.f32 %v2801_v13, %v2802_v62  ;;  %3369 = vmatprep.subr.bf16.mxu0 %v13915_v53  ;;  %13917 = vst [vmem:[#allocation61_spill] sm:$0xff] %v9913_v1  ;;  %v13918_v34 = vld [vmem:[#allocation93_spill] sm:$0xff]  ;;  %13920 = vst [vmem:[#allocation63_spill] sm:$0xff] %v9918_v14  ;;  %v9921_v13 = vld [vmem:[#allocation11 + $0x84] ss:$8 sps:$4 sm:$0xff]  }
 0x5dc   : > { %3191 = vmatpush1.bf16.msra.mxu1 %v9910_v30  ;;  %13921 = vst [vmem:[#allocation65_spill] sm:$0xff] %v9921_v13  ;;  %v13922_v62 = vld [vmem:[#allocation50_spill] sm:$0xff]  ;;  %v13923_v61 = vld [vmem:[#allocation52_spill] sm:$0xff] }
 0x5dd   : > { %2804 = vmax.xlane.f32.xlu0 %v2803_v36  ;;  %3192 = vmatprep.subr.bf16.mxu1 %v9913_v1  ;;  %v9926_v36 = vld [vmem:[#allocation11 + $0x80] ss:$8 sps:$4 sm:$0xff]   ;;  %v9929_v53 = vld [vmem:[#allocation11 + $0x94] ss:$8 sps:$4 sm:$0xff]   ;;  %v9934_v60 = vld [vmem:[#allocation11 + $0x90] ss:$8 sps:$4 sm:$0xff]  }
 0x5de   : > { %3370 = vmatpush1.bf16.msra.mxu0 %v13918_v34  ;;  %13924 = vst [vmem:[#allocation67_spill] sm:$0xff] %v9926_v36  ;;  %13925 = vst [vmem:[#allocation69_spill] sm:$0xff] %v9929_v53  ;;  %v13927_v34 = vld [vmem:[#allocation54_spill] sm:$0xff] }
 0x5df   : > { %3371 = vmatprep.subr.bf16.mxu0 %v13919_v58  ;;  %v13926_v58 = vld [vmem:[#allocation97_spill] sm:$0xff]  ;;  %13928 = vst [vmem:[#allocation71_spill] sm:$0xff] %v9934_v60 }
 0x5e0   : > { %3193 = vmatpush1.bf16.msra.mxu1 %v9918_v14  ;;  %v9970_v14 = vld [vmem:[#allocation11 + $0xf0] ss:$8 sps:$4 sm:$0xff]  }
 0x5e1   : > { %3194 = vmatprep.subr.bf16.mxu1 %v9921_v13  ;;  %v9937_v13 = vld [vmem:[#allocation11 + $0xa4] ss:$8 sps:$4 sm:$0xff]   ;;  %13940 = vst [vmem:[#allocation42_spill] sm:$0xff] %v9970_v14 }
 0x5e2   : > { %3372 = vmatpush1.bf16.msra.mxu0 %v13922_v62  ;;  %13929 = vst [vmem:[#allocation77_spill] sm:$0xff] %v9937_v13  ;;  %v9940_v62 = vld [vmem:[#allocation11 + $0xa0] ss:$8 sps:$4 sm:$0xff]  }
 0x5e3   : > { %3373 = vmatprep.subr.bf16.mxu0 %v13923_v61  ;;  %13930 = vst [vmem:[#allocation33_spill] sm:$0xff] %v9940_v62  ;;  %v9943_v61 = vld [vmem:[#allocation11 + $0xb4] ss:$8 sps:$4 sm:$0xff]  }
 0x5e4   : > { %3195 = vmatpush1.bf16.msra.mxu1 %v9926_v36  ;;  %13931 = vst [vmem:[#allocation79_spill] sm:$0xff] %v9943_v61  ;;  %v9967_v36 = vld [vmem:[#allocation11 + $0xf4] ss:$8 sps:$4 sm:$0xff]  }
 0x5e5   : > { %3196 = vmatprep.subr.bf16.mxu1 %v9929_v53  ;;  %v9946_v53 = vld [vmem:[#allocation11 + $0xb0] ss:$8 sps:$4 sm:$0xff]   ;;  %13939 = vst [vmem:[#allocation87_spill] sm:$0xff] %v9967_v36 }
 0x5e6   : > { %3374 = vmatpush1.bf16.msra.mxu0 %v13926_v58  ;;  %13932 = vst [vmem:[#allocation35_spill] sm:$0xff] %v9946_v53  ;;  %v9949_v58 = vld [vmem:[#allocation11 + $0xc4] ss:$8 sps:$4 sm:$0xff]  }
 0x5e7   : > { %3468 = vmatprep.subr.bf16.mxu0 %v13927_v34  ;;  %13933 = vst [vmem:[#allocation81_spill] sm:$0xff] %v9949_v58  ;;  %v9952_v34 = vld [vmem:[#allocation11 + $0xc0] ss:$8 sps:$4 sm:$0xff]  }
 0x5e8   : > { %3197 = vmatpush1.bf16.msra.mxu1 %v9934_v60  ;;  %13934 = vst [vmem:[#allocation37_spill] sm:$0xff] %v9952_v34  ;;  %v9964_v60 = vld [vmem:[#allocation11 + $0xe0] ss:$8 sps:$4 sm:$0xff]  }
 0x5e9   : > { %3198 = vmatprep.subr.bf16.mxu1 %v9937_v13  ;;  %v9955_v13 = vld [vmem:[#allocation11 + $0xd4] ss:$8 sps:$4 sm:$0xff]   ;;  %13938 = vst [vmem:[#allocation41_spill] sm:$0xff] %v9964_v60 }
 0x5ea   : > { %13935 = vst [vmem:[#allocation83_spill] sm:$0xff] %v9955_v13 }
 0x5ec   : > { %3199 = vmatpush1.bf16.msra.mxu1 %v9940_v62  ;;  %v9958_v62 = vld [vmem:[#allocation11 + $0xd0] ss:$8 sps:$4 sm:$0xff]  }
 0x5ed   : > { %3200 = vmatprep.subr.bf16.mxu1 %v9943_v61  ;;  %13936 = vst [vmem:[#allocation39_spill] sm:$0xff] %v9958_v62  ;;  %v9961_v61 = vld [vmem:[#allocation11 + $0xe4] ss:$8 sps:$4 sm:$0xff]  }
 0x5ee   : > { %13937 = vst [vmem:[#allocation85_spill] sm:$0xff] %v9961_v61 }
 0x5f0   : > { %3201 = vmatpush1.bf16.msra.mxu1 %v9946_v53 }
 0x5f1   : > { %3202 = vmatprep.subr.bf16.mxu1 %v9949_v58 }
 0x5f4   : > { %3203 = vmatpush1.bf16.msra.mxu1 %v9952_v34 }
 0x5f5   : > { %3204 = vmatprep.subr.bf16.mxu1 %v9955_v13 }
 0x5f8   : > { %3205 = vmatpush1.bf16.msra.mxu1 %v9958_v62  ;;  %v9973_v62 = vld [vmem:[#allocation8 + $0x4] ss:$24 sps:$4 sm:$0xff]  }
 0x5f9   : > { %3206 = vmatprep.subr.bf16.mxu1 %v9961_v61  ;;  %13941 = vst [vmem:[#allocation89_spill] sm:$0xff] %v9973_v62 }
 0x5fc   : > { %v3084_v53 = vpop.f32.mrb[28].mxu0  ;;  %3207 = vmatpush1.bf16.msra.mxu1 %v9964_v60 }
 0x5fd   : > { %v3086_v58 = vpop.f32.mrb[29].mxu0  ;;  %3208 = vmatprep.subr.bf16.mxu1 %v9967_v36 }
 0x5fe   : > { %v3088_v34 = vpop.f32.mrb[30].mxu0 }
 0x5ff   : > { %v3089_v13 = vpop.f32.mrb[31].mxu0 }
 0x600   : > { %3209 = vmatpush1.bf16.msra.mxu1 %v9970_v14 }
 0x601   : > { %3302 = vmatprep.subr.bf16.mxu1 %v9973_v62 }
 0x63c   : > { %v9976_v61 = vpop.f32.mrb[32].mxu0 }
 0x63d   : > { %v9978_v1 = vpop.f32.mrb[33].mxu0 }
 0x63e   : > { %v3129_v60 = vpop.f32.mrb[34].mxu0 }
 0x63f   : > { %v3130_v30 = vpop.f32.mrb[35].mxu0  ;;  %v9990_v60 = vld [vmem:[#allocation10 + $0x8] ss:$24 sps:$4 sm:$0xff]  }
 0x640   : > { %v9993_v30 = vld [vmem:[#allocation10 + $0x3c] ss:$24 sps:$4 sm:$0xff]  }
 0x656   : > { %v9980_v57 = vpop.f32.mrb[28].mxu1 }
 0x657   : > { %v9982_v3 = vpop.f32.mrb[29].mxu1 }
 0x658   : > { %v3004_v34 = vpop.f32.mrb[30].mxu1 }
 0x659   : > { %v3005_v13 = vpop.f32.mrb[31].mxu1 }
 0x67c   : > { %v3291_v36 = vpop.f32.mrb[36].mxu0 }
 0x67d   : > { %v3298_v24 = vmax.f32 %v3291_v36, 0.0  ;;  %v3293_v56 = vpop.f32.mrb[37].mxu0 }
 0x67e   : > { %v3299_v14 = vmax.f32 %v3293_v56, 0.0  ;;  %v3295_v51 = vpop.f32.mrb[38].mxu0 }
 0x67f   : > { %v9984_v49 = vpack.c.bf16 %v3298_v24, %v3298_v24  ;;  %v3296_v62 = vpop.f32.mrb[39].mxu0  ;;  %v13942_v51 = vld [vmem:[#allocation171_spill] sm:$0xff] }
 0x680   : > { %v9986_v42 = vpack.c.bf16 %v3299_v14, %v3299_v14 }
 0x682   : > { %3375 = vmatprep.mubr.bf16.mxu0 %v9986_v42 }
 0x683   : > { %3376 = vmatmul.mubr.bf16.vlgmr.msra.gmra.mrb[40].mxu0 %v9984_v49 }
 0x684   : > { %3469 = vmatpush1.bf16.msra.mxu0 %v9990_v60 }
 0x685   : > { %3470 = vmatprep.subr.bf16.mxu0 %v9993_v30 }
 0x688   : > { %3471 = vmatpush1.bf16.msra.mxu0 %v9316_v52 }
 0x689   : > { %3472 = vmatprep.subr.bf16.mxu0 %v9319_v46 }
 0x68c   : > { %3473 = vmatpush1.bf16.msra.mxu0 %v9328_v7 }
 0x68d   : > { %3474 = vmatprep.subr.bf16.mxu0 %v9331_v11  ;;  %v13943_v11 = vld [vmem:[#allocation172_spill] sm:$0xff] }
 0x690   : > { %3475 = vmatpush1.bf16.msra.mxu0 %v9336_v10  ;;  %v5922_v10 = vadd.f32 %v3084_v53, %v13943_v11 }
 0x691   : > { %3476 = vmatprep.subr.bf16.mxu0 %v9339_v16 }
 0x694   : > { %3477 = vmatpush1.bf16.msra.mxu0 %v9342_v47  ;;  %v5923_v47 = vadd.f32 %v3086_v58, %v8776_v32 }
 0x695   : > { %3478 = vmatprep.subr.bf16.mxu0 %v9345_v55  ;;  %v5851_v55 = vmul.f32 -1.442695, %v5922_v10 }
 0x696   : > { %v3043_v14 = vpop.f32.mrb[24].mxu1  ;;  %v5852_v62 = vmul.f32 -1.442695, %v5923_v47 }
 0x697   : > { %v5920_v56 = vadd.f32 %v3043_v14, %v13942_v51  ;;  %v3045_v24 = vpop.f32.mrb[25].mxu1  ;;  %v13946_v14 = vld [vmem:[#allocation176_spill] sm:$0xff] }
 0x698   : > { %v5921_v52 = vadd.f32 %v3045_v24, %v8772_v39  ;;  %v3047_v36 = vpop.f32.mrb[26].mxu1  ;;  %3479 = vmatpush1.bf16.msra.mxu0 %v9350_v54 }
 0x699   : > { %v5849_v46 = vmul.f32 -1.442695, %v5920_v56  ;;  %v3048_v7 = vpop.f32.mrb[27].mxu1  ;;  %3480 = vmatprep.subr.bf16.mxu0 %v9353_v25 }
 0x69a   : > { %v5850_v16 = vmul.f32 -1.442695, %v5921_v52 }
 0x69b   : > { %6526 = vpow2.f32 %v5849_v46 }
 0x69c   : > { %6528 = vpow2.f32 %v5850_v16  ;;  %3481 = vmatpush1.bf16.msra.mxu0 %v9366_v59 }
 0x69d   : > { %3482 = vmatprep.subr.bf16.mxu0 %v9371_v40  ;;  %6530 = vpow2.f32 %v5851_v55  ;;  %v10057_v55 = vld [vmem:[#allocation8] ss:$24 sps:$4 sm:$0xff]  }
 0x69e   : > { %6532 = vpow2.f32 %v5852_v62  ;;  %v10072_v62 = vld [vmem:[#allocation8 + $0x64] ss:$24 sps:$4 sm:$0xff]  }
 0x6a0   : > { %3483 = vmatpush1.bf16.msra.mxu0 %v9376_v35 }
 0x6a1   : > { %3484 = vmatprep.subr.bf16.mxu0 %v9379_v28 }
 0x6a4   : > { %3485 = vmatpush1.bf16.msra.mxu0 %v9384_v45  ;;  %v3160_v45 = vadd.f32 %v9976_v61, %v8786_v22 }
 0x6a5   : > { %v6527_v25 = vpop.eup %6526  ;;  %3486 = vmatprep.subr.bf16.mxu0 %v9387_v26 }
 0x6a6   : > { %v6529_v54 = vpop.eup %6528  ;;  %v3140_v53 = vadd.f32 1.0, %v6527_v25  ;;  %v10084_v25 = vld [vmem:[#allocation8 + $0x90] ss:$24 sps:$4 sm:$0xff]  }
 0x6a7   : > { %v3141_v58 = vadd.f32 1.0, %v6529_v54  ;;  %v6531_v59 = vpop.eup %6530  ;;  %v10108_v54 = vld [vmem:[#allocation8 + $0x120] ss:$24 sps:$4 sm:$0xff]  }
 0x6a8   : > { %6534 = vrcp.f32 %v3140_v53  ;;  %3487 = vmatpush1.bf16.msra.mxu0 %v9392_v37  ;;  %v6533_v40 = vpop.eup %6532  ;;  %v3154_v35 = vadd.f32 1.0, %v6531_v59  ;;  %v13944_v37 = vld [vmem:[#allocation174_spill] sm:$0xff]  ;;  %v10112_v53 = vld [vmem:[#allocation8 + $0x154] ss:$24 sps:$4 sm:$0xff]  }
 0x6a9   : > { %6536 = vrcp.f32 %v3141_v58  ;;  %3488 = vmatprep.subr.bf16.mxu0 %v9395_v48  ;;  %v3155_v28 = vadd.f32 1.0, %v6533_v40  ;;  %v3161_v48 = vadd.f32 %v9978_v1, %v13944_v37  ;;  %v10116_v58 = vld [vmem:[#allocation8 + $0x150] ss:$24 sps:$4 sm:$0xff]   ;;  %v10120_v59 = vld [vmem:[#allocation8 + $0x184] ss:$24 sps:$4 sm:$0xff]  }
 0x6aa   : > { %6538 = vrcp.f32 %v3154_v35  ;;  %v13951_v40 = vld [vmem:[#allocation101_spill] sm:$0xff] }
 0x6ab   : > { %6540 = vrcp.f32 %v3155_v28  ;;  %v10124_v35 = vld [vmem:[#allocation8 + $0x180] ss:$24 sps:$4 sm:$0xff]  }
 0x6ac   : > { %3489 = vmatpush1.bf16.msra.mxu0 %v9400_v31  ;;  %v13945_v31 = vld [vmem:[#allocation175_spill] sm:$0xff]  ;;  %v13952_v28 = vld [vmem:[#allocation60_spill] sm:$0xff] }
 0x6ad   : > { %3490 = vmatprep.subr.bf16.mxu0 %v9403_v21  ;;  %v3001_v13 = vadd.f32 %v9980_v57, %v13945_v31 }
 0x6b0   : > { %3491 = vmatpush1.bf16.msra.mxu0 %v9408_v33  ;;  %v3003_v33 = vadd.f32 %v9982_v3, %v13946_v14 }
 0x6b1   : > { %3492 = vmatprep.subr.bf16.mxu0 %v9411_v8 }
 0x6b2   : > { %v6535_v26 = vpop.eup %6534 }
 0x6b3   : > { %v6537_v34 = vpop.eup %6536  ;;  %v3162_v21 = vmul.f32 %v6535_v26, %v3160_v45  ;;  %v10128_v45 = vld [vmem:[#allocation8 + $0x1b4] ss:$24 sps:$4 sm:$0xff]   ;;  %v13953_v26 = vld [vmem:[#allocation102_spill] sm:$0xff] }
 0x6b4   : > { %v3163_v56 = vmul.f32 %v6537_v34, %v3161_v48  ;;  %3493 = vmatpush1.bf16.msra.mxu0 %v9416_v63  ;;  %v6539_v57 = vpop.eup %6538  ;;  %v10132_v48 = vld [vmem:[#allocation8 + $0x1b0] ss:$24 sps:$4 sm:$0xff]  }
 0x6b5   : > { %v3164_v61 = vadd.f32 %v3162_v21, %v3001_v13  ;;  %3494 = vmatprep.subr.bf16.mxu0 %v9419_v43  ;;  %v6541_v3 = vpop.eup %6540  ;;  %v3168_v63 = vsub.f32 1.0, %v6539_v57  ;;  %v3242_v43 = vstv %s3241_s20  ;;  %v13954_v34 = vld [vmem:[#allocation62_spill] sm:$0xff]  ;;  %v13955_v21 = vld [vmem:[#allocation103_spill] sm:$0xff] }
 0x6b6   : > { %v3165_v8 = vadd.f32 %v3163_v56, %v3003_v33  ;;  %v3169_v24 = vsub.f32 1.0, %v6541_v3  ;;  %v3173_v46 = vmul.f32 %v6541_v3, %v9360_v50  ;;  %vm3243_vm4 = vcmp.eq.s32.totalorder %v3242_v43, 1  ;;  %v10136_v13 = vld [vmem:[#allocation8 + $0x1e4] ss:$24 sps:$4 sm:$0xff]   ;;  %v10140_v33 = vld [vmem:[#allocation8 + $0x1e0] ss:$24 sps:$4 sm:$0xff]  }
 0x6b7   : > { %6542 = vtanh.f32 %v3164_v61  ;;  %v13956_v56 = vld [vmem:[#allocation64_spill] sm:$0xff]  ;;  %v13958_v3 = vld [vmem:[#allocation66_spill] sm:$0xff]  ;;  %v13959_v43 = vld [vmem:[#allocation105_spill] sm:$0xff] }
 0x6b8   : > { %6544 = vtanh.f32 %v3165_v8  ;;  %3495 = vmatpush1.bf16.msra.mxu0 %v9424_v29  ;;  %v3172_v29 = vmul.f32 %v6539_v57, %v9357_v5  ;;  %v10144_v61 = vld [vmem:[#allocation8 + $0x214] ss:$24 sps:$4 sm:$0xff]   ;;  %v10148_v57 = vld [vmem:[#allocation8 + $0x210] ss:$24 sps:$4 sm:$0xff]  }
 0x6b9   : > { %3496 = vmatprep.subr.bf16.mxu0 %v9427_v23  ;;  %v13957_v8 = vld [vmem:[#allocation104_spill] sm:$0xff] }
 0x6bc   : > { %3497 = vmatpush1.bf16.msra.mxu0 %v9432_v44 }
 0x6bd   : > { %3498 = vmatprep.subr.bf16.mxu0 %v9435_v19 }
 0x6c0   : > { %3499 = vmatpush1.bf16.msra.mxu0 %v9440_v41 }
 0x6c1   : > { %v6543_v1 = vpop.eup %6542  ;;  %3509 = vmatprep.subr.bf16.mxu0 %v9447_v27 }
 0x6c2   : > { %v6545_v52 = vpop.eup %6544  ;;  %v3170_v36 = vmul.f32 %v6543_v1, %v3168_v63  ;;  %v10152_v63 = vld [vmem:[#allocation8 + $0x244] ss:$24 sps:$4 sm:$0xff]   ;;  %v10157_v1 = vld [vmem:[#allocation8 + $0x240] ss:$24 sps:$4 sm:$0xff]  }
 0x6c3   : > { %v3171_v23 = vmul.f32 %v6545_v52, %v3169_v24  ;;  %v13960_v24 = vld [vmem:[#allocation68_spill] sm:$0xff] }
 0x6c4   : > { %v3174_v44 = vadd.f32 %v3172_v29, %v3170_v36  ;;  %v10161_v52 = vld [vmem:[#allocation8 + $0x274] ss:$24 sps:$4 sm:$0xff]   ;;  %v13961_v36 = vld [vmem:[#allocation106_spill] sm:$0xff] }
 0x6c5   : > { %v3175_v7 = vadd.f32 %v3173_v46, %v3171_v23  ;;  %v10169_v29 = vld [vmem:[#allocation8 + $0x270] ss:$24 sps:$4 sm:$0xff]   ;;  %v10173_v46 = vld [vmem:[#allocation8 + $0x2a4] ss:$24 sps:$4 sm:$0xff]  }
 0x6c6   : > { %v10043_v19 = vsel %vm3243_vm4, %v3174_v44, %v9357_v5  ;;  %v3176_v16 = vpack.c.bf16 %v3174_v44, %v3174_v44  ;;  %v10063_v5 = vld [vmem:[#allocation8 + $0x34] ss:$24 sps:$4 sm:$0xff]   ;;  %v13962_v23 = vld [vmem:[#allocation70_spill] sm:$0xff] }
 0x6c7   : > { %v3177_v41 = vpack.c.bf16 %v3175_v7, %v3175_v7  ;;  %v10046_v10 = vsel %vm3243_vm4, %v3175_v7, %v9360_v50  ;;  %v10054_v47 = vpack.c.bf16 %v10043_v19, %v10043_v19  ;;  %v10068_v50 = vld [vmem:[#allocation8 + $0x30] ss:$24 sps:$4 sm:$0xff]   ;;  %v10177_v7 = vld [vmem:[#allocation8 + $0x2a0] ss:$24 sps:$4 sm:$0xff]  }
 0x6c8   : > { %v10050_v27 = vpack.c.bf16 %v10046_v10, %v10046_v10  ;;  %v13963_v44 = vld [vmem:[#allocation107_spill] sm:$0xff] }
 0x6c9   : > { %3210 = vmatprep.mubr.bf16.mxu1 %v3177_v41  ;;  %v13964_v41 = vld [vmem:[#allocation72_spill] sm:$0xff] }
 0x6ca   : > { %3211 = vmatmul.mubr.bf16.vlgmr.msra.gmra.mrb[32].mxu1 %v3176_v16  ;;  %3500 = vmatprep.mubr.bf16.mxu0 %v10050_v27  ;;  %v10181_v16 = vld [vmem:[#allocation8 + $0x2d4] ss:$24 sps:$4 sm:$0xff]  }
 0x6cb   : > { %3303 = vmatpush1.bf16.msra.mxu1 %v10057_v55  ;;  %3501 = vmatmul.mubr.bf16.vlgmr.msra.gmra.mrb[40].mxu0 %v10054_v47 }
 0x6cc   : > { %3510 = vmatpush1.bf16.msra.mxu0 %v9453_v38  ;;  %3541 = vmatprep.mubr.bf16.mxu0 %v10050_v27  ;;  %v10076_v38 = vld [vmem:[#allocation8 + $0x60] ss:$24 sps:$4 sm:$0xff]  }
 0x6cd   : > { %3304 = vmatprep.subr.bf16.mxu1 %v10063_v5  ;;  %3511 = vmatprep.subr.bf16.mxu0 %v9457_v0  ;;  %v10080_v0 = vld [vmem:[#allocation8 + $0x94] ss:$24 sps:$4 sm:$0xff]  }
 0x6ce   : > { %3334 = vmatprep.mubr.bf16.mxu1 %v9986_v42 }
 0x6cf   : > { %3305 = vmatpush1.bf16.msra.mxu1 %v10068_v50 }
 0x6d0   : > { %3512 = vmatpush1.bf16.msra.mxu0 %v9462_v2  ;;  %3306 = vmatprep.subr.bf16.mxu1 %v10072_v62  ;;  %v10088_v2 = vld [vmem:[#allocation8 + $0xc4] ss:$24 sps:$4 sm:$0xff]  }
 0x6d1   : > { %3513 = vmatprep.subr.bf16.mxu0 %v9465_v4  ;;  %v10092_v4 = vld [vmem:[#allocation8 + $0xc0] ss:$24 sps:$4 sm:$0xff]  }
 0x6d3   : > { %3307 = vmatpush1.bf16.msra.mxu1 %v10076_v38 }
 0x6d4   : > { %3514 = vmatpush1.bf16.msra.mxu0 %v9470_v6  ;;  %3308 = vmatprep.subr.bf16.mxu1 %v10080_v0  ;;  %v10096_v6 = vld [vmem:[#allocation8 + $0xf4] ss:$24 sps:$4 sm:$0xff]  }
 0x6d5   : > { %3515 = vmatprep.subr.bf16.mxu0 %v9473_v18  ;;  %v10100_v18 = vld [vmem:[#allocation8 + $0xf0] ss:$24 sps:$4 sm:$0xff]  }
 0x6d7   : > { %3309 = vmatpush1.bf16.msra.mxu1 %v10084_v25 }
 0x6d8   : > { %3516 = vmatpush1.bf16.msra.mxu0 %v9478_v9  ;;  %3310 = vmatprep.subr.bf16.mxu1 %v10088_v2  ;;  %v10104_v9 = vld [vmem:[#allocation8 + $0x124] ss:$24 sps:$4 sm:$0xff]  }
 0x6d9   : > { %3517 = vmatprep.subr.bf16.mxu0 %v9481_v12  ;;  %v13947_v12 = vld [vmem:[#allocation99_spill] sm:$0xff] }
 0x6db   : > { %3311 = vmatpush1.bf16.msra.mxu1 %v10092_v4 }
 0x6dc   : > { %3518 = vmatpush1.bf16.msra.mxu0 %v9486_v15  ;;  %3312 = vmatprep.subr.bf16.mxu1 %v10096_v6  ;;  %v13948_v15 = vld [vmem:[#allocation56_spill] sm:$0xff] }
 0x6dd   : > { %3519 = vmatprep.subr.bf16.mxu0 %v9489_v17  ;;  %v13949_v17 = vld [vmem:[#allocation100_spill] sm:$0xff] }
 0x6df   : > { %3313 = vmatpush1.bf16.msra.mxu1 %v10100_v18 }
 0x6e0   : > { %3520 = vmatpush1.bf16.msra.mxu0 %v9494_v20  ;;  %3314 = vmatprep.subr.bf16.mxu1 %v10104_v9  ;;  %v13950_v20 = vld [vmem:[#allocation58_spill] sm:$0xff] }
 0x6e1   : > { %3521 = vmatprep.subr.bf16.mxu0 %v13947_v12  ;;  %v13018_v12 = vstv %s10166_s11 }
 0x6e3   : > { %3315 = vmatpush1.bf16.msra.mxu1 %v10108_v54 }
 0x6e4   : > { %3522 = vmatpush1.bf16.msra.mxu0 %v13948_v15  ;;  %3316 = vmatprep.subr.bf16.mxu1 %v10112_v53  ;;  %v13965_v15 = vld [vmem:[#allocation108_spill] sm:$0xff] }
 0x6e5   : > { %3523 = vmatprep.subr.bf16.mxu0 %v13949_v17  ;;  %v10186_v17 = vld [vmem:[#allocation8 + $0x2d0] ss:$24 sps:$4 sm:$0xff]  }
 0x6e7   : > { %3317 = vmatpush1.bf16.msra.mxu1 %v10116_v58 }
 0x6e8   : > { %3524 = vmatpush1.bf16.msra.mxu0 %v13950_v20  ;;  %3318 = vmatprep.subr.bf16.mxu1 %v10120_v59  ;;  %v13966_v20 = vld [vmem:[#allocation27_spill] sm:$0xff] }
 0x6e9   : > { %3525 = vmatprep.subr.bf16.mxu0 %v13951_v40  ;;  %vm3668_vm5 = vcmp.eq.s32.totalorder %v13966_v20, %v13018_v12  ;;  %v13967_v40 = vld [vmem:[#allocation74_spill] sm:$0xff] }
 0x6ea   : > { %vm5865_vm6 = vmpackc.low %vm3668_vm5, %vm3668_vm5  ;;  %v10241_v12 = vld [vmem:[#allocation8 + $0x100] ss:$24 sps:$4 sm:$0xff]  }
 0x6eb   : > { %3319 = vmatpush1.bf16.msra.mxu1 %v10124_v35  ;;  %13989 = vst [vmem:[#allocation175_spill] sm:$0xff] %v10241_v12 }
 0x6ec   : > { %3526 = vmatpush1.bf16.msra.mxu0 %v13952_v28  ;;  %3320 = vmatprep.subr.bf16.mxu1 %v10128_v45  ;;  %v10193_v28 = vld [vmem:[#allocation8 + $0x14] ss:$24 sps:$4 sm:$0xff]  }
 0x6ed   : > { %3527 = vmatprep.subr.bf16.mxu0 %v13953_v26  ;;  %v13968_v26 = vld [vmem:[#allocation109_spill] sm:$0xff] }
 0x6ef   : > { %3321 = vmatpush1.bf16.msra.mxu1 %v10132_v48 }
 0x6f0   : > { %3528 = vmatpush1.bf16.msra.mxu0 %v13954_v34  ;;  %3322 = vmatprep.subr.bf16.mxu1 %v10136_v13  ;;  %v10198_v34 = vld [vmem:[#allocation8 + $0x10] ss:$24 sps:$4 sm:$0xff]  }
 0x6f1   : > { %3529 = vmatprep.subr.bf16.mxu0 %v13955_v21  ;;  %v10203_v21 = vld [vmem:[#allocation8 + $0x44] ss:$24 sps:$4 sm:$0xff]  }
 0x6f2   : > { %13969 = vst [vmem:[#allocation44_spill] sm:$0xff] %v10203_v21 }
 0x6f3   : > { %3323 = vmatpush1.bf16.msra.mxu1 %v10140_v33 }
 0x6f4   : > { %3530 = vmatpush1.bf16.msra.mxu0 %v13956_v56  ;;  %3324 = vmatprep.subr.bf16.mxu1 %v10144_v61  ;;  %v13970_v56 = vld [vmem:[#allocation76_spill] sm:$0xff] }
 0x6f5   : > { %3531 = vmatprep.subr.bf16.mxu0 %v13957_v8  ;;  %v13971_v8 = vmov 1.0|1.0  }
 0x6f7   : > { %3325 = vmatpush1.bf16.msra.mxu1 %v10148_v57 }
 0x6f8   : > { %3532 = vmatpush1.bf16.msra.mxu0 %v13958_v3  ;;  %3326 = vmatprep.subr.bf16.mxu1 %v10152_v63  ;;  %v13972_v3 = vld [vmem:[#allocation110_spill] sm:$0xff] }
 0x6f9   : > { %3533 = vmatprep.subr.bf16.mxu0 %v13959_v43  ;;  %v10209_v43 = vld [vmem:[#allocation8 + $0x40] ss:$24 sps:$4 sm:$0xff]  }
 0x6fa   : > { %13973 = vst [vmem:[#allocation91_spill] sm:$0xff] %v10209_v43 }
 0x6fb   : > { %3327 = vmatpush1.bf16.msra.mxu1 %v10157_v1 }
 0x6fc   : > { %3534 = vmatpush1.bf16.msra.mxu0 %v13960_v24  ;;  %3328 = vmatprep.subr.bf16.mxu1 %v10161_v52  ;;  %v10212_v24 = vld [vmem:[#allocation8 + $0x74] ss:$24 sps:$4 sm:$0xff]  }
 0x6fd   : > { %3535 = vmatprep.subr.bf16.mxu0 %v13961_v36  ;;  %13974 = vst [vmem:[#allocation46_spill] sm:$0xff] %v10212_v24  ;;  %v13976_v36 = vld [vmem:[#allocation111_spill] sm:$0xff] }
 0x6ff   : > { %3329 = vmatpush1.bf16.msra.mxu1 %v10169_v29 }
 0x700   : > { %3536 = vmatpush1.bf16.msra.mxu0 %v13962_v23  ;;  %3330 = vmatprep.subr.bf16.mxu1 %v10173_v46  ;;  %v10217_v23 = vld [vmem:[#allocation8 + $0x70] ss:$24 sps:$4 sm:$0xff]  }
 0x701   : > { %3537 = vmatprep.subr.bf16.mxu0 %v13963_v44  ;;  %13977 = vst [vmem:[#allocation93_spill] sm:$0xff] %v10217_v23  ;;  %v10220_v44 = vld [vmem:[#allocation8 + $0xa4] ss:$24 sps:$4 sm:$0xff]  }
 0x702   : > { %13978 = vst [vmem:[#allocation48_spill] sm:$0xff] %v10220_v44 }
 0x703   : > { %3331 = vmatpush1.bf16.msra.mxu1 %v10177_v7 }
 0x704   : > { %3538 = vmatpush1.bf16.msra.mxu0 %v13964_v41  ;;  %3332 = vmatprep.subr.bf16.mxu1 %v10181_v16  ;;  %v13979_v41 = vld [vmem:[#allocation80_spill] sm:$0xff] }
 0x705   : > { %3539 = vmatprep.subr.bf16.mxu0 %v13965_v15  ;;  %v13980_v15 = vld [vmem:[#allocation112_spill] sm:$0xff] }
 0x707   : > { %3333 = vmatpush1.bf16.msra.mxu1 %v10186_v17 }
 0x708   : > { %3540 = vmatpush1.bf16.msra.mxu0 %v13967_v40  ;;  %3384 = vmatprep.subr.bf16.mxu1 %v10193_v28  ;;  %v10225_v40 = vld [vmem:[#allocation8 + $0xa0] ss:$24 sps:$4 sm:$0xff]  }
 0x709   : > { %3675 = vmatprep.subr.bf16.mxu0 %v13968_v26  ;;  %13981 = vst [vmem:[#allocation50_spill] sm:$0xff] %v10225_v40  ;;  %v10228_v26 = vld [vmem:[#allocation8 + $0xd4] ss:$24 sps:$4 sm:$0xff]  }
 0x70a   : > { %3335 = vmatmul.mubr.bf16.vlgmr.msra.gmra.mrb[36].mxu1 %v9984_v49  ;;  %13982 = vst [vmem:[#allocation52_spill] sm:$0xff] %v10228_v26 }
 0x70b   : > { %3385 = vmatpush1.bf16.msra.mxu1 %v10198_v34  ;;  %3416 = vmatprep.mubr.bf16.mxu1 %v9986_v42  ;;  %v13975_v42 = vld [vmem:[#allocation78_spill] sm:$0xff] }
 0x70c   : > { %3542 = vmatmul.mubr.bf16.vlgmr.msra.gmra.mrb[44].mxu0 %v10054_v47  ;;  %3386 = vmatprep.subr.bf16.mxu1 %v10203_v21 }
 0x70d   : > { %3676 = vmatpush1.bf16.msra.mxu0 %v13970_v56  ;;  %5866 = vmatprep.mubr.msk.bf16.mxu0 %vm5865_vm6, %v13971_v8  ;;  %v13983_v56 = vld [vmem:[#allocation82_spill] sm:$0xff] }
 0x70e   : > { %3677 = vmatprep.subr.bf16.mxu0 %v13972_v3  ;;  %v13984_v3 = vld [vmem:[#allocation113_spill] sm:$0xff] }
 0x70f   : > { %3387 = vmatpush1.bf16.msra.mxu1 %v10209_v43  ;;  %v14115_v43 = vld [vmem:[#allocation59_spill] sm:$0xff] }
 0x710   : > { %3388 = vmatprep.subr.bf16.mxu1 %v10212_v24 }
 0x711   : > { %3678 = vmatpush1.bf16.msra.mxu0 %v13975_v42  ;;  %v10233_v42 = vld [vmem:[#allocation8 + $0xd0] ss:$24 sps:$4 sm:$0xff]  }
 0x712   : > { %3679 = vmatprep.subr.bf16.mxu0 %v13976_v36  ;;  %13985 = vst [vmem:[#allocation97_spill] sm:$0xff] %v10233_v42  ;;  %v10236_v36 = vld [vmem:[#allocation8 + $0x104] ss:$24 sps:$4 sm:$0xff]  }
 0x713   : > { %3389 = vmatpush1.bf16.msra.mxu1 %v10217_v23  ;;  %13986 = vst [vmem:[#allocation54_spill] sm:$0xff] %v10236_v36  ;;  %v14028_v23 = vld [vmem:[#allocation143_spill] sm:$0xff] }
 0x714   : > { %3390 = vmatprep.subr.bf16.mxu1 %v10220_v44  ;;  %v14026_v44 = vld [vmem:[#allocation116_spill] sm:$0xff] }
 0x715   : > { %3680 = vmatpush1.bf16.msra.mxu0 %v13979_v41  ;;  %v13987_v41 = vld [vmem:[#allocation86_spill] sm:$0xff] }
 0x716   : > { %3681 = vmatprep.subr.bf16.mxu0 %v13980_v15  ;;  %v13988_v15 = vld [vmem:[#allocation115_spill] sm:$0xff] }
 0x717   : > { %3391 = vmatpush1.bf16.msra.mxu1 %v10225_v40  ;;  %v14024_v40 = vld [vmem:[#allocation141_spill] sm:$0xff] }
 0x718   : > { %3392 = vmatprep.subr.bf16.mxu1 %v10228_v26  ;;  %v10244_v26 = vld [vmem:[#allocation8 + $0x134] ss:$24 sps:$4 sm:$0xff]  }
 0x719   : > { %3682 = vmatpush1.bf16.msra.mxu0 %v13983_v56  ;;  %13990 = vst [vmem:[#allocation176_spill] sm:$0xff] %v10244_v26  ;;  %v13991_v56 = vld [vmem:[#allocation90_spill] sm:$0xff] }
 0x71a   : > { %3683 = vmatprep.subr.bf16.mxu0 %v13984_v3  ;;  %v13992_v3 = vld [vmem:[#allocation117_spill] sm:$0xff] }
 0x71b   : > { %3393 = vmatpush1.bf16.msra.mxu1 %v10233_v42  ;;  %v10249_v42 = vld [vmem:[#allocation8 + $0x130] ss:$24 sps:$4 sm:$0xff]  }
 0x71c   : > { %3394 = vmatprep.subr.bf16.mxu1 %v10236_v36  ;;  %13993 = vst [vmem:[#allocation99_spill] sm:$0xff] %v10249_v42  ;;  %v10252_v36 = vld [vmem:[#allocation8 + $0x164] ss:$24 sps:$4 sm:$0xff]  }
 0x71d   : > { %3684 = vmatpush1.bf16.msra.mxu0 %v13987_v41  ;;  %13994 = vst [vmem:[#allocation56_spill] sm:$0xff] %v10252_v36  ;;  %v13995_v41 = vld [vmem:[#allocation94_spill] sm:$0xff] }
 0x71e   : > { %3685 = vmatprep.subr.bf16.mxu0 %v13988_v15  ;;  %v13996_v15 = vld [vmem:[#allocation119_spill] sm:$0xff] }
 0x71f   : > { %3395 = vmatpush1.bf16.msra.mxu1 %v10241_v12  ;;  %v10257_v12 = vld [vmem:[#allocation8 + $0x160] ss:$24 sps:$4 sm:$0xff]  }
 0x720   : > { %3396 = vmatprep.subr.bf16.mxu1 %v10244_v26  ;;  %13997 = vst [vmem:[#allocation100_spill] sm:$0xff] %v10257_v12  ;;  %v10260_v26 = vld [vmem:[#allocation8 + $0x194] ss:$24 sps:$4 sm:$0xff]  }
 0x721   : > { %3686 = vmatpush1.bf16.msra.mxu0 %v13991_v56  ;;  %13998 = vst [vmem:[#allocation58_spill] sm:$0xff] %v10260_v26  ;;  %v13999_v56 = vld [vmem:[#allocation96_spill] sm:$0xff] }
 0x722   : > { %3687 = vmatprep.subr.bf16.mxu0 %v13992_v3  ;;  %v14000_v3 = vld [vmem:[#allocation124_spill] sm:$0xff] }
 0x723   : > { %3397 = vmatpush1.bf16.msra.mxu1 %v10249_v42  ;;  %v10265_v42 = vld [vmem:[#allocation8 + $0x190] ss:$24 sps:$4 sm:$0xff]  }
 0x724   : > { %3398 = vmatprep.subr.bf16.mxu1 %v10252_v36  ;;  %14001 = vst [vmem:[#allocation101_spill] sm:$0xff] %v10265_v42  ;;  %v10268_v36 = vld [vmem:[#allocation8 + $0x1c4] ss:$24 sps:$4 sm:$0xff]  }
 0x725   : > { %3688 = vmatpush1.bf16.msra.mxu0 %v13995_v41  ;;  %14002 = vst [vmem:[#allocation60_spill] sm:$0xff] %v10268_v36  ;;  %v14003_v41 = vld [vmem:[#allocation127_spill] sm:$0xff] }
 0x726   : > { %3689 = vmatprep.subr.bf16.mxu0 %v13996_v15  ;;  %v14004_v15 = vld [vmem:[#allocation129_spill] sm:$0xff] }
 0x727   : > { %3399 = vmatpush1.bf16.msra.mxu1 %v10257_v12  ;;  %v10273_v12 = vld [vmem:[#allocation8 + $0x1c0] ss:$24 sps:$4 sm:$0xff]  }
 0x728   : > { %3400 = vmatprep.subr.bf16.mxu1 %v10260_v26  ;;  %14005 = vst [vmem:[#allocation102_spill] sm:$0xff] %v10273_v12  ;;  %v10276_v26 = vld [vmem:[#allocation8 + $0x1f4] ss:$24 sps:$4 sm:$0xff]  }
 0x729   : > { %3690 = vmatpush1.bf16.msra.mxu0 %v13999_v56  ;;  %14006 = vst [vmem:[#allocation62_spill] sm:$0xff] %v10276_v26  ;;  %v14007_v56 = vld [vmem:[#allocation131_spill] sm:$0xff] }
 0x72a   : > { %3691 = vmatprep.subr.bf16.mxu0 %v14000_v3  ;;  %v14008_v3 = vld [vmem:[#allocation125_spill] sm:$0xff] }
 0x72b   : > { %3401 = vmatpush1.bf16.msra.mxu1 %v10265_v42  ;;  %v10281_v42 = vld [vmem:[#allocation8 + $0x1f0] ss:$24 sps:$4 sm:$0xff]  }
 0x72c   : > { %3402 = vmatprep.subr.bf16.mxu1 %v10268_v36  ;;  %14009 = vst [vmem:[#allocation103_spill] sm:$0xff] %v10281_v42  ;;  %v10284_v36 = vld [vmem:[#allocation8 + $0x224] ss:$24 sps:$4 sm:$0xff]  }
 0x72d   : > { %3692 = vmatpush1.bf16.msra.mxu0 %v14003_v41  ;;  %14010 = vst [vmem:[#allocation64_spill] sm:$0xff] %v10284_v36  ;;  %v14011_v41 = vld [vmem:[#allocation133_spill] sm:$0xff] }
 0x72e   : > { %3693 = vmatprep.subr.bf16.mxu0 %v14004_v15  ;;  %v14012_v15 = vld [vmem:[#allocation128_spill] sm:$0xff] }
 0x72f   : > { %3403 = vmatpush1.bf16.msra.mxu1 %v10273_v12  ;;  %v10289_v12 = vld [vmem:[#allocation8 + $0x220] ss:$24 sps:$4 sm:$0xff]  }
 0x730   : > { %3404 = vmatprep.subr.bf16.mxu1 %v10276_v26  ;;  %14013 = vst [vmem:[#allocation104_spill] sm:$0xff] %v10289_v12  ;;  %v10292_v26 = vld [vmem:[#allocation8 + $0x254] ss:$24 sps:$4 sm:$0xff]  }
 0x731   : > { %3694 = vmatpush1.bf16.msra.mxu0 %v14007_v56  ;;  %14014 = vst [vmem:[#allocation66_spill] sm:$0xff] %v10292_v26  ;;  %v14015_v56 = vld [vmem:[#allocation135_spill] sm:$0xff] }
 0x732   : > { %3695 = vmatprep.subr.bf16.mxu0 %v14008_v3  ;;  %v14016_v3 = vld [vmem:[#allocation136_spill] sm:$0xff] }
 0x733   : > { %3405 = vmatpush1.bf16.msra.mxu1 %v10281_v42  ;;  %v10297_v42 = vld [vmem:[#allocation8 + $0x250] ss:$24 sps:$4 sm:$0xff]  }
 0x734   : > { %3406 = vmatprep.subr.bf16.mxu1 %v10284_v36  ;;  %14017 = vst [vmem:[#allocation105_spill] sm:$0xff] %v10297_v42  ;;  %v14021_v36 = vld [vmem:[#allocation84_spill] sm:$0xff] }
 0x735   : > { %3696 = vmatpush1.bf16.msra.mxu0 %v14011_v41  ;;  %v10300_v41 = vld [vmem:[#allocation8 + $0x284] ss:$24 sps:$4 sm:$0xff]  }
 0x736   : > { %3697 = vmatprep.subr.bf16.mxu0 %v14012_v15  ;;  %14018 = vst [vmem:[#allocation68_spill] sm:$0xff] %v10300_v41  ;;  %v14019_v15 = vld [vmem:[#allocation138_spill] sm:$0xff] }
 0x737   : > { %3407 = vmatpush1.bf16.msra.mxu1 %v10289_v12  ;;  %v14020_v12 = vld [vmem:[#allocation139_spill] sm:$0xff] }
 0x738   : > { %3408 = vmatprep.subr.bf16.mxu1 %v10292_v26  ;;  %v14022_v26 = vld [vmem:[#allocation114_spill] sm:$0xff] }
 0x739   : > { %3698 = vmatpush1.bf16.msra.mxu0 %v14015_v56  ;;  %v14023_v56 = vld [vmem:[#allocation140_spill] sm:$0xff] }
 0x73a   : > { %3699 = vmatprep.subr.bf16.mxu0 %v14016_v3  ;;  %v14025_v3 = vld [vmem:[#allocation88_spill] sm:$0xff] }
 0x73b   : > { %3409 = vmatpush1.bf16.msra.mxu1 %v10297_v42  ;;  %v14027_v42 = vld [vmem:[#allocation142_spill] sm:$0xff] }
 0x73c   : > { %3410 = vmatprep.subr.bf16.mxu1 %v10300_v41  ;;  %v14029_v41 = vstv %s10166_s11 }
 0x73d   : > { %3700 = vmatpush1.bf16.msra.mxu0 %v14019_v15  ;;  %v14030_v15 = vld [vmem:[#allocation26_spill] sm:$0xff] }
 0x73e   : > { %3701 = vmatprep.subr.bf16.mxu0 %v14020_v12  ;;  %vm3667_vm7 = vcmp.eq.s32.totalorder %v14030_v15, %v14029_v41  ;;  %v14031_v12 = vld [vmem:[#allocation92_spill] sm:$0xff]  ;;  %v14039_v41 = vld [vmem:[#allocation98_spill] sm:$0xff] }
 0x73f   : > { %3411 = vmatpush1.bf16.msra.mxu1 %v14021_v36  ;;  %v14032_v36 = vld [vmem:[#allocation118_spill] sm:$0xff]  ;;  %vm5867_vm8 = vmpackc.low %vm3667_vm7, %vm3667_vm7 }
 0x740   : > { %3412 = vmatprep.subr.bf16.mxu1 %v14022_v26  ;;  %v14033_v26 = vld [vmem:[#allocation144_spill] sm:$0xff] }
 0x741   : > { %3702 = vmatpush1.bf16.msra.mxu0 %v14023_v56  ;;  %v14035_v56 = vld [vmem:[#allocation95_spill] sm:$0xff] }
 0x742   : > { %3703 = vmatprep.subr.bf16.mxu0 %v14024_v40  ;;  %v14034_v40 = vld [vmem:[#allocation145_spill] sm:$0xff] }
 0x743   : > { %3413 = vmatpush1.bf16.msra.mxu1 %v14025_v3  ;;  %v14040_v3 = vld [vmem:[#allocation121_spill] sm:$0xff] }
 0x744   : > { %3414 = vmatprep.subr.bf16.mxu1 %v14026_v44  ;;  %v14036_v44 = vld [vmem:[#allocation120_spill] sm:$0xff] }
 0x745   : > { %3704 = vmatpush1.bf16.msra.mxu0 %v14027_v42  ;;  %v14038_v42 = vld [vmem:[#allocation147_spill] sm:$0xff] }
 0x746   : > { %3705 = vmatprep.subr.bf16.mxu0 %v14028_v23  ;;  %v14037_v23 = vld [vmem:[#allocation146_spill] sm:$0xff] }
 0x747   : > { %3415 = vmatpush1.bf16.msra.mxu1 %v14031_v12  ;;  %v14041_v12 = vld [vmem:[#allocation159_spill] sm:$0xff] }
 0x748   : > { %3427 = vmatprep.subr.bf16.mxu1 %v14032_v36  ;;  %v14043_v36 = vld [vmem:[#allocation122_spill] sm:$0xff] }
 0x749   : > { %3706 = vmatpush1.bf16.msra.mxu0 %v14033_v26  ;;  %v14044_v26 = vld [vmem:[#allocation123_spill] sm:$0xff] }
 0x74a   : > { %3417 = vmatmul.mubr.bf16.vlgmr.msra.gmra.mrb[40].mxu1 %v9984_v49  ;;  %3761 = vmatprep.subr.bf16.mxu0 %v14034_v40  ;;  %v14042_v49 = vld [vmem:[#allocation160_spill] sm:$0xff] }
 0x74b   : > { %3428 = vmatpush1.bf16.msra.mxu1 %v14035_v56  ;;  %3459 = vmatprep.mubr.bf16.mxu1 %v10050_v27  ;;  %v14045_v27 = vld [vmem:[#allocation163_spill] sm:$0xff]  ;;  %v14046_v40 = vld [vmem:[#allocation164_spill] sm:$0xff]  ;;  %v14047_v56 = vld [vmem:[#allocation126_spill] sm:$0xff] }
 0x74c   : > { %3429 = vmatprep.subr.bf16.mxu1 %v14036_v44  ;;  %5868 = vmatmul.mubr.msk.bf16.vlgmr.msra.gmra.mrb[48].mxu0 %vm5867_vm8, %v13971_v8  ;;  %v14048_v44 = vld [vmem:[#allocation132_spill] sm:$0xff] }
 0x74d   : > { %3762 = vmatpush1.bf16.msra.mxu0 %v14037_v23  ;;  %v14049_v23 = vld [vmem:[#allocation167_spill] sm:$0xff] }
 0x74e   : > { %3763 = vmatprep.subr.bf16.mxu0 %v14038_v42  ;;  %v14050_v42 = vld [vmem:[#allocation168_spill] sm:$0xff] }
 0x74f   : > { %3430 = vmatpush1.bf16.msra.mxu1 %v14039_v41  ;;  %v14051_v41 = vld [vmem:[#allocation130_spill] sm:$0xff] }
 0x750   : > { %3431 = vmatprep.subr.bf16.mxu1 %v14040_v3  ;;  %v14052_v3 = vld [vmem:[#allocation134_spill] sm:$0xff] }
 0x751   : > { %3764 = vmatpush1.bf16.msra.mxu0 %v14041_v12  ;;  %v14053_v12 = vld [vmem:[#allocation177_spill] sm:$0xff] }
 0x752   : > { %3765 = vmatprep.subr.bf16.mxu0 %v14042_v49  ;;  %v14054_v49 = vld [vmem:[#allocation178_spill] sm:$0xff] }
 0x753   : > { %3432 = vmatpush1.bf16.msra.mxu1 %v14043_v36  ;;  %v14055_v36 = vld [vmem:[#allocation137_spill] sm:$0xff] }
 0x754   : > { %3433 = vmatprep.subr.bf16.mxu1 %v14044_v26  ;;  %v14056_v26 = vld [vmem:[#allocation148_spill] sm:$0xff] }
 0x755   : > { %3766 = vmatpush1.bf16.msra.mxu0 %v14045_v27  ;;  %v10345_v27 = vld [vmem:[#allocation8 + $0xf8] ss:$24 sps:$4 sm:$0xff]  }
 0x756   : > { %3767 = vmatprep.subr.bf16.mxu0 %v14046_v40  ;;  %14057 = vst [vmem:[#allocation106_spill] sm:$0xff] %v10345_v27  ;;  %v10348_v40 = vld [vmem:[#allocation8 + $0x12c] ss:$24 sps:$4 sm:$0xff]  }
 0x757   : > { %3434 = vmatpush1.bf16.msra.mxu1 %v14047_v56  ;;  %14058 = vst [vmem:[#allocation70_spill] sm:$0xff] %v10348_v40  ;;  %v14059_v56 = vld [vmem:[#allocation149_spill] sm:$0xff] }
 0x758   : > { %3435 = vmatprep.subr.bf16.mxu1 %v14048_v44  ;;  %v14060_v44 = vld [vmem:[#allocation150_spill] sm:$0xff] }
 0x759   : > { %3768 = vmatpush1.bf16.msra.mxu0 %v14049_v23  ;;  %v10353_v23 = vld [vmem:[#allocation8 + $0x128] ss:$24 sps:$4 sm:$0xff]  }
 0x75a   : > { %3769 = vmatprep.subr.bf16.mxu0 %v14050_v42  ;;  %14061 = vst [vmem:[#allocation107_spill] sm:$0xff] %v10353_v23  ;;  %v10356_v42 = vld [vmem:[#allocation8 + $0x15c] ss:$24 sps:$4 sm:$0xff]  }
 0x75b   : > { %3436 = vmatpush1.bf16.msra.mxu1 %v14051_v41  ;;  %14062 = vst [vmem:[#allocation72_spill] sm:$0xff] %v10356_v42  ;;  %v14063_v41 = vld [vmem:[#allocation151_spill] sm:$0xff] }
 0x75c   : > { %3437 = vmatprep.subr.bf16.mxu1 %v14052_v3  ;;  %v14064_v3 = vld [vmem:[#allocation152_spill] sm:$0xff] }
 0x75d   : > { %3770 = vmatpush1.bf16.msra.mxu0 %v14053_v12  ;;  %v10361_v12 = vld [vmem:[#allocation8 + $0x158] ss:$24 sps:$4 sm:$0xff]  }
 0x75e   : > { %3771 = vmatprep.subr.bf16.mxu0 %v14054_v49  ;;  %14065 = vst [vmem:[#allocation108_spill] sm:$0xff] %v10361_v12  ;;  %v10364_v49 = vld [vmem:[#allocation8 + $0x18c] ss:$24 sps:$4 sm:$0xff]  }
 0x75f   : > { %3438 = vmatpush1.bf16.msra.mxu1 %v14055_v36  ;;  %14066 = vst [vmem:[#allocation27_spill] sm:$0xff] %v10364_v49  ;;  %v14067_v36 = vld [vmem:[#allocation153_spill] sm:$0xff] }
 0x760   : > { %3439 = vmatprep.subr.bf16.mxu1 %v14056_v26  ;;  %v14068_v26 = vld [vmem:[#allocation154_spill] sm:$0xff] }
 0x761   : > { %3772 = vmatpush1.bf16.msra.mxu0 %v10345_v27 }
 0x762   : > { %3773 = vmatprep.subr.bf16.mxu0 %v10348_v40 }
 0x763   : > { %3440 = vmatpush1.bf16.msra.mxu1 %v14059_v56  ;;  %v10369_v56 = vld [vmem:[#allocation8 + $0x188] ss:$24 sps:$4 sm:$0xff]  }
 0x764   : > { %3441 = vmatprep.subr.bf16.mxu1 %v14060_v44  ;;  %14069 = vst [vmem:[#allocation74_spill] sm:$0xff] %v10369_v56  ;;  %v10372_v44 = vld [vmem:[#allocation8 + $0x1bc] ss:$24 sps:$4 sm:$0xff]  }
 0x765   : > { %3774 = vmatpush1.bf16.msra.mxu0 %v10353_v23  ;;  %14070 = vst [vmem:[#allocation109_spill] sm:$0xff] %v10372_v44  ;;  %v14108_v23 = vld [vmem:[#allocation49_spill] sm:$0xff] }
 0x766   : > { %3775 = vmatprep.subr.bf16.mxu0 %v10356_v42  ;;  %v14105_v42 = vld [vmem:[#allocation43_spill] sm:$0xff] }
 0x767   : > { %3442 = vmatpush1.bf16.msra.mxu1 %v14063_v41  ;;  %v14071_v41 = vld [vmem:[#allocation155_spill] sm:$0xff] }
 0x768   : > { %3443 = vmatprep.subr.bf16.mxu1 %v14064_v3  ;;  %v14072_v3 = vld [vmem:[#allocation156_spill] sm:$0xff] }
 0x769   : > { %3776 = vmatpush1.bf16.msra.mxu0 %v10361_v12  ;;  %v10377_v12 = vld [vmem:[#allocation8 + $0x1b8] ss:$24 sps:$4 sm:$0xff]  }
 0x76a   : > { %3777 = vmatprep.subr.bf16.mxu0 %v10364_v49  ;;  %14073 = vst [vmem:[#allocation76_spill] sm:$0xff] %v10377_v12  ;;  %v10380_v49 = vld [vmem:[#allocation8 + $0x1ec] ss:$24 sps:$4 sm:$0xff]  }
 0x76b   : > { %3444 = vmatpush1.bf16.msra.mxu1 %v14067_v36  ;;  %14074 = vst [vmem:[#allocation110_spill] sm:$0xff] %v10380_v49  ;;  %v14075_v36 = vld [vmem:[#allocation157_spill] sm:$0xff] }
 0x76c   : > { %3445 = vmatprep.subr.bf16.mxu1 %v14068_v26  ;;  %v14076_v26 = vld [vmem:[#allocation158_spill] sm:$0xff] }
 0x76d   : > { %3778 = vmatpush1.bf16.msra.mxu0 %v10369_v56  ;;  %v10385_v56 = vld [vmem:[#allocation8 + $0x1e8] ss:$24 sps:$4 sm:$0xff]  }
 0x76e   : > { %3779 = vmatprep.subr.bf16.mxu0 %v10372_v44  ;;  %14077 = vst [vmem:[#allocation78_spill] sm:$0xff] %v10385_v56  ;;  %v10388_v44 = vld [vmem:[#allocation8 + $0x21c] ss:$24 sps:$4 sm:$0xff]  }
 0x76f   : > { %3446 = vmatpush1.bf16.msra.mxu1 %v14071_v41  ;;  %14078 = vst [vmem:[#allocation111_spill] sm:$0xff] %v10388_v44  ;;  %v14079_v41 = vld [vmem:[#allocation161_spill] sm:$0xff] }
 0x770   : > { %3447 = vmatprep.subr.bf16.mxu1 %v14072_v3  ;;  %v14080_v3 = vld [vmem:[#allocation162_spill] sm:$0xff] }
 0x771   : > { %3780 = vmatpush1.bf16.msra.mxu0 %v10377_v12  ;;  %v10393_v12 = vld [vmem:[#allocation8 + $0x218] ss:$24 sps:$4 sm:$0xff]  }
 0x772   : > { %3781 = vmatprep.subr.bf16.mxu0 %v10380_v49  ;;  %14081 = vst [vmem:[#allocation80_spill] sm:$0xff] %v10393_v12  ;;  %v10396_v49 = vld [vmem:[#allocation8 + $0x24c] ss:$24 sps:$4 sm:$0xff]  }
 0x773   : > { %3448 = vmatpush1.bf16.msra.mxu1 %v14075_v36  ;;  %14082 = vst [vmem:[#allocation112_spill] sm:$0xff] %v10396_v49  ;;  %v14083_v36 = vld [vmem:[#allocation165_spill] sm:$0xff] }
 0x774   : > { %3449 = vmatprep.subr.bf16.mxu1 %v14076_v26  ;;  %v14084_v26 = vld [vmem:[#allocation166_spill] sm:$0xff] }
 0x775   : > { %3782 = vmatpush1.bf16.msra.mxu0 %v10385_v56  ;;  %v10401_v56 = vld [vmem:[#allocation8 + $0x248] ss:$24 sps:$4 sm:$0xff]  }
 0x776   : > { %3783 = vmatprep.subr.bf16.mxu0 %v10388_v44  ;;  %14085 = vst [vmem:[#allocation82_spill] sm:$0xff] %v10401_v56  ;;  %v10404_v44 = vld [vmem:[#allocation8 + $0x27c] ss:$24 sps:$4 sm:$0xff]  }
 0x777   : > { %3450 = vmatpush1.bf16.msra.mxu1 %v14079_v41  ;;  %14086 = vst [vmem:[#allocation113_spill] sm:$0xff] %v10404_v44  ;;  %v14087_v41 = vld [vmem:[#allocation169_spill] sm:$0xff] }
 0x778   : > { %3451 = vmatprep.subr.bf16.mxu1 %v14080_v3  ;;  %v14088_v3 = vld [vmem:[#allocation170_spill] sm:$0xff] }
 0x779   : > { %3784 = vmatpush1.bf16.msra.mxu0 %v10393_v12  ;;  %v10409_v12 = vld [vmem:[#allocation8 + $0x278] ss:$24 sps:$4 sm:$0xff]  }
 0x77a   : > { %3785 = vmatprep.subr.bf16.mxu0 %v10396_v49  ;;  %14089 = vst [vmem:[#allocation86_spill] sm:$0xff] %v10409_v12  ;;  %v10412_v49 = vld [vmem:[#allocation8 + $0x2ac] ss:$24 sps:$4 sm:$0xff]  }
 0x77b   : > { %3452 = vmatpush1.bf16.msra.mxu1 %v14083_v36  ;;  %14090 = vst [vmem:[#allocation115_spill] sm:$0xff] %v10412_v49  ;;  %v14091_v36 = vld [vmem:[#allocation179_spill] sm:$0xff] }
 0x77c   : > { %3453 = vmatprep.subr.bf16.mxu1 %v14084_v26  ;;  %v14092_v26 = vld [vmem:[#allocation180_spill] sm:$0xff] }
 0x77d   : > { %3786 = vmatpush1.bf16.msra.mxu0 %v10401_v56  ;;  %v10417_v56 = vld [vmem:[#allocation8 + $0x2a8] ss:$24 sps:$4 sm:$0xff]  }
 0x77e   : > { %3787 = vmatprep.subr.bf16.mxu0 %v10404_v44  ;;  %14093 = vst [vmem:[#allocation90_spill] sm:$0xff] %v10417_v56  ;;  %v10420_v44 = vld [vmem:[#allocation8 + $0x2dc] ss:$24 sps:$4 sm:$0xff]  }
 0x77f   : > { %3454 = vmatpush1.bf16.msra.mxu1 %v14087_v41  ;;  %14094 = vst [vmem:[#allocation117_spill] sm:$0xff] %v10420_v44  ;;  %v14095_v41 = vld [vmem:[#allocation181_spill] sm:$0xff] }
 0x780   : > { %3455 = vmatprep.subr.bf16.mxu1 %v14088_v3  ;;  %v14096_v3 = vld [vmem:[#allocation30_spill] sm:$0xff] }
 0x781   : > { %3788 = vmatpush1.bf16.msra.mxu0 %v10409_v12  ;;  %v10425_v12 = vld [vmem:[#allocation8 + $0x2d8] ss:$24 sps:$4 sm:$0xff]  }
 0x782   : > { %3789 = vmatprep.subr.bf16.mxu0 %v10412_v49  ;;  %14097 = vst [vmem:[#allocation94_spill] sm:$0xff] %v10425_v12  ;;  %v14101_v49 = vld [vmem:[#allocation36_spill] sm:$0xff] }
 0x783   : > { %3456 = vmatpush1.bf16.msra.mxu1 %v14091_v36  ;;  %v10429_v36 = vld [vmem:[#allocation10 + $0xc] ss:$24 sps:$4 sm:$0xff]  }
 0x784   : > { %3457 = vmatprep.subr.bf16.mxu1 %v14092_v26  ;;  %14098 = vst [vmem:[#allocation119_spill] sm:$0xff] %v10429_v36  ;;  %v14099_v26 = vld [vmem:[#allocation32_spill] sm:$0xff] }
 0x785   : > { %3790 = vmatpush1.bf16.msra.mxu0 %v10417_v56  ;;  %v14100_v56 = vld [vmem:[#allocation34_spill] sm:$0xff] }
 0x786   : > { %3791 = vmatprep.subr.bf16.mxu0 %v10420_v44  ;;  %v14102_v44 = vld [vmem:[#allocation38_spill] sm:$0xff] }
 0x787   : > { %3458 = vmatpush1.bf16.msra.mxu1 %v14095_v41  ;;  %v14103_v41 = vld [vmem:[#allocation40_spill] sm:$0xff] }
 0x788   : > { %3596 = vmatprep.subr.bf16.mxu1 %v14096_v3  ;;  %v14104_v3 = vld [vmem:[#allocation182_spill] sm:$0xff] }
 0x789   : > { %3792 = vmatpush1.bf16.msra.mxu0 %v10425_v12  ;;  %v14106_v12 = vld [vmem:[#allocation45_spill] sm:$0xff] }
 0x78a   : > { %3460 = vmatmul.mubr.bf16.vlgmr.msra.gmra.mrb[36].mxu1 %v10054_v47  ;;  %3886 = vmatprep.subr.bf16.mxu0 %v10429_v36  ;;  %v14107_v47 = vld [vmem:[#allocation47_spill] sm:$0xff] }
 0x78b   : > { %3597 = vmatpush1.bf16.msra.mxu1 %v14099_v26  ;;  %v14109_v26 = vld [vmem:[#allocation73_spill] sm:$0xff] }
 0x78c   : > { %3598 = vmatprep.subr.bf16.mxu1 %v14100_v56 }
 0x78f   : > { %3599 = vmatpush1.bf16.msra.mxu1 %v14101_v49 }
 0x790   : > { %3600 = vmatprep.subr.bf16.mxu1 %v14102_v44  ;;  %v14111_v44 = vld [vmem:[#allocation29_spill] sm:$0xff] }
 0x793   : > { %3601 = vmatpush1.bf16.msra.mxu1 %v14103_v41 }
 0x794   : > { %3602 = vmatprep.subr.bf16.mxu1 %v14104_v3 }
 0x797   : > { %3603 = vmatpush1.bf16.msra.mxu1 %v14105_v42  ;;  %v14113_v42 = vld [vmem:[#allocation55_spill] sm:$0xff] }
 0x798   : > { %3604 = vmatprep.subr.bf16.mxu1 %v14106_v12 }
 0x79b   : > { %3605 = vmatpush1.bf16.msra.mxu1 %v14107_v47  ;;  %v14114_v47 = vld [vmem:[#allocation57_spill] sm:$0xff] }
 0x79c   : > { %3606 = vmatprep.subr.bf16.mxu1 %v14108_v23 }
 0x79d   : > { %v3212_v36 = vpop.f32.mrb[32].mxu1 }
 0x79e   : > { %v10443_v40 = vadd.f32 %v3212_v36, %v14109_v26  ;;  %v3214_v56 = vpop.f32.mrb[33].mxu1  ;;  %v10445_v49 = vpop.f32.mrb[40].mxu0 }
 0x79f   : > { %v10448_v27 = vadd.f32 %v3214_v56, %v14111_v44  ;;  %v3216_v41 = vpop.f32.mrb[34].mxu1  ;;  %v10450_v3 = vpop.f32.mrb[41].mxu0  ;;  %3607 = vmatpush1.bf16.msra.mxu1 %v14113_v42  ;;  %v14116_v56 = vld [vmem:[#allocation61_spill] sm:$0xff] }
 0x7a0   : > { %14110 = vst [vmem:[#allocation96_spill] sm:$0xff] %v10443_v40  ;;  %v3217_v12 = vpop.f32.mrb[35].mxu1  ;;  %v3506_v15 = vpop.f32.mrb[42].mxu0  ;;  %v3219_v23 = vsel %vm2382_vm14, %v10443_v40, -inf  ;;  %3608 = vmatprep.subr.bf16.mxu1 %v14114_v47  ;;  %v14117_v41 = vld [vmem:[#allocation63_spill] sm:$0xff]  ;;  %v14118_v42 = vld [vmem:[#allocation65_spill] sm:$0xff] }
 0x7a1   : > { %14112 = vst [vmem:[#allocation124_spill] sm:$0xff] %v10448_v27  ;;  %v3507_v36 = vpop.f32.mrb[43].mxu0  ;;  %v3220_v26 = vsel %vm2382_vm14, %v10448_v27, -inf  ;;  %v14119_v15 = vld [vmem:[#allocation67_spill] sm:$0xff]  ;;  %v14120_v12 = vld [vmem:[#allocation69_spill] sm:$0xff] }
 0x7a2   : > { %v3221_v24 = vmax.f32 %v3219_v23, %v3220_v26  ;;  %v14121_v40 = vld [vmem:[#allocation71_spill] sm:$0xff]  ;;  %v14122_v47 = vld [vmem:[#allocation77_spill] sm:$0xff] }
 0x7a3   : > { %3609 = vmatpush1.bf16.msra.mxu1 %v14115_v43  ;;  %v14123_v36 = vld [vmem:[#allocation33_spill] sm:$0xff]  ;;  %v14124_v26 = vld [vmem:[#allocation79_spill] sm:$0xff] }
 0x7a4   : > { %3222 = vmax.xlane.f32.xlu0 %v3221_v24  ;;  %3610 = vmatprep.subr.bf16.mxu1 %v14116_v56  ;;  %v14125_v43 = vld [vmem:[#allocation35_spill] sm:$0xff]  ;;  %v14126_v24 = vld [vmem:[#allocation81_spill] sm:$0xff] }
 0x7a5   : > { %v14127_v23 = vld [vmem:[#allocation37_spill] sm:$0xff]  ;;  %v14128_v56 = vld [vmem:[#allocation83_spill] sm:$0xff] }
 0x7a7   : > { %3611 = vmatpush1.bf16.msra.mxu1 %v14117_v41  ;;  %v14129_v41 = vld [vmem:[#allocation39_spill] sm:$0xff] }
 0x7a8   : > { %3612 = vmatprep.subr.bf16.mxu1 %v14118_v42  ;;  %v14130_v42 = vld [vmem:[#allocation85_spill] sm:$0xff] }
 0x7ab   : > { %3613 = vmatpush1.bf16.msra.mxu1 %v14119_v15  ;;  %v14131_v15 = vld [vmem:[#allocation41_spill] sm:$0xff] }
 0x7ac   : > { %3614 = vmatprep.subr.bf16.mxu1 %v14120_v12  ;;  %v14133_v12 = vld [vmem:[#allocation42_spill] sm:$0xff] }
 0x7af   : > { %3615 = vmatpush1.bf16.msra.mxu1 %v14121_v40  ;;  %v14132_v40 = vld [vmem:[#allocation87_spill] sm:$0xff] }
 0x7b0   : > { %3616 = vmatprep.subr.bf16.mxu1 %v14122_v47  ;;  %v14134_v47 = vld [vmem:[#allocation89_spill] sm:$0xff] }
 0x7b3   : > { %3617 = vmatpush1.bf16.msra.mxu1 %v14123_v36 }
 0x7b4   : > { %3618 = vmatprep.subr.bf16.mxu1 %v14124_v26 }
 0x7b7   : > { %3619 = vmatpush1.bf16.msra.mxu1 %v14125_v43 }
 0x7b8   : > { %3620 = vmatprep.subr.bf16.mxu1 %v14126_v24 }
 0x7bb   : > { %3621 = vmatpush1.bf16.msra.mxu1 %v14127_v23 }
 0x7bc   : > { %3622 = vmatprep.subr.bf16.mxu1 %v14128_v56 }
 0x7bf   : > { %3623 = vmatpush1.bf16.msra.mxu1 %v14129_v41 }
 0x7c0   : > { %3624 = vmatprep.subr.bf16.mxu1 %v14130_v42 }
 0x7c3   : > { %3625 = vmatpush1.bf16.msra.mxu1 %v14131_v15 }
 0x7c4   : > { %3626 = vmatprep.subr.bf16.mxu1 %v14132_v40 }
 0x7c7   : > { %3627 = vmatpush1.bf16.msra.mxu1 %v14133_v12 }
 0x7c8   : > { %3720 = vmatprep.subr.bf16.mxu1 %v14134_v47 }
 0x7df   : > { %v10478_v36 = vpop.f32.mrb[44].mxu0 }
 0x7e0   : > { %v10480_v26 = vpop.f32.mrb[45].mxu0 }
 0x7e1   : > { %v3547_v43 = vpop.f32.mrb[46].mxu0 }
 0x7e2   : > { %v3548_v24 = vpop.f32.mrb[47].mxu0  ;;  %v10494_v43 = vld [vmem:[#allocation10 + $0x38] ss:$24 sps:$4 sm:$0xff]  }
 0x7e3   : > { %v10506_v24 = vld [vmem:[#allocation10 + $0x98] ss:$24 sps:$4 sm:$0xff]  }
 0x7e4   : > { %14138 = vst [vmem:[#allocation125_spill] sm:$0xff] %v10506_v24 }
 0x81d   : > { %v10482_v23 = vpop.f32.mrb[40].mxu1 }
 0x81e   : > { %v10484_v56 = vpop.f32.mrb[41].mxu1 }
 0x81f   : > { %v3422_v41 = vpop.f32.mrb[42].mxu1  ;;  %v3709_v42 = vpop.f32.mrb[48].mxu0 }
 0x820   : > { %v3423_v27 = vpop.f32.mrb[43].mxu1  ;;  %v3716_v15 = vmax.f32 %v3709_v42, 0.0  ;;  %v3711_v44 = vpop.f32.mrb[49].mxu0  ;;  %v10515_v41 = vld [vmem:[#allocation10 + $0xfc] ss:$24 sps:$4 sm:$0xff]  }
 0x821   : > { %v3717_v40 = vmax.f32 %v3711_v44, 0.0  ;;  %v3713_v8 = vpop.f32.mrb[50].mxu0  ;;  %v10497_v27 = vld [vmem:[#allocation10 + $0x6c] ss:$24 sps:$4 sm:$0xff]   ;;  %v10503_v44 = vld [vmem:[#allocation10 + $0x9c] ss:$24 sps:$4 sm:$0xff]  }
 0x822   : > { %v10486_v12 = vpack.c.bf16 %v3716_v15, %v3716_v15  ;;  %v3714_v47 = vpop.f32.mrb[51].mxu0  ;;  %14135 = vst [vmem:[#allocation127_spill] sm:$0xff] %v10497_v27  ;;  %v10500_v8 = vld [vmem:[#allocation10 + $0x68] ss:$24 sps:$4 sm:$0xff]   ;;  %14137 = vst [vmem:[#allocation131_spill] sm:$0xff] %v10503_v44 }
 0x823   : > { %v10488_v21 = vpack.c.bf16 %v3717_v40, %v3717_v40  ;;  %14136 = vst [vmem:[#allocation129_spill] sm:$0xff] %v10500_v8  ;;  %14141 = vst [vmem:[#allocation135_spill] sm:$0xff] %v10515_v41  ;;  %v10518_v42 = vld [vmem:[#allocation10 + $0xf8] ss:$24 sps:$4 sm:$0xff]   ;;  %v10521_v15 = vld [vmem:[#allocation10 + $0x12c] ss:$24 sps:$4 sm:$0xff]  }
 0x824   : > { %14142 = vst [vmem:[#allocation136_spill] sm:$0xff] %v10518_v42  ;;  %14143 = vst [vmem:[#allocation138_spill] sm:$0xff] %v10521_v15  ;;  %v10524_v40 = vld [vmem:[#allocation10 + $0x128] ss:$24 sps:$4 sm:$0xff]   ;;  %v10527_v47 = vld [vmem:[#allocation10 + $0x15c] ss:$24 sps:$4 sm:$0xff]  }
 0x825   : > { %3793 = vmatprep.mubr.bf16.mxu0 %v10488_v21  ;;  %14144 = vst [vmem:[#allocation139_spill] sm:$0xff] %v10524_v40  ;;  %14145 = vst [vmem:[#allocation84_spill] sm:$0xff] %v10527_v47 }
 0x826   : > { %3794 = vmatmul.mubr.bf16.vlgmr.msra.gmra.mrb[52].mxu0 %v10486_v12 }
 0x827   : > { %3887 = vmatpush1.bf16.msra.mxu0 %v9990_v60  ;;  %v10509_v60 = vld [vmem:[#allocation10 + $0xcc] ss:$24 sps:$4 sm:$0xff]  }
 0x828   : > { %3888 = vmatprep.subr.bf16.mxu0 %v9993_v30  ;;  %14139 = vst [vmem:[#allocation133_spill] sm:$0xff] %v10509_v60  ;;  %v10512_v30 = vld [vmem:[#allocation10 + $0xc8] ss:$24 sps:$4 sm:$0xff]  }
 0x829   : > { %14140 = vst [vmem:[#allocation128_spill] sm:$0xff] %v10512_v30 }
 0x82b   : > { %3889 = vmatpush1.bf16.msra.mxu0 %v10494_v43 }
 0x82c   : > { %3890 = vmatprep.subr.bf16.mxu0 %v10497_v27  ;;  %v10577_v27 = vld [vmem:[#allocation10 + $0x2dc] ss:$24 sps:$4 sm:$0xff]  }
 0x82d   : > { %14161 = vst [vmem:[#allocation98_spill] sm:$0xff] %v10577_v27 }
 0x82f   : > { %3891 = vmatpush1.bf16.msra.mxu0 %v10500_v8 }
 0x830   : > { %3892 = vmatprep.subr.bf16.mxu0 %v10503_v44 }
 0x833   : > { %3893 = vmatpush1.bf16.msra.mxu0 %v10506_v24 }
 0x834   : > { %3894 = vmatprep.subr.bf16.mxu0 %v10509_v60 }
 0x837   : > { %3895 = vmatpush1.bf16.msra.mxu0 %v10512_v30  ;;  %v10530_v30 = vld [vmem:[#allocation10 + $0x158] ss:$24 sps:$4 sm:$0xff]  }
 0x838   : > { %3896 = vmatprep.subr.bf16.mxu0 %v10515_v41  ;;  %14146 = vst [vmem:[#allocation114_spill] sm:$0xff] %v10530_v30  ;;  %v10533_v41 = vld [vmem:[#allocation10 + $0x18c] ss:$24 sps:$4 sm:$0xff]  }
 0x839   : > { %14147 = vst [vmem:[#allocation140_spill] sm:$0xff] %v10533_v41 }
 0x83b   : > { %3897 = vmatpush1.bf16.msra.mxu0 %v10518_v42  ;;  %v10536_v42 = vld [vmem:[#allocation10 + $0x188] ss:$24 sps:$4 sm:$0xff]  }
 0x83c   : > { %3898 = vmatprep.subr.bf16.mxu0 %v10521_v15  ;;  %14148 = vst [vmem:[#allocation141_spill] sm:$0xff] %v10536_v42  ;;  %v10539_v15 = vld [vmem:[#allocation10 + $0x1bc] ss:$24 sps:$4 sm:$0xff]  }
 0x83d   : > { %14149 = vst [vmem:[#allocation88_spill] sm:$0xff] %v10539_v15 }
 0x83f   : > { %3899 = vmatpush1.bf16.msra.mxu0 %v10524_v40  ;;  %v10542_v40 = vld [vmem:[#allocation10 + $0x1b8] ss:$24 sps:$4 sm:$0xff]  }
 0x840   : > { %3900 = vmatprep.subr.bf16.mxu0 %v10527_v47  ;;  %14150 = vst [vmem:[#allocation116_spill] sm:$0xff] %v10542_v40  ;;  %v10545_v47 = vld [vmem:[#allocation10 + $0x1ec] ss:$24 sps:$4 sm:$0xff]  }
 0x841   : > { %14151 = vst [vmem:[#allocation142_spill] sm:$0xff] %v10545_v47 }
 0x843   : > { %3901 = vmatpush1.bf16.msra.mxu0 %v10530_v30  ;;  %v10548_v30 = vld [vmem:[#allocation10 + $0x1e8] ss:$24 sps:$4 sm:$0xff]  }
 0x844   : > { %3902 = vmatprep.subr.bf16.mxu0 %v10533_v41  ;;  %14152 = vst [vmem:[#allocation143_spill] sm:$0xff] %v10548_v30  ;;  %v10551_v41 = vld [vmem:[#allocation10 + $0x21c] ss:$24 sps:$4 sm:$0xff]  }
 0x845   : > { %14153 = vst [vmem:[#allocation92_spill] sm:$0xff] %v10551_v41 }
 0x847   : > { %3903 = vmatpush1.bf16.msra.mxu0 %v10536_v42  ;;  %v10554_v42 = vld [vmem:[#allocation10 + $0x218] ss:$24 sps:$4 sm:$0xff]  }
 0x848   : > { %3904 = vmatprep.subr.bf16.mxu0 %v10539_v15  ;;  %14154 = vst [vmem:[#allocation118_spill] sm:$0xff] %v10554_v42  ;;  %v10557_v15 = vld [vmem:[#allocation10 + $0x24c] ss:$24 sps:$4 sm:$0xff]  }
 0x849   : > { %14155 = vst [vmem:[#allocation144_spill] sm:$0xff] %v10557_v15 }
 0x84b   : > { %3905 = vmatpush1.bf16.msra.mxu0 %v10542_v40  ;;  %v10560_v40 = vld [vmem:[#allocation10 + $0x248] ss:$24 sps:$4 sm:$0xff]  }
 0x84c   : > { %3906 = vmatprep.subr.bf16.mxu0 %v10545_v47  ;;  %14156 = vst [vmem:[#allocation145_spill] sm:$0xff] %v10560_v40  ;;  %v10563_v47 = vld [vmem:[#allocation10 + $0x27c] ss:$24 sps:$4 sm:$0xff]  }
 0x84d   : > { %14157 = vst [vmem:[#allocation95_spill] sm:$0xff] %v10563_v47 }
 0x84f   : > { %3907 = vmatpush1.bf16.msra.mxu0 %v10548_v30  ;;  %v10566_v30 = vld [vmem:[#allocation10 + $0x278] ss:$24 sps:$4 sm:$0xff]  }
 0x850   : > { %3908 = vmatprep.subr.bf16.mxu0 %v10551_v41  ;;  %14158 = vst [vmem:[#allocation120_spill] sm:$0xff] %v10566_v30  ;;  %v10569_v41 = vld [vmem:[#allocation10 + $0x2ac] ss:$24 sps:$4 sm:$0xff]  }
 0x851   : > { %14159 = vst [vmem:[#allocation146_spill] sm:$0xff] %v10569_v41 }
 0x853   : > { %3909 = vmatpush1.bf16.msra.mxu0 %v10554_v42 }
 0x854   : > { %3910 = vmatprep.subr.bf16.mxu0 %v10557_v15 }
 0x857   : > { %3911 = vmatpush1.bf16.msra.mxu0 %v10560_v40  ;;  %v10574_v40 = vld [vmem:[#allocation10 + $0x2a8] ss:$24 sps:$4 sm:$0xff]  }
 0x858   : > { %3912 = vmatprep.subr.bf16.mxu0 %v10563_v47  ;;  %14160 = vst [vmem:[#allocation147_spill] sm:$0xff] %v10574_v40 }
 0x85b   : > { %3913 = vmatpush1.bf16.msra.mxu0 %v10566_v30 }
 0x85c   : > { %3914 = vmatprep.subr.bf16.mxu0 %v10569_v41  ;;  %v5926_v41 = vadd.f32 %v10445_v49, %v13943_v11 }
 0x85d   : > { %v3461_v42 = vpop.f32.mrb[36].mxu1 }
 0x85e   : > { %v5924_v60 = vadd.f32 %v3461_v42, %v13942_v51  ;;  %v3463_v15 = vpop.f32.mrb[37].mxu1  ;;  %v5927_v42 = vadd.f32 %v10450_v3, %v8776_v32 }
 0x85f   : > { %v5925_v24 = vadd.f32 %v3463_v15, %v8772_v39  ;;  %v3465_v44 = vpop.f32.mrb[38].mxu1  ;;  %3915 = vmatpush1.bf16.msra.mxu0 %v10574_v40  ;;  %v10587_v15 = vld [vmem:[#allocation10 + $0x14] ss:$24 sps:$4 sm:$0xff]  }
 0x860   : > { %v5859_v47 = vmul.f32 -1.442695, %v5924_v60  ;;  %v3466_v8 = vpop.f32.mrb[39].mxu1  ;;  %3916 = vmatprep.subr.bf16.mxu0 %v10577_v27  ;;  %v10584_v44 = vld [vmem:[#allocation10 + $0x2d8] ss:$24 sps:$4 sm:$0xff]  }
 0x861   : > { %v5860_v30 = vmul.f32 -1.442695, %v5925_v24  ;;  %14162 = vst [vmem:[#allocation121_spill] sm:$0xff] %v10584_v44  ;;  %v5861_v8 = vmul.f32 -1.442695, %v5926_v41  ;;  %v3579_v41 = vadd.f32 %v10480_v26, %v13944_v37 }
 0x862   : > { %6546 = vpow2.f32 %v5859_v47  ;;  %v5862_v60 = vmul.f32 -1.442695, %v5927_v42 }
 0x863   : > { %6548 = vpow2.f32 %v5860_v30  ;;  %3917 = vmatpush1.bf16.msra.mxu0 %v10584_v44  ;;  %v3578_v44 = vadd.f32 %v10478_v36, %v8786_v22 }
 0x864   : > { %3927 = vmatprep.subr.bf16.mxu0 %v10587_v15  ;;  %6550 = vpow2.f32 %v5861_v8 }
 0x865   : > { %6552 = vpow2.f32 %v5862_v60 }
 0x86c   : > { %v6547_v27 = vpop.eup %6546 }
 0x86d   : > { %v6549_v49 = vpop.eup %6548  ;;  %v3558_v24 = vadd.f32 1.0, %v6547_v27  ;;  %v3419_v27 = vadd.f32 %v10482_v23, %v13945_v31 }
 0x86e   : > { %v3559_v11 = vadd.f32 1.0, %v6549_v49  ;;  %v6551_v3 = vpop.eup %6550 }
 0x86f   : > { %6554 = vrcp.f32 %v3558_v24  ;;  %v6553_v30 = vpop.eup %6552  ;;  %v3572_v47 = vadd.f32 1.0, %v6551_v3 }
 0x870   : > { %6556 = vrcp.f32 %v3559_v11  ;;  %v3573_v32 = vadd.f32 1.0, %v6553_v30  ;;  %v3421_v11 = vadd.f32 %v10484_v56, %v13946_v14  ;;  %v3660_v30 = vstv %s3659_s19 }
 0x871   : > { %6558 = vrcp.f32 %v3572_v47  ;;  %vm3661_vm9 = vcmp.eq.s32.totalorder %v3660_v30, 1  ;;  %v14167_v30 = vld [vmem:[#allocation46_spill] sm:$0xff] }
 0x872   : > { %6560 = vrcp.f32 %v3573_v32 }
 0x879   : > { %v6555_v40 = vpop.eup %6554 }
 0x87a   : > { %v6557_v42 = vpop.eup %6556  ;;  %v3580_v8 = vmul.f32 %v6555_v40, %v3578_v44 }
 0x87b   : > { %v3581_v60 = vmul.f32 %v6557_v42, %v3579_v41  ;;  %v6559_v36 = vpop.eup %6558 }
 0x87c   : > { %v3582_v49 = vadd.f32 %v3580_v8, %v3419_v27  ;;  %v6561_v26 = vpop.eup %6560  ;;  %v3586_v3 = vsub.f32 1.0, %v6559_v36  ;;  %v3590_v32 = vmul.f32 %v6559_v36, %v10043_v19  ;;  %v10641_v36 = vld [vmem:[#allocation10 + $0xa4] ss:$24 sps:$4 sm:$0xff]  }
 0x87d   : > { %v3583_v24 = vadd.f32 %v3581_v60, %v3421_v11  ;;  %v3587_v37 = vsub.f32 1.0, %v6561_v26  ;;  %v3591_v56 = vmul.f32 %v6561_v26, %v10046_v10  ;;  %v10766_v26 = vld [vmem:[#allocation5 + $0x14] ss:$8 sps:$4 sm:$0xff]  }
 0x87e   : > { %6562 = vtanh.f32 %v3582_v49  ;;  %14165 = vst [vmem:[#allocation159_spill] sm:$0xff] %v10766_v26 }
 0x87f   : > { %6564 = vtanh.f32 %v3583_v24  ;;  %v10629_v24 = vld [vmem:[#allocation10 + $0x40] ss:$24 sps:$4 sm:$0xff]  }
 0x888   : > { %v6563_v47 = vpop.eup %6562 }
 0x889   : > { %v6565_v23 = vpop.eup %6564  ;;  %v3588_v40 = vmul.f32 %v6563_v47, %v3586_v3  ;;  %v14166_v3 = vld [vmem:[#allocation91_spill] sm:$0xff]  ;;  %v14170_v47 = vld [vmem:[#allocation93_spill] sm:$0xff] }
 0x88a   : > { %v3589_v44 = vmul.f32 %v6565_v23, %v3587_v37  ;;  %v14171_v23 = vld [vmem:[#allocation48_spill] sm:$0xff] }
 0x88b   : > { %v3592_v41 = vadd.f32 %v3590_v32, %v3588_v40  ;;  %v10779_v40 = vld [vmem:[#allocation5 + $0x20] ss:$8 sps:$4 sm:$0xff]   ;;  %v10782_v32 = vld [vmem:[#allocation5 + $0x34] ss:$8 sps:$4 sm:$0xff]  }
 0x88c   : > { %v3593_v42 = vadd.f32 %v3591_v56, %v3589_v44  ;;  %14172 = vst [vmem:[#allocation123_spill] sm:$0xff] %v10779_v40  ;;  %14173 = vst [vmem:[#allocation163_spill] sm:$0xff] %v10782_v32  ;;  %v14174_v44 = vld [vmem:[#allocation50_spill] sm:$0xff]  ;;  %v14175_v56 = vld [vmem:[#allocation52_spill] sm:$0xff] }
 0x88d   : > { %v10603_v27 = vsel %vm3661_vm9, %v3592_v41, %v10043_v19  ;;  %v3594_v60 = vpack.c.bf16 %v3592_v41, %v3592_v41  ;;  %v10619_v19 = vld [vmem:[#allocation10 + $0x10] ss:$24 sps:$4 sm:$0xff]  }
 0x88e   : > { %v3595_v8 = vpack.c.bf16 %v3593_v42, %v3593_v42  ;;  %v10606_v11 = vsel %vm3661_vm9, %v3593_v42, %v10046_v10  ;;  %v10614_v37 = vpack.c.bf16 %v10603_v27, %v10603_v27  ;;  %v10624_v10 = vld [vmem:[#allocation10 + $0x44] ss:$24 sps:$4 sm:$0xff]   ;;  %v10787_v41 = vld [vmem:[#allocation5 + $0x30] ss:$8 sps:$4 sm:$0xff]  }
 0x88f   : > { %v10610_v49 = vpack.c.bf16 %v10606_v11, %v10606_v11  ;;  %14176 = vst [vmem:[#allocation164_spill] sm:$0xff] %v10787_v41  ;;  %v10790_v42 = vld [vmem:[#allocation5 + $0x44] ss:$8 sps:$4 sm:$0xff]  }
 0x890   : > { %3628 = vmatprep.mubr.bf16.mxu1 %v3595_v8  ;;  %14177 = vst [vmem:[#allocation126_spill] sm:$0xff] %v10790_v42  ;;  %v14178_v8 = vld [vmem:[#allocation97_spill] sm:$0xff] }
 0x891   : > { %3629 = vmatmul.mubr.bf16.vlgmr.msra.gmra.mrb[44].mxu1 %v3594_v60  ;;  %3918 = vmatprep.mubr.bf16.mxu0 %v10610_v49  ;;  %v14179_v60 = vld [vmem:[#allocation54_spill] sm:$0xff] }
 0x892   : > { %3721 = vmatpush1.bf16.msra.mxu1 %v10057_v55  ;;  %3919 = vmatmul.mubr.bf16.vlgmr.msra.gmra.mrb[52].mxu0 %v10614_v37  ;;  %v10633_v55 = vld [vmem:[#allocation10 + $0x74] ss:$24 sps:$4 sm:$0xff]  }
 0x893   : > { %3928 = vmatpush1.bf16.msra.mxu0 %v10619_v19  ;;  %3959 = vmatprep.mubr.bf16.mxu0 %v10610_v49 }
 0x894   : > { %3722 = vmatprep.subr.bf16.mxu1 %v10063_v5  ;;  %3929 = vmatprep.subr.bf16.mxu0 %v10624_v10  ;;  %v10637_v5 = vld [vmem:[#allocation10 + $0x70] ss:$24 sps:$4 sm:$0xff]  }
 0x895   : > { %3752 = vmatprep.mubr.bf16.mxu1 %v10488_v21 }
 0x896   : > { %3723 = vmatpush1.bf16.msra.mxu1 %v10068_v50  ;;  %v10645_v50 = vld [vmem:[#allocation10 + $0xa0] ss:$24 sps:$4 sm:$0xff]  }
 0x897   : > { %3930 = vmatpush1.bf16.msra.mxu0 %v10629_v24  ;;  %3724 = vmatprep.subr.bf16.mxu1 %v10072_v62  ;;  %v10649_v62 = vld [vmem:[#allocation10 + $0xd4] ss:$24 sps:$4 sm:$0xff]  }
 0x898   : > { %3931 = vmatprep.subr.bf16.mxu0 %v10633_v55 }
 0x89a   : > { %3725 = vmatpush1.bf16.msra.mxu1 %v10076_v38  ;;  %v10653_v38 = vld [vmem:[#allocation10 + $0xd0] ss:$24 sps:$4 sm:$0xff]  }
 0x89b   : > { %3932 = vmatpush1.bf16.msra.mxu0 %v10637_v5  ;;  %3726 = vmatprep.subr.bf16.mxu1 %v10080_v0  ;;  %v10657_v0 = vld [vmem:[#allocation10 + $0x104] ss:$24 sps:$4 sm:$0xff]  }
 0x89c   : > { %3933 = vmatprep.subr.bf16.mxu0 %v10641_v36 }
 0x89e   : > { %3727 = vmatpush1.bf16.msra.mxu1 %v10084_v25  ;;  %v10661_v25 = vld [vmem:[#allocation10 + $0x100] ss:$24 sps:$4 sm:$0xff]  }
 0x89f   : > { %3934 = vmatpush1.bf16.msra.mxu0 %v10645_v50  ;;  %3728 = vmatprep.subr.bf16.mxu1 %v10088_v2  ;;  %v10665_v2 = vld [vmem:[#allocation10 + $0x134] ss:$24 sps:$4 sm:$0xff]  }
 0x8a0   : > { %3935 = vmatprep.subr.bf16.mxu0 %v10649_v62 }
 0x8a2   : > { %3729 = vmatpush1.bf16.msra.mxu1 %v10092_v4  ;;  %v10669_v4 = vld [vmem:[#allocation10 + $0x130] ss:$24 sps:$4 sm:$0xff]  }
 0x8a3   : > { %3936 = vmatpush1.bf16.msra.mxu0 %v10653_v38  ;;  %3730 = vmatprep.subr.bf16.mxu1 %v10096_v6  ;;  %v10673_v6 = vld [vmem:[#allocation10 + $0x164] ss:$24 sps:$4 sm:$0xff]  }
 0x8a4   : > { %3937 = vmatprep.subr.bf16.mxu0 %v10657_v0 }
 0x8a6   : > { %3731 = vmatpush1.bf16.msra.mxu1 %v10100_v18  ;;  %v10677_v18 = vld [vmem:[#allocation10 + $0x160] ss:$24 sps:$4 sm:$0xff]  }
 0x8a7   : > { %3938 = vmatpush1.bf16.msra.mxu0 %v10661_v25  ;;  %3732 = vmatprep.subr.bf16.mxu1 %v10104_v9  ;;  %v10681_v9 = vld [vmem:[#allocation10 + $0x194] ss:$24 sps:$4 sm:$0xff]  }
 0x8a8   : > { %3939 = vmatprep.subr.bf16.mxu0 %v10665_v2 }
 0x8aa   : > { %3733 = vmatpush1.bf16.msra.mxu1 %v10108_v54  ;;  %v10685_v54 = vld [vmem:[#allocation10 + $0x190] ss:$24 sps:$4 sm:$0xff]  }
 0x8ab   : > { %3940 = vmatpush1.bf16.msra.mxu0 %v10669_v4  ;;  %3734 = vmatprep.subr.bf16.mxu1 %v10112_v53  ;;  %v10689_v53 = vld [vmem:[#allocation10 + $0x1c4] ss:$24 sps:$4 sm:$0xff]  }
 0x8ac   : > { %3941 = vmatprep.subr.bf16.mxu0 %v10673_v6 }
 0x8ae   : > { %3735 = vmatpush1.bf16.msra.mxu1 %v10116_v58  ;;  %v10693_v58 = vld [vmem:[#allocation10 + $0x1c0] ss:$24 sps:$4 sm:$0xff]  }
 0x8af   : > { %3942 = vmatpush1.bf16.msra.mxu0 %v10677_v18  ;;  %3736 = vmatprep.subr.bf16.mxu1 %v10120_v59  ;;  %v10697_v59 = vld [vmem:[#allocation10 + $0x1f4] ss:$24 sps:$4 sm:$0xff]  }
 0x8b0   : > { %3943 = vmatprep.subr.bf16.mxu0 %v10681_v9 }
 0x8b2   : > { %3737 = vmatpush1.bf16.msra.mxu1 %v10124_v35  ;;  %v10701_v35 = vld [vmem:[#allocation10 + $0x1f0] ss:$24 sps:$4 sm:$0xff]  }
 0x8b3   : > { %3944 = vmatpush1.bf16.msra.mxu0 %v10685_v54  ;;  %3738 = vmatprep.subr.bf16.mxu1 %v10128_v45  ;;  %v10705_v45 = vld [vmem:[#allocation10 + $0x224] ss:$24 sps:$4 sm:$0xff]  }
 0x8b4   : > { %3945 = vmatprep.subr.bf16.mxu0 %v10689_v53 }
 0x8b6   : > { %3739 = vmatpush1.bf16.msra.mxu1 %v10132_v48  ;;  %v10709_v48 = vld [vmem:[#allocation10 + $0x220] ss:$24 sps:$4 sm:$0xff]  }
 0x8b7   : > { %3946 = vmatpush1.bf16.msra.mxu0 %v10693_v58  ;;  %3740 = vmatprep.subr.bf16.mxu1 %v10136_v13  ;;  %v10713_v13 = vld [vmem:[#allocation10 + $0x254] ss:$24 sps:$4 sm:$0xff]  }
 0x8b8   : > { %3947 = vmatprep.subr.bf16.mxu0 %v10697_v59 }
 0x8ba   : > { %3741 = vmatpush1.bf16.msra.mxu1 %v10140_v33  ;;  %v10718_v33 = vld [vmem:[#allocation10 + $0x250] ss:$24 sps:$4 sm:$0xff]  }
 0x8bb   : > { %3948 = vmatpush1.bf16.msra.mxu0 %v10701_v35  ;;  %3742 = vmatprep.subr.bf16.mxu1 %v10144_v61  ;;  %v10726_v61 = vld [vmem:[#allocation10 + $0x284] ss:$24 sps:$4 sm:$0xff]  }
 0x8bc   : > { %3949 = vmatprep.subr.bf16.mxu0 %v10705_v45 }
 0x8be   : > { %3743 = vmatpush1.bf16.msra.mxu1 %v10148_v57  ;;  %v10730_v57 = vld [vmem:[#allocation10 + $0x280] ss:$24 sps:$4 sm:$0xff]  }
 0x8bf   : > { %3950 = vmatpush1.bf16.msra.mxu0 %v10709_v48  ;;  %3744 = vmatprep.subr.bf16.mxu1 %v10152_v63  ;;  %v10734_v63 = vld [vmem:[#allocation10 + $0x2b4] ss:$24 sps:$4 sm:$0xff]  }
 0x8c0   : > { %3951 = vmatprep.subr.bf16.mxu0 %v10713_v13 }
 0x8c2   : > { %3745 = vmatpush1.bf16.msra.mxu1 %v10157_v1  ;;  %v10738_v1 = vld [vmem:[#allocation10 + $0x2b0] ss:$24 sps:$4 sm:$0xff]  }
 0x8c3   : > { %3952 = vmatpush1.bf16.msra.mxu0 %v10718_v33  ;;  %3746 = vmatprep.subr.bf16.mxu1 %v10161_v52  ;;  %v13103_v52 = vstv %s10724_s29 }
 0x8c4   : > { %3953 = vmatprep.subr.bf16.mxu0 %v10726_v61  ;;  %vm4086_vm10 = vcmp.eq.s32.totalorder %v13966_v20, %v13103_v52  ;;  %v10814_v52 = vld [vmem:[#allocation5 + $0x74] ss:$8 sps:$4 sm:$0xff]  }
 0x8c5   : > { %vm5875_vm11 = vmpackc.low %vm4086_vm10, %vm4086_vm10  ;;  %14189 = vst [vmem:[#allocation177_spill] sm:$0xff] %v10814_v52 }
 0x8c6   : > { %3747 = vmatpush1.bf16.msra.mxu1 %v10169_v29  ;;  %v10743_v29 = vld [vmem:[#allocation10 + $0x2e4] ss:$24 sps:$4 sm:$0xff]  }
 0x8c7   : > { %3954 = vmatpush1.bf16.msra.mxu0 %v10730_v57  ;;  %3748 = vmatprep.subr.bf16.mxu1 %v10173_v46  ;;  %v10750_v46 = vld [vmem:[#allocation10 + $0x2e0] ss:$24 sps:$4 sm:$0xff]  }
 0x8c8   : > { %3955 = vmatprep.subr.bf16.mxu0 %v10734_v63 }
 0x8ca   : > { %3749 = vmatpush1.bf16.msra.mxu1 %v10177_v7  ;;  %v10754_v7 = vld [vmem:[#allocation5 + $0x4] ss:$8 sps:$4 sm:$0xff]  }
 0x8cb   : > { %3956 = vmatpush1.bf16.msra.mxu0 %v10738_v1  ;;  %3750 = vmatprep.subr.bf16.mxu1 %v10181_v16  ;;  %v14163_v16 = vld [vmem:[#allocation44_spill] sm:$0xff] }
 0x8cc   : > { %3957 = vmatprep.subr.bf16.mxu0 %v10743_v29 }
 0x8ce   : > { %3751 = vmatpush1.bf16.msra.mxu1 %v10186_v17  ;;  %v10762_v17 = vld [vmem:[#allocation5] ss:$8 sps:$4 sm:$0xff]  }
 0x8cf   : > { %3958 = vmatpush1.bf16.msra.mxu0 %v10750_v46  ;;  %3802 = vmatprep.subr.bf16.mxu1 %v10193_v28  ;;  %v14164_v28 = vmov 1.0|1.0  }
 0x8d0   : > { %4093 = vmatprep.subr.bf16.mxu0 %v10754_v7 }
 0x8d1   : > { %3753 = vmatmul.mubr.bf16.vlgmr.msra.gmra.mrb[48].mxu1 %v10486_v12 }
 0x8d2   : > { %3803 = vmatpush1.bf16.msra.mxu1 %v10198_v34  ;;  %3834 = vmatprep.mubr.bf16.mxu1 %v10488_v21  ;;  %v10771_v34 = vld [vmem:[#allocation5 + $0x10] ss:$8 sps:$4 sm:$0xff]   ;;  %v10774_v21 = vld [vmem:[#allocation5 + $0x24] ss:$8 sps:$4 sm:$0xff]  }
 0x8d3   : > { %3960 = vmatmul.mubr.bf16.vlgmr.msra.gmra.mrb[56].mxu0 %v10614_v37  ;;  %3804 = vmatprep.subr.bf16.mxu1 %v14163_v16  ;;  %14168 = vst [vmem:[#allocation160_spill] sm:$0xff] %v10771_v34  ;;  %14169 = vst [vmem:[#allocation122_spill] sm:$0xff] %v10774_v21  ;;  %v10795_v16 = vld [vmem:[#allocation5 + $0x40] ss:$8 sps:$4 sm:$0xff]  }
 0x8d4   : > { %4094 = vmatpush1.bf16.msra.mxu0 %v10762_v17  ;;  %5876 = vmatprep.mubr.msk.bf16.mxu0 %vm5875_vm11, %v14164_v28  ;;  %14180 = vst [vmem:[#allocation132_spill] sm:$0xff] %v10795_v16 }
 0x8d5   : > { %4095 = vmatprep.subr.bf16.mxu0 %v10766_v26 }
 0x8d6   : > { %3805 = vmatpush1.bf16.msra.mxu1 %v14166_v3  ;;  %v10798_v3 = vld [vmem:[#allocation5 + $0x54] ss:$8 sps:$4 sm:$0xff]  }
 0x8d7   : > { %3806 = vmatprep.subr.bf16.mxu1 %v14167_v30  ;;  %14181 = vst [vmem:[#allocation167_spill] sm:$0xff] %v10798_v3  ;;  %v14182_v30 = vld [vmem:[#allocation175_spill] sm:$0xff] }
 0x8d8   : > { %4096 = vmatpush1.bf16.msra.mxu0 %v10771_v34 }
 0x8d9   : > { %4097 = vmatprep.subr.bf16.mxu0 %v10774_v21 }
 0x8da   : > { %3807 = vmatpush1.bf16.msra.mxu1 %v14170_v47  ;;  %v14183_v47 = vld [vmem:[#allocation176_spill] sm:$0xff] }
 0x8db   : > { %3808 = vmatprep.subr.bf16.mxu1 %v14171_v23  ;;  %v10803_v23 = vld [vmem:[#allocation5 + $0x50] ss:$8 sps:$4 sm:$0xff]  }
 0x8dc   : > { %4098 = vmatpush1.bf16.msra.mxu0 %v10779_v40  ;;  %14184 = vst [vmem:[#allocation168_spill] sm:$0xff] %v10803_v23 }
 0x8dd   : > { %4099 = vmatprep.subr.bf16.mxu0 %v10782_v32 }
 0x8de   : > { %3809 = vmatpush1.bf16.msra.mxu1 %v14174_v44  ;;  %v10806_v44 = vld [vmem:[#allocation5 + $0x64] ss:$8 sps:$4 sm:$0xff]  }
 0x8df   : > { %3810 = vmatprep.subr.bf16.mxu1 %v14175_v56  ;;  %14185 = vst [vmem:[#allocation130_spill] sm:$0xff] %v10806_v44  ;;  %v14186_v56 = vld [vmem:[#allocation99_spill] sm:$0xff] }
 0x8e0   : > { %4100 = vmatpush1.bf16.msra.mxu0 %v10787_v41 }
 0x8e1   : > { %4101 = vmatprep.subr.bf16.mxu0 %v10790_v42 }
 0x8e2   : > { %3811 = vmatpush1.bf16.msra.mxu1 %v14178_v8  ;;  %v14187_v8 = vld [vmem:[#allocation56_spill] sm:$0xff] }
 0x8e3   : > { %3812 = vmatprep.subr.bf16.mxu1 %v14179_v60  ;;  %v10811_v60 = vld [vmem:[#allocation5 + $0x60] ss:$8 sps:$4 sm:$0xff]  }
 0x8e4   : > { %4102 = vmatpush1.bf16.msra.mxu0 %v10795_v16  ;;  %14188 = vst [vmem:[#allocation134_spill] sm:$0xff] %v10811_v60 }
 0x8e5   : > { %4103 = vmatprep.subr.bf16.mxu0 %v10798_v3  ;;  %v11103_v3 = vld [vmem:[#allocation11 + $0x50] ss:$8 sps:$4 sm:$0xff]  }
 0x8e6   : > { %3813 = vmatpush1.bf16.msra.mxu1 %v14182_v30  ;;  %v14190_v30 = vld [vmem:[#allocation100_spill] sm:$0xff] }
 0x8e7   : > { %3814 = vmatprep.subr.bf16.mxu1 %v14183_v47  ;;  %v14191_v47 = vld [vmem:[#allocation58_spill] sm:$0xff] }
 0x8e8   : > { %4104 = vmatpush1.bf16.msra.mxu0 %v10803_v23  ;;  %v10819_v23 = vld [vmem:[#allocation5 + $0x70] ss:$8 sps:$4 sm:$0xff]  }
 0x8e9   : > { %4105 = vmatprep.subr.bf16.mxu0 %v10806_v44  ;;  %14192 = vst [vmem:[#allocation178_spill] sm:$0xff] %v10819_v23  ;;  %v10822_v44 = vld [vmem:[#allocation5 + $0x84] ss:$8 sps:$4 sm:$0xff]  }
 0x8ea   : > { %3815 = vmatpush1.bf16.msra.mxu1 %v14186_v56  ;;  %14193 = vst [vmem:[#allocation137_spill] sm:$0xff] %v10822_v44  ;;  %v14194_v56 = vld [vmem:[#allocation101_spill] sm:$0xff] }
 0x8eb   : > { %3816 = vmatprep.subr.bf16.mxu1 %v14187_v8  ;;  %v14195_v8 = vld [vmem:[#allocation60_spill] sm:$0xff] }
 0x8ec   : > { %4106 = vmatpush1.bf16.msra.mxu0 %v10811_v60  ;;  %v10827_v60 = vld [vmem:[#allocation5 + $0x80] ss:$8 sps:$4 sm:$0xff]  }
 0x8ed   : > { %4107 = vmatprep.subr.bf16.mxu0 %v10814_v52  ;;  %14196 = vst [vmem:[#allocation148_spill] sm:$0xff] %v10827_v60  ;;  %v10830_v52 = vld [vmem:[#allocation5 + $0x94] ss:$8 sps:$4 sm:$0xff]  }
 0x8ee   : > { %3817 = vmatpush1.bf16.msra.mxu1 %v14190_v30  ;;  %14197 = vst [vmem:[#allocation149_spill] sm:$0xff] %v10830_v52  ;;  %v14198_v30 = vld [vmem:[#allocation102_spill] sm:$0xff] }
 0x8ef   : > { %3818 = vmatprep.subr.bf16.mxu1 %v14191_v47  ;;  %v14199_v47 = vld [vmem:[#allocation62_spill] sm:$0xff] }
 0x8f0   : > { %4108 = vmatpush1.bf16.msra.mxu0 %v10819_v23  ;;  %v10835_v23 = vld [vmem:[#allocation5 + $0x90] ss:$8 sps:$4 sm:$0xff]  }
 0x8f1   : > { %4109 = vmatprep.subr.bf16.mxu0 %v10822_v44  ;;  %14200 = vst [vmem:[#allocation150_spill] sm:$0xff] %v10835_v23  ;;  %v10838_v44 = vld [vmem:[#allocation5 + $0xa4] ss:$8 sps:$4 sm:$0xff]  }
 0x8f2   : > { %3819 = vmatpush1.bf16.msra.mxu1 %v14194_v56  ;;  %14201 = vst [vmem:[#allocation151_spill] sm:$0xff] %v10838_v44  ;;  %v14202_v56 = vld [vmem:[#allocation103_spill] sm:$0xff] }
 0x8f3   : > { %3820 = vmatprep.subr.bf16.mxu1 %v14195_v8  ;;  %v14203_v8 = vld [vmem:[#allocation64_spill] sm:$0xff] }
 0x8f4   : > { %4110 = vmatpush1.bf16.msra.mxu0 %v10827_v60  ;;  %v10843_v60 = vld [vmem:[#allocation5 + $0xa0] ss:$8 sps:$4 sm:$0xff]  }
 0x8f5   : > { %4111 = vmatprep.subr.bf16.mxu0 %v10830_v52  ;;  %14204 = vst [vmem:[#allocation152_spill] sm:$0xff] %v10843_v60  ;;  %v10846_v52 = vld [vmem:[#allocation5 + $0xb4] ss:$8 sps:$4 sm:$0xff]  }
 0x8f6   : > { %3821 = vmatpush1.bf16.msra.mxu1 %v14198_v30  ;;  %14205 = vst [vmem:[#allocation153_spill] sm:$0xff] %v10846_v52  ;;  %v14206_v30 = vld [vmem:[#allocation104_spill] sm:$0xff] }
 0x8f7   : > { %3822 = vmatprep.subr.bf16.mxu1 %v14199_v47  ;;  %v14207_v47 = vld [vmem:[#allocation66_spill] sm:$0xff] }
 0x8f8   : > { %4112 = vmatpush1.bf16.msra.mxu0 %v10835_v23  ;;  %v10851_v23 = vld [vmem:[#allocation5 + $0xb0] ss:$8 sps:$4 sm:$0xff]  }
 0x8f9   : > { %4113 = vmatprep.subr.bf16.mxu0 %v10838_v44  ;;  %14208 = vst [vmem:[#allocation154_spill] sm:$0xff] %v10851_v23  ;;  %v10854_v44 = vld [vmem:[#allocation5 + $0xc4] ss:$8 sps:$4 sm:$0xff]  }
 0x8fa   : > { %3823 = vmatpush1.bf16.msra.mxu1 %v14202_v56  ;;  %14209 = vst [vmem:[#allocation155_spill] sm:$0xff] %v10854_v44  ;;  %v14210_v56 = vld [vmem:[#allocation105_spill] sm:$0xff] }
 0x8fb   : > { %3824 = vmatprep.subr.bf16.mxu1 %v14203_v8  ;;  %v14211_v8 = vld [vmem:[#allocation68_spill] sm:$0xff]  ;;  %14308 = vst [vmem:[#allocation105_spill] sm:$0xff] %v11103_v3 }
 0x8fc   : > { %4114 = vmatpush1.bf16.msra.mxu0 %v10843_v60  ;;  %v10859_v60 = vld [vmem:[#allocation5 + $0xc0] ss:$8 sps:$4 sm:$0xff]  }
 0x8fd   : > { %4115 = vmatprep.subr.bf16.mxu0 %v10846_v52  ;;  %14212 = vst [vmem:[#allocation156_spill] sm:$0xff] %v10859_v60  ;;  %v10862_v52 = vld [vmem:[#allocation5 + $0xd4] ss:$8 sps:$4 sm:$0xff]  }
 0x8fe   : > { %3825 = vmatpush1.bf16.msra.mxu1 %v14206_v30  ;;  %14213 = vst [vmem:[#allocation157_spill] sm:$0xff] %v10862_v52  ;;  %v10865_v30 = vld [vmem:[#allocation8 + $0x280] ss:$24 sps:$4 sm:$0xff]  }
 0x8ff   : > { %3826 = vmatprep.subr.bf16.mxu1 %v14207_v47  ;;  %14214 = vst [vmem:[#allocation158_spill] sm:$0xff] %v10865_v30  ;;  %v10868_v47 = vld [vmem:[#allocation8 + $0x2b4] ss:$24 sps:$4 sm:$0xff]  }
 0x900   : > { %4116 = vmatpush1.bf16.msra.mxu0 %v10851_v23  ;;  %14215 = vst [vmem:[#allocation161_spill] sm:$0xff] %v10868_v47  ;;  %v10896_v23 = vld [vmem:[#allocation8 + $0x2e0] ss:$24 sps:$4 sm:$0xff]  }
 0x901   : > { %4117 = vmatprep.subr.bf16.mxu0 %v10854_v44  ;;  %v14223_v44 = vld [vmem:[#allocation26_spill] sm:$0xff]  ;;  %14226 = vst [vmem:[#allocation180_spill] sm:$0xff] %v10896_v23 }
 0x902   : > { %3827 = vmatpush1.bf16.msra.mxu1 %v14210_v56  ;;  %v10871_v56 = vld [vmem:[#allocation5 + $0xd0] ss:$8 sps:$4 sm:$0xff]  }
 0x903   : > { %3828 = vmatprep.subr.bf16.mxu1 %v14211_v8  ;;  %14216 = vst [vmem:[#allocation162_spill] sm:$0xff] %v10871_v56  ;;  %v10874_v8 = vld [vmem:[#allocation5 + $0xe4] ss:$8 sps:$4 sm:$0xff]  }
 0x904   : > { %4118 = vmatpush1.bf16.msra.mxu0 %v10859_v60  ;;  %14217 = vst [vmem:[#allocation165_spill] sm:$0xff] %v10874_v8  ;;  %v10877_v60 = vld [vmem:[#allocation8 + $0x2b0] ss:$24 sps:$4 sm:$0xff]  }
 0x905   : > { %4119 = vmatprep.subr.bf16.mxu0 %v10862_v52  ;;  %14218 = vst [vmem:[#allocation166_spill] sm:$0xff] %v10877_v60  ;;  %v10880_v52 = vld [vmem:[#allocation8 + $0x2e4] ss:$24 sps:$4 sm:$0xff]  }
 0x906   : > { %3829 = vmatpush1.bf16.msra.mxu1 %v10865_v30  ;;  %14219 = vst [vmem:[#allocation169_spill] sm:$0xff] %v10880_v52  ;;  %v10883_v30 = vld [vmem:[#allocation5 + $0xe0] ss:$8 sps:$4 sm:$0xff]  }
 0x907   : > { %3830 = vmatprep.subr.bf16.mxu1 %v10868_v47  ;;  %14220 = vst [vmem:[#allocation170_spill] sm:$0xff] %v10883_v30  ;;  %v10886_v47 = vld [vmem:[#allocation5 + $0xf4] ss:$8 sps:$4 sm:$0xff]  }
 0x908   : > { %4120 = vmatpush1.bf16.msra.mxu0 %v10871_v56  ;;  %14221 = vst [vmem:[#allocation179_spill] sm:$0xff] %v10886_v47  ;;  %v14222_v56 = vstv %s10724_s29 }
 0x909   : > { %4121 = vmatprep.subr.bf16.mxu0 %v10874_v8  ;;  %vm10892_vm12 = vcmp.eq.s32.totalorder %v14223_v44, %v14222_v56  ;;  %v10909_v56 = vld [vmem:[#allocation8 + $0xc] ss:$24 sps:$4 sm:$0xff]   ;;  %v10912_v44 = vld [vmem:[#allocation10] ss:$24 sps:$4 sm:$0xff]  }
 0x90a   : > { %3831 = vmatpush1.bf16.msra.mxu1 %v10877_v60  ;;  %v10899_v60 = vld [vmem:[#allocation10 + $0x4] ss:$24 sps:$4 sm:$0xff]   ;;  %vm5877_vm13 = vmpackc.low %vm10892_vm12, %vm10892_vm12  ;;  %14229 = vst [vmem:[#allocation32_spill] sm:$0xff] %v10909_v56  ;;  %v10920_v8 = vld [vmem:[#allocation8 + $0x8] ss:$24 sps:$4 sm:$0xff]   ;;  %vm5380_vm12 = vcmask 1041408  }
 0x90b   : > { %3832 = vmatprep.subr.bf16.mxu1 %v10880_v52  ;;  %14227 = vst [vmem:[#allocation181_spill] sm:$0xff] %v10899_v60  ;;  %v10902_v52 = vld [vmem:[#allocation5 + $0xf0] ss:$8 sps:$4 sm:$0xff]   ;;  %14230 = vst [vmem:[#allocation34_spill] sm:$0xff] %v10912_v44 }
 0x90c   : > { %4122 = vmatpush1.bf16.msra.mxu0 %v10883_v30  ;;  %14228 = vst [vmem:[#allocation30_spill] sm:$0xff] %v10902_v52  ;;  %14232 = vst [vmem:[#allocation38_spill] sm:$0xff] %v10920_v8 }
 0x90d   : > { %4123 = vmatprep.subr.bf16.mxu0 %v10886_v47 }
 0x90e   : > { %3833 = vmatpush1.bf16.msra.mxu1 %v10896_v23  ;;  %v14257_v23 = vld [vmem:[#allocation72_spill] sm:$0xff] }
 0x90f   : > { %3845 = vmatprep.subr.bf16.mxu1 %v10899_v60  ;;  %v10916_v60 = vld [vmem:[#allocation10 + $0x34] ss:$24 sps:$4 sm:$0xff]  }
 0x910   : > { %4124 = vmatpush1.bf16.msra.mxu0 %v10902_v52  ;;  %14231 = vst [vmem:[#allocation36_spill] sm:$0xff] %v10916_v60  ;;  %v14253_v52 = vld [vmem:[#allocation70_spill] sm:$0xff] }
 0x911   : > { %3835 = vmatmul.mubr.bf16.vlgmr.msra.gmra.mrb[52].mxu1 %v10486_v12  ;;  %4179 = vmatprep.subr.bf16.mxu0 %v10909_v56  ;;  %v10923_v12 = vld [vmem:[#allocation8 + $0x3c] ss:$24 sps:$4 sm:$0xff]   ;;  %v10926_v56 = vld [vmem:[#allocation10 + $0x30] ss:$24 sps:$4 sm:$0xff]  }
 0x912   : > { %3846 = vmatpush1.bf16.msra.mxu1 %v10912_v44  ;;  %3877 = vmatprep.mubr.bf16.mxu1 %v10610_v49  ;;  %14233 = vst [vmem:[#allocation40_spill] sm:$0xff] %v10923_v12  ;;  %14234 = vst [vmem:[#allocation182_spill] sm:$0xff] %v10926_v56  ;;  %v10929_v44 = vld [vmem:[#allocation10 + $0x64] ss:$24 sps:$4 sm:$0xff]   ;;  %v10932_v49 = vld [vmem:[#allocation8 + $0x38] ss:$24 sps:$4 sm:$0xff]  }
 0x913   : > { %3847 = vmatprep.subr.bf16.mxu1 %v10916_v60  ;;  %5878 = vmatmul.mubr.msk.bf16.vlgmr.msra.gmra.mrb[60].mxu0 %vm5877_vm13, %v14164_v28  ;;  %14235 = vst [vmem:[#allocation43_spill] sm:$0xff] %v10929_v44  ;;  %14236 = vst [vmem:[#allocation45_spill] sm:$0xff] %v10932_v49  ;;  %v10935_v60 = vld [vmem:[#allocation8 + $0x6c] ss:$24 sps:$4 sm:$0xff]   ;;  %vm5383_vm13 = vcmask 1042432  }
 0x914   : > { %4180 = vmatpush1.bf16.msra.mxu0 %v10920_v8  ;;  %14237 = vst [vmem:[#allocation47_spill] sm:$0xff] %v10935_v60  ;;  %v10938_v8 = vld [vmem:[#allocation10 + $0x60] ss:$24 sps:$4 sm:$0xff]  }
 0x915   : > { %4181 = vmatprep.subr.bf16.mxu0 %v10923_v12  ;;  %14238 = vst [vmem:[#allocation49_spill] sm:$0xff] %v10938_v8  ;;  %v10941_v12 = vld [vmem:[#allocation10 + $0x94] ss:$24 sps:$4 sm:$0xff]  }
 0x916   : > { %3848 = vmatpush1.bf16.msra.mxu1 %v10926_v56  ;;  %14239 = vst [vmem:[#allocation55_spill] sm:$0xff] %v10941_v12  ;;  %v10944_v56 = vld [vmem:[#allocation8 + $0x68] ss:$24 sps:$4 sm:$0xff]  }
 0x917   : > { %3849 = vmatprep.subr.bf16.mxu1 %v10929_v44  ;;  %14240 = vst [vmem:[#allocation57_spill] sm:$0xff] %v10944_v56  ;;  %v10947_v44 = vld [vmem:[#allocation8 + $0x9c] ss:$24 sps:$4 sm:$0xff]  }
 0x918   : > { %4182 = vmatpush1.bf16.msra.mxu0 %v10932_v49  ;;  %14241 = vst [vmem:[#allocation59_spill] sm:$0xff] %v10947_v44  ;;  %v10950_v49 = vld [vmem:[#allocation10 + $0x90] ss:$24 sps:$4 sm:$0xff]  }
 0x919   : > { %4183 = vmatprep.subr.bf16.mxu0 %v10935_v60  ;;  %14242 = vst [vmem:[#allocation61_spill] sm:$0xff] %v10950_v49  ;;  %v10953_v60 = vld [vmem:[#allocation10 + $0xc4] ss:$24 sps:$4 sm:$0xff]  }
 0x91a   : > { %3850 = vmatpush1.bf16.msra.mxu1 %v10938_v8  ;;  %14243 = vst [vmem:[#allocation63_spill] sm:$0xff] %v10953_v60  ;;  %v10956_v8 = vld [vmem:[#allocation8 + $0x98] ss:$24 sps:$4 sm:$0xff]  }
 0x91b   : > { %3851 = vmatprep.subr.bf16.mxu1 %v10941_v12  ;;  %14244 = vst [vmem:[#allocation65_spill] sm:$0xff] %v10956_v8  ;;  %v10959_v12 = vld [vmem:[#allocation8 + $0xcc] ss:$24 sps:$4 sm:$0xff]  }
 0x91c   : > { %4184 = vmatpush1.bf16.msra.mxu0 %v10944_v56  ;;  %14245 = vst [vmem:[#allocation67_spill] sm:$0xff] %v10959_v12  ;;  %v10962_v56 = vld [vmem:[#allocation10 + $0xc0] ss:$24 sps:$4 sm:$0xff]  }
 0x91d   : > { %4185 = vmatprep.subr.bf16.mxu0 %v10947_v44  ;;  %14246 = vst [vmem:[#allocation69_spill] sm:$0xff] %v10962_v56  ;;  %v10965_v44 = vld [vmem:[#allocation10 + $0xf4] ss:$24 sps:$4 sm:$0xff]  }
 0x91e   : > { %3852 = vmatpush1.bf16.msra.mxu1 %v10950_v49  ;;  %14247 = vst [vmem:[#allocation71_spill] sm:$0xff] %v10965_v44  ;;  %v10968_v49 = vld [vmem:[#allocation8 + $0xc8] ss:$24 sps:$4 sm:$0xff]  }
 0x91f   : > { %3853 = vmatprep.subr.bf16.mxu1 %v10953_v60  ;;  %14248 = vst [vmem:[#allocation77_spill] sm:$0xff] %v10968_v49  ;;  %v10971_v60 = vld [vmem:[#allocation8 + $0xfc] ss:$24 sps:$4 sm:$0xff]  }
 0x920   : > { %4186 = vmatpush1.bf16.msra.mxu0 %v10956_v8  ;;  %14249 = vst [vmem:[#allocation33_spill] sm:$0xff] %v10971_v60  ;;  %v10974_v8 = vld [vmem:[#allocation10 + $0xf0] ss:$24 sps:$4 sm:$0xff]  }
 0x921   : > { %4187 = vmatprep.subr.bf16.mxu0 %v10959_v12  ;;  %14250 = vst [vmem:[#allocation79_spill] sm:$0xff] %v10974_v8  ;;  %v10977_v12 = vld [vmem:[#allocation10 + $0x124] ss:$24 sps:$4 sm:$0xff]  }
 0x922   : > { %3854 = vmatpush1.bf16.msra.mxu1 %v10962_v56  ;;  %14251 = vst [vmem:[#allocation35_spill] sm:$0xff] %v10977_v12  ;;  %v14252_v56 = vld [vmem:[#allocation106_spill] sm:$0xff] }
 0x923   : > { %3855 = vmatprep.subr.bf16.mxu1 %v10965_v44  ;;  %v10982_v44 = vld [vmem:[#allocation10 + $0x120] ss:$24 sps:$4 sm:$0xff]  }
 0x924   : > { %4188 = vmatpush1.bf16.msra.mxu0 %v10968_v49  ;;  %14254 = vst [vmem:[#allocation81_spill] sm:$0xff] %v10982_v44  ;;  %v10985_v49 = vld [vmem:[#allocation10 + $0x154] ss:$24 sps:$4 sm:$0xff]  }
 0x925   : > { %4189 = vmatprep.subr.bf16.mxu0 %v10971_v60  ;;  %14255 = vst [vmem:[#allocation37_spill] sm:$0xff] %v10985_v49  ;;  %v14256_v60 = vld [vmem:[#allocation107_spill] sm:$0xff] }
 0x926   : > { %3856 = vmatpush1.bf16.msra.mxu1 %v10974_v8  ;;  %v10990_v8 = vld [vmem:[#allocation10 + $0x150] ss:$24 sps:$4 sm:$0xff]  }
 0x927   : > { %3857 = vmatprep.subr.bf16.mxu1 %v10977_v12  ;;  %14258 = vst [vmem:[#allocation83_spill] sm:$0xff] %v10990_v8  ;;  %v10993_v12 = vld [vmem:[#allocation10 + $0x184] ss:$24 sps:$4 sm:$0xff]  }
 0x928   : > { %4190 = vmatpush1.bf16.msra.mxu0 %v14252_v56  ;;  %14259 = vst [vmem:[#allocation39_spill] sm:$0xff] %v10993_v12  ;;  %v14261_v56 = vld [vmem:[#allocation27_spill] sm:$0xff] }
 0x929   : > { %4191 = vmatprep.subr.bf16.mxu0 %v14253_v52  ;;  %v14260_v52 = vld [vmem:[#allocation108_spill] sm:$0xff] }
 0x92a   : > { %3858 = vmatpush1.bf16.msra.mxu1 %v10982_v44  ;;  %v10998_v44 = vld [vmem:[#allocation10 + $0x180] ss:$24 sps:$4 sm:$0xff]  }
 0x92b   : > { %3859 = vmatprep.subr.bf16.mxu1 %v10985_v49  ;;  %14262 = vst [vmem:[#allocation85_spill] sm:$0xff] %v10998_v44  ;;  %v11001_v49 = vld [vmem:[#allocation10 + $0x1b4] ss:$24 sps:$4 sm:$0xff]  }
 0x92c   : > { %4192 = vmatpush1.bf16.msra.mxu0 %v14256_v60  ;;  %14263 = vst [vmem:[#allocation41_spill] sm:$0xff] %v11001_v49  ;;  %v14265_v60 = vld [vmem:[#allocation109_spill] sm:$0xff] }
 0x92d   : > { %4193 = vmatprep.subr.bf16.mxu0 %v14257_v23  ;;  %v14264_v23 = vld [vmem:[#allocation74_spill] sm:$0xff] }
 0x92e   : > { %3860 = vmatpush1.bf16.msra.mxu1 %v10990_v8  ;;  %v11006_v8 = vld [vmem:[#allocation10 + $0x1b0] ss:$24 sps:$4 sm:$0xff]  }
 0x92f   : > { %3861 = vmatprep.subr.bf16.mxu1 %v10993_v12  ;;  %14266 = vst [vmem:[#allocation87_spill] sm:$0xff] %v11006_v8  ;;  %v11009_v12 = vld [vmem:[#allocation10 + $0x1e4] ss:$24 sps:$4 sm:$0xff]  }
 0x930   : > { %4194 = vmatpush1.bf16.msra.mxu0 %v14260_v52  ;;  %14267 = vst [vmem:[#allocation42_spill] sm:$0xff] %v11009_v12  ;;  %v14268_v52 = vld [vmem:[#allocation76_spill] sm:$0xff] }
 0x931   : > { %4195 = vmatprep.subr.bf16.mxu0 %v14261_v56  ;;  %v14269_v56 = vld [vmem:[#allocation110_spill] sm:$0xff] }
 0x932   : > { %3862 = vmatpush1.bf16.msra.mxu1 %v10998_v44  ;;  %v11014_v44 = vld [vmem:[#allocation10 + $0x1e0] ss:$24 sps:$4 sm:$0xff]  }
 0x933   : > { %3863 = vmatprep.subr.bf16.mxu1 %v11001_v49  ;;  %14270 = vst [vmem:[#allocation89_spill] sm:$0xff] %v11014_v44  ;;  %v11017_v49 = vld [vmem:[#allocation10 + $0x214] ss:$24 sps:$4 sm:$0xff]  }
 0x934   : > { %4196 = vmatpush1.bf16.msra.mxu0 %v14264_v23  ;;  %14271 = vst [vmem:[#allocation44_spill] sm:$0xff] %v11017_v49  ;;  %v14272_v23 = vld [vmem:[#allocation78_spill] sm:$0xff] }
 0x935   : > { %4197 = vmatprep.subr.bf16.mxu0 %v14265_v60  ;;  %v14273_v60 = vld [vmem:[#allocation111_spill] sm:$0xff] }
 0x936   : > { %3864 = vmatpush1.bf16.msra.mxu1 %v11006_v8  ;;  %v11022_v8 = vld [vmem:[#allocation10 + $0x210] ss:$24 sps:$4 sm:$0xff]  }
 0x937   : > { %3865 = vmatprep.subr.bf16.mxu1 %v11009_v12  ;;  %14274 = vst [vmem:[#allocation91_spill] sm:$0xff] %v11022_v8  ;;  %v11025_v12 = vld [vmem:[#allocation10 + $0x244] ss:$24 sps:$4 sm:$0xff]  }
 0x938   : > { %4198 = vmatpush1.bf16.msra.mxu0 %v14268_v52  ;;  %14275 = vst [vmem:[#allocation46_spill] sm:$0xff] %v11025_v12  ;;  %v14276_v52 = vld [vmem:[#allocation80_spill] sm:$0xff] }
 0x939   : > { %4199 = vmatprep.subr.bf16.mxu0 %v14269_v56  ;;  %v14277_v56 = vld [vmem:[#allocation112_spill] sm:$0xff] }
 0x93a   : > { %3866 = vmatpush1.bf16.msra.mxu1 %v11014_v44  ;;  %v11030_v44 = vld [vmem:[#allocation10 + $0x240] ss:$24 sps:$4 sm:$0xff]  }
 0x93b   : > { %3867 = vmatprep.subr.bf16.mxu1 %v11017_v49  ;;  %14278 = vst [vmem:[#allocation93_spill] sm:$0xff] %v11030_v44  ;;  %v11033_v49 = vld [vmem:[#allocation10 + $0x274] ss:$24 sps:$4 sm:$0xff]  }
 0x93c   : > { %4200 = vmatpush1.bf16.msra.mxu0 %v14272_v23  ;;  %14279 = vst [vmem:[#allocation48_spill] sm:$0xff] %v11033_v49  ;;  %v14280_v23 = vld [vmem:[#allocation82_spill] sm:$0xff] }
 0x93d   : > { %4201 = vmatprep.subr.bf16.mxu0 %v14273_v60  ;;  %v14281_v60 = vld [vmem:[#allocation113_spill] sm:$0xff] }
 0x93e   : > { %3868 = vmatpush1.bf16.msra.mxu1 %v11022_v8  ;;  %v11038_v8 = vld [vmem:[#allocation10 + $0x270] ss:$24 sps:$4 sm:$0xff]  }
 0x93f   : > { %3869 = vmatprep.subr.bf16.mxu1 %v11025_v12  ;;  %14282 = vst [vmem:[#allocation50_spill] sm:$0xff] %v11038_v8  ;;  %v11041_v12 = vld [vmem:[#allocation10 + $0x2a4] ss:$24 sps:$4 sm:$0xff]  }
 0x940   : > { %4202 = vmatpush1.bf16.msra.mxu0 %v14276_v52  ;;  %14283 = vst [vmem:[#allocation52_spill] sm:$0xff] %v11041_v12  ;;  %v14284_v52 = vld [vmem:[#allocation86_spill] sm:$0xff] }
 0x941   : > { %4203 = vmatprep.subr.bf16.mxu0 %v14277_v56  ;;  %v14285_v56 = vld [vmem:[#allocation115_spill] sm:$0xff] }
 0x942   : > { %3870 = vmatpush1.bf16.msra.mxu1 %v11030_v44  ;;  %v11046_v44 = vld [vmem:[#allocation10 + $0x2a0] ss:$24 sps:$4 sm:$0xff]  }
 0x943   : > { %3871 = vmatprep.subr.bf16.mxu1 %v11033_v49  ;;  %14286 = vst [vmem:[#allocation97_spill] sm:$0xff] %v11046_v44  ;;  %v11049_v49 = vld [vmem:[#allocation10 + $0x2d4] ss:$24 sps:$4 sm:$0xff]  }
 0x944   : > { %4204 = vmatpush1.bf16.msra.mxu0 %v14280_v23  ;;  %14287 = vst [vmem:[#allocation54_spill] sm:$0xff] %v11049_v49  ;;  %v14288_v23 = vld [vmem:[#allocation90_spill] sm:$0xff] }
 0x945   : > { %4205 = vmatprep.subr.bf16.mxu0 %v14281_v60  ;;  %v14289_v60 = vld [vmem:[#allocation117_spill] sm:$0xff] }
 0x946   : > { %3872 = vmatpush1.bf16.msra.mxu1 %v11038_v8  ;;  %v11054_v8 = vld [vmem:[#allocation10 + $0x2d0] ss:$24 sps:$4 sm:$0xff]  }
 0x947   : > { %3873 = vmatprep.subr.bf16.mxu1 %v11041_v12  ;;  %14290 = vst [vmem:[#allocation175_spill] sm:$0xff] %v11054_v8  ;;  %v11057_v12 = vld [vmem:[#allocation11 + $0x4] ss:$8 sps:$4 sm:$0xff]  }
 0x948   : > { %4206 = vmatpush1.bf16.msra.mxu0 %v14284_v52  ;;  %14291 = vst [vmem:[#allocation176_spill] sm:$0xff] %v11057_v12  ;;  %v14292_v52 = vld [vmem:[#allocation94_spill] sm:$0xff] }
 0x949   : > { %4207 = vmatprep.subr.bf16.mxu0 %v14285_v56  ;;  %v14293_v56 = vld [vmem:[#allocation119_spill] sm:$0xff] }
 0x94a   : > { %3874 = vmatpush1.bf16.msra.mxu1 %v11046_v44  ;;  %v11063_v44 = vld [vmem:[#allocation11] ss:$8 sps:$4 sm:$0xff]  }
 0x94b   : > { %3875 = vmatprep.subr.bf16.mxu1 %v11049_v49  ;;  %14294 = vst [vmem:[#allocation99_spill] sm:$0xff] %v11063_v44 }
 0x94c   : > { %4208 = vmatpush1.bf16.msra.mxu0 %v14288_v23  ;;  %v11066_v23 = vld [vmem:[#allocation11 + $0x14] ss:$8 sps:$4 sm:$0xff]  }
 0x94d   : > { %4209 = vmatprep.subr.bf16.mxu0 %v14289_v60  ;;  %14295 = vst [vmem:[#allocation56_spill] sm:$0xff] %v11066_v23  ;;  %v11069_v60 = vld [vmem:[#allocation11 + $0x10] ss:$8 sps:$4 sm:$0xff]  }
 0x94e   : > { %3876 = vmatpush1.bf16.msra.mxu1 %v11054_v8  ;;  %14296 = vst [vmem:[#allocation100_spill] sm:$0xff] %v11069_v60  ;;  %v11072_v8 = vld [vmem:[#allocation11 + $0x24] ss:$8 sps:$4 sm:$0xff]  }
 0x94f   : > { %4014 = vmatprep.subr.bf16.mxu1 %v11057_v12  ;;  %14297 = vst [vmem:[#allocation58_spill] sm:$0xff] %v11072_v8 }
 0x950   : > { %4210 = vmatpush1.bf16.msra.mxu0 %v14292_v52  ;;  %v11075_v52 = vld [vmem:[#allocation11 + $0x20] ss:$8 sps:$4 sm:$0xff]  }
 0x951   : > { %3878 = vmatmul.mubr.bf16.vlgmr.msra.gmra.mrb[48].mxu1 %v10614_v37  ;;  %4304 = vmatprep.subr.bf16.mxu0 %v14293_v56  ;;  %14298 = vst [vmem:[#allocation101_spill] sm:$0xff] %v11075_v52  ;;  %v11078_v37 = vld [vmem:[#allocation11 + $0x34] ss:$8 sps:$4 sm:$0xff]   ;;  %v11081_v56 = vld [vmem:[#allocation11 + $0x30] ss:$8 sps:$4 sm:$0xff]  }
 0x952   : > { %4015 = vmatpush1.bf16.msra.mxu1 %v11063_v44  ;;  %14299 = vst [vmem:[#allocation60_spill] sm:$0xff] %v11078_v37  ;;  %14300 = vst [vmem:[#allocation102_spill] sm:$0xff] %v11081_v56  ;;  %v14304_v44 = vld [vmem:[#allocation73_spill] sm:$0xff] }
 0x953   : > { %4016 = vmatprep.subr.bf16.mxu1 %v11066_v23  ;;  %v11084_v23 = vld [vmem:[#allocation11 + $0x44] ss:$8 sps:$4 sm:$0xff]  }
 0x954   : > { %14301 = vst [vmem:[#allocation62_spill] sm:$0xff] %v11084_v23 }
 0x956   : > { %4017 = vmatpush1.bf16.msra.mxu1 %v11069_v60  ;;  %v11087_v60 = vld [vmem:[#allocation11 + $0x40] ss:$8 sps:$4 sm:$0xff]  }
 0x957   : > { %4018 = vmatprep.subr.bf16.mxu1 %v11072_v8  ;;  %14302 = vst [vmem:[#allocation103_spill] sm:$0xff] %v11087_v60  ;;  %v11090_v8 = vld [vmem:[#allocation11 + $0x54] ss:$8 sps:$4 sm:$0xff]  }
 0x958   : > { %14303 = vst [vmem:[#allocation64_spill] sm:$0xff] %v11090_v8 }
 0x95a   : > { %4019 = vmatpush1.bf16.msra.mxu1 %v11075_v52 }
 0x95b   : > { %4020 = vmatprep.subr.bf16.mxu1 %v11078_v37 }
 0x95e   : > { %4021 = vmatpush1.bf16.msra.mxu1 %v11081_v56  ;;  %v14306_v56 = vld [vmem:[#allocation29_spill] sm:$0xff] }
 0x95f   : > { %4022 = vmatprep.subr.bf16.mxu1 %v11084_v23 }
 0x962   : > { %4023 = vmatpush1.bf16.msra.mxu1 %v11087_v60 }
 0x963   : > { %4024 = vmatprep.subr.bf16.mxu1 %v11090_v8 }
 0x964   : > { %v3630_v52 = vpop.f32.mrb[44].mxu1 }
 0x965   : > { %v11094_v12 = vadd.f32 %v3630_v52, %v14304_v44  ;;  %v3632_v37 = vpop.f32.mrb[45].mxu1  ;;  %v11096_v49 = vpop.f32.mrb[52].mxu0  ;;  %v11108_v52 = vld [vmem:[#allocation11 + $0x64] ss:$8 sps:$4 sm:$0xff]  }
 0x966   : > { %v11099_v47 = vadd.f32 %v3632_v37, %v14306_v56  ;;  %v3634_v30 = vpop.f32.mrb[46].mxu1  ;;  %v11101_v23 = vpop.f32.mrb[53].mxu0  ;;  %4025 = vmatpush1.bf16.msra.mxu1 %v11103_v3  ;;  %14309 = vst [vmem:[#allocation68_spill] sm:$0xff] %v11108_v52  ;;  %v11113_v56 = vld [vmem:[#allocation11 + $0x60] ss:$8 sps:$4 sm:$0xff]  }
 0x967   : > { %14305 = vst [vmem:[#allocation104_spill] sm:$0xff] %v11094_v12  ;;  %v3635_v60 = vpop.f32.mrb[47].mxu1  ;;  %v3924_v16 = vpop.f32.mrb[54].mxu0  ;;  %v3637_v8 = vsel %vm2382_vm14, %v11094_v12, -inf  ;;  %4026 = vmatprep.subr.bf16.mxu1 %v11108_v52  ;;  %14310 = vst [vmem:[#allocation106_spill] sm:$0xff] %v11113_v56 }
 0x968   : > { %14307 = vst [vmem:[#allocation66_spill] sm:$0xff] %v11099_v47  ;;  %v3925_v44 = vpop.f32.mrb[55].mxu0  ;;  %v3638_v37 = vsel %vm2382_vm14, %v11099_v47, -inf  ;;  %v11116_v3 = vld [vmem:[#allocation11 + $0x74] ss:$8 sps:$4 sm:$0xff]  }
 0x969   : > { %v3639_v30 = vmax.f32 %v3637_v8, %v3638_v37  ;;  %14311 = vst [vmem:[#allocation70_spill] sm:$0xff] %v11116_v3  ;;  %v11119_v16 = vld [vmem:[#allocation11 + $0x70] ss:$8 sps:$4 sm:$0xff]   ;;  %v11122_v60 = vld [vmem:[#allocation11 + $0x84] ss:$8 sps:$4 sm:$0xff]  }
 0x96a   : > { %4027 = vmatpush1.bf16.msra.mxu1 %v11113_v56  ;;  %14312 = vst [vmem:[#allocation107_spill] sm:$0xff] %v11119_v16  ;;  %14313 = vst [vmem:[#allocation72_spill] sm:$0xff] %v11122_v60  ;;  %v11125_v44 = vld [vmem:[#allocation11 + $0x80] ss:$8 sps:$4 sm:$0xff]   ;;  %v11128_v8 = vld [vmem:[#allocation11 + $0x94] ss:$8 sps:$4 sm:$0xff]  }
 0x96b   : > { %3640 = vmax.xlane.f32.xlu1 %v3639_v30  ;;  %4028 = vmatprep.subr.bf16.mxu1 %v11116_v3  ;;  %14314 = vst [vmem:[#allocation108_spill] sm:$0xff] %v11125_v44  ;;  %14315 = vst [vmem:[#allocation27_spill] sm:$0xff] %v11128_v8  ;;  %v11131_v37 = vld [vmem:[#allocation11 + $0x90] ss:$8 sps:$4 sm:$0xff]   ;;  %v11134_v30 = vld [vmem:[#allocation11 + $0xa4] ss:$8 sps:$4 sm:$0xff]  }
 0x96c   : > { %14316 = vst [vmem:[#allocation74_spill] sm:$0xff] %v11131_v37  ;;  %14317 = vst [vmem:[#allocation109_spill] sm:$0xff] %v11134_v30  ;;  %v11137_v47 = vld [vmem:[#allocation11 + $0xa0] ss:$8 sps:$4 sm:$0xff]   ;;  %v11140_v12 = vld [vmem:[#allocation11 + $0xb4] ss:$8 sps:$4 sm:$0xff]  }
 0x96d   : > { %14318 = vst [vmem:[#allocation76_spill] sm:$0xff] %v11137_v47  ;;  %14319 = vst [vmem:[#allocation110_spill] sm:$0xff] %v11140_v12 }
 0x96e   : > { %4029 = vmatpush1.bf16.msra.mxu1 %v11119_v16 }
 0x96f   : > { %4030 = vmatprep.subr.bf16.mxu1 %v11122_v60 }
 0x972   : > { %4031 = vmatpush1.bf16.msra.mxu1 %v11125_v44  ;;  %v11143_v44 = vld [vmem:[#allocation11 + $0xb0] ss:$8 sps:$4 sm:$0xff]  }
 0x973   : > { %4032 = vmatprep.subr.bf16.mxu1 %v11128_v8  ;;  %14320 = vst [vmem:[#allocation78_spill] sm:$0xff] %v11143_v44  ;;  %v11146_v8 = vld [vmem:[#allocation11 + $0xc4] ss:$8 sps:$4 sm:$0xff]  }
 0x974   : > { %14321 = vst [vmem:[#allocation111_spill] sm:$0xff] %v11146_v8 }
 0x976   : > { %4033 = vmatpush1.bf16.msra.mxu1 %v11131_v37  ;;  %v11149_v37 = vld [vmem:[#allocation11 + $0xc0] ss:$8 sps:$4 sm:$0xff]  }
 0x977   : > { %4034 = vmatprep.subr.bf16.mxu1 %v11134_v30  ;;  %14322 = vst [vmem:[#allocation80_spill] sm:$0xff] %v11149_v37  ;;  %v11152_v30 = vld [vmem:[#allocation11 + $0xd4] ss:$8 sps:$4 sm:$0xff]  }
 0x978   : > { %14323 = vst [vmem:[#allocation112_spill] sm:$0xff] %v11152_v30 }
 0x97a   : > { %4035 = vmatpush1.bf16.msra.mxu1 %v11137_v47  ;;  %v11155_v47 = vld [vmem:[#allocation11 + $0xd0] ss:$8 sps:$4 sm:$0xff]  }
 0x97b   : > { %4036 = vmatprep.subr.bf16.mxu1 %v11140_v12  ;;  %14324 = vst [vmem:[#allocation82_spill] sm:$0xff] %v11155_v47  ;;  %v11158_v12 = vld [vmem:[#allocation11 + $0xe4] ss:$8 sps:$4 sm:$0xff]  }
 0x97c   : > { %14325 = vst [vmem:[#allocation113_spill] sm:$0xff] %v11158_v12 }
 0x97e   : > { %4037 = vmatpush1.bf16.msra.mxu1 %v11143_v44  ;;  %v11161_v44 = vld [vmem:[#allocation11 + $0xe0] ss:$8 sps:$4 sm:$0xff]  }
 0x97f   : > { %4038 = vmatprep.subr.bf16.mxu1 %v11146_v8  ;;  %14326 = vst [vmem:[#allocation86_spill] sm:$0xff] %v11161_v44  ;;  %v11164_v8 = vld [vmem:[#allocation11 + $0xf4] ss:$8 sps:$4 sm:$0xff]  }
 0x980   : > { %14327 = vst [vmem:[#allocation115_spill] sm:$0xff] %v11164_v8 }
 0x982   : > { %4039 = vmatpush1.bf16.msra.mxu1 %v11149_v37  ;;  %v11167_v37 = vld [vmem:[#allocation11 + $0xf0] ss:$8 sps:$4 sm:$0xff]  }
 0x983   : > { %4040 = vmatprep.subr.bf16.mxu1 %v11152_v30  ;;  %14328 = vst [vmem:[#allocation90_spill] sm:$0xff] %v11167_v37  ;;  %v11170_v30 = vld [vmem:[#allocation8 + $0x4] ss:$24 sps:$4 sm:$0xff]  }
 0x984   : > { %14329 = vst [vmem:[#allocation117_spill] sm:$0xff] %v11170_v30 }
 0x986   : > { %4041 = vmatpush1.bf16.msra.mxu1 %v11155_v47 }
 0x987   : > { %4042 = vmatprep.subr.bf16.mxu1 %v11158_v12 }
 0x98a   : > { %4043 = vmatpush1.bf16.msra.mxu1 %v11161_v44 }
 0x98b   : > { %4044 = vmatprep.subr.bf16.mxu1 %v11164_v8 }
 0x98e   : > { %4045 = vmatpush1.bf16.msra.mxu1 %v11167_v37 }
 0x98f   : > { %4138 = vmatprep.subr.bf16.mxu1 %v11170_v30 }
 0x9a6   : > { %v11173_v47 = vpop.f32.mrb[56].mxu0 }
 0x9a7   : > { %v11175_v60 = vpop.f32.mrb[57].mxu0 }
 0x9a8   : > { %v3965_v12 = vpop.f32.mrb[58].mxu0 }
 0x9a9   : > { %v3966_v16 = vpop.f32.mrb[59].mxu0  ;;  %v11187_v12 = vld [vmem:[#allocation10 + $0x8] ss:$24 sps:$4 sm:$0xff]  }
 0x9aa   : > { %14330 = vst [vmem:[#allocation94_spill] sm:$0xff] %v11187_v12  ;;  %v14336_v16 = vld [vmem:[#allocation133_spill] sm:$0xff] }
 0x9e4   : > { %v11177_v3 = vpop.f32.mrb[52].mxu1 }
 0x9e5   : > { %v11179_v44 = vpop.f32.mrb[53].mxu1 }
 0x9e6   : > { %v3840_v56 = vpop.f32.mrb[54].mxu1  ;;  %v4127_v8 = vpop.f32.mrb[60].mxu0 }
 0x9e7   : > { %v3841_v52 = vpop.f32.mrb[55].mxu1  ;;  %v4134_v42 = vmax.f32 %v4127_v8, 0.0  ;;  %v4129_v41 = vpop.f32.mrb[61].mxu0  ;;  %v11190_v56 = vld [vmem:[#allocation10 + $0x3c] ss:$24 sps:$4 sm:$0xff]  }
 0x9e8   : > { %v4135_v37 = vmax.f32 %v4129_v41, 0.0  ;;  %v4131_v32 = vpop.f32.mrb[62].mxu0  ;;  %14331 = vst [vmem:[#allocation119_spill] sm:$0xff] %v11190_v56  ;;  %v14333_v41 = vld [vmem:[#allocation129_spill] sm:$0xff]  ;;  %v14337_v8 = vld [vmem:[#allocation128_spill] sm:$0xff] }
 0x9e9   : > { %v11181_v40 = vpack.c.bf16 %v4134_v42, %v4134_v42  ;;  %v4132_v30 = vpop.f32.mrb[63].mxu0  ;;  %v14332_v32 = vld [vmem:[#allocation127_spill] sm:$0xff]  ;;  %v14335_v52 = vld [vmem:[#allocation125_spill] sm:$0xff] }
 0x9ea   : > { %v11183_v21 = vpack.c.bf16 %v4135_v37, %v4135_v37  ;;  %v14334_v42 = vld [vmem:[#allocation131_spill] sm:$0xff]  ;;  %v14339_v30 = vld [vmem:[#allocation136_spill] sm:$0xff] }
 0x9eb   : > { %v14338_v37 = vld [vmem:[#allocation135_spill] sm:$0xff] }
 0x9ec   : > { %4211 = vmatprep.mubr.bf16.mxu0 %v11183_v21 }
 0x9ed   : > { %4212 = vmatmul.mubr.bf16.vlgmr.msra.gmra.mrb[64].mxu0 %v11181_v40 }
 0x9ee   : > { %4305 = vmatpush1.bf16.msra.mxu0 %v11187_v12  ;;  %v14340_v12 = vld [vmem:[#allocation138_spill] sm:$0xff] }
 0x9ef   : > { %4306 = vmatprep.subr.bf16.mxu0 %v11190_v56  ;;  %v14341_v56 = vld [vmem:[#allocation139_spill] sm:$0xff] }
 0x9f2   : > { %4307 = vmatpush1.bf16.msra.mxu0 %v10494_v43  ;;  %v14342_v43 = vld [vmem:[#allocation84_spill] sm:$0xff] }
 0x9f3   : > { %4308 = vmatprep.subr.bf16.mxu0 %v14332_v32  ;;  %v14343_v32 = vld [vmem:[#allocation114_spill] sm:$0xff] }
 0x9f6   : > { %4309 = vmatpush1.bf16.msra.mxu0 %v14333_v41  ;;  %v14344_v41 = vld [vmem:[#allocation140_spill] sm:$0xff] }
 0x9f7   : > { %4310 = vmatprep.subr.bf16.mxu0 %v14334_v42  ;;  %v14345_v42 = vld [vmem:[#allocation141_spill] sm:$0xff] }
 0x9fa   : > { %4311 = vmatpush1.bf16.msra.mxu0 %v14335_v52  ;;  %v14346_v52 = vld [vmem:[#allocation88_spill] sm:$0xff] }
 0x9fb   : > { %4312 = vmatprep.subr.bf16.mxu0 %v14336_v16  ;;  %v14347_v16 = vld [vmem:[#allocation116_spill] sm:$0xff] }
 0x9fe   : > { %4313 = vmatpush1.bf16.msra.mxu0 %v14337_v8  ;;  %v14348_v8 = vld [vmem:[#allocation142_spill] sm:$0xff] }
 0x9ff   : > { %4314 = vmatprep.subr.bf16.mxu0 %v14338_v37  ;;  %v14349_v37 = vld [vmem:[#allocation143_spill] sm:$0xff] }
 0xa02   : > { %4315 = vmatpush1.bf16.msra.mxu0 %v14339_v30  ;;  %v14350_v30 = vld [vmem:[#allocation92_spill] sm:$0xff] }
 0xa03   : > { %4316 = vmatprep.subr.bf16.mxu0 %v14340_v12  ;;  %v14351_v12 = vld [vmem:[#allocation118_spill] sm:$0xff] }
 0xa06   : > { %4317 = vmatpush1.bf16.msra.mxu0 %v14341_v56  ;;  %v14352_v56 = vld [vmem:[#allocation144_spill] sm:$0xff] }
 0xa07   : > { %4318 = vmatprep.subr.bf16.mxu0 %v14342_v43  ;;  %v14353_v43 = vld [vmem:[#allocation145_spill] sm:$0xff] }
 0xa0a   : > { %4319 = vmatpush1.bf16.msra.mxu0 %v14343_v32  ;;  %v14354_v32 = vld [vmem:[#allocation95_spill] sm:$0xff] }
 0xa0b   : > { %4320 = vmatprep.subr.bf16.mxu0 %v14344_v41  ;;  %v14355_v41 = vld [vmem:[#allocation120_spill] sm:$0xff] }
 0xa0e   : > { %4321 = vmatpush1.bf16.msra.mxu0 %v14345_v42  ;;  %v14356_v42 = vld [vmem:[#allocation146_spill] sm:$0xff] }
 0xa0f   : > { %4322 = vmatprep.subr.bf16.mxu0 %v14346_v52 }
 0xa12   : > { %4323 = vmatpush1.bf16.msra.mxu0 %v14347_v16 }
 0xa13   : > { %4324 = vmatprep.subr.bf16.mxu0 %v14348_v8 }
 0xa16   : > { %4325 = vmatpush1.bf16.msra.mxu0 %v14349_v37 }
 0xa17   : > { %4326 = vmatprep.subr.bf16.mxu0 %v14350_v30  ;;  %v14357_v30 = vld [vmem:[#allocation147_spill] sm:$0xff] }
 0xa1a   : > { %4327 = vmatpush1.bf16.msra.mxu0 %v14351_v12 }
 0xa1b   : > { %4328 = vmatprep.subr.bf16.mxu0 %v14352_v56  ;;  %v14358_v56 = vld [vmem:[#allocation98_spill] sm:$0xff] }
 0xa1e   : > { %4329 = vmatpush1.bf16.msra.mxu0 %v14353_v43  ;;  %v14359_v43 = vld [vmem:[#allocation172_spill] sm:$0xff] }
 0xa1f   : > { %4330 = vmatprep.subr.bf16.mxu0 %v14354_v32  ;;  %v5930_v32 = vadd.f32 %v11096_v49, %v14359_v43 }
 0xa22   : > { %4331 = vmatpush1.bf16.msra.mxu0 %v14355_v41  ;;  %v14360_v41 = vld [vmem:[#allocation173_spill] sm:$0xff] }
 0xa23   : > { %4332 = vmatprep.subr.bf16.mxu0 %v14356_v42  ;;  %v5931_v42 = vadd.f32 %v11101_v23, %v14360_v41 }
 0xa24   : > { %v3879_v52 = vpop.f32.mrb[48].mxu1 }
 0xa25   : > { %v5928_v16 = vadd.f32 %v3879_v52, %v13942_v51  ;;  %v3881_v8 = vpop.f32.mrb[49].mxu1  ;;  %v14361_v52 = vld [vmem:[#allocation121_spill] sm:$0xff] }
 0xa26   : > { %v5929_v37 = vadd.f32 %v3881_v8, %v8772_v39  ;;  %v3883_v34 = vpop.f32.mrb[50].mxu1  ;;  %4333 = vmatpush1.bf16.msra.mxu0 %v14357_v30  ;;  %v5872_v8 = vmul.f32 -1.442695, %v5931_v42 }
 0xa27   : > { %v5869_v12 = vmul.f32 -1.442695, %v5928_v16  ;;  %v3884_v26 = vpop.f32.mrb[51].mxu1  ;;  %4334 = vmatprep.subr.bf16.mxu0 %v14358_v56  ;;  %v5871_v34 = vmul.f32 -1.442695, %v5930_v32 }
 0xa28   : > { %v5870_v28 = vmul.f32 -1.442695, %v5929_v37 }
 0xa29   : > { %6566 = vpow2.f32 %v5869_v12 }
 0xa2a   : > { %6568 = vpow2.f32 %v5870_v28  ;;  %4335 = vmatpush1.bf16.msra.mxu0 %v14361_v52  ;;  %v3996_v28 = vadd.f32 %v11173_v47, %v8786_v22 }
 0xa2b   : > { %4345 = vmatprep.subr.bf16.mxu0 %v10587_v15  ;;  %6570 = vpow2.f32 %v5871_v34  ;;  %v14362_v15 = vld [vmem:[#allocation174_spill] sm:$0xff]  ;;  %v3837_v34 = vadd.f32 %v11177_v3, %v13945_v31 }
 0xa2c   : > { %6572 = vpow2.f32 %v5872_v8  ;;  %v3997_v32 = vadd.f32 %v11175_v60, %v14362_v15 }
 0xa33   : > { %v6567_v26 = vpop.eup %6566 }
 0xa34   : > { %v6569_v16 = vpop.eup %6568  ;;  %v3976_v30 = vadd.f32 1.0, %v6567_v26  ;;  %v3839_v26 = vadd.f32 %v11179_v44, %v13946_v14 }
 0xa35   : > { %v3977_v56 = vadd.f32 1.0, %v6569_v16  ;;  %v6571_v49 = vpop.eup %6570 }
 0xa36   : > { %6574 = vrcp.f32 %v3976_v30  ;;  %v6573_v37 = vpop.eup %6572  ;;  %v3990_v23 = vadd.f32 1.0, %v6571_v49 }
 0xa37   : > { %6576 = vrcp.f32 %v3977_v56  ;;  %v3991_v12 = vadd.f32 1.0, %v6573_v37  ;;  %v4078_v37 = vstv %s4077_s25 }
 0xa38   : > { %6578 = vrcp.f32 %v3990_v23  ;;  %vm4079_vm15 = vcmp.eq.s32.totalorder %v4078_v37, 1  ;;  %v11411_v37 = vld [vmem:[#allocation8 + $0x74] ss:$24 sps:$4 sm:$0xff]  }
 0xa39   : > { %6580 = vrcp.f32 %v3991_v12  ;;  %14366 = vst [vmem:[#allocation129_spill] sm:$0xff] %v11411_v37 }
 0xa40   : > { %v6575_v52 = vpop.eup %6574 }
 0xa41   : > { %v6577_v42 = vpop.eup %6576  ;;  %v3998_v8 = vmul.f32 %v6575_v52, %v3996_v28 }
 0xa42   : > { %v3999_v16 = vmul.f32 %v6577_v42, %v3997_v32  ;;  %v6579_v47 = vpop.eup %6578 }
 0xa43   : > { %v4000_v30 = vadd.f32 %v3998_v8, %v3837_v34  ;;  %v6581_v60 = vpop.eup %6580  ;;  %v4004_v49 = vsub.f32 1.0, %v6579_v47  ;;  %v4008_v12 = vmul.f32 %v6579_v47, %v10603_v27  ;;  %v11271_v47 = vld [vmem:[#allocation8 + $0x64] ss:$24 sps:$4 sm:$0xff]  }
 0xa44   : > { %v4001_v56 = vadd.f32 %v3999_v16, %v3839_v26  ;;  %v4005_v15 = vsub.f32 1.0, %v6581_v60  ;;  %v4009_v44 = vmul.f32 %v6581_v60, %v10606_v11  ;;  %v11283_v60 = vld [vmem:[#allocation8 + $0x90] ss:$24 sps:$4 sm:$0xff]  }
 0xa45   : > { %6582 = vtanh.f32 %v4000_v30 }
 0xa46   : > { %6584 = vtanh.f32 %v4001_v56  ;;  %v11256_v56 = vld [vmem:[#allocation8] ss:$24 sps:$4 sm:$0xff]  }
 0xa4f   : > { %v6583_v23 = vpop.eup %6582 }
 0xa50   : > { %v6585_v3 = vpop.eup %6584  ;;  %v4006_v28 = vmul.f32 %v6583_v23, %v4004_v49  ;;  %v11408_v49 = vld [vmem:[#allocation8 + $0x40] ss:$24 sps:$4 sm:$0xff]  }
 0xa51   : > { %v4007_v52 = vmul.f32 %v6585_v3, %v4005_v15  ;;  %14365 = vst [vmem:[#allocation127_spill] sm:$0xff] %v11408_v49  ;;  %v14368_v23 = vld [vmem:[#allocation122_spill] sm:$0xff] }
 0xa52   : > { %v4010_v32 = vadd.f32 %v4008_v12, %v4006_v28  ;;  %v11416_v3 = vld [vmem:[#allocation8 + $0x70] ss:$24 sps:$4 sm:$0xff]  }
 0xa53   : > { %v4011_v42 = vadd.f32 %v4009_v44, %v4007_v52  ;;  %14369 = vst [vmem:[#allocation131_spill] sm:$0xff] %v11416_v3  ;;  %v14371_v28 = vld [vmem:[#allocation123_spill] sm:$0xff]  ;;  %v11424_v52 = vld [vmem:[#allocation8 + $0xa0] ss:$24 sps:$4 sm:$0xff]  }
 0xa54   : > { %v11242_v34 = vsel %vm4079_vm15, %v4010_v32, %v10603_v27  ;;  %v4012_v16 = vpack.c.bf16 %v4010_v32, %v4010_v32  ;;  %v11262_v27 = vld [vmem:[#allocation8 + $0x34] ss:$24 sps:$4 sm:$0xff]   ;;  %14373 = vst [vmem:[#allocation133_spill] sm:$0xff] %v11424_v52 }
 0xa55   : > { %v4013_v8 = vpack.c.bf16 %v4011_v42, %v4011_v42  ;;  %v11245_v26 = vsel %vm4079_vm15, %v4011_v42, %v10606_v11  ;;  %v11253_v15 = vpack.c.bf16 %v11242_v34, %v11242_v34  ;;  %v11267_v11 = vld [vmem:[#allocation8 + $0x30] ss:$24 sps:$4 sm:$0xff]   ;;  %v11427_v44 = vld [vmem:[#allocation8 + $0xd4] ss:$24 sps:$4 sm:$0xff]   ;;  %vm5386_vm15 = vcmask 1043456  }
 0xa56   : > { %v11249_v30 = vpack.c.bf16 %v11245_v26, %v11245_v26  ;;  %v14372_v12 = vld [vmem:[#allocation163_spill] sm:$0xff]  ;;  %14374 = vst [vmem:[#allocation128_spill] sm:$0xff] %v11427_v44  ;;  %v14375_v32 = vld [vmem:[#allocation164_spill] sm:$0xff]  ;;  %v14376_v42 = vld [vmem:[#allocation126_spill] sm:$0xff] }
 0xa57   : > { %4046 = vmatprep.mubr.bf16.mxu1 %v4013_v8  ;;  %v11432_v8 = vld [vmem:[#allocation8 + $0xd0] ss:$24 sps:$4 sm:$0xff]  }
 0xa58   : > { %4047 = vmatmul.mubr.bf16.vlgmr.msra.gmra.mrb[56].mxu1 %v4012_v16  ;;  %4336 = vmatprep.mubr.bf16.mxu0 %v11249_v30  ;;  %14377 = vst [vmem:[#allocation135_spill] sm:$0xff] %v11432_v8  ;;  %v11435_v16 = vld [vmem:[#allocation8 + $0x104] ss:$24 sps:$4 sm:$0xff]  }
 0xa59   : > { %4139 = vmatpush1.bf16.msra.mxu1 %v11256_v56  ;;  %4337 = vmatmul.mubr.bf16.vlgmr.msra.gmra.mrb[64].mxu0 %v11253_v15  ;;  %14378 = vst [vmem:[#allocation136_spill] sm:$0xff] %v11435_v16 }
 0xa5a   : > { %4346 = vmatpush1.bf16.msra.mxu0 %v10619_v19  ;;  %4377 = vmatprep.mubr.bf16.mxu0 %v11249_v30  ;;  %v11275_v19 = vld [vmem:[#allocation8 + $0x60] ss:$24 sps:$4 sm:$0xff]  }
 0xa5b   : > { %4140 = vmatprep.subr.bf16.mxu1 %v11262_v27  ;;  %4347 = vmatprep.subr.bf16.mxu0 %v10624_v10  ;;  %v11279_v10 = vld [vmem:[#allocation8 + $0x94] ss:$24 sps:$4 sm:$0xff]  }
 0xa5c   : > { %4170 = vmatprep.mubr.bf16.mxu1 %v11183_v21 }
 0xa5d   : > { %4141 = vmatpush1.bf16.msra.mxu1 %v11267_v11 }
 0xa5e   : > { %4348 = vmatpush1.bf16.msra.mxu0 %v10629_v24  ;;  %4142 = vmatprep.subr.bf16.mxu1 %v11271_v47  ;;  %v11287_v24 = vld [vmem:[#allocation8 + $0xc4] ss:$24 sps:$4 sm:$0xff]  }
 0xa5f   : > { %4349 = vmatprep.subr.bf16.mxu0 %v10633_v55  ;;  %v11291_v55 = vld [vmem:[#allocation8 + $0xc0] ss:$24 sps:$4 sm:$0xff]  }
 0xa61   : > { %4143 = vmatpush1.bf16.msra.mxu1 %v11275_v19 }
 0xa62   : > { %4350 = vmatpush1.bf16.msra.mxu0 %v10637_v5  ;;  %4144 = vmatprep.subr.bf16.mxu1 %v11279_v10  ;;  %v11295_v5 = vld [vmem:[#allocation8 + $0xf4] ss:$24 sps:$4 sm:$0xff]  }
 0xa63   : > { %4351 = vmatprep.subr.bf16.mxu0 %v10641_v36  ;;  %v11299_v36 = vld [vmem:[#allocation8 + $0xf0] ss:$24 sps:$4 sm:$0xff]  }
 0xa65   : > { %4145 = vmatpush1.bf16.msra.mxu1 %v11283_v60 }
 0xa66   : > { %4352 = vmatpush1.bf16.msra.mxu0 %v10645_v50  ;;  %4146 = vmatprep.subr.bf16.mxu1 %v11287_v24  ;;  %v11303_v50 = vld [vmem:[#allocation8 + $0x124] ss:$24 sps:$4 sm:$0xff]  }
 0xa67   : > { %4353 = vmatprep.subr.bf16.mxu0 %v10649_v62  ;;  %v11307_v62 = vld [vmem:[#allocation8 + $0x120] ss:$24 sps:$4 sm:$0xff]  }
 0xa69   : > { %4147 = vmatpush1.bf16.msra.mxu1 %v11291_v55 }
 0xa6a   : > { %4354 = vmatpush1.bf16.msra.mxu0 %v10653_v38  ;;  %4148 = vmatprep.subr.bf16.mxu1 %v11295_v5  ;;  %v11311_v38 = vld [vmem:[#allocation8 + $0x154] ss:$24 sps:$4 sm:$0xff]  }
 0xa6b   : > { %4355 = vmatprep.subr.bf16.mxu0 %v10657_v0  ;;  %v11315_v0 = vld [vmem:[#allocation8 + $0x150] ss:$24 sps:$4 sm:$0xff]  }
 0xa6d   : > { %4149 = vmatpush1.bf16.msra.mxu1 %v11299_v36 }
 0xa6e   : > { %4356 = vmatpush1.bf16.msra.mxu0 %v10661_v25  ;;  %4150 = vmatprep.subr.bf16.mxu1 %v11303_v50  ;;  %v11319_v25 = vld [vmem:[#allocation8 + $0x184] ss:$24 sps:$4 sm:$0xff]  }
 0xa6f   : > { %4357 = vmatprep.subr.bf16.mxu0 %v10665_v2  ;;  %v11323_v2 = vld [vmem:[#allocation8 + $0x180] ss:$24 sps:$4 sm:$0xff]  }
 0xa71   : > { %4151 = vmatpush1.bf16.msra.mxu1 %v11307_v62 }
 0xa72   : > { %4358 = vmatpush1.bf16.msra.mxu0 %v10669_v4  ;;  %4152 = vmatprep.subr.bf16.mxu1 %v11311_v38  ;;  %v11327_v4 = vld [vmem:[#allocation8 + $0x1b4] ss:$24 sps:$4 sm:$0xff]  }
 0xa73   : > { %4359 = vmatprep.subr.bf16.mxu0 %v10673_v6  ;;  %v11331_v6 = vld [vmem:[#allocation8 + $0x1b0] ss:$24 sps:$4 sm:$0xff]  }
 0xa75   : > { %4153 = vmatpush1.bf16.msra.mxu1 %v11315_v0 }
 0xa76   : > { %4360 = vmatpush1.bf16.msra.mxu0 %v10677_v18  ;;  %4154 = vmatprep.subr.bf16.mxu1 %v11319_v25  ;;  %v11335_v18 = vld [vmem:[#allocation8 + $0x1e4] ss:$24 sps:$4 sm:$0xff]  }
 0xa77   : > { %4361 = vmatprep.subr.bf16.mxu0 %v10681_v9  ;;  %v11339_v9 = vld [vmem:[#allocation8 + $0x1e0] ss:$24 sps:$4 sm:$0xff]  }
 0xa79   : > { %4155 = vmatpush1.bf16.msra.mxu1 %v11323_v2 }
 0xa7a   : > { %4362 = vmatpush1.bf16.msra.mxu0 %v10685_v54  ;;  %4156 = vmatprep.subr.bf16.mxu1 %v11327_v4  ;;  %v11343_v54 = vld [vmem:[#allocation8 + $0x214] ss:$24 sps:$4 sm:$0xff]  }
 0xa7b   : > { %4363 = vmatprep.subr.bf16.mxu0 %v10689_v53  ;;  %v11347_v53 = vld [vmem:[#allocation8 + $0x210] ss:$24 sps:$4 sm:$0xff]  }
 0xa7d   : > { %4157 = vmatpush1.bf16.msra.mxu1 %v11331_v6 }
 0xa7e   : > { %4364 = vmatpush1.bf16.msra.mxu0 %v10693_v58  ;;  %4158 = vmatprep.subr.bf16.mxu1 %v11335_v18  ;;  %v11351_v58 = vld [vmem:[#allocation8 + $0x244] ss:$24 sps:$4 sm:$0xff]  }
 0xa7f   : > { %4365 = vmatprep.subr.bf16.mxu0 %v10697_v59  ;;  %v11356_v59 = vld [vmem:[#allocation8 + $0x240] ss:$24 sps:$4 sm:$0xff]  }
 0xa81   : > { %4159 = vmatpush1.bf16.msra.mxu1 %v11339_v9 }
 0xa82   : > { %4366 = vmatpush1.bf16.msra.mxu0 %v10701_v35  ;;  %4160 = vmatprep.subr.bf16.mxu1 %v11343_v54  ;;  %v11360_v35 = vld [vmem:[#allocation8 + $0x274] ss:$24 sps:$4 sm:$0xff]  }
 0xa83   : > { %4367 = vmatprep.subr.bf16.mxu0 %v10705_v45  ;;  %v11368_v45 = vld [vmem:[#allocation8 + $0x270] ss:$24 sps:$4 sm:$0xff]  }
 0xa85   : > { %4161 = vmatpush1.bf16.msra.mxu1 %v11347_v53 }
 0xa86   : > { %4368 = vmatpush1.bf16.msra.mxu0 %v10709_v48  ;;  %4162 = vmatprep.subr.bf16.mxu1 %v11351_v58  ;;  %v11372_v48 = vld [vmem:[#allocation8 + $0x2a4] ss:$24 sps:$4 sm:$0xff]  }
 0xa87   : > { %4369 = vmatprep.subr.bf16.mxu0 %v10713_v13  ;;  %v11376_v13 = vld [vmem:[#allocation8 + $0x2a0] ss:$24 sps:$4 sm:$0xff]  }
 0xa89   : > { %4163 = vmatpush1.bf16.msra.mxu1 %v11356_v59 }
 0xa8a   : > { %4370 = vmatpush1.bf16.msra.mxu0 %v10718_v33  ;;  %4164 = vmatprep.subr.bf16.mxu1 %v11360_v35  ;;  %v11380_v33 = vld [vmem:[#allocation8 + $0x2d4] ss:$24 sps:$4 sm:$0xff]  }
 0xa8b   : > { %4371 = vmatprep.subr.bf16.mxu0 %v10726_v61  ;;  %v13222_v61 = vstv %s11365_s27 }
 0xa8c   : > { %vm4504_vm0 = vcmp.eq.s32.totalorder %v13966_v20, %v13222_v61  ;;  %v11451_v61 = vld [vmem:[#allocation8 + $0x164] ss:$24 sps:$4 sm:$0xff]  }
 0xa8d   : > { %4165 = vmatpush1.bf16.msra.mxu1 %v11368_v45  ;;  %vm5885_vm1 = vmpackc.low %vm4504_vm0, %vm4504_vm0  ;;  %14386 = vst [vmem:[#allocation114_spill] sm:$0xff] %v11451_v61  ;;  %vm5389_vm0 = vcmask 1044480  }
 0xa8e   : > { %4372 = vmatpush1.bf16.msra.mxu0 %v10730_v57  ;;  %4166 = vmatprep.subr.bf16.mxu1 %v11372_v48  ;;  %v11385_v57 = vld [vmem:[#allocation8 + $0x2d0] ss:$24 sps:$4 sm:$0xff]  }
 0xa8f   : > { %4373 = vmatprep.subr.bf16.mxu0 %v10734_v63  ;;  %v11392_v63 = vld [vmem:[#allocation8 + $0x14] ss:$24 sps:$4 sm:$0xff]  }
 0xa91   : > { %4167 = vmatpush1.bf16.msra.mxu1 %v11376_v13 }
 0xa92   : > { %4374 = vmatpush1.bf16.msra.mxu0 %v10738_v1  ;;  %4168 = vmatprep.subr.bf16.mxu1 %v11380_v33  ;;  %v11397_v1 = vld [vmem:[#allocation8 + $0x10] ss:$24 sps:$4 sm:$0xff]  }
 0xa93   : > { %4375 = vmatprep.subr.bf16.mxu0 %v10743_v29  ;;  %v11402_v29 = vld [vmem:[#allocation8 + $0x44] ss:$24 sps:$4 sm:$0xff]  }
 0xa95   : > { %4169 = vmatpush1.bf16.msra.mxu1 %v11385_v57 }
 0xa96   : > { %4376 = vmatpush1.bf16.msra.mxu0 %v10750_v46  ;;  %4220 = vmatprep.subr.bf16.mxu1 %v11392_v63  ;;  %v14363_v46 = vmov 1.0|1.0  }
 0xa97   : > { %4511 = vmatprep.subr.bf16.mxu0 %v10754_v7  ;;  %v14364_v7 = vld [vmem:[#allocation159_spill] sm:$0xff] }
 0xa98   : > { %4171 = vmatmul.mubr.bf16.vlgmr.msra.gmra.mrb[60].mxu1 %v11181_v40 }
 0xa99   : > { %4221 = vmatpush1.bf16.msra.mxu1 %v11397_v1  ;;  %4252 = vmatprep.mubr.bf16.mxu1 %v11183_v21  ;;  %v14367_v21 = vld [vmem:[#allocation160_spill] sm:$0xff] }
 0xa9a   : > { %4378 = vmatmul.mubr.bf16.vlgmr.msra.gmra.mrb[68].mxu0 %v11253_v15  ;;  %4222 = vmatprep.subr.bf16.mxu1 %v11402_v29 }
 0xa9b   : > { %4512 = vmatpush1.bf16.msra.mxu0 %v10762_v17  ;;  %5886 = vmatprep.mubr.msk.bf16.mxu0 %vm5885_vm1, %v14363_v46  ;;  %v11419_v17 = vld [vmem:[#allocation8 + $0xa4] ss:$24 sps:$4 sm:$0xff]   ;;  %vm5395_vm1 = vcmask 1046528  }
 0xa9c   : > { %4513 = vmatprep.subr.bf16.mxu0 %v14364_v7  ;;  %14370 = vst [vmem:[#allocation125_spill] sm:$0xff] %v11419_v17  ;;  %v14379_v7 = vld [vmem:[#allocation132_spill] sm:$0xff] }
 0xa9d   : > { %4223 = vmatpush1.bf16.msra.mxu1 %v11408_v49  ;;  %v11776_v49 = vld [vmem:[#allocation10 + $0x2dc] ss:$24 sps:$4 sm:$0xff]  }
 0xa9e   : > { %4224 = vmatprep.subr.bf16.mxu1 %v11411_v37 }
 0xa9f   : > { %4514 = vmatpush1.bf16.msra.mxu0 %v14367_v21  ;;  %v14380_v21 = vld [vmem:[#allocation167_spill] sm:$0xff] }
 0xaa0   : > { %4515 = vmatprep.subr.bf16.mxu0 %v14368_v23  ;;  %v11440_v23 = vld [vmem:[#allocation8 + $0x100] ss:$24 sps:$4 sm:$0xff]  }
 0xaa1   : > { %4225 = vmatpush1.bf16.msra.mxu1 %v11416_v3  ;;  %14381 = vst [vmem:[#allocation138_spill] sm:$0xff] %v11440_v23 }
 0xaa2   : > { %4226 = vmatprep.subr.bf16.mxu1 %v11419_v17  ;;  %v14507_v17 = vld [vmem:[#allocation106_spill] sm:$0xff] }
 0xaa3   : > { %4516 = vmatpush1.bf16.msra.mxu0 %v14371_v28  ;;  %v11443_v28 = vld [vmem:[#allocation8 + $0x134] ss:$24 sps:$4 sm:$0xff]  }
 0xaa4   : > { %4517 = vmatprep.subr.bf16.mxu0 %v14372_v12  ;;  %14382 = vst [vmem:[#allocation139_spill] sm:$0xff] %v11443_v28  ;;  %v14383_v12 = vld [vmem:[#allocation168_spill] sm:$0xff] }
 0xaa5   : > { %4227 = vmatpush1.bf16.msra.mxu1 %v11424_v52 }
 0xaa6   : > { %4228 = vmatprep.subr.bf16.mxu1 %v11427_v44  ;;  %v14420_v44 = vld [vmem:[#allocation179_spill] sm:$0xff] }
 0xaa7   : > { %4518 = vmatpush1.bf16.msra.mxu0 %v14375_v32  ;;  %v14384_v32 = vld [vmem:[#allocation130_spill] sm:$0xff] }
 0xaa8   : > { %4519 = vmatprep.subr.bf16.mxu0 %v14376_v42  ;;  %v11448_v42 = vld [vmem:[#allocation8 + $0x130] ss:$24 sps:$4 sm:$0xff]  }
 0xaa9   : > { %4229 = vmatpush1.bf16.msra.mxu1 %v11432_v8  ;;  %14385 = vst [vmem:[#allocation84_spill] sm:$0xff] %v11448_v42  ;;  %v14418_v8 = vld [vmem:[#allocation169_spill] sm:$0xff] }
 0xaaa   : > { %4230 = vmatprep.subr.bf16.mxu1 %v11435_v16  ;;  %v14416_v16 = vld [vmem:[#allocation165_spill] sm:$0xff] }
 0xaab   : > { %4520 = vmatpush1.bf16.msra.mxu0 %v14379_v7  ;;  %v14387_v7 = vld [vmem:[#allocation134_spill] sm:$0xff] }
 0xaac   : > { %4521 = vmatprep.subr.bf16.mxu0 %v14380_v21  ;;  %v14388_v21 = vld [vmem:[#allocation177_spill] sm:$0xff] }
 0xaad   : > { %4231 = vmatpush1.bf16.msra.mxu1 %v11440_v23  ;;  %v11456_v23 = vld [vmem:[#allocation8 + $0x160] ss:$24 sps:$4 sm:$0xff]  }
 0xaae   : > { %4232 = vmatprep.subr.bf16.mxu1 %v11443_v28  ;;  %14389 = vst [vmem:[#allocation140_spill] sm:$0xff] %v11456_v23  ;;  %v11459_v28 = vld [vmem:[#allocation8 + $0x194] ss:$24 sps:$4 sm:$0xff]  }
 0xaaf   : > { %4522 = vmatpush1.bf16.msra.mxu0 %v14383_v12  ;;  %14390 = vst [vmem:[#allocation141_spill] sm:$0xff] %v11459_v28  ;;  %v14391_v12 = vld [vmem:[#allocation178_spill] sm:$0xff] }
 0xab0   : > { %4523 = vmatprep.subr.bf16.mxu0 %v14384_v32  ;;  %v14392_v32 = vld [vmem:[#allocation137_spill] sm:$0xff] }
 0xab1   : > { %4233 = vmatpush1.bf16.msra.mxu1 %v11448_v42  ;;  %v11464_v42 = vld [vmem:[#allocation8 + $0x190] ss:$24 sps:$4 sm:$0xff]  }
 0xab2   : > { %4234 = vmatprep.subr.bf16.mxu1 %v11451_v61  ;;  %14393 = vst [vmem:[#allocation88_spill] sm:$0xff] %v11464_v42  ;;  %v11467_v61 = vld [vmem:[#allocation8 + $0x1c4] ss:$24 sps:$4 sm:$0xff]  }
 0xab3   : > { %4524 = vmatpush1.bf16.msra.mxu0 %v14387_v7  ;;  %14394 = vst [vmem:[#allocation116_spill] sm:$0xff] %v11467_v61  ;;  %v14395_v7 = vld [vmem:[#allocation148_spill] sm:$0xff] }
 0xab4   : > { %4525 = vmatprep.subr.bf16.mxu0 %v14388_v21  ;;  %v14396_v21 = vld [vmem:[#allocation149_spill] sm:$0xff] }
 0xab5   : > { %4235 = vmatpush1.bf16.msra.mxu1 %v11456_v23  ;;  %v11472_v23 = vld [vmem:[#allocation8 + $0x1c0] ss:$24 sps:$4 sm:$0xff]  }
 0xab6   : > { %4236 = vmatprep.subr.bf16.mxu1 %v11459_v28  ;;  %14397 = vst [vmem:[#allocation142_spill] sm:$0xff] %v11472_v23  ;;  %v11475_v28 = vld [vmem:[#allocation8 + $0x1f4] ss:$24 sps:$4 sm:$0xff]  }
 0xab7   : > { %4526 = vmatpush1.bf16.msra.mxu0 %v14391_v12  ;;  %14398 = vst [vmem:[#allocation143_spill] sm:$0xff] %v11475_v28  ;;  %v14399_v12 = vld [vmem:[#allocation150_spill] sm:$0xff] }
 0xab8   : > { %4527 = vmatprep.subr.bf16.mxu0 %v14392_v32  ;;  %v14400_v32 = vld [vmem:[#allocation151_spill] sm:$0xff] }
 0xab9   : > { %4237 = vmatpush1.bf16.msra.mxu1 %v11464_v42  ;;  %v11480_v42 = vld [vmem:[#allocation8 + $0x1f0] ss:$24 sps:$4 sm:$0xff]  }
 0xaba   : > { %4238 = vmatprep.subr.bf16.mxu1 %v11467_v61  ;;  %14401 = vst [vmem:[#allocation92_spill] sm:$0xff] %v11480_v42  ;;  %v11483_v61 = vld [vmem:[#allocation8 + $0x224] ss:$24 sps:$4 sm:$0xff]  }
 0xabb   : > { %4528 = vmatpush1.bf16.msra.mxu0 %v14395_v7  ;;  %14402 = vst [vmem:[#allocation118_spill] sm:$0xff] %v11483_v61  ;;  %v14403_v7 = vld [vmem:[#allocation152_spill] sm:$0xff] }
 0xabc   : > { %4529 = vmatprep.subr.bf16.mxu0 %v14396_v21  ;;  %v14404_v21 = vld [vmem:[#allocation153_spill] sm:$0xff] }
 0xabd   : > { %4239 = vmatpush1.bf16.msra.mxu1 %v11472_v23  ;;  %v11488_v23 = vld [vmem:[#allocation8 + $0x220] ss:$24 sps:$4 sm:$0xff]  }
 0xabe   : > { %4240 = vmatprep.subr.bf16.mxu1 %v11475_v28  ;;  %14405 = vst [vmem:[#allocation144_spill] sm:$0xff] %v11488_v23  ;;  %v11491_v28 = vld [vmem:[#allocation8 + $0x254] ss:$24 sps:$4 sm:$0xff]  }
 0xabf   : > { %4530 = vmatpush1.bf16.msra.mxu0 %v14399_v12  ;;  %14406 = vst [vmem:[#allocation145_spill] sm:$0xff] %v11491_v28  ;;  %v14407_v12 = vld [vmem:[#allocation154_spill] sm:$0xff] }
 0xac0   : > { %4531 = vmatprep.subr.bf16.mxu0 %v14400_v32  ;;  %v14408_v32 = vld [vmem:[#allocation155_spill] sm:$0xff] }
 0xac1   : > { %4241 = vmatpush1.bf16.msra.mxu1 %v11480_v42  ;;  %v11496_v42 = vld [vmem:[#allocation8 + $0x250] ss:$24 sps:$4 sm:$0xff]  }
 0xac2   : > { %4242 = vmatprep.subr.bf16.mxu1 %v11483_v61  ;;  %14409 = vst [vmem:[#allocation95_spill] sm:$0xff] %v11496_v42  ;;  %v14413_v61 = vld [vmem:[#allocation158_spill] sm:$0xff] }
 0xac3   : > { %4532 = vmatpush1.bf16.msra.mxu0 %v14403_v7  ;;  %v11499_v7 = vld [vmem:[#allocation8 + $0x284] ss:$24 sps:$4 sm:$0xff]  }
 0xac4   : > { %4533 = vmatprep.subr.bf16.mxu0 %v14404_v21  ;;  %14410 = vst [vmem:[#allocation120_spill] sm:$0xff] %v11499_v7  ;;  %v14411_v21 = vld [vmem:[#allocation156_spill] sm:$0xff] }
 0xac5   : > { %4243 = vmatpush1.bf16.msra.mxu1 %v11488_v23  ;;  %v14412_v23 = vld [vmem:[#allocation157_spill] sm:$0xff] }
 0xac6   : > { %4244 = vmatprep.subr.bf16.mxu1 %v11491_v28  ;;  %v14414_v28 = vld [vmem:[#allocation161_spill] sm:$0xff] }
 0xac7   : > { %4534 = vmatpush1.bf16.msra.mxu0 %v14407_v12  ;;  %v14415_v12 = vld [vmem:[#allocation162_spill] sm:$0xff] }
 0xac8   : > { %4535 = vmatprep.subr.bf16.mxu0 %v14408_v32  ;;  %v14417_v32 = vld [vmem:[#allocation166_spill] sm:$0xff] }
 0xac9   : > { %4245 = vmatpush1.bf16.msra.mxu1 %v11496_v42  ;;  %v14419_v42 = vld [vmem:[#allocation170_spill] sm:$0xff] }
 0xaca   : > { %4246 = vmatprep.subr.bf16.mxu1 %v11499_v7  ;;  %v14421_v7 = vstv %s11365_s27 }
 0xacb   : > { %4536 = vmatpush1.bf16.msra.mxu0 %v14411_v21  ;;  %v14422_v21 = vld [vmem:[#allocation26_spill] sm:$0xff] }
 0xacc   : > { %4537 = vmatprep.subr.bf16.mxu0 %v14412_v23  ;;  %vm4503_vm2 = vcmp.eq.s32.totalorder %v14422_v21, %v14421_v7  ;;  %v14423_v23 = vld [vmem:[#allocation180_spill] sm:$0xff]  ;;  %v14431_v7 = vld [vmem:[#allocation182_spill] sm:$0xff] }
 0xacd   : > { %4247 = vmatpush1.bf16.msra.mxu1 %v14413_v61  ;;  %v14424_v61 = vld [vmem:[#allocation181_spill] sm:$0xff]  ;;  %vm5887_vm3 = vmpackc.low %vm4503_vm2, %vm4503_vm2 }
 0xace   : > { %4248 = vmatprep.subr.bf16.mxu1 %v14414_v28  ;;  %v14425_v28 = vld [vmem:[#allocation30_spill] sm:$0xff] }
 0xacf   : > { %4538 = vmatpush1.bf16.msra.mxu0 %v14415_v12  ;;  %v14427_v12 = vld [vmem:[#allocation34_spill] sm:$0xff] }
 0xad0   : > { %4539 = vmatprep.subr.bf16.mxu0 %v14416_v16  ;;  %v14426_v16 = vld [vmem:[#allocation32_spill] sm:$0xff] }
 0xad1   : > { %4249 = vmatpush1.bf16.msra.mxu1 %v14417_v32  ;;  %v14432_v32 = vld [vmem:[#allocation43_spill] sm:$0xff] }
 0xad2   : > { %4250 = vmatprep.subr.bf16.mxu1 %v14418_v8  ;;  %v14428_v8 = vld [vmem:[#allocation36_spill] sm:$0xff] }
 0xad3   : > { %4540 = vmatpush1.bf16.msra.mxu0 %v14419_v42  ;;  %v14430_v42 = vld [vmem:[#allocation40_spill] sm:$0xff] }
 0xad4   : > { %4541 = vmatprep.subr.bf16.mxu0 %v14420_v44  ;;  %v14429_v44 = vld [vmem:[#allocation38_spill] sm:$0xff] }
 0xad5   : > { %4251 = vmatpush1.bf16.msra.mxu1 %v14423_v23  ;;  %v14433_v23 = vld [vmem:[#allocation45_spill] sm:$0xff] }
 0xad6   : > { %4263 = vmatprep.subr.bf16.mxu1 %v14424_v61  ;;  %v14435_v61 = vld [vmem:[#allocation49_spill] sm:$0xff] }
 0xad7   : > { %4542 = vmatpush1.bf16.msra.mxu0 %v14425_v28  ;;  %v14436_v28 = vld [vmem:[#allocation55_spill] sm:$0xff] }
 0xad8   : > { %4253 = vmatmul.mubr.bf16.vlgmr.msra.gmra.mrb[64].mxu1 %v11181_v40  ;;  %4597 = vmatprep.subr.bf16.mxu0 %v14426_v16  ;;  %v14434_v40 = vld [vmem:[#allocation47_spill] sm:$0xff] }
 0xad9   : > { %4264 = vmatpush1.bf16.msra.mxu1 %v14427_v12  ;;  %4295 = vmatprep.mubr.bf16.mxu1 %v11249_v30  ;;  %v14437_v30 = vld [vmem:[#allocation57_spill] sm:$0xff]  ;;  %v14438_v16 = vld [vmem:[#allocation59_spill] sm:$0xff] }
 0xada   : > { %4265 = vmatprep.subr.bf16.mxu1 %v14428_v8  ;;  %5888 = vmatmul.mubr.msk.bf16.vlgmr.msra.gmra.mrb[72].mxu0 %vm5887_vm3, %v14363_v46  ;;  %v14439_v12 = vld [vmem:[#allocation61_spill] sm:$0xff]  ;;  %v14440_v8 = vld [vmem:[#allocation63_spill] sm:$0xff]  ;;  %14556 = vst [vmem:[#allocation57_spill] sm:$0xff] %v11776_v49 }
 0xadb   : > { %4598 = vmatpush1.bf16.msra.mxu0 %v14429_v44  ;;  %v14441_v44 = vld [vmem:[#allocation65_spill] sm:$0xff] }
 0xadc   : > { %4599 = vmatprep.subr.bf16.mxu0 %v14430_v42  ;;  %v14442_v42 = vld [vmem:[#allocation67_spill] sm:$0xff] }
 0xadd   : > { %4266 = vmatpush1.bf16.msra.mxu1 %v14431_v7  ;;  %v14443_v7 = vld [vmem:[#allocation69_spill] sm:$0xff] }
 0xade   : > { %4267 = vmatprep.subr.bf16.mxu1 %v14432_v32  ;;  %v14444_v32 = vld [vmem:[#allocation71_spill] sm:$0xff] }
 0xadf   : > { %4600 = vmatpush1.bf16.msra.mxu0 %v14433_v23  ;;  %v14445_v23 = vld [vmem:[#allocation77_spill] sm:$0xff] }
 0xae0   : > { %4601 = vmatprep.subr.bf16.mxu0 %v14434_v40  ;;  %v14446_v40 = vld [vmem:[#allocation33_spill] sm:$0xff] }
 0xae1   : > { %4268 = vmatpush1.bf16.msra.mxu1 %v14435_v61  ;;  %v14447_v61 = vld [vmem:[#allocation79_spill] sm:$0xff] }
 0xae2   : > { %4269 = vmatprep.subr.bf16.mxu1 %v14436_v28  ;;  %v14448_v28 = vld [vmem:[#allocation35_spill] sm:$0xff] }
 0xae3   : > { %4602 = vmatpush1.bf16.msra.mxu0 %v14437_v30  ;;  %v11544_v30 = vld [vmem:[#allocation8 + $0xf8] ss:$24 sps:$4 sm:$0xff]  }
 0xae4   : > { %4603 = vmatprep.subr.bf16.mxu0 %v14438_v16  ;;  %14449 = vst [vmem:[#allocation146_spill] sm:$0xff] %v11544_v30  ;;  %v11547_v16 = vld [vmem:[#allocation8 + $0x12c] ss:$24 sps:$4 sm:$0xff]  }
 0xae5   : > { %4270 = vmatpush1.bf16.msra.mxu1 %v14439_v12  ;;  %14450 = vst [vmem:[#allocation147_spill] sm:$0xff] %v11547_v16  ;;  %v14451_v12 = vld [vmem:[#allocation81_spill] sm:$0xff] }
 0xae6   : > { %4271 = vmatprep.subr.bf16.mxu1 %v14440_v8  ;;  %v14452_v8 = vld [vmem:[#allocation37_spill] sm:$0xff] }
 0xae7   : > { %4604 = vmatpush1.bf16.msra.mxu0 %v14441_v44  ;;  %v11552_v44 = vld [vmem:[#allocation8 + $0x128] ss:$24 sps:$4 sm:$0xff]  }
 0xae8   : > { %4605 = vmatprep.subr.bf16.mxu0 %v14442_v42  ;;  %14453 = vst [vmem:[#allocation98_spill] sm:$0xff] %v11552_v44  ;;  %v11555_v42 = vld [vmem:[#allocation8 + $0x15c] ss:$24 sps:$4 sm:$0xff]  }
 0xae9   : > { %4272 = vmatpush1.bf16.msra.mxu1 %v14443_v7  ;;  %14454 = vst [vmem:[#allocation121_spill] sm:$0xff] %v11555_v42  ;;  %v14455_v7 = vld [vmem:[#allocation83_spill] sm:$0xff] }
 0xaea   : > { %4273 = vmatprep.subr.bf16.mxu1 %v14444_v32  ;;  %v14456_v32 = vld [vmem:[#allocation39_spill] sm:$0xff] }
 0xaeb   : > { %4606 = vmatpush1.bf16.msra.mxu0 %v14445_v23  ;;  %v11560_v23 = vld [vmem:[#allocation8 + $0x158] ss:$24 sps:$4 sm:$0xff]  }
 0xaec   : > { %4607 = vmatprep.subr.bf16.mxu0 %v14446_v40  ;;  %14457 = vst [vmem:[#allocation159_spill] sm:$0xff] %v11560_v23  ;;  %v11563_v40 = vld [vmem:[#allocation8 + $0x18c] ss:$24 sps:$4 sm:$0xff]  }
 0xaed   : > { %4274 = vmatpush1.bf16.msra.mxu1 %v14447_v61  ;;  %14458 = vst [vmem:[#allocation160_spill] sm:$0xff] %v11563_v40  ;;  %v14459_v61 = vld [vmem:[#allocation85_spill] sm:$0xff] }
 0xaee   : > { %4275 = vmatprep.subr.bf16.mxu1 %v14448_v28  ;;  %v14460_v28 = vld [vmem:[#allocation41_spill] sm:$0xff] }
 0xaef   : > { %4608 = vmatpush1.bf16.msra.mxu0 %v11544_v30 }
 0xaf0   : > { %4609 = vmatprep.subr.bf16.mxu0 %v11547_v16 }
 0xaf1   : > { %4276 = vmatpush1.bf16.msra.mxu1 %v14451_v12  ;;  %v11568_v12 = vld [vmem:[#allocation8 + $0x188] ss:$24 sps:$4 sm:$0xff]  }
 0xaf2   : > { %4277 = vmatprep.subr.bf16.mxu1 %v14452_v8  ;;  %14461 = vst [vmem:[#allocation122_spill] sm:$0xff] %v11568_v12  ;;  %v11571_v8 = vld [vmem:[#allocation8 + $0x1bc] ss:$24 sps:$4 sm:$0xff]  }
 0xaf3   : > { %4610 = vmatpush1.bf16.msra.mxu0 %v11552_v44  ;;  %14462 = vst [vmem:[#allocation123_spill] sm:$0xff] %v11571_v8  ;;  %v14500_v44 = vld [vmem:[#allocation64_spill] sm:$0xff] }
 0xaf4   : > { %4611 = vmatprep.subr.bf16.mxu0 %v11555_v42  ;;  %v14497_v42 = vld [vmem:[#allocation102_spill] sm:$0xff] }
 0xaf5   : > { %4278 = vmatpush1.bf16.msra.mxu1 %v14455_v7  ;;  %v14463_v7 = vld [vmem:[#allocation87_spill] sm:$0xff] }
 0xaf6   : > { %4279 = vmatprep.subr.bf16.mxu1 %v14456_v32  ;;  %v14464_v32 = vld [vmem:[#allocation42_spill] sm:$0xff] }
 0xaf7   : > { %4612 = vmatpush1.bf16.msra.mxu0 %v11560_v23  ;;  %v11576_v23 = vld [vmem:[#allocation8 + $0x1b8] ss:$24 sps:$4 sm:$0xff]  }
 0xaf8   : > { %4613 = vmatprep.subr.bf16.mxu0 %v11563_v40  ;;  %14465 = vst [vmem:[#allocation163_spill] sm:$0xff] %v11576_v23  ;;  %v11579_v40 = vld [vmem:[#allocation8 + $0x1ec] ss:$24 sps:$4 sm:$0xff]  }
 0xaf9   : > { %4280 = vmatpush1.bf16.msra.mxu1 %v14459_v61  ;;  %14466 = vst [vmem:[#allocation164_spill] sm:$0xff] %v11579_v40  ;;  %v14467_v61 = vld [vmem:[#allocation89_spill] sm:$0xff] }
 0xafa   : > { %4281 = vmatprep.subr.bf16.mxu1 %v14460_v28  ;;  %v14468_v28 = vld [vmem:[#allocation44_spill] sm:$0xff] }
 0xafb   : > { %4614 = vmatpush1.bf16.msra.mxu0 %v11568_v12  ;;  %v11584_v12 = vld [vmem:[#allocation8 + $0x1e8] ss:$24 sps:$4 sm:$0xff]  }
 0xafc   : > { %4615 = vmatprep.subr.bf16.mxu0 %v11571_v8  ;;  %14469 = vst [vmem:[#allocation126_spill] sm:$0xff] %v11584_v12  ;;  %v11587_v8 = vld [vmem:[#allocation8 + $0x21c] ss:$24 sps:$4 sm:$0xff]  }
 0xafd   : > { %4282 = vmatpush1.bf16.msra.mxu1 %v14463_v7  ;;  %14470 = vst [vmem:[#allocation132_spill] sm:$0xff] %v11587_v8  ;;  %v14471_v7 = vld [vmem:[#allocation91_spill] sm:$0xff] }
 0xafe   : > { %4283 = vmatprep.subr.bf16.mxu1 %v14464_v32  ;;  %v14472_v32 = vld [vmem:[#allocation46_spill] sm:$0xff] }
 0xaff   : > { %4616 = vmatpush1.bf16.msra.mxu0 %v11576_v23  ;;  %v11592_v23 = vld [vmem:[#allocation8 + $0x218] ss:$24 sps:$4 sm:$0xff]  }
 0xb00   : > { %4617 = vmatprep.subr.bf16.mxu0 %v11579_v40  ;;  %14473 = vst [vmem:[#allocation167_spill] sm:$0xff] %v11592_v23  ;;  %v11595_v40 = vld [vmem:[#allocation8 + $0x24c] ss:$24 sps:$4 sm:$0xff]  }
 0xb01   : > { %4284 = vmatpush1.bf16.msra.mxu1 %v14467_v61  ;;  %14474 = vst [vmem:[#allocation168_spill] sm:$0xff] %v11595_v40  ;;  %v14475_v61 = vld [vmem:[#allocation93_spill] sm:$0xff] }
 0xb02   : > { %4285 = vmatprep.subr.bf16.mxu1 %v14468_v28  ;;  %v14476_v28 = vld [vmem:[#allocation48_spill] sm:$0xff] }
 0xb03   : > { %4618 = vmatpush1.bf16.msra.mxu0 %v11584_v12  ;;  %v11600_v12 = vld [vmem:[#allocation8 + $0x248] ss:$24 sps:$4 sm:$0xff]  }
 0xb04   : > { %4619 = vmatprep.subr.bf16.mxu0 %v11587_v8  ;;  %14477 = vst [vmem:[#allocation130_spill] sm:$0xff] %v11600_v12  ;;  %v11603_v8 = vld [vmem:[#allocation8 + $0x27c] ss:$24 sps:$4 sm:$0xff]  }
 0xb05   : > { %4286 = vmatpush1.bf16.msra.mxu1 %v14471_v7  ;;  %14478 = vst [vmem:[#allocation134_spill] sm:$0xff] %v11603_v8  ;;  %v14479_v7 = vld [vmem:[#allocation50_spill] sm:$0xff] }
 0xb06   : > { %4287 = vmatprep.subr.bf16.mxu1 %v14472_v32  ;;  %v14480_v32 = vld [vmem:[#allocation52_spill] sm:$0xff] }
 0xb07   : > { %4620 = vmatpush1.bf16.msra.mxu0 %v11592_v23  ;;  %v11608_v23 = vld [vmem:[#allocation8 + $0x278] ss:$24 sps:$4 sm:$0xff]  }
 0xb08   : > { %4621 = vmatprep.subr.bf16.mxu0 %v11595_v40  ;;  %14481 = vst [vmem:[#allocation177_spill] sm:$0xff] %v11608_v23  ;;  %v11611_v40 = vld [vmem:[#allocation8 + $0x2ac] ss:$24 sps:$4 sm:$0xff]  }
 0xb09   : > { %4288 = vmatpush1.bf16.msra.mxu1 %v14475_v61  ;;  %14482 = vst [vmem:[#allocation178_spill] sm:$0xff] %v11611_v40  ;;  %v14483_v61 = vld [vmem:[#allocation97_spill] sm:$0xff] }
 0xb0a   : > { %4289 = vmatprep.subr.bf16.mxu1 %v14476_v28  ;;  %v14484_v28 = vld [vmem:[#allocation54_spill] sm:$0xff] }
 0xb0b   : > { %4622 = vmatpush1.bf16.msra.mxu0 %v11600_v12  ;;  %v11616_v12 = vld [vmem:[#allocation8 + $0x2a8] ss:$24 sps:$4 sm:$0xff]  }
 0xb0c   : > { %4623 = vmatprep.subr.bf16.mxu0 %v11603_v8  ;;  %14485 = vst [vmem:[#allocation137_spill] sm:$0xff] %v11616_v12  ;;  %v11619_v8 = vld [vmem:[#allocation8 + $0x2dc] ss:$24 sps:$4 sm:$0xff]  }
 0xb0d   : > { %4290 = vmatpush1.bf16.msra.mxu1 %v14479_v7  ;;  %14486 = vst [vmem:[#allocation148_spill] sm:$0xff] %v11619_v8  ;;  %v14487_v7 = vld [vmem:[#allocation175_spill] sm:$0xff] }
 0xb0e   : > { %4291 = vmatprep.subr.bf16.mxu1 %v14480_v32  ;;  %v14488_v32 = vld [vmem:[#allocation176_spill] sm:$0xff] }
 0xb0f   : > { %4624 = vmatpush1.bf16.msra.mxu0 %v11608_v23  ;;  %v11624_v23 = vld [vmem:[#allocation8 + $0x2d8] ss:$24 sps:$4 sm:$0xff]  }
 0xb10   : > { %4625 = vmatprep.subr.bf16.mxu0 %v11611_v40  ;;  %14489 = vst [vmem:[#allocation149_spill] sm:$0xff] %v11624_v23  ;;  %v14493_v40 = vld [vmem:[#allocation100_spill] sm:$0xff] }
 0xb11   : > { %4292 = vmatpush1.bf16.msra.mxu1 %v14483_v61  ;;  %v11628_v61 = vld [vmem:[#allocation10 + $0xc] ss:$24 sps:$4 sm:$0xff]  }
 0xb12   : > { %4293 = vmatprep.subr.bf16.mxu1 %v14484_v28  ;;  %14490 = vst [vmem:[#allocation150_spill] sm:$0xff] %v11628_v61  ;;  %v14491_v28 = vld [vmem:[#allocation99_spill] sm:$0xff] }
 0xb13   : > { %4626 = vmatpush1.bf16.msra.mxu0 %v11616_v12  ;;  %v14492_v12 = vld [vmem:[#allocation56_spill] sm:$0xff] }
 0xb14   : > { %4627 = vmatprep.subr.bf16.mxu0 %v11619_v8  ;;  %v14494_v8 = vld [vmem:[#allocation58_spill] sm:$0xff] }
 0xb15   : > { %4294 = vmatpush1.bf16.msra.mxu1 %v14487_v7  ;;  %v14495_v7 = vld [vmem:[#allocation101_spill] sm:$0xff] }
 0xb16   : > { %4432 = vmatprep.subr.bf16.mxu1 %v14488_v32  ;;  %v14496_v32 = vld [vmem:[#allocation60_spill] sm:$0xff] }
 0xb17   : > { %4628 = vmatpush1.bf16.msra.mxu0 %v11624_v23  ;;  %v14498_v23 = vld [vmem:[#allocation62_spill] sm:$0xff] }
 0xb18   : > { %4296 = vmatmul.mubr.bf16.vlgmr.msra.gmra.mrb[60].mxu1 %v11253_v15  ;;  %4722 = vmatprep.subr.bf16.mxu0 %v11628_v61  ;;  %v14499_v15 = vld [vmem:[#allocation103_spill] sm:$0xff] }
 0xb19   : > { %4433 = vmatpush1.bf16.msra.mxu1 %v14491_v28  ;;  %v14501_v28 = vld [vmem:[#allocation73_spill] sm:$0xff] }
 0xb1a   : > { %4434 = vmatprep.subr.bf16.mxu1 %v14492_v12 }
 0xb1d   : > { %4435 = vmatpush1.bf16.msra.mxu1 %v14493_v40 }
 0xb1e   : > { %4436 = vmatprep.subr.bf16.mxu1 %v14494_v8  ;;  %v14503_v8 = vld [vmem:[#allocation29_spill] sm:$0xff] }
 0xb21   : > { %4437 = vmatpush1.bf16.msra.mxu1 %v14495_v7 }
 0xb22   : > { %4438 = vmatprep.subr.bf16.mxu1 %v14496_v32 }
 0xb25   : > { %4439 = vmatpush1.bf16.msra.mxu1 %v14497_v42  ;;  %v14505_v42 = vld [vmem:[#allocation105_spill] sm:$0xff] }
 0xb26   : > { %4440 = vmatprep.subr.bf16.mxu1 %v14498_v23 }
 0xb29   : > { %4441 = vmatpush1.bf16.msra.mxu1 %v14499_v15  ;;  %v14506_v15 = vld [vmem:[#allocation68_spill] sm:$0xff] }
 0xb2a   : > { %4442 = vmatprep.subr.bf16.mxu1 %v14500_v44 }
 0xb2b   : > { %v4048_v61 = vpop.f32.mrb[56].mxu1 }
 0xb2c   : > { %v11642_v16 = vadd.f32 %v4048_v61, %v14501_v28  ;;  %v4050_v12 = vpop.f32.mrb[57].mxu1  ;;  %v11644_v40 = vpop.f32.mrb[64].mxu0 }
 0xb2d   : > { %v11647_v30 = vadd.f32 %v4050_v12, %v14503_v8  ;;  %v4052_v7 = vpop.f32.mrb[58].mxu1  ;;  %v11649_v32 = vpop.f32.mrb[65].mxu0  ;;  %4443 = vmatpush1.bf16.msra.mxu1 %v14505_v42  ;;  %v14508_v12 = vld [vmem:[#allocation70_spill] sm:$0xff]  ;;  %v14510_v42 = vld [vmem:[#allocation72_spill] sm:$0xff] }
 0xb2e   : > { %14502 = vst [vmem:[#allocation151_spill] sm:$0xff] %v11642_v16  ;;  %v4053_v23 = vpop.f32.mrb[59].mxu1  ;;  %v4342_v21 = vpop.f32.mrb[66].mxu0  ;;  %v4055_v44 = vsel %vm2382_vm14, %v11642_v16, -inf  ;;  %4444 = vmatprep.subr.bf16.mxu1 %v14506_v15  ;;  %v14509_v7 = vld [vmem:[#allocation107_spill] sm:$0xff]  ;;  %v14513_v16 = vld [vmem:[#allocation74_spill] sm:$0xff] }
 0xb2f   : > { %14504 = vst [vmem:[#allocation152_spill] sm:$0xff] %v11647_v30  ;;  %v4343_v61 = vpop.f32.mrb[67].mxu0  ;;  %v4056_v28 = vsel %vm2382_vm14, %v11647_v30, -inf  ;;  %v14511_v21 = vld [vmem:[#allocation108_spill] sm:$0xff]  ;;  %v14512_v23 = vld [vmem:[#allocation27_spill] sm:$0xff]  ;;  %v14514_v15 = vld [vmem:[#allocation109_spill] sm:$0xff] }
 0xb30   : > { %v4057_v52 = vmax.f32 %v4055_v44, %v4056_v28  ;;  %v14515_v61 = vld [vmem:[#allocation76_spill] sm:$0xff]  ;;  %v14516_v28 = vld [vmem:[#allocation110_spill] sm:$0xff] }
 0xb31   : > { %4445 = vmatpush1.bf16.msra.mxu1 %v14507_v17  ;;  %v14517_v17 = vld [vmem:[#allocation78_spill] sm:$0xff]  ;;  %v14519_v44 = vld [vmem:[#allocation80_spill] sm:$0xff] }
 0xb32   : > { %4058 = vmax.xlane.f32.xlu0 %v4057_v52  ;;  %4446 = vmatprep.subr.bf16.mxu1 %v14508_v12  ;;  %v14518_v52 = vld [vmem:[#allocation111_spill] sm:$0xff]  ;;  %v14520_v12 = vld [vmem:[#allocation112_spill] sm:$0xff] }
 0xb35   : > { %4447 = vmatpush1.bf16.msra.mxu1 %v14509_v7  ;;  %v14521_v7 = vld [vmem:[#allocation82_spill] sm:$0xff] }
 0xb36   : > { %4448 = vmatprep.subr.bf16.mxu1 %v14510_v42  ;;  %v14522_v42 = vld [vmem:[#allocation113_spill] sm:$0xff] }
 0xb39   : > { %4449 = vmatpush1.bf16.msra.mxu1 %v14511_v21  ;;  %v14523_v21 = vld [vmem:[#allocation86_spill] sm:$0xff] }
 0xb3a   : > { %4450 = vmatprep.subr.bf16.mxu1 %v14512_v23  ;;  %v14525_v23 = vld [vmem:[#allocation90_spill] sm:$0xff] }
 0xb3d   : > { %4451 = vmatpush1.bf16.msra.mxu1 %v14513_v16  ;;  %v14524_v16 = vld [vmem:[#allocation115_spill] sm:$0xff] }
 0xb3e   : > { %4452 = vmatprep.subr.bf16.mxu1 %v14514_v15  ;;  %v14526_v15 = vld [vmem:[#allocation117_spill] sm:$0xff] }
 0xb41   : > { %4453 = vmatpush1.bf16.msra.mxu1 %v14515_v61 }
 0xb42   : > { %4454 = vmatprep.subr.bf16.mxu1 %v14516_v28 }
 0xb45   : > { %4455 = vmatpush1.bf16.msra.mxu1 %v14517_v17 }
 0xb46   : > { %4456 = vmatprep.subr.bf16.mxu1 %v14518_v52 }
 0xb49   : > { %4457 = vmatpush1.bf16.msra.mxu1 %v14519_v44 }
 0xb4a   : > { %4458 = vmatprep.subr.bf16.mxu1 %v14520_v12 }
 0xb4d   : > { %4459 = vmatpush1.bf16.msra.mxu1 %v14521_v7 }
 0xb4e   : > { %4460 = vmatprep.subr.bf16.mxu1 %v14522_v42 }
 0xb51   : > { %4461 = vmatpush1.bf16.msra.mxu1 %v14523_v21 }
 0xb52   : > { %4462 = vmatprep.subr.bf16.mxu1 %v14524_v16 }
 0xb55   : > { %4463 = vmatpush1.bf16.msra.mxu1 %v14525_v23 }
 0xb56   : > { %4556 = vmatprep.subr.bf16.mxu1 %v14526_v15 }
 0xb6d   : > { %v11677_v61 = vpop.f32.mrb[68].mxu0 }
 0xb6e   : > { %v11679_v28 = vpop.f32.mrb[69].mxu0 }
 0xb6f   : > { %v4383_v17 = vpop.f32.mrb[70].mxu0 }
 0xb70   : > { %v4384_v52 = vpop.f32.mrb[71].mxu0  ;;  %v14527_v17 = vld [vmem:[#allocation94_spill] sm:$0xff] }
 0xb71   : > { %v14528_v52 = vld [vmem:[#allocation119_spill] sm:$0xff] }
 0xbab   : > { %v11681_v44 = vpop.f32.mrb[64].mxu1 }
 0xbac   : > { %v11683_v12 = vpop.f32.mrb[65].mxu1 }
 0xbad   : > { %v4258_v7 = vpop.f32.mrb[66].mxu1  ;;  %v4545_v42 = vpop.f32.mrb[72].mxu0 }
 0xbae   : > { %v4259_v30 = vpop.f32.mrb[67].mxu1  ;;  %v4552_v21 = vmax.f32 %v4545_v42, 0.0  ;;  %v4547_v8 = vpop.f32.mrb[73].mxu0  ;;  %v11693_v7 = vld [vmem:[#allocation10 + $0x38] ss:$24 sps:$4 sm:$0xff]  }
 0xbaf   : > { %v4553_v16 = vmax.f32 %v4547_v8, 0.0  ;;  %v4549_v3 = vpop.f32.mrb[74].mxu0  ;;  %14529 = vst [vmem:[#allocation153_spill] sm:$0xff] %v11693_v7  ;;  %v11696_v30 = vld [vmem:[#allocation10 + $0x6c] ss:$24 sps:$4 sm:$0xff]  }
 0xbb0   : > { %v11685_v23 = vpack.c.bf16 %v4552_v21, %v4552_v21  ;;  %v4550_v15 = vpop.f32.mrb[75].mxu0  ;;  %14530 = vst [vmem:[#allocation154_spill] sm:$0xff] %v11696_v30  ;;  %v11699_v3 = vld [vmem:[#allocation10 + $0x68] ss:$24 sps:$4 sm:$0xff]   ;;  %v11702_v8 = vld [vmem:[#allocation10 + $0x9c] ss:$24 sps:$4 sm:$0xff]  }
 0xbb1   : > { %v11687_v37 = vpack.c.bf16 %v4553_v16, %v4553_v16  ;;  %14531 = vst [vmem:[#allocation155_spill] sm:$0xff] %v11699_v3  ;;  %14532 = vst [vmem:[#allocation156_spill] sm:$0xff] %v11702_v8  ;;  %v11705_v42 = vld [vmem:[#allocation10 + $0x98] ss:$24 sps:$4 sm:$0xff]   ;;  %v11708_v21 = vld [vmem:[#allocation10 + $0xcc] ss:$24 sps:$4 sm:$0xff]  }
 0xbb2   : > { %14533 = vst [vmem:[#allocation157_spill] sm:$0xff] %v11705_v42  ;;  %14534 = vst [vmem:[#allocation158_spill] sm:$0xff] %v11708_v21  ;;  %v11711_v16 = vld [vmem:[#allocation10 + $0xc8] ss:$24 sps:$4 sm:$0xff]   ;;  %v11714_v15 = vld [vmem:[#allocation10 + $0xfc] ss:$24 sps:$4 sm:$0xff]  }
 0xbb3   : > { %4629 = vmatprep.mubr.bf16.mxu0 %v11687_v37  ;;  %14535 = vst [vmem:[#allocation161_spill] sm:$0xff] %v11711_v16  ;;  %14536 = vst [vmem:[#allocation162_spill] sm:$0xff] %v11714_v15 }
 0xbb4   : > { %4630 = vmatmul.mubr.bf16.vlgmr.msra.gmra.mrb[76].mxu0 %v11685_v23 }
 0xbb5   : > { %4723 = vmatpush1.bf16.msra.mxu0 %v14527_v17  ;;  %v11717_v17 = vld [vmem:[#allocation10 + $0xf8] ss:$24 sps:$4 sm:$0xff]  }
 0xbb6   : > { %4724 = vmatprep.subr.bf16.mxu0 %v14528_v52  ;;  %14537 = vst [vmem:[#allocation165_spill] sm:$0xff] %v11717_v17  ;;  %v11720_v52 = vld [vmem:[#allocation10 + $0x12c] ss:$24 sps:$4 sm:$0xff]  }
 0xbb7   : > { %14538 = vst [vmem:[#allocation166_spill] sm:$0xff] %v11720_v52 }
 0xbb9   : > { %4725 = vmatpush1.bf16.msra.mxu0 %v11693_v7 }
 0xbba   : > { %4726 = vmatprep.subr.bf16.mxu0 %v11696_v30 }
 0xbbd   : > { %4727 = vmatpush1.bf16.msra.mxu0 %v11699_v3 }
 0xbbe   : > { %4728 = vmatprep.subr.bf16.mxu0 %v11702_v8 }
 0xbc1   : > { %4729 = vmatpush1.bf16.msra.mxu0 %v11705_v42  ;;  %v11723_v42 = vld [vmem:[#allocation10 + $0x128] ss:$24 sps:$4 sm:$0xff]  }
 0xbc2   : > { %4730 = vmatprep.subr.bf16.mxu0 %v11708_v21  ;;  %14539 = vst [vmem:[#allocation169_spill] sm:$0xff] %v11723_v42  ;;  %v11726_v21 = vld [vmem:[#allocation10 + $0x15c] ss:$24 sps:$4 sm:$0xff]  }
 0xbc3   : > { %14540 = vst [vmem:[#allocation170_spill] sm:$0xff] %v11726_v21 }
 0xbc5   : > { %4731 = vmatpush1.bf16.msra.mxu0 %v11711_v16  ;;  %v11729_v16 = vld [vmem:[#allocation10 + $0x158] ss:$24 sps:$4 sm:$0xff]  }
 0xbc6   : > { %4732 = vmatprep.subr.bf16.mxu0 %v11714_v15  ;;  %14541 = vst [vmem:[#allocation179_spill] sm:$0xff] %v11729_v16  ;;  %v11732_v15 = vld [vmem:[#allocation10 + $0x18c] ss:$24 sps:$4 sm:$0xff]  }
 0xbc7   : > { %14542 = vst [vmem:[#allocation180_spill] sm:$0xff] %v11732_v15 }
 0xbc9   : > { %4733 = vmatpush1.bf16.msra.mxu0 %v11717_v17  ;;  %v11735_v17 = vld [vmem:[#allocation10 + $0x188] ss:$24 sps:$4 sm:$0xff]  }
 0xbca   : > { %4734 = vmatprep.subr.bf16.mxu0 %v11720_v52  ;;  %14543 = vst [vmem:[#allocation181_spill] sm:$0xff] %v11735_v17  ;;  %v11738_v52 = vld [vmem:[#allocation10 + $0x1bc] ss:$24 sps:$4 sm:$0xff]  }
 0xbcb   : > { %14544 = vst [vmem:[#allocation30_spill] sm:$0xff] %v11738_v52 }
 0xbcd   : > { %4735 = vmatpush1.bf16.msra.mxu0 %v11723_v42  ;;  %v11741_v42 = vld [vmem:[#allocation10 + $0x1b8] ss:$24 sps:$4 sm:$0xff]  }
 0xbce   : > { %4736 = vmatprep.subr.bf16.mxu0 %v11726_v21  ;;  %14545 = vst [vmem:[#allocation32_spill] sm:$0xff] %v11741_v42  ;;  %v11744_v21 = vld [vmem:[#allocation10 + $0x1ec] ss:$24 sps:$4 sm:$0xff]  }
 0xbcf   : > { %14546 = vst [vmem:[#allocation34_spill] sm:$0xff] %v11744_v21 }
 0xbd1   : > { %4737 = vmatpush1.bf16.msra.mxu0 %v11729_v16  ;;  %v11747_v16 = vld [vmem:[#allocation10 + $0x1e8] ss:$24 sps:$4 sm:$0xff]  }
 0xbd2   : > { %4738 = vmatprep.subr.bf16.mxu0 %v11732_v15  ;;  %14547 = vst [vmem:[#allocation36_spill] sm:$0xff] %v11747_v16  ;;  %v11750_v15 = vld [vmem:[#allocation10 + $0x21c] ss:$24 sps:$4 sm:$0xff]  }
 0xbd3   : > { %14548 = vst [vmem:[#allocation38_spill] sm:$0xff] %v11750_v15 }
 0xbd5   : > { %4739 = vmatpush1.bf16.msra.mxu0 %v11735_v17  ;;  %v11753_v17 = vld [vmem:[#allocation10 + $0x218] ss:$24 sps:$4 sm:$0xff]  }
 0xbd6   : > { %4740 = vmatprep.subr.bf16.mxu0 %v11738_v52  ;;  %14549 = vst [vmem:[#allocation40_spill] sm:$0xff] %v11753_v17  ;;  %v11756_v52 = vld [vmem:[#allocation10 + $0x24c] ss:$24 sps:$4 sm:$0xff]  }
 0xbd7   : > { %14550 = vst [vmem:[#allocation182_spill] sm:$0xff] %v11756_v52 }
 0xbd9   : > { %4741 = vmatpush1.bf16.msra.mxu0 %v11741_v42  ;;  %v11759_v42 = vld [vmem:[#allocation10 + $0x248] ss:$24 sps:$4 sm:$0xff]  }
 0xbda   : > { %4742 = vmatprep.subr.bf16.mxu0 %v11744_v21  ;;  %14551 = vst [vmem:[#allocation43_spill] sm:$0xff] %v11759_v42  ;;  %v11762_v21 = vld [vmem:[#allocation10 + $0x27c] ss:$24 sps:$4 sm:$0xff]  }
 0xbdb   : > { %14552 = vst [vmem:[#allocation45_spill] sm:$0xff] %v11762_v21 }
 0xbdd   : > { %4743 = vmatpush1.bf16.msra.mxu0 %v11747_v16  ;;  %v11765_v16 = vld [vmem:[#allocation10 + $0x278] ss:$24 sps:$4 sm:$0xff]  }
 0xbde   : > { %4744 = vmatprep.subr.bf16.mxu0 %v11750_v15  ;;  %14553 = vst [vmem:[#allocation47_spill] sm:$0xff] %v11765_v16  ;;  %v11768_v15 = vld [vmem:[#allocation10 + $0x2ac] ss:$24 sps:$4 sm:$0xff]  }
 0xbdf   : > { %14554 = vst [vmem:[#allocation49_spill] sm:$0xff] %v11768_v15 }
 0xbe1   : > { %4745 = vmatpush1.bf16.msra.mxu0 %v11753_v17 }
 0xbe2   : > { %4746 = vmatprep.subr.bf16.mxu0 %v11756_v52 }
 0xbe5   : > { %4747 = vmatpush1.bf16.msra.mxu0 %v11759_v42  ;;  %v11773_v42 = vld [vmem:[#allocation10 + $0x2a8] ss:$24 sps:$4 sm:$0xff]  }
 0xbe6   : > { %4748 = vmatprep.subr.bf16.mxu0 %v11762_v21  ;;  %14555 = vst [vmem:[#allocation55_spill] sm:$0xff] %v11773_v42 }
 0xbe9   : > { %4749 = vmatpush1.bf16.msra.mxu0 %v11765_v16 }
 0xbea   : > { %4750 = vmatprep.subr.bf16.mxu0 %v11768_v15  ;;  %v5934_v15 = vadd.f32 %v11644_v40, %v14359_v43 }
 0xbeb   : > { %v4297_v17 = vpop.f32.mrb[60].mxu1 }
 0xbec   : > { %v5932_v8 = vadd.f32 %v4297_v17, %v13942_v51  ;;  %v4299_v52 = vpop.f32.mrb[61].mxu1  ;;  %v5935_v17 = vadd.f32 %v11649_v32, %v14360_v41 }
 0xbed   : > { %v5933_v3 = vadd.f32 %v4299_v52, %v8772_v39  ;;  %v4301_v30 = vpop.f32.mrb[62].mxu1  ;;  %4751 = vmatpush1.bf16.msra.mxu0 %v11773_v42  ;;  %v11786_v52 = vld [vmem:[#allocation10 + $0x14] ss:$24 sps:$4 sm:$0xff]  }
 0xbee   : > { %v5879_v21 = vmul.f32 -1.442695, %v5932_v8  ;;  %v4302_v7 = vpop.f32.mrb[63].mxu1  ;;  %4752 = vmatprep.subr.bf16.mxu0 %v11776_v49  ;;  %v11783_v30 = vld [vmem:[#allocation10 + $0x2d8] ss:$24 sps:$4 sm:$0xff]   ;;  %14558 = vst [vmem:[#allocation61_spill] sm:$0xff] %v11786_v52 }
 0xbef   : > { %v5880_v16 = vmul.f32 -1.442695, %v5933_v3  ;;  %14557 = vst [vmem:[#allocation59_spill] sm:$0xff] %v11783_v30  ;;  %v5881_v7 = vmul.f32 -1.442695, %v5934_v15 }
 0xbf0   : > { %6586 = vpow2.f32 %v5879_v21  ;;  %v5882_v8 = vmul.f32 -1.442695, %v5935_v17 }
 0xbf1   : > { %6588 = vpow2.f32 %v5880_v16  ;;  %4753 = vmatpush1.bf16.msra.mxu0 %v11783_v30  ;;  %v4414_v30 = vadd.f32 %v11677_v61, %v8786_v22 }
 0xbf2   : > { %4763 = vmatprep.subr.bf16.mxu0 %v11786_v52  ;;  %6590 = vpow2.f32 %v5881_v7  ;;  %v14559_v52 = vld [vmem:[#allocation174_spill] sm:$0xff] }
 0xbf3   : > { %6592 = vpow2.f32 %v5882_v8  ;;  %v4415_v15 = vadd.f32 %v11679_v28, %v14559_v52 }
 0xbfa   : > { %v6587_v49 = vpop.eup %6586 }
 0xbfb   : > { %v6589_v40 = vpop.eup %6588  ;;  %v4394_v3 = vadd.f32 1.0, %v6587_v49  ;;  %v4255_v49 = vadd.f32 %v11681_v44, %v13945_v31 }
 0xbfc   : > { %v4395_v43 = vadd.f32 1.0, %v6589_v40  ;;  %v6591_v32 = vpop.eup %6590 }
 0xbfd   : > { %6594 = vrcp.f32 %v4394_v3  ;;  %v6593_v21 = vpop.eup %6592  ;;  %v4408_v16 = vadd.f32 1.0, %v6591_v32 }
 0xbfe   : > { %6596 = vrcp.f32 %v4395_v43  ;;  %v4409_v41 = vadd.f32 1.0, %v6593_v21  ;;  %v4257_v43 = vadd.f32 %v11683_v12, %v13946_v14  ;;  %v4496_v21 = vstv %s4495_s17 }
 0xbff   : > { %6598 = vrcp.f32 %v4408_v16  ;;  %vm4497_vm4 = vcmp.eq.s32.totalorder %v4496_v21, 1  ;;  %v7398_v21 = vld [vmem:[#allocation5 + $0x20] ss:$8 sps:$4 sm:$0xff]  }
 0xc00   : > { %6600 = vrcp.f32 %v4409_v41 }
 0xc07   : > { %v6595_v42 = vpop.eup %6594 }
 0xc08   : > { %v6597_v17 = vpop.eup %6596  ;;  %v4416_v7 = vmul.f32 %v6595_v42, %v4414_v30 }
 0xc09   : > { %v4417_v8 = vmul.f32 %v6597_v17, %v4415_v15  ;;  %v6599_v61 = vpop.eup %6598 }
 0xc0a   : > { %v4418_v40 = vadd.f32 %v4416_v7, %v4255_v49  ;;  %v6601_v28 = vpop.eup %6600  ;;  %v4422_v32 = vsub.f32 1.0, %v6599_v61  ;;  %v4426_v41 = vmul.f32 %v6599_v61, %v11242_v34  ;;  %v11840_v61 = vld [vmem:[#allocation10 + $0xa4] ss:$24 sps:$4 sm:$0xff]  }
 0xc0b   : > { %v4419_v3 = vadd.f32 %v4417_v8, %v4257_v43  ;;  %v4423_v52 = vsub.f32 1.0, %v6601_v28  ;;  %v4427_v12 = vmul.f32 %v6601_v28, %v11245_v26  ;;  %v7396_v28 = vld [vmem:[#allocation5 + $0x10] ss:$8 sps:$4 sm:$0xff]  }
 0xc0c   : > { %6602 = vtanh.f32 %v4418_v40 }
 0xc0d   : > { %6604 = vtanh.f32 %v4419_v3  ;;  %v11828_v3 = vld [vmem:[#allocation10 + $0x40] ss:$24 sps:$4 sm:$0xff]  }
 0xc16   : > { %v6603_v16 = vpop.eup %6602 }
 0xc17   : > { %v6605_v44 = vpop.eup %6604  ;;  %v4424_v42 = vmul.f32 %v6603_v16, %v4422_v32  ;;  %v7397_v32 = vld [vmem:[#allocation5 + $0x24] ss:$8 sps:$4 sm:$0xff]   ;;  %v14564_v16 = vld [vmem:[#allocation133_spill] sm:$0xff] }
 0xc18   : > { %v4425_v30 = vmul.f32 %v6605_v44, %v4423_v52  ;;  %v14565_v44 = vld [vmem:[#allocation128_spill] sm:$0xff] }
 0xc19   : > { %v4428_v15 = vadd.f32 %v4426_v41, %v4424_v42  ;;  %v7400_v42 = vld [vmem:[#allocation5 + $0x30] ss:$8 sps:$4 sm:$0xff]   ;;  %v7401_v41 = vld [vmem:[#allocation5 + $0x44] ss:$8 sps:$4 sm:$0xff]  }
 0xc1a   : > { %v4429_v17 = vadd.f32 %v4427_v12, %v4425_v30  ;;  %v14566_v30 = vld [vmem:[#allocation135_spill] sm:$0xff]  ;;  %v14567_v12 = vld [vmem:[#allocation136_spill] sm:$0xff] }
 0xc1b   : > { %v11802_v49 = vsel %vm4497_vm4, %v4428_v15, %v11242_v34  ;;  %v4430_v8 = vpack.c.bf16 %v4428_v15, %v4428_v15  ;;  %v11818_v34 = vld [vmem:[#allocation10 + $0x10] ss:$24 sps:$4 sm:$0xff]  }
 0xc1c   : > { %v4431_v7 = vpack.c.bf16 %v4429_v17, %v4429_v17  ;;  %v11805_v43 = vsel %vm4497_vm4, %v4429_v17, %v11245_v26  ;;  %v11813_v52 = vpack.c.bf16 %v11802_v49, %v11802_v49  ;;  %v11823_v26 = vld [vmem:[#allocation10 + $0x44] ss:$24 sps:$4 sm:$0xff]   ;;  %v7402_v15 = vld [vmem:[#allocation5 + $0x40] ss:$8 sps:$4 sm:$0xff]  }
 0xc1d   : > { %v11809_v40 = vpack.c.bf16 %v11805_v43, %v11805_v43  ;;  %v7403_v17 = vld [vmem:[#allocation5 + $0x54] ss:$8 sps:$4 sm:$0xff]  }
 0xc1e   : > { %4464 = vmatprep.mubr.bf16.mxu1 %v4431_v7  ;;  %v14568_v7 = vld [vmem:[#allocation138_spill] sm:$0xff] }
 0xc1f   : > { %4465 = vmatmul.mubr.bf16.vlgmr.msra.gmra.mrb[68].mxu1 %v4430_v8  ;;  %4754 = vmatprep.mubr.bf16.mxu0 %v11809_v40  ;;  %v14569_v8 = vld [vmem:[#allocation139_spill] sm:$0xff] }
 0xc20   : > { %4557 = vmatpush1.bf16.msra.mxu1 %v11256_v56  ;;  %4755 = vmatmul.mubr.bf16.vlgmr.msra.gmra.mrb[76].mxu0 %v11813_v52  ;;  %v11832_v56 = vld [vmem:[#allocation10 + $0x74] ss:$24 sps:$4 sm:$0xff]  }
 0xc21   : > { %4764 = vmatpush1.bf16.msra.mxu0 %v11818_v34  ;;  %4795 = vmatprep.mubr.bf16.mxu0 %v11809_v40 }
 0xc22   : > { %4558 = vmatprep.subr.bf16.mxu1 %v11262_v27  ;;  %4765 = vmatprep.subr.bf16.mxu0 %v11823_v26  ;;  %v11836_v27 = vld [vmem:[#allocation10 + $0x70] ss:$24 sps:$4 sm:$0xff]  }
 0xc23   : > { %4588 = vmatprep.mubr.bf16.mxu1 %v11687_v37 }
 0xc24   : > { %4559 = vmatpush1.bf16.msra.mxu1 %v11267_v11  ;;  %v11844_v11 = vld [vmem:[#allocation10 + $0xa0] ss:$24 sps:$4 sm:$0xff]  }
 0xc25   : > { %4766 = vmatpush1.bf16.msra.mxu0 %v11828_v3  ;;  %4560 = vmatprep.subr.bf16.mxu1 %v11271_v47  ;;  %v11848_v47 = vld [vmem:[#allocation10 + $0xd4] ss:$24 sps:$4 sm:$0xff]  }
 0xc26   : > { %4767 = vmatprep.subr.bf16.mxu0 %v11832_v56 }
 0xc28   : > { %4561 = vmatpush1.bf16.msra.mxu1 %v11275_v19  ;;  %v11852_v19 = vld [vmem:[#allocation10 + $0xd0] ss:$24 sps:$4 sm:$0xff]  }
 0xc29   : > { %4768 = vmatpush1.bf16.msra.mxu0 %v11836_v27  ;;  %4562 = vmatprep.subr.bf16.mxu1 %v11279_v10  ;;  %v11856_v10 = vld [vmem:[#allocation10 + $0x104] ss:$24 sps:$4 sm:$0xff]  }
 0xc2a   : > { %4769 = vmatprep.subr.bf16.mxu0 %v11840_v61 }
 0xc2c   : > { %4563 = vmatpush1.bf16.msra.mxu1 %v11283_v60  ;;  %v11860_v60 = vld [vmem:[#allocation10 + $0x100] ss:$24 sps:$4 sm:$0xff]  }
 0xc2d   : > { %4770 = vmatpush1.bf16.msra.mxu0 %v11844_v11  ;;  %4564 = vmatprep.subr.bf16.mxu1 %v11287_v24  ;;  %v11864_v24 = vld [vmem:[#allocation10 + $0x134] ss:$24 sps:$4 sm:$0xff]  }
 0xc2e   : > { %4771 = vmatprep.subr.bf16.mxu0 %v11848_v47 }
 0xc30   : > { %4565 = vmatpush1.bf16.msra.mxu1 %v11291_v55  ;;  %v11868_v55 = vld [vmem:[#allocation10 + $0x130] ss:$24 sps:$4 sm:$0xff]  }
 0xc31   : > { %4772 = vmatpush1.bf16.msra.mxu0 %v11852_v19  ;;  %4566 = vmatprep.subr.bf16.mxu1 %v11295_v5  ;;  %v11872_v5 = vld [vmem:[#allocation10 + $0x164] ss:$24 sps:$4 sm:$0xff]  }
 0xc32   : > { %4773 = vmatprep.subr.bf16.mxu0 %v11856_v10 }
 0xc34   : > { %4567 = vmatpush1.bf16.msra.mxu1 %v11299_v36  ;;  %v11876_v36 = vld [vmem:[#allocation10 + $0x160] ss:$24 sps:$4 sm:$0xff]  }
 0xc35   : > { %4774 = vmatpush1.bf16.msra.mxu0 %v11860_v60  ;;  %4568 = vmatprep.subr.bf16.mxu1 %v11303_v50  ;;  %v11880_v50 = vld [vmem:[#allocation10 + $0x194] ss:$24 sps:$4 sm:$0xff]  }
 0xc36   : > { %4775 = vmatprep.subr.bf16.mxu0 %v11864_v24 }
 0xc38   : > { %4569 = vmatpush1.bf16.msra.mxu1 %v11307_v62  ;;  %v11884_v62 = vld [vmem:[#allocation10 + $0x190] ss:$24 sps:$4 sm:$0xff]  }
 0xc39   : > { %4776 = vmatpush1.bf16.msra.mxu0 %v11868_v55  ;;  %4570 = vmatprep.subr.bf16.mxu1 %v11311_v38  ;;  %v11888_v38 = vld [vmem:[#allocation10 + $0x1c4] ss:$24 sps:$4 sm:$0xff]  }
 0xc3a   : > { %4777 = vmatprep.subr.bf16.mxu0 %v11872_v5 }
 0xc3c   : > { %4571 = vmatpush1.bf16.msra.mxu1 %v11315_v0  ;;  %v11892_v0 = vld [vmem:[#allocation10 + $0x1c0] ss:$24 sps:$4 sm:$0xff]  }
 0xc3d   : > { %4778 = vmatpush1.bf16.msra.mxu0 %v11876_v36  ;;  %4572 = vmatprep.subr.bf16.mxu1 %v11319_v25  ;;  %v11896_v25 = vld [vmem:[#allocation10 + $0x1f4] ss:$24 sps:$4 sm:$0xff]  }
 0xc3e   : > { %4779 = vmatprep.subr.bf16.mxu0 %v11880_v50 }
 0xc40   : > { %4573 = vmatpush1.bf16.msra.mxu1 %v11323_v2  ;;  %v11900_v2 = vld [vmem:[#allocation10 + $0x1f0] ss:$24 sps:$4 sm:$0xff]  }
 0xc41   : > { %4780 = vmatpush1.bf16.msra.mxu0 %v11884_v62  ;;  %4574 = vmatprep.subr.bf16.mxu1 %v11327_v4  ;;  %v11904_v4 = vld [vmem:[#allocation10 + $0x224] ss:$24 sps:$4 sm:$0xff]  }
 0xc42   : > { %4781 = vmatprep.subr.bf16.mxu0 %v11888_v38 }
 0xc44   : > { %4575 = vmatpush1.bf16.msra.mxu1 %v11331_v6  ;;  %v11908_v6 = vld [vmem:[#allocation10 + $0x220] ss:$24 sps:$4 sm:$0xff]  }
 0xc45   : > { %4782 = vmatpush1.bf16.msra.mxu0 %v11892_v0  ;;  %4576 = vmatprep.subr.bf16.mxu1 %v11335_v18  ;;  %v11912_v18 = vld [vmem:[#allocation10 + $0x254] ss:$24 sps:$4 sm:$0xff]  }
 0xc46   : > { %4783 = vmatprep.subr.bf16.mxu0 %v11896_v25 }
 0xc48   : > { %4577 = vmatpush1.bf16.msra.mxu1 %v11339_v9  ;;  %v11917_v9 = vld [vmem:[#allocation10 + $0x250] ss:$24 sps:$4 sm:$0xff]  }
 0xc49   : > { %4784 = vmatpush1.bf16.msra.mxu0 %v11900_v2  ;;  %4578 = vmatprep.subr.bf16.mxu1 %v11343_v54  ;;  %v11925_v54 = vld [vmem:[#allocation10 + $0x284] ss:$24 sps:$4 sm:$0xff]  }
 0xc4a   : > { %4785 = vmatprep.subr.bf16.mxu0 %v11904_v4 }
 0xc4c   : > { %4579 = vmatpush1.bf16.msra.mxu1 %v11347_v53  ;;  %v11929_v53 = vld [vmem:[#allocation10 + $0x280] ss:$24 sps:$4 sm:$0xff]  }
 0xc4d   : > { %4786 = vmatpush1.bf16.msra.mxu0 %v11908_v6  ;;  %4580 = vmatprep.subr.bf16.mxu1 %v11351_v58  ;;  %v11933_v58 = vld [vmem:[#allocation10 + $0x2b4] ss:$24 sps:$4 sm:$0xff]  }
 0xc4e   : > { %4787 = vmatprep.subr.bf16.mxu0 %v11912_v18 }
 0xc50   : > { %4581 = vmatpush1.bf16.msra.mxu1 %v11356_v59  ;;  %v11937_v59 = vld [vmem:[#allocation10 + $0x2b0] ss:$24 sps:$4 sm:$0xff]  }
 0xc51   : > { %4788 = vmatpush1.bf16.msra.mxu0 %v11917_v9  ;;  %4582 = vmatprep.subr.bf16.mxu1 %v11360_v35  ;;  %v4920_v35 = vstv %s11923_s18 }
 0xc52   : > { %4789 = vmatprep.subr.bf16.mxu0 %v11925_v54  ;;  %vm4922_vm5 = vcmp.eq.s32.totalorder %v13966_v20, %v4920_v35  ;;  %v7394_v20 = vld [vmem:[#allocation5] ss:$8 sps:$4 sm:$0xff]  }
 0xc53   : > { %vm5895_vm6 = vmpackc.low %vm4922_vm5, %vm4922_vm5 }
 0xc54   : > { %4583 = vmatpush1.bf16.msra.mxu1 %v11368_v45  ;;  %v11942_v45 = vld [vmem:[#allocation10 + $0x2e4] ss:$24 sps:$4 sm:$0xff]  }
 0xc55   : > { %4790 = vmatpush1.bf16.msra.mxu0 %v11929_v53  ;;  %4584 = vmatprep.subr.bf16.mxu1 %v11372_v48  ;;  %v11949_v48 = vld [vmem:[#allocation10 + $0x2e0] ss:$24 sps:$4 sm:$0xff]  }
 0xc56   : > { %4791 = vmatprep.subr.bf16.mxu0 %v11933_v58 }
 0xc58   : > { %4585 = vmatpush1.bf16.msra.mxu1 %v11376_v13  ;;  %v7393_v13 = vld [vmem:[#allocation5 + $0x4] ss:$8 sps:$4 sm:$0xff]  }
 0xc59   : > { %4792 = vmatpush1.bf16.msra.mxu0 %v11937_v59  ;;  %4586 = vmatprep.subr.bf16.mxu1 %v11380_v33  ;;  %v7395_v33 = vld [vmem:[#allocation5 + $0x14] ss:$8 sps:$4 sm:$0xff]  }
 0xc5a   : > { %4793 = vmatprep.subr.bf16.mxu0 %v11942_v45 }
 0xc5c   : > { %4587 = vmatpush1.bf16.msra.mxu1 %v11385_v57  ;;  %v14560_v57 = vld [vmem:[#allocation127_spill] sm:$0xff] }
 0xc5d   : > { %4794 = vmatpush1.bf16.msra.mxu0 %v11949_v48  ;;  %4638 = vmatprep.subr.bf16.mxu1 %v11392_v63  ;;  %v14561_v63 = vld [vmem:[#allocation129_spill] sm:$0xff] }
 0xc5e   : > { %4929 = vmatprep.subr.bf16.mxu0 %v7393_v13  ;;  %v7404_v13 = vld [vmem:[#allocation5 + $0x50] ss:$8 sps:$4 sm:$0xff]  }
 0xc5f   : > { %4589 = vmatmul.mubr.bf16.vlgmr.msra.gmra.mrb[72].mxu1 %v11685_v23 }
 0xc60   : > { %4639 = vmatpush1.bf16.msra.mxu1 %v11397_v1  ;;  %4670 = vmatprep.mubr.bf16.mxu1 %v11687_v37  ;;  %v14562_v1 = vld [vmem:[#allocation131_spill] sm:$0xff]  ;;  %v14563_v37 = vld [vmem:[#allocation125_spill] sm:$0xff] }
 0xc61   : > { %4796 = vmatmul.mubr.bf16.vlgmr.msra.gmra.mrb[80].mxu0 %v11813_v52  ;;  %4640 = vmatprep.subr.bf16.mxu1 %v11402_v29  ;;  %v7399_v29 = vld [vmem:[#allocation5 + $0x34] ss:$8 sps:$4 sm:$0xff]  }
 0xc62   : > { %4930 = vmatpush1.bf16.msra.mxu0 %v7394_v20  ;;  %5896 = vmatprep.mubr.msk.bf16.mxu0 %vm5895_vm6, %v14363_v46  ;;  %v7405_v20 = vld [vmem:[#allocation5 + $0x64] ss:$8 sps:$4 sm:$0xff]  }
 0xc63   : > { %4931 = vmatprep.subr.bf16.mxu0 %v7395_v33  ;;  %v14570_v33 = vld [vmem:[#allocation84_spill] sm:$0xff] }
 0xc64   : > { %4641 = vmatpush1.bf16.msra.mxu1 %v14560_v57  ;;  %v14571_v57 = vld [vmem:[#allocation114_spill] sm:$0xff] }
 0xc65   : > { %4642 = vmatprep.subr.bf16.mxu1 %v14561_v63  ;;  %v7406_v63 = vld [vmem:[#allocation5 + $0x60] ss:$8 sps:$4 sm:$0xff]  }
 0xc66   : > { %4932 = vmatpush1.bf16.msra.mxu0 %v7396_v28  ;;  %v7407_v28 = vld [vmem:[#allocation5 + $0x74] ss:$8 sps:$4 sm:$0xff]  }
 0xc67   : > { %4933 = vmatprep.subr.bf16.mxu0 %v7397_v32  ;;  %v14572_v32 = vld [vmem:[#allocation140_spill] sm:$0xff] }
 0xc68   : > { %4643 = vmatpush1.bf16.msra.mxu1 %v14562_v1  ;;  %v14573_v1 = vld [vmem:[#allocation141_spill] sm:$0xff] }
 0xc69   : > { %4644 = vmatprep.subr.bf16.mxu1 %v14563_v37  ;;  %v7408_v37 = vld [vmem:[#allocation5 + $0x70] ss:$8 sps:$4 sm:$0xff]  }
 0xc6a   : > { %4934 = vmatpush1.bf16.msra.mxu0 %v7398_v21  ;;  %v7409_v21 = vld [vmem:[#allocation5 + $0x84] ss:$8 sps:$4 sm:$0xff]  }
 0xc6b   : > { %4935 = vmatprep.subr.bf16.mxu0 %v7399_v29  ;;  %v14574_v29 = vld [vmem:[#allocation88_spill] sm:$0xff] }
 0xc6c   : > { %4645 = vmatpush1.bf16.msra.mxu1 %v14564_v16  ;;  %v14575_v16 = vld [vmem:[#allocation116_spill] sm:$0xff] }
 0xc6d   : > { %4646 = vmatprep.subr.bf16.mxu1 %v14565_v44  ;;  %v7410_v44 = vld [vmem:[#allocation5 + $0x80] ss:$8 sps:$4 sm:$0xff]  }
 0xc6e   : > { %4936 = vmatpush1.bf16.msra.mxu0 %v7400_v42  ;;  %v7411_v42 = vld [vmem:[#allocation5 + $0x94] ss:$8 sps:$4 sm:$0xff]  }
 0xc6f   : > { %4937 = vmatprep.subr.bf16.mxu0 %v7401_v41  ;;  %v14576_v41 = vld [vmem:[#allocation142_spill] sm:$0xff] }
 0xc70   : > { %4647 = vmatpush1.bf16.msra.mxu1 %v14566_v30  ;;  %v14577_v30 = vld [vmem:[#allocation143_spill] sm:$0xff] }
 0xc71   : > { %4648 = vmatprep.subr.bf16.mxu1 %v14567_v12  ;;  %v7412_v12 = vld [vmem:[#allocation5 + $0x90] ss:$8 sps:$4 sm:$0xff]  }
 0xc72   : > { %4938 = vmatpush1.bf16.msra.mxu0 %v7402_v15  ;;  %v7413_v15 = vld [vmem:[#allocation5 + $0xa4] ss:$8 sps:$4 sm:$0xff]  }
 0xc73   : > { %4939 = vmatprep.subr.bf16.mxu0 %v7403_v17  ;;  %v14578_v17 = vld [vmem:[#allocation92_spill] sm:$0xff] }
 0xc74   : > { %4649 = vmatpush1.bf16.msra.mxu1 %v14568_v7  ;;  %v14579_v7 = vld [vmem:[#allocation118_spill] sm:$0xff] }
 0xc75   : > { %4650 = vmatprep.subr.bf16.mxu1 %v14569_v8  ;;  %v7414_v8 = vld [vmem:[#allocation5 + $0xa0] ss:$8 sps:$4 sm:$0xff]  }
 0xc76   : > { %4940 = vmatpush1.bf16.msra.mxu0 %v7404_v13  ;;  %v7415_v13 = vld [vmem:[#allocation5 + $0xb4] ss:$8 sps:$4 sm:$0xff]  }
 0xc77   : > { %4941 = vmatprep.subr.bf16.mxu0 %v7405_v20  ;;  %v14580_v20 = vld [vmem:[#allocation144_spill] sm:$0xff] }
 0xc78   : > { %4651 = vmatpush1.bf16.msra.mxu1 %v14570_v33  ;;  %v14581_v33 = vld [vmem:[#allocation145_spill] sm:$0xff] }
 0xc79   : > { %4652 = vmatprep.subr.bf16.mxu1 %v14571_v57  ;;  %v7416_v57 = vld [vmem:[#allocation5 + $0xb0] ss:$8 sps:$4 sm:$0xff]  }
 0xc7a   : > { %4942 = vmatpush1.bf16.msra.mxu0 %v7406_v63  ;;  %v7417_v63 = vld [vmem:[#allocation5 + $0xc4] ss:$8 sps:$4 sm:$0xff]  }
 0xc7b   : > { %4943 = vmatprep.subr.bf16.mxu0 %v7407_v28  ;;  %v14582_v28 = vld [vmem:[#allocation95_spill] sm:$0xff] }
 0xc7c   : > { %4653 = vmatpush1.bf16.msra.mxu1 %v14572_v32  ;;  %v14583_v32 = vld [vmem:[#allocation120_spill] sm:$0xff] }
 0xc7d   : > { %4654 = vmatprep.subr.bf16.mxu1 %v14573_v1  ;;  %v7418_v1 = vld [vmem:[#allocation5 + $0xc0] ss:$8 sps:$4 sm:$0xff]  }
 0xc7e   : > { %4944 = vmatpush1.bf16.msra.mxu0 %v7408_v37  ;;  %v7419_v37 = vld [vmem:[#allocation5 + $0xd4] ss:$8 sps:$4 sm:$0xff]  }
 0xc7f   : > { %4945 = vmatprep.subr.bf16.mxu0 %v7409_v21  ;;  %v11983_v21 = vld [vmem:[#allocation8 + $0x280] ss:$24 sps:$4 sm:$0xff]  }
 0xc80   : > { %4655 = vmatpush1.bf16.msra.mxu1 %v14574_v29  ;;  %v11986_v29 = vld [vmem:[#allocation8 + $0x2b4] ss:$24 sps:$4 sm:$0xff]  }
 0xc81   : > { %4656 = vmatprep.subr.bf16.mxu1 %v14575_v16  ;;  %v7422_v16 = vld [vmem:[#allocation5 + $0xd0] ss:$8 sps:$4 sm:$0xff]  }
 0xc82   : > { %4946 = vmatpush1.bf16.msra.mxu0 %v7410_v44  ;;  %v7423_v44 = vld [vmem:[#allocation5 + $0xe4] ss:$8 sps:$4 sm:$0xff]  }
 0xc83   : > { %4947 = vmatprep.subr.bf16.mxu0 %v7411_v42  ;;  %v11989_v42 = vld [vmem:[#allocation8 + $0x2b0] ss:$24 sps:$4 sm:$0xff]  }
 0xc84   : > { %4657 = vmatpush1.bf16.msra.mxu1 %v14576_v41  ;;  %v11992_v41 = vld [vmem:[#allocation8 + $0x2e4] ss:$24 sps:$4 sm:$0xff]  }
 0xc85   : > { %4658 = vmatprep.subr.bf16.mxu1 %v14577_v30  ;;  %v7426_v30 = vld [vmem:[#allocation5 + $0xe0] ss:$8 sps:$4 sm:$0xff]  }
 0xc86   : > { %4948 = vmatpush1.bf16.msra.mxu0 %v7412_v12  ;;  %v7427_v12 = vld [vmem:[#allocation5 + $0xf4] ss:$8 sps:$4 sm:$0xff]  }
 0xc87   : > { %4949 = vmatprep.subr.bf16.mxu0 %v7413_v15  ;;  %v14584_v15 = vld [vmem:[#allocation26_spill] sm:$0xff] }
 0xc88   : > { %4659 = vmatpush1.bf16.msra.mxu1 %v14578_v17  ;;  %vm11998_vm7 = vcmp.eq.s32.totalorder %v14584_v15, %v4920_v35  ;;  %v7431_v35 = vld [vmem:[#allocation8 + $0xc] ss:$24 sps:$4 sm:$0xff]   ;;  %v12038_v17 = vld [vmem:[#allocation10 + $0xc0] ss:$24 sps:$4 sm:$0xff]  }
 0xc89   : > { %4660 = vmatprep.subr.bf16.mxu1 %v14579_v7  ;;  %v12002_v7 = vld [vmem:[#allocation8 + $0x2e0] ss:$24 sps:$4 sm:$0xff]   ;;  %vm5897_vm8 = vmpackc.low %vm11998_vm7, %vm11998_vm7  ;;  %v7447_v15 = vld [vmem:[#allocation8 + $0xcc] ss:$24 sps:$4 sm:$0xff]   ;;  %14597 = vst [vmem:[#allocation37_spill] sm:$0xff] %v12038_v17 }
 0xc8a   : > { %4950 = vmatpush1.bf16.msra.mxu0 %v7414_v8  ;;  %14587 = vst [vmem:[#allocation63_spill] sm:$0xff] %v12002_v7  ;;  %v12005_v8 = vld [vmem:[#allocation10 + $0x4] ss:$24 sps:$4 sm:$0xff]  }
 0xc8b   : > { %4951 = vmatprep.subr.bf16.mxu0 %v7415_v13  ;;  %14588 = vst [vmem:[#allocation65_spill] sm:$0xff] %v12005_v8  ;;  %v7430_v13 = vld [vmem:[#allocation5 + $0xf0] ss:$8 sps:$4 sm:$0xff]  }
 0xc8c   : > { %4661 = vmatpush1.bf16.msra.mxu1 %v14580_v20  ;;  %v12012_v20 = vld [vmem:[#allocation10] ss:$24 sps:$4 sm:$0xff]  }
 0xc8d   : > { %4662 = vmatprep.subr.bf16.mxu1 %v14581_v33  ;;  %14589 = vst [vmem:[#allocation67_spill] sm:$0xff] %v12012_v20  ;;  %v12016_v33 = vld [vmem:[#allocation10 + $0x34] ss:$24 sps:$4 sm:$0xff]  }
 0xc8e   : > { %4952 = vmatpush1.bf16.msra.mxu0 %v7416_v57  ;;  %14590 = vst [vmem:[#allocation69_spill] sm:$0xff] %v12016_v33  ;;  %v7434_v57 = vld [vmem:[#allocation8 + $0x8] ss:$24 sps:$4 sm:$0xff]  }
 0xc8f   : > { %4953 = vmatprep.subr.bf16.mxu0 %v7417_v63  ;;  %v7435_v63 = vld [vmem:[#allocation8 + $0x3c] ss:$24 sps:$4 sm:$0xff]  }
 0xc90   : > { %4663 = vmatpush1.bf16.msra.mxu1 %v14582_v28  ;;  %v12020_v28 = vld [vmem:[#allocation10 + $0x30] ss:$24 sps:$4 sm:$0xff]  }
 0xc91   : > { %4664 = vmatprep.subr.bf16.mxu1 %v14583_v32  ;;  %14591 = vst [vmem:[#allocation71_spill] sm:$0xff] %v12020_v28  ;;  %v7438_v32 = vld [vmem:[#allocation8 + $0x38] ss:$24 sps:$4 sm:$0xff]  }
 0xc92   : > { %4954 = vmatpush1.bf16.msra.mxu0 %v7418_v1  ;;  %v12026_v1 = vld [vmem:[#allocation10 + $0x60] ss:$24 sps:$4 sm:$0xff]  }
 0xc93   : > { %4955 = vmatprep.subr.bf16.mxu0 %v7419_v37  ;;  %14593 = vst [vmem:[#allocation33_spill] sm:$0xff] %v12026_v1  ;;  %v7442_v37 = vld [vmem:[#allocation8 + $0x68] ss:$24 sps:$4 sm:$0xff]  }
 0xc94   : > { %4665 = vmatpush1.bf16.msra.mxu1 %v11983_v21 }
 0xc95   : > { %4666 = vmatprep.subr.bf16.mxu1 %v11986_v29 }
 0xc96   : > { %4956 = vmatpush1.bf16.msra.mxu0 %v7422_v16  ;;  %v7443_v16 = vld [vmem:[#allocation8 + $0x9c] ss:$24 sps:$4 sm:$0xff]  }
 0xc97   : > { %4957 = vmatprep.subr.bf16.mxu0 %v7423_v44  ;;  %v12032_v44 = vld [vmem:[#allocation10 + $0x90] ss:$24 sps:$4 sm:$0xff]  }
 0xc98   : > { %4667 = vmatpush1.bf16.msra.mxu1 %v11989_v42  ;;  %14595 = vst [vmem:[#allocation35_spill] sm:$0xff] %v12032_v44 }
 0xc99   : > { %4668 = vmatprep.subr.bf16.mxu1 %v11992_v41 }
 0xc9a   : > { %4958 = vmatpush1.bf16.msra.mxu0 %v7426_v30  ;;  %v12035_v30 = vld [vmem:[#allocation10 + $0xc4] ss:$24 sps:$4 sm:$0xff]  }
 0xc9b   : > { %4959 = vmatprep.subr.bf16.mxu0 %v7427_v12  ;;  %14596 = vst [vmem:[#allocation81_spill] sm:$0xff] %v12035_v30  ;;  %v7446_v12 = vld [vmem:[#allocation8 + $0x98] ss:$24 sps:$4 sm:$0xff]  }
 0xc9c   : > { %4669 = vmatpush1.bf16.msra.mxu1 %v12002_v7 }
 0xc9d   : > { %4681 = vmatprep.subr.bf16.mxu1 %v12005_v8 }
 0xc9e   : > { %4960 = vmatpush1.bf16.msra.mxu0 %v7430_v13  ;;  %v12041_v13 = vld [vmem:[#allocation10 + $0xf4] ss:$24 sps:$4 sm:$0xff]  }
 0xc9f   : > { %4671 = vmatmul.mubr.bf16.vlgmr.msra.gmra.mrb[76].mxu1 %v11685_v23  ;;  %5015 = vmatprep.subr.bf16.mxu0 %v7431_v35  ;;  %v12023_v23 = vld [vmem:[#allocation10 + $0x64] ss:$24 sps:$4 sm:$0xff]   ;;  %14598 = vst [vmem:[#allocation83_spill] sm:$0xff] %v12041_v13  ;;  %v7450_v35 = vld [vmem:[#allocation8 + $0xc8] ss:$24 sps:$4 sm:$0xff]  }
 0xca0   : > { %4682 = vmatpush1.bf16.msra.mxu1 %v12012_v20  ;;  %4713 = vmatprep.mubr.bf16.mxu1 %v11809_v40  ;;  %14592 = vst [vmem:[#allocation77_spill] sm:$0xff] %v12023_v23  ;;  %v7439_v40 = vld [vmem:[#allocation8 + $0x6c] ss:$24 sps:$4 sm:$0xff]  }
 0xca1   : > { %4683 = vmatprep.subr.bf16.mxu1 %v12016_v33  ;;  %5898 = vmatmul.mubr.msk.bf16.vlgmr.msra.gmra.mrb[84].mxu0 %vm5897_vm8, %v14363_v46  ;;  %v12029_v46 = vld [vmem:[#allocation10 + $0x94] ss:$24 sps:$4 sm:$0xff]   ;;  %v14686_v33 = vld [vmem:[#allocation165_spill] sm:$0xff] }
 0xca2   : > { %5016 = vmatpush1.bf16.msra.mxu0 %v7434_v57  ;;  %14594 = vst [vmem:[#allocation79_spill] sm:$0xff] %v12029_v46  ;;  %v7451_v57 = vld [vmem:[#allocation8 + $0xfc] ss:$24 sps:$4 sm:$0xff]  }
 0xca3   : > { %5017 = vmatprep.subr.bf16.mxu0 %v7435_v63  ;;  %v12044_v63 = vld [vmem:[#allocation10 + $0xf0] ss:$24 sps:$4 sm:$0xff]  }
 0xca4   : > { %4684 = vmatpush1.bf16.msra.mxu1 %v12020_v28  ;;  %14599 = vst [vmem:[#allocation39_spill] sm:$0xff] %v12044_v63 }
 0xca5   : > { %4685 = vmatprep.subr.bf16.mxu1 %v12023_v23 }
 0xca6   : > { %5018 = vmatpush1.bf16.msra.mxu0 %v7438_v32  ;;  %v12047_v32 = vld [vmem:[#allocation10 + $0x124] ss:$24 sps:$4 sm:$0xff]  }
 0xca7   : > { %5019 = vmatprep.subr.bf16.mxu0 %v7439_v40  ;;  %14600 = vst [vmem:[#allocation85_spill] sm:$0xff] %v12047_v32  ;;  %v14601_v40 = vld [vmem:[#allocation146_spill] sm:$0xff] }
 0xca8   : > { %4686 = vmatpush1.bf16.msra.mxu1 %v12026_v1 }
 0xca9   : > { %4687 = vmatprep.subr.bf16.mxu1 %v12029_v46 }
 0xcaa   : > { %5020 = vmatpush1.bf16.msra.mxu0 %v7442_v37  ;;  %v14602_v37 = vld [vmem:[#allocation147_spill] sm:$0xff] }
 0xcab   : > { %5021 = vmatprep.subr.bf16.mxu0 %v7443_v16  ;;  %v12052_v16 = vld [vmem:[#allocation10 + $0x120] ss:$24 sps:$4 sm:$0xff]  }
 0xcac   : > { %4688 = vmatpush1.bf16.msra.mxu1 %v12032_v44  ;;  %14603 = vst [vmem:[#allocation41_spill] sm:$0xff] %v12052_v16 }
 0xcad   : > { %4689 = vmatprep.subr.bf16.mxu1 %v12035_v30 }
 0xcae   : > { %5022 = vmatpush1.bf16.msra.mxu0 %v7446_v12  ;;  %v12055_v12 = vld [vmem:[#allocation10 + $0x154] ss:$24 sps:$4 sm:$0xff]  }
 0xcaf   : > { %5023 = vmatprep.subr.bf16.mxu0 %v7447_v15  ;;  %14604 = vst [vmem:[#allocation87_spill] sm:$0xff] %v12055_v12  ;;  %v14605_v15 = vld [vmem:[#allocation98_spill] sm:$0xff] }
 0xcb0   : > { %4690 = vmatpush1.bf16.msra.mxu1 %v12038_v17  ;;  %v12173_v17 = vld [vmem:[#allocation11 + $0x50] ss:$8 sps:$4 sm:$0xff]  }
 0xcb1   : > { %4691 = vmatprep.subr.bf16.mxu1 %v12041_v13  ;;  %14657 = vst [vmem:[#allocation27_spill] sm:$0xff] %v12173_v17 }
 0xcb2   : > { %5024 = vmatpush1.bf16.msra.mxu0 %v7450_v35  ;;  %v14606_v35 = vld [vmem:[#allocation121_spill] sm:$0xff] }
 0xcb3   : > { %5025 = vmatprep.subr.bf16.mxu0 %v7451_v57  ;;  %v12060_v57 = vld [vmem:[#allocation10 + $0x150] ss:$24 sps:$4 sm:$0xff]  }
 0xcb4   : > { %4692 = vmatpush1.bf16.msra.mxu1 %v12044_v63  ;;  %14607 = vst [vmem:[#allocation42_spill] sm:$0xff] %v12060_v57 }
 0xcb5   : > { %4693 = vmatprep.subr.bf16.mxu1 %v12047_v32  ;;  %v12063_v32 = vld [vmem:[#allocation10 + $0x184] ss:$24 sps:$4 sm:$0xff]  }
 0xcb6   : > { %5026 = vmatpush1.bf16.msra.mxu0 %v14601_v40  ;;  %14608 = vst [vmem:[#allocation89_spill] sm:$0xff] %v12063_v32  ;;  %v14609_v40 = vld [vmem:[#allocation159_spill] sm:$0xff] }
 0xcb7   : > { %5027 = vmatprep.subr.bf16.mxu0 %v14602_v37  ;;  %v14610_v37 = vld [vmem:[#allocation160_spill] sm:$0xff] }
 0xcb8   : > { %4694 = vmatpush1.bf16.msra.mxu1 %v12052_v16  ;;  %v12068_v16 = vld [vmem:[#allocation10 + $0x180] ss:$24 sps:$4 sm:$0xff]  }
 0xcb9   : > { %4695 = vmatprep.subr.bf16.mxu1 %v12055_v12  ;;  %14611 = vst [vmem:[#allocation44_spill] sm:$0xff] %v12068_v16  ;;  %v12071_v12 = vld [vmem:[#allocation10 + $0x1b4] ss:$24 sps:$4 sm:$0xff]  }
 0xcba   : > { %5028 = vmatpush1.bf16.msra.mxu0 %v14605_v15  ;;  %14612 = vst [vmem:[#allocation91_spill] sm:$0xff] %v12071_v12  ;;  %v14613_v15 = vld [vmem:[#allocation122_spill] sm:$0xff] }
 0xcbb   : > { %5029 = vmatprep.subr.bf16.mxu0 %v14606_v35  ;;  %v14614_v35 = vld [vmem:[#allocation123_spill] sm:$0xff] }
 0xcbc   : > { %4696 = vmatpush1.bf16.msra.mxu1 %v12060_v57  ;;  %v12076_v57 = vld [vmem:[#allocation10 + $0x1b0] ss:$24 sps:$4 sm:$0xff]  }
 0xcbd   : > { %4697 = vmatprep.subr.bf16.mxu1 %v12063_v32  ;;  %14615 = vst [vmem:[#allocation46_spill] sm:$0xff] %v12076_v57  ;;  %v12079_v32 = vld [vmem:[#allocation10 + $0x1e4] ss:$24 sps:$4 sm:$0xff]  }
 0xcbe   : > { %5030 = vmatpush1.bf16.msra.mxu0 %v14609_v40  ;;  %14616 = vst [vmem:[#allocation93_spill] sm:$0xff] %v12079_v32  ;;  %v14617_v40 = vld [vmem:[#allocation163_spill] sm:$0xff] }
 0xcbf   : > { %5031 = vmatprep.subr.bf16.mxu0 %v14610_v37  ;;  %v14618_v37 = vld [vmem:[#allocation164_spill] sm:$0xff] }
 0xcc0   : > { %4698 = vmatpush1.bf16.msra.mxu1 %v12068_v16  ;;  %v12084_v16 = vld [vmem:[#allocation10 + $0x1e0] ss:$24 sps:$4 sm:$0xff]  }
 0xcc1   : > { %4699 = vmatprep.subr.bf16.mxu1 %v12071_v12  ;;  %14619 = vst [vmem:[#allocation48_spill] sm:$0xff] %v12084_v16  ;;  %v12087_v12 = vld [vmem:[#allocation10 + $0x214] ss:$24 sps:$4 sm:$0xff]  }
 0xcc2   : > { %5032 = vmatpush1.bf16.msra.mxu0 %v14613_v15  ;;  %14620 = vst [vmem:[#allocation50_spill] sm:$0xff] %v12087_v12  ;;  %v14621_v15 = vld [vmem:[#allocation126_spill] sm:$0xff] }
 0xcc3   : > { %5033 = vmatprep.subr.bf16.mxu0 %v14614_v35  ;;  %v14622_v35 = vld [vmem:[#allocation132_spill] sm:$0xff] }
 0xcc4   : > { %4700 = vmatpush1.bf16.msra.mxu1 %v12076_v57  ;;  %v12092_v57 = vld [vmem:[#allocation10 + $0x210] ss:$24 sps:$4 sm:$0xff]  }
 0xcc5   : > { %4701 = vmatprep.subr.bf16.mxu1 %v12079_v32  ;;  %14623 = vst [vmem:[#allocation52_spill] sm:$0xff] %v12092_v57  ;;  %v12095_v32 = vld [vmem:[#allocation10 + $0x244] ss:$24 sps:$4 sm:$0xff]  }
 0xcc6   : > { %5034 = vmatpush1.bf16.msra.mxu0 %v14617_v40  ;;  %14624 = vst [vmem:[#allocation97_spill] sm:$0xff] %v12095_v32  ;;  %v14625_v40 = vld [vmem:[#allocation167_spill] sm:$0xff] }
 0xcc7   : > { %5035 = vmatprep.subr.bf16.mxu0 %v14618_v37  ;;  %v14626_v37 = vld [vmem:[#allocation168_spill] sm:$0xff] }
 0xcc8   : > { %4702 = vmatpush1.bf16.msra.mxu1 %v12084_v16  ;;  %v12100_v16 = vld [vmem:[#allocation10 + $0x240] ss:$24 sps:$4 sm:$0xff]  }
 0xcc9   : > { %4703 = vmatprep.subr.bf16.mxu1 %v12087_v12  ;;  %14627 = vst [vmem:[#allocation54_spill] sm:$0xff] %v12100_v16  ;;  %v12103_v12 = vld [vmem:[#allocation10 + $0x274] ss:$24 sps:$4 sm:$0xff]  }
 0xcca   : > { %5036 = vmatpush1.bf16.msra.mxu0 %v14621_v15  ;;  %14628 = vst [vmem:[#allocation175_spill] sm:$0xff] %v12103_v12  ;;  %v14629_v15 = vld [vmem:[#allocation130_spill] sm:$0xff] }
 0xccb   : > { %5037 = vmatprep.subr.bf16.mxu0 %v14622_v35  ;;  %v14630_v35 = vld [vmem:[#allocation134_spill] sm:$0xff] }
 0xccc   : > { %4704 = vmatpush1.bf16.msra.mxu1 %v12092_v57  ;;  %v12108_v57 = vld [vmem:[#allocation10 + $0x270] ss:$24 sps:$4 sm:$0xff]  }
 0xccd   : > { %4705 = vmatprep.subr.bf16.mxu1 %v12095_v32  ;;  %14631 = vst [vmem:[#allocation176_spill] sm:$0xff] %v12108_v57  ;;  %v12111_v32 = vld [vmem:[#allocation10 + $0x2a4] ss:$24 sps:$4 sm:$0xff]  }
 0xcce   : > { %5038 = vmatpush1.bf16.msra.mxu0 %v14625_v40  ;;  %14632 = vst [vmem:[#allocation99_spill] sm:$0xff] %v12111_v32  ;;  %v14633_v40 = vld [vmem:[#allocation177_spill] sm:$0xff] }
 0xccf   : > { %5039 = vmatprep.subr.bf16.mxu0 %v14626_v37  ;;  %v14634_v37 = vld [vmem:[#allocation178_spill] sm:$0xff] }
 0xcd0   : > { %4706 = vmatpush1.bf16.msra.mxu1 %v12100_v16  ;;  %v12116_v16 = vld [vmem:[#allocation10 + $0x2a0] ss:$24 sps:$4 sm:$0xff]  }
 0xcd1   : > { %4707 = vmatprep.subr.bf16.mxu1 %v12103_v12  ;;  %14635 = vst [vmem:[#allocation56_spill] sm:$0xff] %v12116_v16  ;;  %v12119_v12 = vld [vmem:[#allocation10 + $0x2d4] ss:$24 sps:$4 sm:$0xff]  }
 0xcd2   : > { %5040 = vmatpush1.bf16.msra.mxu0 %v14629_v15  ;;  %14636 = vst [vmem:[#allocation100_spill] sm:$0xff] %v12119_v12  ;;  %v14637_v15 = vld [vmem:[#allocation137_spill] sm:$0xff] }
 0xcd3   : > { %5041 = vmatprep.subr.bf16.mxu0 %v14630_v35  ;;  %v14638_v35 = vld [vmem:[#allocation148_spill] sm:$0xff] }
 0xcd4   : > { %4708 = vmatpush1.bf16.msra.mxu1 %v12108_v57  ;;  %v12124_v57 = vld [vmem:[#allocation10 + $0x2d0] ss:$24 sps:$4 sm:$0xff]  }
 0xcd5   : > { %4709 = vmatprep.subr.bf16.mxu1 %v12111_v32  ;;  %14639 = vst [vmem:[#allocation58_spill] sm:$0xff] %v12124_v57  ;;  %v12127_v32 = vld [vmem:[#allocation11 + $0x4] ss:$8 sps:$4 sm:$0xff]  }
 0xcd6   : > { %5042 = vmatpush1.bf16.msra.mxu0 %v14633_v40  ;;  %14640 = vst [vmem:[#allocation101_spill] sm:$0xff] %v12127_v32  ;;  %v14641_v40 = vld [vmem:[#allocation149_spill] sm:$0xff] }
 0xcd7   : > { %5043 = vmatprep.subr.bf16.mxu0 %v14634_v37  ;;  %v14642_v37 = vld [vmem:[#allocation150_spill] sm:$0xff] }
 0xcd8   : > { %4710 = vmatpush1.bf16.msra.mxu1 %v12116_v16  ;;  %v12133_v16 = vld [vmem:[#allocation11] ss:$8 sps:$4 sm:$0xff]  }
 0xcd9   : > { %4711 = vmatprep.subr.bf16.mxu1 %v12119_v12  ;;  %14643 = vst [vmem:[#allocation60_spill] sm:$0xff] %v12133_v16 }
 0xcda   : > { %5044 = vmatpush1.bf16.msra.mxu0 %v14637_v15  ;;  %v12136_v15 = vld [vmem:[#allocation11 + $0x14] ss:$8 sps:$4 sm:$0xff]  }
 0xcdb   : > { %5045 = vmatprep.subr.bf16.mxu0 %v14638_v35  ;;  %14644 = vst [vmem:[#allocation102_spill] sm:$0xff] %v12136_v15  ;;  %v12139_v35 = vld [vmem:[#allocation11 + $0x10] ss:$8 sps:$4 sm:$0xff]  }
 0xcdc   : > { %4712 = vmatpush1.bf16.msra.mxu1 %v12124_v57  ;;  %14645 = vst [vmem:[#allocation62_spill] sm:$0xff] %v12139_v35  ;;  %v12142_v57 = vld [vmem:[#allocation11 + $0x24] ss:$8 sps:$4 sm:$0xff]  }
 0xcdd   : > { %4850 = vmatprep.subr.bf16.mxu1 %v12127_v32  ;;  %14646 = vst [vmem:[#allocation103_spill] sm:$0xff] %v12142_v57 }
 0xcde   : > { %5046 = vmatpush1.bf16.msra.mxu0 %v14641_v40  ;;  %v12145_v40 = vld [vmem:[#allocation11 + $0x20] ss:$8 sps:$4 sm:$0xff]  }
 0xcdf   : > { %4714 = vmatmul.mubr.bf16.vlgmr.msra.gmra.mrb[72].mxu1 %v11813_v52  ;;  %5140 = vmatprep.subr.bf16.mxu0 %v14642_v37  ;;  %14647 = vst [vmem:[#allocation64_spill] sm:$0xff] %v12145_v40  ;;  %v12148_v52 = vld [vmem:[#allocation11 + $0x34] ss:$8 sps:$4 sm:$0xff]   ;;  %v12151_v37 = vld [vmem:[#allocation11 + $0x30] ss:$8 sps:$4 sm:$0xff]  }
 0xce0   : > { %4851 = vmatpush1.bf16.msra.mxu1 %v12133_v16  ;;  %14648 = vst [vmem:[#allocation105_spill] sm:$0xff] %v12148_v52  ;;  %14649 = vst [vmem:[#allocation68_spill] sm:$0xff] %v12151_v37  ;;  %v14653_v16 = vld [vmem:[#allocation73_spill] sm:$0xff] }
 0xce1   : > { %4852 = vmatprep.subr.bf16.mxu1 %v12136_v15  ;;  %v12154_v15 = vld [vmem:[#allocation11 + $0x44] ss:$8 sps:$4 sm:$0xff]  }
 0xce2   : > { %14650 = vst [vmem:[#allocation106_spill] sm:$0xff] %v12154_v15 }
 0xce4   : > { %4853 = vmatpush1.bf16.msra.mxu1 %v12139_v35  ;;  %v12157_v35 = vld [vmem:[#allocation11 + $0x40] ss:$8 sps:$4 sm:$0xff]  }
 0xce5   : > { %4854 = vmatprep.subr.bf16.mxu1 %v12142_v57  ;;  %14651 = vst [vmem:[#allocation70_spill] sm:$0xff] %v12157_v35  ;;  %v12160_v57 = vld [vmem:[#allocation11 + $0x54] ss:$8 sps:$4 sm:$0xff]  }
 0xce6   : > { %14652 = vst [vmem:[#allocation107_spill] sm:$0xff] %v12160_v57 }
 0xce8   : > { %4855 = vmatpush1.bf16.msra.mxu1 %v12145_v40 }
 0xce9   : > { %4856 = vmatprep.subr.bf16.mxu1 %v12148_v52 }
 0xcec   : > { %4857 = vmatpush1.bf16.msra.mxu1 %v12151_v37  ;;  %v14655_v37 = vld [vmem:[#allocation29_spill] sm:$0xff] }
 0xced   : > { %4858 = vmatprep.subr.bf16.mxu1 %v12154_v15 }
 0xcf0   : > { %4859 = vmatpush1.bf16.msra.mxu1 %v12157_v35 }
 0xcf1   : > { %4860 = vmatprep.subr.bf16.mxu1 %v12160_v57 }
 0xcf2   : > { %v4466_v40 = vpop.f32.mrb[68].mxu1 }
 0xcf3   : > { %v12164_v32 = vadd.f32 %v4466_v40, %v14653_v16  ;;  %v4468_v52 = vpop.f32.mrb[69].mxu1  ;;  %v12166_v12 = vpop.f32.mrb[76].mxu0  ;;  %v12178_v40 = vld [vmem:[#allocation11 + $0x64] ss:$8 sps:$4 sm:$0xff]  }
 0xcf4   : > { %v12169_v63 = vadd.f32 %v4468_v52, %v14655_v37  ;;  %v4470_v13 = vpop.f32.mrb[70].mxu1  ;;  %v12171_v15 = vpop.f32.mrb[77].mxu0  ;;  %4861 = vmatpush1.bf16.msra.mxu1 %v12173_v17  ;;  %14658 = vst [vmem:[#allocation74_spill] sm:$0xff] %v12178_v40  ;;  %v12183_v37 = vld [vmem:[#allocation11 + $0x60] ss:$8 sps:$4 sm:$0xff]  }
 0xcf5   : > { %14654 = vst [vmem:[#allocation72_spill] sm:$0xff] %v12164_v32  ;;  %v4471_v35 = vpop.f32.mrb[71].mxu1  ;;  %v4760_v30 = vpop.f32.mrb[78].mxu0  ;;  %v4473_v57 = vsel %vm2382_vm14, %v12164_v32, -inf  ;;  %4862 = vmatprep.subr.bf16.mxu1 %v12178_v40  ;;  %14659 = vst [vmem:[#allocation109_spill] sm:$0xff] %v12183_v37 }
 0xcf6   : > { %14656 = vst [vmem:[#allocation108_spill] sm:$0xff] %v12169_v63  ;;  %v4761_v16 = vpop.f32.mrb[79].mxu0  ;;  %v4474_v52 = vsel %vm2382_vm14, %v12169_v63, -inf  ;;  %v12186_v17 = vld [vmem:[#allocation11 + $0x74] ss:$8 sps:$4 sm:$0xff]  }
 0xcf7   : > { %v4475_v13 = vmax.f32 %v4473_v57, %v4474_v52  ;;  %14660 = vst [vmem:[#allocation76_spill] sm:$0xff] %v12186_v17  ;;  %v12189_v30 = vld [vmem:[#allocation11 + $0x70] ss:$8 sps:$4 sm:$0xff]   ;;  %v12192_v35 = vld [vmem:[#allocation11 + $0x84] ss:$8 sps:$4 sm:$0xff]  }
 0xcf8   : > { %4863 = vmatpush1.bf16.msra.mxu1 %v12183_v37  ;;  %14661 = vst [vmem:[#allocation110_spill] sm:$0xff] %v12189_v30  ;;  %14662 = vst [vmem:[#allocation78_spill] sm:$0xff] %v12192_v35  ;;  %v12195_v16 = vld [vmem:[#allocation11 + $0x80] ss:$8 sps:$4 sm:$0xff]   ;;  %v12198_v57 = vld [vmem:[#allocation11 + $0x94] ss:$8 sps:$4 sm:$0xff]  }
 0xcf9   : > { %4476 = vmax.xlane.f32.xlu1 %v4475_v13  ;;  %4864 = vmatprep.subr.bf16.mxu1 %v12186_v17  ;;  %14663 = vst [vmem:[#allocation111_spill] sm:$0xff] %v12195_v16  ;;  %14664 = vst [vmem:[#allocation80_spill] sm:$0xff] %v12198_v57  ;;  %v12201_v52 = vld [vmem:[#allocation11 + $0x90] ss:$8 sps:$4 sm:$0xff]   ;;  %v12204_v13 = vld [vmem:[#allocation11 + $0xa4] ss:$8 sps:$4 sm:$0xff]  }
 0xcfa   : > { %14665 = vst [vmem:[#allocation112_spill] sm:$0xff] %v12201_v52  ;;  %14666 = vst [vmem:[#allocation82_spill] sm:$0xff] %v12204_v13  ;;  %v12207_v63 = vld [vmem:[#allocation11 + $0xa0] ss:$8 sps:$4 sm:$0xff]   ;;  %v12210_v32 = vld [vmem:[#allocation11 + $0xb4] ss:$8 sps:$4 sm:$0xff]  }
 0xcfb   : > { %14667 = vst [vmem:[#allocation113_spill] sm:$0xff] %v12207_v63  ;;  %14668 = vst [vmem:[#allocation86_spill] sm:$0xff] %v12210_v32 }
 0xcfc   : > { %4865 = vmatpush1.bf16.msra.mxu1 %v12189_v30 }
 0xcfd   : > { %4866 = vmatprep.subr.bf16.mxu1 %v12192_v35 }
 0xd00   : > { %4867 = vmatpush1.bf16.msra.mxu1 %v12195_v16  ;;  %v12213_v16 = vld [vmem:[#allocation11 + $0xb0] ss:$8 sps:$4 sm:$0xff]  }
 0xd01   : > { %4868 = vmatprep.subr.bf16.mxu1 %v12198_v57  ;;  %14669 = vst [vmem:[#allocation115_spill] sm:$0xff] %v12213_v16  ;;  %v12216_v57 = vld [vmem:[#allocation11 + $0xc4] ss:$8 sps:$4 sm:$0xff]  }
 0xd02   : > { %14670 = vst [vmem:[#allocation90_spill] sm:$0xff] %v12216_v57 }
 0xd04   : > { %4869 = vmatpush1.bf16.msra.mxu1 %v12201_v52  ;;  %v12219_v52 = vld [vmem:[#allocation11 + $0xc0] ss:$8 sps:$4 sm:$0xff]  }
 0xd05   : > { %4870 = vmatprep.subr.bf16.mxu1 %v12204_v13  ;;  %14671 = vst [vmem:[#allocation117_spill] sm:$0xff] %v12219_v52  ;;  %v12222_v13 = vld [vmem:[#allocation11 + $0xd4] ss:$8 sps:$4 sm:$0xff]  }
 0xd06   : > { %14672 = vst [vmem:[#allocation94_spill] sm:$0xff] %v12222_v13 }
 0xd08   : > { %4871 = vmatpush1.bf16.msra.mxu1 %v12207_v63  ;;  %v12225_v63 = vld [vmem:[#allocation11 + $0xd0] ss:$8 sps:$4 sm:$0xff]  }
 0xd09   : > { %4872 = vmatprep.subr.bf16.mxu1 %v12210_v32  ;;  %14673 = vst [vmem:[#allocation119_spill] sm:$0xff] %v12225_v63  ;;  %v12228_v32 = vld [vmem:[#allocation11 + $0xe4] ss:$8 sps:$4 sm:$0xff]  }
 0xd0a   : > { %14674 = vst [vmem:[#allocation127_spill] sm:$0xff] %v12228_v32 }
 0xd0c   : > { %4873 = vmatpush1.bf16.msra.mxu1 %v12213_v16  ;;  %v12231_v16 = vld [vmem:[#allocation11 + $0xe0] ss:$8 sps:$4 sm:$0xff]  }
 0xd0d   : > { %4874 = vmatprep.subr.bf16.mxu1 %v12216_v57  ;;  %14675 = vst [vmem:[#allocation129_spill] sm:$0xff] %v12231_v16  ;;  %v12234_v57 = vld [vmem:[#allocation11 + $0xf4] ss:$8 sps:$4 sm:$0xff]  }
 0xd0e   : > { %14676 = vst [vmem:[#allocation131_spill] sm:$0xff] %v12234_v57 }
 0xd10   : > { %4875 = vmatpush1.bf16.msra.mxu1 %v12219_v52  ;;  %v12237_v52 = vld [vmem:[#allocation11 + $0xf0] ss:$8 sps:$4 sm:$0xff]  }
 0xd11   : > { %4876 = vmatprep.subr.bf16.mxu1 %v12222_v13  ;;  %14677 = vst [vmem:[#allocation125_spill] sm:$0xff] %v12237_v52  ;;  %v7505_v13 = vld [vmem:[#allocation8 + $0x4] ss:$24 sps:$4 sm:$0xff]  }
 0xd14   : > { %4877 = vmatpush1.bf16.msra.mxu1 %v12225_v63 }
 0xd15   : > { %4878 = vmatprep.subr.bf16.mxu1 %v12228_v32 }
 0xd18   : > { %4879 = vmatpush1.bf16.msra.mxu1 %v12231_v16 }
 0xd19   : > { %4880 = vmatprep.subr.bf16.mxu1 %v12234_v57 }
 0xd1c   : > { %4881 = vmatpush1.bf16.msra.mxu1 %v12237_v52 }
 0xd1d   : > { %4974 = vmatprep.subr.bf16.mxu1 %v7505_v13 }
 0xd34   : > { %v12240_v35 = vpop.f32.mrb[80].mxu0 }
 0xd35   : > { %v12242_v63 = vpop.f32.mrb[81].mxu0 }
 0xd36   : > { %v4801_v30 = vpop.f32.mrb[82].mxu0 }
 0xd37   : > { %v4802_v32 = vpop.f32.mrb[83].mxu0  ;;  %v7507_v30 = vld [vmem:[#allocation10 + $0x3c] ss:$24 sps:$4 sm:$0xff]  }
 0xd38   : > { %v7506_v32 = vld [vmem:[#allocation10 + $0x8] ss:$24 sps:$4 sm:$0xff]  }
 0xd72   : > { %v12244_v17 = vpop.f32.mrb[76].mxu1 }
 0xd73   : > { %v12246_v37 = vpop.f32.mrb[77].mxu1 }
 0xd74   : > { %v4676_v16 = vpop.f32.mrb[78].mxu1  ;;  %v4963_v40 = vpop.f32.mrb[84].mxu0 }
 0xd75   : > { %v4677_v44 = vpop.f32.mrb[79].mxu1  ;;  %v4970_v57 = vmax.f32 %v4963_v40, 0.0  ;;  %v4965_v46 = vpop.f32.mrb[85].mxu0  ;;  %v14678_v16 = vld [vmem:[#allocation153_spill] sm:$0xff]  ;;  %v14680_v40 = vld [vmem:[#allocation155_spill] sm:$0xff] }
 0xd76   : > { %v4971_v1 = vmax.f32 %v4965_v46, 0.0  ;;  %v4967_v23 = vpop.f32.mrb[86].mxu0  ;;  %v14679_v44 = vld [vmem:[#allocation154_spill] sm:$0xff]  ;;  %v14682_v46 = vld [vmem:[#allocation157_spill] sm:$0xff] }
 0xd77   : > { %v12248_v52 = vpack.c.bf16 %v4970_v57, %v4970_v57  ;;  %v4968_v13 = vpop.f32.mrb[87].mxu0  ;;  %v14681_v23 = vld [vmem:[#allocation156_spill] sm:$0xff]  ;;  %v14684_v57 = vld [vmem:[#allocation161_spill] sm:$0xff] }
 0xd78   : > { %v12250_v28 = vpack.c.bf16 %v4971_v1, %v4971_v1  ;;  %v14683_v1 = vld [vmem:[#allocation158_spill] sm:$0xff] }
 0xd79   : > { %v14685_v13 = vld [vmem:[#allocation162_spill] sm:$0xff] }
 0xd7a   : > { %5047 = vmatprep.mubr.bf16.mxu0 %v12250_v28 }
 0xd7b   : > { %5048 = vmatmul.mubr.bf16.vlgmr.msra.gmra.mrb[88].mxu0 %v12248_v52 }
 0xd7c   : > { %5141 = vmatpush1.bf16.msra.mxu0 %v7506_v32  ;;  %v14687_v32 = vld [vmem:[#allocation166_spill] sm:$0xff] }
 0xd7d   : > { %5142 = vmatprep.subr.bf16.mxu0 %v7507_v30  ;;  %v14688_v30 = vld [vmem:[#allocation169_spill] sm:$0xff] }
 0xd80   : > { %5143 = vmatpush1.bf16.msra.mxu0 %v14678_v16  ;;  %v14689_v16 = vld [vmem:[#allocation170_spill] sm:$0xff] }
 0xd81   : > { %5144 = vmatprep.subr.bf16.mxu0 %v14679_v44  ;;  %v14690_v44 = vld [vmem:[#allocation179_spill] sm:$0xff] }
 0xd84   : > { %5145 = vmatpush1.bf16.msra.mxu0 %v14680_v40  ;;  %v14691_v40 = vld [vmem:[#allocation180_spill] sm:$0xff] }
 0xd85   : > { %5146 = vmatprep.subr.bf16.mxu0 %v14681_v23  ;;  %v14692_v23 = vld [vmem:[#allocation181_spill] sm:$0xff] }
 0xd88   : > { %5147 = vmatpush1.bf16.msra.mxu0 %v14682_v46  ;;  %v14693_v46 = vld [vmem:[#allocation30_spill] sm:$0xff] }
 0xd89   : > { %5148 = vmatprep.subr.bf16.mxu0 %v14683_v1  ;;  %v14694_v1 = vld [vmem:[#allocation32_spill] sm:$0xff] }
 0xd8c   : > { %5149 = vmatpush1.bf16.msra.mxu0 %v14684_v57  ;;  %v14695_v57 = vld [vmem:[#allocation34_spill] sm:$0xff] }
 0xd8d   : > { %5150 = vmatprep.subr.bf16.mxu0 %v14685_v13  ;;  %v14696_v13 = vld [vmem:[#allocation36_spill] sm:$0xff] }
 0xd90   : > { %5151 = vmatpush1.bf16.msra.mxu0 %v14686_v33  ;;  %v14697_v33 = vld [vmem:[#allocation38_spill] sm:$0xff] }
 0xd91   : > { %5152 = vmatprep.subr.bf16.mxu0 %v14687_v32  ;;  %v14698_v32 = vld [vmem:[#allocation40_spill] sm:$0xff] }
 0xd94   : > { %5153 = vmatpush1.bf16.msra.mxu0 %v14688_v30  ;;  %v14699_v30 = vld [vmem:[#allocation182_spill] sm:$0xff] }
 0xd95   : > { %5154 = vmatprep.subr.bf16.mxu0 %v14689_v16  ;;  %v14700_v16 = vld [vmem:[#allocation43_spill] sm:$0xff] }
 0xd98   : > { %5155 = vmatpush1.bf16.msra.mxu0 %v14690_v44  ;;  %v14701_v44 = vld [vmem:[#allocation45_spill] sm:$0xff] }
 0xd99   : > { %5156 = vmatprep.subr.bf16.mxu0 %v14691_v40  ;;  %v14702_v40 = vld [vmem:[#allocation47_spill] sm:$0xff] }
 0xd9c   : > { %5157 = vmatpush1.bf16.msra.mxu0 %v14692_v23  ;;  %v14703_v23 = vld [vmem:[#allocation49_spill] sm:$0xff] }
 0xd9d   : > { %5158 = vmatprep.subr.bf16.mxu0 %v14693_v46 }
 0xda0   : > { %5159 = vmatpush1.bf16.msra.mxu0 %v14694_v1 }
 0xda1   : > { %5160 = vmatprep.subr.bf16.mxu0 %v14695_v57 }
 0xda4   : > { %5161 = vmatpush1.bf16.msra.mxu0 %v14696_v13 }
 0xda5   : > { %5162 = vmatprep.subr.bf16.mxu0 %v14697_v33  ;;  %v14704_v33 = vld [vmem:[#allocation55_spill] sm:$0xff] }
 0xda8   : > { %5163 = vmatpush1.bf16.msra.mxu0 %v14698_v32 }
 0xda9   : > { %5164 = vmatprep.subr.bf16.mxu0 %v14699_v30  ;;  %v14705_v30 = vld [vmem:[#allocation57_spill] sm:$0xff] }
 0xdac   : > { %5165 = vmatpush1.bf16.msra.mxu0 %v14700_v16  ;;  %v14706_v16 = vld [vmem:[#allocation172_spill] sm:$0xff] }
 0xdad   : > { %5166 = vmatprep.subr.bf16.mxu0 %v14701_v44  ;;  %v5938_v44 = vadd.f32 %v12166_v12, %v14706_v16 }
 0xdb0   : > { %5167 = vmatpush1.bf16.msra.mxu0 %v14702_v40  ;;  %v14707_v40 = vld [vmem:[#allocation173_spill] sm:$0xff] }
 0xdb1   : > { %5168 = vmatprep.subr.bf16.mxu0 %v14703_v23  ;;  %v5939_v23 = vadd.f32 %v12171_v15, %v14707_v40 }
 0xdb2   : > { %v4715_v46 = vpop.f32.mrb[72].mxu1 }
 0xdb3   : > { %v5936_v1 = vadd.f32 %v4715_v46, %v13942_v51  ;;  %v4717_v57 = vpop.f32.mrb[73].mxu1  ;;  %v14708_v46 = vld [vmem:[#allocation59_spill] sm:$0xff]  ;;  %v14709_v51 = vld [vmem:[#allocation61_spill] sm:$0xff] }
 0xdb4   : > { %v5937_v13 = vadd.f32 %v4717_v57, %v8772_v39  ;;  %v4719_v20 = vpop.f32.mrb[74].mxu1  ;;  %5169 = vmatpush1.bf16.msra.mxu0 %v14704_v33  ;;  %v5892_v57 = vmul.f32 -1.442695, %v5939_v23 }
 0xdb5   : > { %v5889_v32 = vmul.f32 -1.442695, %v5936_v1  ;;  %v4720_v8 = vpop.f32.mrb[75].mxu1  ;;  %5170 = vmatprep.subr.bf16.mxu0 %v14705_v30  ;;  %v5891_v20 = vmul.f32 -1.442695, %v5938_v44 }
 0xdb6   : > { %v5890_v7 = vmul.f32 -1.442695, %v5937_v13 }
 0xdb7   : > { %6606 = vpow2.f32 %v5889_v32 }
 0xdb8   : > { %6608 = vpow2.f32 %v5890_v7  ;;  %5171 = vmatpush1.bf16.msra.mxu0 %v14708_v46  ;;  %v4832_v7 = vadd.f32 %v12240_v35, %v8786_v22 }
 0xdb9   : > { %5181 = vmatprep.subr.bf16.mxu0 %v14709_v51  ;;  %6610 = vpow2.f32 %v5891_v20  ;;  %v14710_v51 = vld [vmem:[#allocation174_spill] sm:$0xff]  ;;  %v4673_v20 = vadd.f32 %v12244_v17, %v13945_v31 }
 0xdba   : > { %6612 = vpow2.f32 %v5892_v57  ;;  %v4833_v44 = vadd.f32 %v12242_v63, %v14710_v51 }
 0xdc1   : > { %v6607_v8 = vpop.eup %6606 }
 0xdc2   : > { %v6609_v1 = vpop.eup %6608  ;;  %v4812_v33 = vadd.f32 1.0, %v6607_v8  ;;  %v4675_v8 = vadd.f32 %v12246_v37, %v13946_v14 }
 0xdc3   : > { %v4813_v30 = vadd.f32 1.0, %v6609_v1  ;;  %v6611_v12 = vpop.eup %6610 }
 0xdc4   : > { %6614 = vrcp.f32 %v4812_v33  ;;  %v6613_v13 = vpop.eup %6612  ;;  %v4826_v15 = vadd.f32 1.0, %v6611_v12 }
 0xdc5   : > { %6616 = vrcp.f32 %v4813_v30  ;;  %v4827_v32 = vadd.f32 1.0, %v6613_v13  ;;  %v4914_v13 = vstv %s4913_s21 }
 0xdc6   : > { %6618 = vrcp.f32 %v4826_v15  ;;  %vm4915_vm9 = vcmp.eq.s32.totalorder %v4914_v13, 1  ;;  %v7543_v13 = vld [vmem:[#allocation8 + $0x74] ss:$24 sps:$4 sm:$0xff]  }
 0xdc7   : > { %6620 = vrcp.f32 %v4827_v32 }
 0xdce   : > { %v6615_v46 = vpop.eup %6614 }
 0xdcf   : > { %v6617_v23 = vpop.eup %6616  ;;  %v4834_v57 = vmul.f32 %v6615_v46, %v4832_v7 }
 0xdd0   : > { %v4835_v1 = vmul.f32 %v6617_v23, %v4833_v44  ;;  %v6619_v35 = vpop.eup %6618 }
 0xdd1   : > { %v4836_v33 = vadd.f32 %v4834_v57, %v4673_v20  ;;  %v6621_v63 = vpop.eup %6620  ;;  %v4840_v12 = vsub.f32 1.0, %v6619_v35  ;;  %v4844_v32 = vmul.f32 %v6619_v35, %v11802_v49  ;;  %v7511_v35 = vld [vmem:[#allocation8 + $0x64] ss:$24 sps:$4 sm:$0xff]  }
 0xdd2   : > { %v4837_v30 = vadd.f32 %v4835_v1, %v4675_v8  ;;  %v4841_v51 = vsub.f32 1.0, %v6621_v63  ;;  %v4845_v37 = vmul.f32 %v6621_v63, %v11805_v43  ;;  %v7512_v63 = vld [vmem:[#allocation8 + $0x60] ss:$24 sps:$4 sm:$0xff]  }
 0xdd3   : > { %6622 = vtanh.f32 %v4836_v33 }
 0xdd4   : > { %6624 = vtanh.f32 %v4837_v30  ;;  %v7508_v30 = vld [vmem:[#allocation8] ss:$24 sps:$4 sm:$0xff]  }
 0xddd   : > { %v6623_v15 = vpop.eup %6622 }
 0xdde   : > { %v6625_v17 = vpop.eup %6624  ;;  %v4842_v7 = vmul.f32 %v6623_v15, %v4840_v12  ;;  %v7514_v12 = vld [vmem:[#allocation8 + $0x90] ss:$24 sps:$4 sm:$0xff]   ;;  %v7545_v15 = vld [vmem:[#allocation8 + $0xa4] ss:$24 sps:$4 sm:$0xff]  }
 0xddf   : > { %v4843_v46 = vmul.f32 %v6625_v17, %v4841_v51  ;;  %v7547_v17 = vld [vmem:[#allocation8 + $0xd4] ss:$24 sps:$4 sm:$0xff]  }
 0xde0   : > { %v4846_v44 = vadd.f32 %v4844_v32, %v4842_v7  ;;  %v7548_v7 = vld [vmem:[#allocation8 + $0xd0] ss:$24 sps:$4 sm:$0xff]   ;;  %v7549_v32 = vld [vmem:[#allocation8 + $0x104] ss:$24 sps:$4 sm:$0xff]  }
 0xde1   : > { %v4847_v23 = vadd.f32 %v4845_v37, %v4843_v46  ;;  %v7551_v46 = vld [vmem:[#allocation8 + $0x134] ss:$24 sps:$4 sm:$0xff]   ;;  %v7552_v37 = vld [vmem:[#allocation8 + $0x130] ss:$24 sps:$4 sm:$0xff]  }
 0xde2   : > { %v12303_v20 = vsel %vm4915_vm9, %v4846_v44, %v11802_v49  ;;  %v4848_v1 = vpack.c.bf16 %v4846_v44, %v4846_v44  ;;  %v7509_v49 = vld [vmem:[#allocation8 + $0x34] ss:$24 sps:$4 sm:$0xff]   ;;  %v7553_v44 = vld [vmem:[#allocation8 + $0x164] ss:$24 sps:$4 sm:$0xff]  }
 0xde3   : > { %v4849_v57 = vpack.c.bf16 %v4847_v23, %v4847_v23  ;;  %v12306_v8 = vsel %vm4915_vm9, %v4847_v23, %v11805_v43  ;;  %v12314_v51 = vpack.c.bf16 %v12303_v20, %v12303_v20  ;;  %v7510_v43 = vld [vmem:[#allocation8 + $0x30] ss:$24 sps:$4 sm:$0xff]   ;;  %v7554_v23 = vld [vmem:[#allocation8 + $0x160] ss:$24 sps:$4 sm:$0xff]  }
 0xde4   : > { %v12310_v33 = vpack.c.bf16 %v12306_v8, %v12306_v8 }
 0xde5   : > { %4882 = vmatprep.mubr.bf16.mxu1 %v4849_v57  ;;  %v7555_v57 = vld [vmem:[#allocation8 + $0x194] ss:$24 sps:$4 sm:$0xff]  }
 0xde6   : > { %4883 = vmatmul.mubr.bf16.vlgmr.msra.gmra.mrb[80].mxu1 %v4848_v1  ;;  %5172 = vmatprep.mubr.bf16.mxu0 %v12310_v33  ;;  %v7556_v1 = vld [vmem:[#allocation8 + $0x190] ss:$24 sps:$4 sm:$0xff]  }
 0xde7   : > { %4975 = vmatpush1.bf16.msra.mxu1 %v7508_v30  ;;  %5173 = vmatmul.mubr.bf16.vlgmr.msra.gmra.mrb[88].mxu0 %v12314_v51  ;;  %v7557_v30 = vld [vmem:[#allocation8 + $0x1c4] ss:$24 sps:$4 sm:$0xff]  }
 0xde8   : > { %5182 = vmatpush1.bf16.msra.mxu0 %v11818_v34  ;;  %5213 = vmatprep.mubr.bf16.mxu0 %v12310_v33  ;;  %v7513_v34 = vld [vmem:[#allocation8 + $0x94] ss:$24 sps:$4 sm:$0xff]  }
 0xde9   : > { %4976 = vmatprep.subr.bf16.mxu1 %v7509_v49  ;;  %5183 = vmatprep.subr.bf16.mxu0 %v11823_v26  ;;  %v7515_v26 = vld [vmem:[#allocation8 + $0xc4] ss:$24 sps:$4 sm:$0xff]   ;;  %v7558_v49 = vld [vmem:[#allocation8 + $0x1c0] ss:$24 sps:$4 sm:$0xff]  }
 0xdea   : > { %5006 = vmatprep.mubr.bf16.mxu1 %v12250_v28 }
 0xdeb   : > { %4977 = vmatpush1.bf16.msra.mxu1 %v7510_v43  ;;  %v7559_v43 = vld [vmem:[#allocation8 + $0x1f4] ss:$24 sps:$4 sm:$0xff]  }
 0xdec   : > { %5184 = vmatpush1.bf16.msra.mxu0 %v11828_v3  ;;  %4978 = vmatprep.subr.bf16.mxu1 %v7511_v35  ;;  %v7516_v3 = vld [vmem:[#allocation8 + $0xc0] ss:$24 sps:$4 sm:$0xff]   ;;  %v7560_v35 = vld [vmem:[#allocation8 + $0x1f0] ss:$24 sps:$4 sm:$0xff]  }
 0xded   : > { %5185 = vmatprep.subr.bf16.mxu0 %v11832_v56  ;;  %v7517_v56 = vld [vmem:[#allocation8 + $0xf4] ss:$24 sps:$4 sm:$0xff]  }
 0xdef   : > { %4979 = vmatpush1.bf16.msra.mxu1 %v7512_v63  ;;  %v7561_v63 = vld [vmem:[#allocation8 + $0x224] ss:$24 sps:$4 sm:$0xff]  }
 0xdf0   : > { %5186 = vmatpush1.bf16.msra.mxu0 %v11836_v27  ;;  %4980 = vmatprep.subr.bf16.mxu1 %v7513_v34  ;;  %v7518_v27 = vld [vmem:[#allocation8 + $0xf0] ss:$24 sps:$4 sm:$0xff]   ;;  %v7562_v34 = vld [vmem:[#allocation8 + $0x220] ss:$24 sps:$4 sm:$0xff]  }
 0xdf1   : > { %5187 = vmatprep.subr.bf16.mxu0 %v11840_v61  ;;  %v7519_v61 = vld [vmem:[#allocation8 + $0x124] ss:$24 sps:$4 sm:$0xff]  }
 0xdf3   : > { %4981 = vmatpush1.bf16.msra.mxu1 %v7514_v12  ;;  %v7563_v12 = vld [vmem:[#allocation8 + $0x254] ss:$24 sps:$4 sm:$0xff]  }
 0xdf4   : > { %5188 = vmatpush1.bf16.msra.mxu0 %v11844_v11  ;;  %4982 = vmatprep.subr.bf16.mxu1 %v7515_v26  ;;  %v7520_v11 = vld [vmem:[#allocation8 + $0x120] ss:$24 sps:$4 sm:$0xff]   ;;  %v7564_v26 = vld [vmem:[#allocation8 + $0x250] ss:$24 sps:$4 sm:$0xff]  }
 0xdf5   : > { %5189 = vmatprep.subr.bf16.mxu0 %v11848_v47  ;;  %v7521_v47 = vld [vmem:[#allocation8 + $0x154] ss:$24 sps:$4 sm:$0xff]  }
 0xdf7   : > { %4983 = vmatpush1.bf16.msra.mxu1 %v7516_v3  ;;  %v7565_v3 = vld [vmem:[#allocation8 + $0x284] ss:$24 sps:$4 sm:$0xff]  }
 0xdf8   : > { %5190 = vmatpush1.bf16.msra.mxu0 %v11852_v19  ;;  %4984 = vmatprep.subr.bf16.mxu1 %v7517_v56  ;;  %v7522_v19 = vld [vmem:[#allocation8 + $0x150] ss:$24 sps:$4 sm:$0xff]  }
 0xdf9   : > { %5191 = vmatprep.subr.bf16.mxu0 %v11856_v10  ;;  %v7523_v10 = vld [vmem:[#allocation8 + $0x184] ss:$24 sps:$4 sm:$0xff]   ;;  %v14711_v56 = vld [vmem:[#allocation63_spill] sm:$0xff] }
 0xdfb   : > { %4985 = vmatpush1.bf16.msra.mxu1 %v7518_v27  ;;  %v14712_v27 = vld [vmem:[#allocation65_spill] sm:$0xff] }
 0xdfc   : > { %5192 = vmatpush1.bf16.msra.mxu0 %v11860_v60  ;;  %4986 = vmatprep.subr.bf16.mxu1 %v7519_v61  ;;  %v7524_v60 = vld [vmem:[#allocation8 + $0x180] ss:$24 sps:$4 sm:$0xff]   ;;  %v14713_v61 = vld [vmem:[#allocation67_spill] sm:$0xff] }
 0xdfd   : > { %5193 = vmatprep.subr.bf16.mxu0 %v11864_v24  ;;  %v7525_v24 = vld [vmem:[#allocation8 + $0x1b4] ss:$24 sps:$4 sm:$0xff]  }
 0xdff   : > { %4987 = vmatpush1.bf16.msra.mxu1 %v7520_v11  ;;  %v14714_v11 = vld [vmem:[#allocation69_spill] sm:$0xff] }
 0xe00   : > { %5194 = vmatpush1.bf16.msra.mxu0 %v11868_v55  ;;  %4988 = vmatprep.subr.bf16.mxu1 %v7521_v47  ;;  %v7526_v55 = vld [vmem:[#allocation8 + $0x1b0] ss:$24 sps:$4 sm:$0xff]  }
 0xe01   : > { %5195 = vmatprep.subr.bf16.mxu0 %v11872_v5  ;;  %v7527_v5 = vld [vmem:[#allocation8 + $0x1e4] ss:$24 sps:$4 sm:$0xff]   ;;  %v14715_v47 = vld [vmem:[#allocation71_spill] sm:$0xff] }
 0xe03   : > { %4989 = vmatpush1.bf16.msra.mxu1 %v7522_v19  ;;  %v14720_v19 = vld [vmem:[#allocation81_spill] sm:$0xff] }
 0xe04   : > { %5196 = vmatpush1.bf16.msra.mxu0 %v11876_v36  ;;  %4990 = vmatprep.subr.bf16.mxu1 %v7523_v10  ;;  %v7528_v36 = vld [vmem:[#allocation8 + $0x1e0] ss:$24 sps:$4 sm:$0xff]  }
 0xe05   : > { %5197 = vmatprep.subr.bf16.mxu0 %v11880_v50  ;;  %v7529_v50 = vld [vmem:[#allocation8 + $0x214] ss:$24 sps:$4 sm:$0xff]   ;;  %v14721_v10 = vld [vmem:[#allocation37_spill] sm:$0xff] }
 0xe07   : > { %4991 = vmatpush1.bf16.msra.mxu1 %v7524_v60  ;;  %v14723_v60 = vld [vmem:[#allocation39_spill] sm:$0xff] }
 0xe08   : > { %5198 = vmatpush1.bf16.msra.mxu0 %v11884_v62  ;;  %4992 = vmatprep.subr.bf16.mxu1 %v7525_v24  ;;  %v7530_v62 = vld [vmem:[#allocation8 + $0x210] ss:$24 sps:$4 sm:$0xff]   ;;  %v14725_v24 = vld [vmem:[#allocation41_spill] sm:$0xff] }
 0xe09   : > { %5199 = vmatprep.subr.bf16.mxu0 %v11888_v38  ;;  %v7531_v38 = vld [vmem:[#allocation8 + $0x244] ss:$24 sps:$4 sm:$0xff]  }
 0xe0b   : > { %4993 = vmatpush1.bf16.msra.mxu1 %v7526_v55  ;;  %v14726_v55 = vld [vmem:[#allocation87_spill] sm:$0xff] }
 0xe0c   : > { %5200 = vmatpush1.bf16.msra.mxu0 %v11892_v0  ;;  %4994 = vmatprep.subr.bf16.mxu1 %v7527_v5  ;;  %v7532_v0 = vld [vmem:[#allocation8 + $0x240] ss:$24 sps:$4 sm:$0xff]  }
 0xe0d   : > { %5201 = vmatprep.subr.bf16.mxu0 %v11896_v25  ;;  %v7533_v25 = vld [vmem:[#allocation8 + $0x274] ss:$24 sps:$4 sm:$0xff]   ;;  %v14727_v5 = vld [vmem:[#allocation42_spill] sm:$0xff] }
 0xe0f   : > { %4995 = vmatpush1.bf16.msra.mxu1 %v7528_v36  ;;  %v14728_v36 = vld [vmem:[#allocation89_spill] sm:$0xff] }
 0xe10   : > { %5202 = vmatpush1.bf16.msra.mxu0 %v11900_v2  ;;  %4996 = vmatprep.subr.bf16.mxu1 %v7529_v50  ;;  %v7534_v2 = vld [vmem:[#allocation8 + $0x270] ss:$24 sps:$4 sm:$0xff]  }
 0xe11   : > { %5203 = vmatprep.subr.bf16.mxu0 %v11904_v4  ;;  %v7535_v4 = vld [vmem:[#allocation8 + $0x2a4] ss:$24 sps:$4 sm:$0xff]   ;;  %v14729_v50 = vld [vmem:[#allocation44_spill] sm:$0xff] }
 0xe13   : > { %4997 = vmatpush1.bf16.msra.mxu1 %v7530_v62  ;;  %v14730_v62 = vld [vmem:[#allocation91_spill] sm:$0xff] }
 0xe14   : > { %5204 = vmatpush1.bf16.msra.mxu0 %v11908_v6  ;;  %4998 = vmatprep.subr.bf16.mxu1 %v7531_v38  ;;  %v7536_v6 = vld [vmem:[#allocation8 + $0x2a0] ss:$24 sps:$4 sm:$0xff]  }
 0xe15   : > { %5205 = vmatprep.subr.bf16.mxu0 %v11912_v18  ;;  %v7537_v18 = vld [vmem:[#allocation8 + $0x2d4] ss:$24 sps:$4 sm:$0xff]   ;;  %v14731_v38 = vld [vmem:[#allocation46_spill] sm:$0xff] }
 0xe17   : > { %4999 = vmatpush1.bf16.msra.mxu1 %v7532_v0  ;;  %v14732_v0 = vld [vmem:[#allocation93_spill] sm:$0xff] }
 0xe18   : > { %5206 = vmatpush1.bf16.msra.mxu0 %v11917_v9  ;;  %5000 = vmatprep.subr.bf16.mxu1 %v7533_v25  ;;  %v7538_v9 = vld [vmem:[#allocation8 + $0x2d0] ss:$24 sps:$4 sm:$0xff]  }
 0xe19   : > { %5207 = vmatprep.subr.bf16.mxu0 %v11925_v54  ;;  %v7539_v54 = vld [vmem:[#allocation8 + $0x14] ss:$24 sps:$4 sm:$0xff]  }
 0xe1a   : > { %v14733_v25 = vld [vmem:[#allocation48_spill] sm:$0xff] }
 0xe1b   : > { %5001 = vmatpush1.bf16.msra.mxu1 %v7534_v2  ;;  %v14734_v2 = vld [vmem:[#allocation50_spill] sm:$0xff] }
 0xe1c   : > { %5208 = vmatpush1.bf16.msra.mxu0 %v11929_v53  ;;  %5002 = vmatprep.subr.bf16.mxu1 %v7535_v4  ;;  %v7540_v53 = vld [vmem:[#allocation8 + $0x10] ss:$24 sps:$4 sm:$0xff]  }
 0xe1d   : > { %5209 = vmatprep.subr.bf16.mxu0 %v11933_v58  ;;  %v7541_v58 = vld [vmem:[#allocation8 + $0x44] ss:$24 sps:$4 sm:$0xff]   ;;  %v14735_v4 = vld [vmem:[#allocation52_spill] sm:$0xff] }
 0xe1f   : > { %5003 = vmatpush1.bf16.msra.mxu1 %v7536_v6  ;;  %v14736_v6 = vld [vmem:[#allocation97_spill] sm:$0xff] }
 0xe20   : > { %5210 = vmatpush1.bf16.msra.mxu0 %v11937_v59  ;;  %5004 = vmatprep.subr.bf16.mxu1 %v7537_v18  ;;  %v7542_v59 = vld [vmem:[#allocation8 + $0x40] ss:$24 sps:$4 sm:$0xff]  }
 0xe21   : > { %5211 = vmatprep.subr.bf16.mxu0 %v11942_v45  ;;  %v7544_v45 = vld [vmem:[#allocation8 + $0x70] ss:$24 sps:$4 sm:$0xff]  }
 0xe22   : > { %v14737_v18 = vld [vmem:[#allocation54_spill] sm:$0xff] }
 0xe23   : > { %5005 = vmatpush1.bf16.msra.mxu1 %v7538_v9  ;;  %v14738_v9 = vld [vmem:[#allocation175_spill] sm:$0xff] }
 0xe24   : > { %5212 = vmatpush1.bf16.msra.mxu0 %v11949_v48  ;;  %5056 = vmatprep.subr.bf16.mxu1 %v7539_v54  ;;  %v7546_v48 = vld [vmem:[#allocation8 + $0xa0] ss:$24 sps:$4 sm:$0xff]  }
 0xe25   : > { %v14739_v54 = vld [vmem:[#allocation176_spill] sm:$0xff] }
 0xe26   : > { %5007 = vmatmul.mubr.bf16.vlgmr.msra.gmra.mrb[84].mxu1 %v12248_v52 }
 0xe27   : > { %5057 = vmatpush1.bf16.msra.mxu1 %v7540_v53  ;;  %5088 = vmatprep.mubr.bf16.mxu1 %v12250_v28  ;;  %v7550_v28 = vld [vmem:[#allocation8 + $0x100] ss:$24 sps:$4 sm:$0xff]   ;;  %v14740_v53 = vld [vmem:[#allocation99_spill] sm:$0xff] }
 0xe28   : > { %5214 = vmatmul.mubr.bf16.vlgmr.msra.gmra.mrb[92].mxu0 %v12314_v51  ;;  %5058 = vmatprep.subr.bf16.mxu1 %v7541_v58  ;;  %v14741_v58 = vld [vmem:[#allocation56_spill] sm:$0xff] }
 0xe2b   : > { %5059 = vmatpush1.bf16.msra.mxu1 %v7542_v59  ;;  %v14742_v59 = vld [vmem:[#allocation100_spill] sm:$0xff] }
 0xe2c   : > { %5060 = vmatprep.subr.bf16.mxu1 %v7543_v13  ;;  %v14743_v13 = vld [vmem:[#allocation58_spill] sm:$0xff] }
 0xe2f   : > { %5061 = vmatpush1.bf16.msra.mxu1 %v7544_v45  ;;  %v14744_v45 = vld [vmem:[#allocation101_spill] sm:$0xff] }
 0xe30   : > { %5062 = vmatprep.subr.bf16.mxu1 %v7545_v15  ;;  %v12394_v15 = vpop.xlane.xlu0 %2804 }
 0xe33   : > { %5063 = vmatpush1.bf16.msra.mxu1 %v7546_v48  ;;  %v14745_v48 = vld [vmem:[#allocation60_spill] sm:$0xff] }
 0xe34   : > { %5064 = vmatprep.subr.bf16.mxu1 %v7547_v17  ;;  %v14746_v17 = vld [vmem:[#allocation102_spill] sm:$0xff] }
 0xe37   : > { %5065 = vmatpush1.bf16.msra.mxu1 %v7548_v7  ;;  %v14747_v7 = vld [vmem:[#allocation51_spill] sm:$0xff] }
 0xe38   : > { %5066 = vmatprep.subr.bf16.mxu1 %v7549_v32  ;;  %v2806_v32 = vsub.f32 %v14747_v7, %v12394_v15 }
 0xe3b   : > { %5067 = vmatpush1.bf16.msra.mxu1 %v7550_v28  ;;  %v12401_v28 = vpop.xlane.xlu1 %2386 }
 0xe3c   : > { %5068 = vmatprep.subr.bf16.mxu1 %v7551_v46  ;;  %v14748_v46 = vld [vmem:[#allocation53_spill] sm:$0xff] }
 0xe3f   : > { %5069 = vmatpush1.bf16.msra.mxu1 %v7552_v37  ;;  %v2807_v37 = vsub.f32 %v14748_v46, %v12394_v15 }
 0xe40   : > { %5070 = vmatprep.subr.bf16.mxu1 %v7553_v44  ;;  %v12405_v44 = vpop.xlane.xlu0 %3222 }
 0xe43   : > { %5071 = vmatpush1.bf16.msra.mxu1 %v7554_v23  ;;  %v14749_v23 = vld [vmem:[#allocation62_spill] sm:$0xff] }
 0xe44   : > { %5072 = vmatprep.subr.bf16.mxu1 %v7555_v57  ;;  %v14750_v57 = vld [vmem:[#allocation103_spill] sm:$0xff] }
 0xe47   : > { %5073 = vmatpush1.bf16.msra.mxu1 %v7556_v1 }
 0xe48   : > { %5074 = vmatprep.subr.bf16.mxu1 %v7557_v30  ;;  %v2808_v30 = vmul.f32 1.442695, %v2806_v32 }
 0xe4a   : > { %6626 = vpow2.f32 %v2808_v30  ;;  %v14768_v30 = vld [vmem:[#allocation78_spill] sm:$0xff] }
 0xe4b   : > { %5075 = vmatpush1.bf16.msra.mxu1 %v7558_v49  ;;  %v14752_v49 = vld [vmem:[#allocation31_spill] sm:$0xff] }
 0xe4c   : > { %5076 = vmatprep.subr.bf16.mxu1 %v7559_v43  ;;  %v2389_v43 = vsub.f32 %v14752_v49, %v12401_v28 }
 0xe4f   : > { %5077 = vmatpush1.bf16.msra.mxu1 %v7560_v35  ;;  %v2810_v35 = vmul.f32 1.442695, %v2807_v37 }
 0xe50   : > { %5078 = vmatprep.subr.bf16.mxu1 %v7561_v63  ;;  %v12413_v63 = vpop.xlane.xlu0 %4058 }
 0xe51   : > { %6628 = vpow2.f32 %v2810_v35 }
 0xe53   : > { %5079 = vmatpush1.bf16.msra.mxu1 %v7562_v34  ;;  %v14753_v34 = vld [vmem:[#allocation64_spill] sm:$0xff] }
 0xe54   : > { %5080 = vmatprep.subr.bf16.mxu1 %v7563_v12  ;;  %v14754_v12 = vld [vmem:[#allocation105_spill] sm:$0xff] }
 0xe57   : > { %5081 = vmatpush1.bf16.msra.mxu1 %v7564_v26 }
 0xe58   : > { %5082 = vmatprep.subr.bf16.mxu1 %v7565_v3  ;;  %v14755_v3 = vld [vmem:[#allocation151_spill] sm:$0xff] }
 0xe5b   : > { %5083 = vmatpush1.bf16.msra.mxu1 %v11983_v21  ;;  %v14716_v21 = vld [vmem:[#allocation77_spill] sm:$0xff] }
 0xe5c   : > { %5084 = vmatprep.subr.bf16.mxu1 %v11986_v29  ;;  %v14717_v29 = vld [vmem:[#allocation33_spill] sm:$0xff] }
 0xe5f   : > { %5085 = vmatpush1.bf16.msra.mxu1 %v11989_v42  ;;  %v14718_v42 = vld [vmem:[#allocation79_spill] sm:$0xff] }
 0xe60   : > { %5086 = vmatprep.subr.bf16.mxu1 %v11992_v41  ;;  %v14719_v41 = vld [vmem:[#allocation35_spill] sm:$0xff] }
 0xe63   : > { %5087 = vmatpush1.bf16.msra.mxu1 %v14711_v56  ;;  %v4060_v56 = vsub.f32 %v14755_v3, %v12413_v63 }
 0xe64   : > { %5099 = vmatprep.subr.bf16.mxu1 %v14712_v27  ;;  %v2392_v27 = vmul.f32 1.442695, %v2389_v43 }
 0xe66   : > { %5089 = vmatmul.mubr.bf16.vlgmr.msra.gmra.mrb[88].mxu1 %v12248_v52  ;;  %v14722_v52 = vld [vmem:[#allocation83_spill] sm:$0xff] }
 0xe67   : > { %5100 = vmatpush1.bf16.msra.mxu1 %v14713_v61  ;;  %5131 = vmatprep.mubr.bf16.mxu1 %v12310_v33  ;;  %v14724_v33 = vld [vmem:[#allocation85_spill] sm:$0xff]  ;;  %v14756_v61 = vld [vmem:[#allocation152_spill] sm:$0xff] }
 0xe68   : > { %5101 = vmatprep.subr.bf16.mxu1 %v14714_v11  ;;  %v4061_v11 = vsub.f32 %v14756_v61, %v12413_v63 }
 0xe6b   : > { %5102 = vmatpush1.bf16.msra.mxu1 %v14715_v47  ;;  %v14757_v47 = vld [vmem:[#allocation68_spill] sm:$0xff] }
 0xe6c   : > { %5103 = vmatprep.subr.bf16.mxu1 %v14716_v21  ;;  %v14758_v21 = vld [vmem:[#allocation106_spill] sm:$0xff] }
 0xe6f   : > { %5104 = vmatpush1.bf16.msra.mxu1 %v14717_v29  ;;  %v4062_v29 = vmul.f32 1.442695, %v4060_v56 }
 0xe70   : > { %5105 = vmatprep.subr.bf16.mxu1 %v14718_v42  ;;  %v4064_v42 = vmul.f32 1.442695, %v4061_v11  ;;  %v14772_v11 = vld [vmem:[#allocation82_spill] sm:$0xff] }
 0xe73   : > { %5106 = vmatpush1.bf16.msra.mxu1 %v14719_v41  ;;  %v14759_v41 = vld [vmem:[#allocation70_spill] sm:$0xff] }
 0xe74   : > { %5107 = vmatprep.subr.bf16.mxu1 %v14720_v19  ;;  %v14760_v19 = vld [vmem:[#allocation107_spill] sm:$0xff] }
 0xe77   : > { %5108 = vmatpush1.bf16.msra.mxu1 %v14721_v10 }
 0xe78   : > { %5109 = vmatprep.subr.bf16.mxu1 %v14722_v52  ;;  %v14761_v52 = vld [vmem:[#allocation73_spill] sm:$0xff] }
 0xe7b   : > { %5110 = vmatpush1.bf16.msra.mxu1 %v14723_v60 }
 0xe7c   : > { %5111 = vmatprep.subr.bf16.mxu1 %v14724_v33 }
 0xe7f   : > { %5112 = vmatpush1.bf16.msra.mxu1 %v14725_v24 }
 0xe80   : > { %5113 = vmatprep.subr.bf16.mxu1 %v14726_v55  ;;  %v6627_v55 = vpop.eup %6626 }
 0xe83   : > { %5114 = vmatpush1.bf16.msra.mxu1 %v14727_v5  ;;  %v14762_v5 = vld [vmem:[#allocation29_spill] sm:$0xff] }
 0xe84   : > { %5115 = vmatprep.subr.bf16.mxu1 %v14728_v36 }
 0xe87   : > { %5116 = vmatpush1.bf16.msra.mxu1 %v14729_v50 }
 0xe88   : > { %5117 = vmatprep.subr.bf16.mxu1 %v14730_v62 }
 0xe8b   : > { %5118 = vmatpush1.bf16.msra.mxu1 %v14731_v38  ;;  %v14763_v38 = vld [vmem:[#allocation27_spill] sm:$0xff] }
 0xe8c   : > { %5119 = vmatprep.subr.bf16.mxu1 %v14732_v0  ;;  %v6629_v0 = vpop.eup %6628 }
 0xe8f   : > { %5120 = vmatpush1.bf16.msra.mxu1 %v14733_v25 }
 0xe90   : > { %5121 = vmatprep.subr.bf16.mxu1 %v14734_v2 }
 0xe93   : > { %5122 = vmatpush1.bf16.msra.mxu1 %v14735_v4 }
 0xe94   : > { %5123 = vmatprep.subr.bf16.mxu1 %v14736_v6  ;;  %v14764_v6 = vld [vmem:[#allocation74_spill] sm:$0xff] }
 0xe97   : > { %5124 = vmatpush1.bf16.msra.mxu1 %v14737_v18 }
 0xe98   : > { %5125 = vmatprep.subr.bf16.mxu1 %v14738_v9 }
 0xe9b   : > { %5126 = vmatpush1.bf16.msra.mxu1 %v14739_v54 }
 0xe9c   : > { %5127 = vmatprep.subr.bf16.mxu1 %v14740_v53 }
 0xe9f   : > { %5128 = vmatpush1.bf16.msra.mxu1 %v14741_v58  ;;  %v2812_v58 = vsel %vm2382_vm14, %v6627_v55, 0.0  ;;  %v14781_v55 = vld [vmem:[#allocation129_spill] sm:$0xff] }
 0xea0   : > { %5129 = vmatprep.subr.bf16.mxu1 %v14742_v59  ;;  %v2813_v59 = vsel %vm2382_vm14, %v6629_v0, 0.0 }
 0xea3   : > { %5130 = vmatpush1.bf16.msra.mxu1 %v14743_v13  ;;  %v14765_v13 = vld [vmem:[#allocation109_spill] sm:$0xff] }
 0xea4   : > { %5268 = vmatprep.subr.bf16.mxu1 %v14744_v45 }
 0xea6   : > { %5132 = vmatmul.mubr.bf16.vlgmr.msra.gmra.mrb[84].mxu1 %v12314_v51  ;;  %v14751_v51 = vld [vmem:[#allocation75_spill] sm:$0xff] }
 0xea7   : > { %5269 = vmatpush1.bf16.msra.mxu1 %v14745_v48  ;;  %v2388_v1 = vsub.f32 %v14751_v51, %v12401_v28  ;;  %v14766_v48 = vld [vmem:[#allocation76_spill] sm:$0xff] }
 0xea8   : > { %5270 = vmatprep.subr.bf16.mxu1 %v14746_v17  ;;  %v2814_v17 = vadd.f32 %v2813_v59, %v2812_v58 }
 0xea9   : > { %v2390_v26 = vmul.f32 1.442695, %v2388_v1 }
 0xeab   : > { %5271 = vmatpush1.bf16.msra.mxu1 %v14749_v23  ;;  %6630 = vpow2.f32 %v2390_v26  ;;  %v14770_v26 = vld [vmem:[#allocation80_spill] sm:$0xff] }
 0xeac   : > { %5272 = vmatprep.subr.bf16.mxu1 %v14750_v57  ;;  %6632 = vpow2.f32 %v2392_v27  ;;  %v14767_v57 = vld [vmem:[#allocation110_spill] sm:$0xff]  ;;  %v14771_v27 = vld [vmem:[#allocation112_spill] sm:$0xff] }
 0xead   : > { %6634 = vpow2.f32 %v4062_v29  ;;  %v14775_v29 = vld [vmem:[#allocation115_spill] sm:$0xff] }
 0xeae   : > { %6636 = vpow2.f32 %v4064_v42  ;;  %v14776_v42 = vld [vmem:[#allocation90_spill] sm:$0xff] }
 0xeaf   : > { %5273 = vmatpush1.bf16.msra.mxu1 %v14753_v34 }
 0xeb0   : > { %5274 = vmatprep.subr.bf16.mxu1 %v14754_v12  ;;  %v14769_v12 = vld [vmem:[#allocation111_spill] sm:$0xff] }
 0xeb3   : > { %5275 = vmatpush1.bf16.msra.mxu1 %v14757_v47  ;;  %v14773_v47 = vld [vmem:[#allocation113_spill] sm:$0xff] }
 0xeb4   : > { %5276 = vmatprep.subr.bf16.mxu1 %v14758_v21  ;;  %v14774_v21 = vld [vmem:[#allocation86_spill] sm:$0xff] }
 0xeb5   : > { %v6631_v53 = vpop.eup %6630 }
 0xeb6   : > { %v6633_v45 = vpop.eup %6632  ;;  %v2394_v37 = vsel %vm2382_vm14, %v6631_v53, 0.0 }
 0xeb7   : > { %5277 = vmatpush1.bf16.msra.mxu1 %v14759_v41  ;;  %v6635_v32 = vpop.eup %6634  ;;  %v2395_v23 = vsel %vm2382_vm14, %v6633_v45, 0.0  ;;  %v14777_v41 = vld [vmem:[#allocation117_spill] sm:$0xff] }
 0xeb8   : > { %5278 = vmatprep.subr.bf16.mxu1 %v14760_v19  ;;  %v6637_v1 = vpop.eup %6636  ;;  %v2396_v43 = vadd.f32 %v2395_v23, %v2394_v37  ;;  %v4066_v35 = vsel %vm2382_vm14, %v6635_v32, 0.0  ;;  %v14778_v19 = vld [vmem:[#allocation94_spill] sm:$0xff] }
 0xeb9   : > { %v4884_v10 = vpop.f32.mrb[80].mxu1  ;;  %v4067_v34 = vsel %vm2382_vm14, %v6637_v1, 0.0  ;;  %v14784_v1 = vld [vmem:[#allocation171_spill] sm:$0xff] }
 0xeba   : > { %v12426_v60 = vadd.f32 %v4884_v10, %v14761_v52  ;;  %v4886_v33 = vpop.f32.mrb[81].mxu1  ;;  %v12428_v24 = vpop.f32.mrb[88].mxu0  ;;  %v4068_v56 = vadd.f32 %v4067_v34, %v4066_v35  ;;  %v14779_v10 = vld [vmem:[#allocation119_spill] sm:$0xff] }
 0xebb   : > { %v12431_v36 = vadd.f32 %v4886_v33, %v14762_v5  ;;  %v4888_v50 = vpop.f32.mrb[82].mxu1  ;;  %v12433_v62 = vpop.f32.mrb[89].mxu0  ;;  %5279 = vmatpush1.bf16.msra.mxu1 %v14763_v38  ;;  %v14780_v33 = vld [vmem:[#allocation127_spill] sm:$0xff]  ;;  %v14783_v38 = vld [vmem:[#allocation125_spill] sm:$0xff] }
 0xebc   : > { %v4889_v25 = vpop.f32.mrb[83].mxu1  ;;  %v5178_v2 = vpop.f32.mrb[90].mxu0  ;;  %v4891_v4 = vsel %vm2382_vm14, %v12426_v60, -inf  ;;  %5280 = vmatprep.subr.bf16.mxu1 %v14764_v6  ;;  %v14782_v50 = vld [vmem:[#allocation131_spill] sm:$0xff] }
 0xebd   : > { %v5179_v18 = vpop.f32.mrb[91].mxu0  ;;  %v4892_v9 = vsel %vm2382_vm14, %v12431_v36, -inf }
 0xebe   : > { %v4893_v54 = vmax.f32 %v4891_v4, %v4892_v9 }
 0xebf   : > { %5281 = vmatpush1.bf16.msra.mxu1 %v14765_v13 }
 0xec0   : > { %4894 = vmax.xlane.f32.xlu0 %v4893_v54  ;;  %5282 = vmatprep.subr.bf16.mxu1 %v14766_v48 }
 0xec3   : > { %5283 = vmatpush1.bf16.msra.mxu1 %v14767_v57 }
 0xec4   : > { %2815 = vadd.xlane.f32.xlu0 %v2814_v17  ;;  %5284 = vmatprep.subr.bf16.mxu1 %v14768_v30 }
 0xec7   : > { %5285 = vmatpush1.bf16.msra.mxu1 %v14769_v12 }
 0xec8   : > { %2397 = vadd.xlane.f32.xlu0 %v2396_v43  ;;  %5286 = vmatprep.subr.bf16.mxu1 %v14770_v26 }
 0xecb   : > { %5287 = vmatpush1.bf16.msra.mxu1 %v14771_v27 }
 0xecc   : > { %4069 = vadd.xlane.f32.xlu0 %v4068_v56  ;;  %5288 = vmatprep.subr.bf16.mxu1 %v14772_v11  ;;  %v5942_v56 = vadd.f32 %v12428_v24, %v14706_v16  ;;  %v5943_v11 = vadd.f32 %v12433_v62, %v14707_v40  ;;  %v14785_v62 = vld [vmem:[#allocation174_spill] sm:$0xff] }
 0xecf   : > { %5289 = vmatpush1.bf16.msra.mxu1 %v14773_v47  ;;  %v5901_v47 = vmul.f32 -1.442695, %v5942_v56 }
 0xed0   : > { %5290 = vmatprep.subr.bf16.mxu1 %v14774_v21  ;;  %v5902_v21 = vmul.f32 -1.442695, %v5943_v11 }
 0xed3   : > { %5291 = vmatpush1.bf16.msra.mxu1 %v14775_v29 }
 0xed4   : > { %5292 = vmatprep.subr.bf16.mxu1 %v14776_v42 }
 0xed7   : > { %5293 = vmatpush1.bf16.msra.mxu1 %v14777_v41 }
 0xed8   : > { %5294 = vmatprep.subr.bf16.mxu1 %v14778_v19 }
 0xedb   : > { %5295 = vmatpush1.bf16.msra.mxu1 %v14779_v10 }
 0xedc   : > { %5296 = vmatprep.subr.bf16.mxu1 %v14780_v33 }
 0xedf   : > { %5297 = vmatpush1.bf16.msra.mxu1 %v14781_v55 }
 0xee0   : > { %5298 = vmatprep.subr.bf16.mxu1 %v14782_v50 }
 0xee3   : > { %5299 = vmatpush1.bf16.msra.mxu1 %v14783_v38 }
 0xefb   : > { %v5215_v0 = vpop.f32.mrb[92].mxu0 }
 0xefc   : > { %v5217_v25 = vpop.f32.mrb[93].mxu0  ;;  %v5250_v33 = vadd.f32 %v5215_v0, %v8786_v22 }
 0xefd   : > { %v5219_v2 = vpop.f32.mrb[94].mxu0  ;;  %v5251_v55 = vadd.f32 %v5217_v25, %v14785_v62  ;;  %v14794_v62 = vld [vmem:[#allocation72_spill] sm:$0xff] }
 0xefe   : > { %v5220_v4 = vpop.f32.mrb[95].mxu0 }
 0xf39   : > { %v5090_v6 = vpop.f32.mrb[88].mxu1 }
 0xf3a   : > { %v5092_v18 = vpop.f32.mrb[89].mxu1  ;;  %v5091_v38 = vadd.f32 %v5090_v6, %v13945_v31 }
 0xf3b   : > { %v5094_v9 = vpop.f32.mrb[90].mxu1  ;;  %v5093_v4 = vadd.f32 %v5092_v18, %v13946_v14 }
 0xf3c   : > { %v5095_v54 = vpop.f32.mrb[91].mxu1 }
 0xf4d   : > { %v12466_v53 = vpop.xlane.xlu0 %4894 }
 0xf4e   : > { %v4896_v58 = vsub.f32 %v12426_v60, %v12466_v53  ;;  %v4897_v59 = vsub.f32 %v12431_v36, %v12466_v53 }
 0xf50   : > { %v4898_v13 = vmul.f32 1.442695, %v4896_v58  ;;  %v4900_v45 = vmul.f32 1.442695, %v4897_v59  ;;  %v7806_v59 = vmov 1966171168  }
 0xf51   : > { %v5404_v25 = vunpack.c.l.s4 %v7806_v59 }
 0xf52   : > { %6638 = vpow2.f32 %v4898_v13  ;;  %v5332_v13 = vstv %s5331_s15 }
 0xf53   : > { %6640 = vpow2.f32 %v4900_v45  ;;  %v5405_v18 = vunpack.c.0.s8 %v5404_v25  ;;  %vm5333_vm10 = vcmp.eq.s32.totalorder %v5332_v13, 1 }
 0xf5c   : > { %v6639_v48 = vpop.eup %6638 }
 0xf5d   : > { %v6641_v17 = vpop.eup %6640  ;;  %v4902_v32 = vsel %vm2382_vm14, %v6639_v48, 0.0 }
 0xf5e   : > { %v4903_v37 = vsel %vm2382_vm14, %v6641_v17, 0.0 }
 0xf5f   : > { %v4904_v23 = vadd.f32 %v4903_v37, %v4902_v32 }
 0xf61   : > { %4905 = vadd.xlane.f32.xlu0 %v4904_v23 }
 0xf79   : > { %v5133_v57 = vpop.f32.mrb[84].mxu1 }
 0xf7a   : > { %v5940_v30 = vadd.f32 %v5133_v57, %v14784_v1  ;;  %v5135_v43 = vpop.f32.mrb[85].mxu1 }
 0xf7b   : > { %v5941_v35 = vadd.f32 %v5135_v43, %v8772_v39  ;;  %v5137_v34 = vpop.f32.mrb[86].mxu1 }
 0xf7c   : > { %v5899_v12 = vmul.f32 -1.442695, %v5940_v30  ;;  %v5138_v26 = vpop.f32.mrb[87].mxu1  ;;  %v14786_v30 = vld [vmem:[#allocation28_spill] sm:$0xff] }
 0xf7d   : > { %v5900_v27 = vmul.f32 -1.442695, %v5941_v35  ;;  %v5408_v43 = vsub.s32 %v5405_v18, %v14786_v30 }
 0xf7e   : > { %6642 = vpow2.f32 %v5899_v12 }
 0xf7f   : > { %6644 = vpow2.f32 %v5900_v27  ;;  %v14787_v27 = vlaneseq }
 0xf80   : > { %6646 = vpow2.f32 %v5901_v47 }
 0xf81   : > { %6648 = vpow2.f32 %v5902_v21  ;;  %vm12492_vm11 = vcmp.lt.s32.totalorder %v14787_v27, 256 }
 0xf88   : > { %v6643_v29 = vpop.eup %6642 }
 0xf89   : > { %v6645_v42 = vpop.eup %6644  ;;  %v5230_v41 = vadd.f32 1.0, %v6643_v29 }
 0xf8a   : > { %v5231_v39 = vadd.f32 1.0, %v6645_v42  ;;  %v6647_v19 = vpop.eup %6646  ;;  %v12505_v42 = vpop.xlane.xlu1 %3640 }
 0xf8b   : > { %6650 = vrcp.f32 %v5230_v41  ;;  %v6649_v10 = vpop.eup %6648  ;;  %v5244_v16 = vadd.f32 1.0, %v6647_v19 }
 0xf8c   : > { %6652 = vrcp.f32 %v5231_v39  ;;  %v5245_v24 = vadd.f32 1.0, %v6649_v10  ;;  %v14792_v39 = vld [vmem:[#allocation104_spill] sm:$0xff] }
 0xf8d   : > { %6654 = vrcp.f32 %v5244_v16  ;;  %v3642_v19 = vsub.f32 %v14792_v39, %v12505_v42  ;;  %v14793_v16 = vld [vmem:[#allocation66_spill] sm:$0xff] }
 0xf8e   : > { %6656 = vrcp.f32 %v5245_v24  ;;  %v3643_v24 = vsub.f32 %v14793_v16, %v12505_v42 }
 0xf95   : > { %v6651_v40 = vpop.eup %6650 }
 0xf96   : > { %v6653_v50 = vpop.eup %6652  ;;  %v5252_v2 = vmul.f32 %v6651_v40, %v5250_v33  ;;  %v12511_v33 = vpop.xlane.xlu1 %4476  ;;  %v3644_v40 = vmul.f32 1.442695, %v3642_v19 }
 0xf97   : > { %v5253_v9 = vmul.f32 %v6653_v50, %v5251_v55  ;;  %v6655_v22 = vpop.eup %6654  ;;  %v4478_v55 = vsub.f32 %v14794_v62, %v12511_v33  ;;  %v3646_v50 = vmul.f32 1.442695, %v3643_v24  ;;  %v2816_v24 = vpop.xlane.xlu0 %2815 }
 0xf98   : > { %v5254_v54 = vadd.f32 %v5252_v2, %v5091_v38  ;;  %v6657_v0 = vpop.eup %6656  ;;  %v5258_v45 = vsub.f32 1.0, %v6655_v22  ;;  %v5262_v14 = vmul.f32 %v6655_v22, %v12303_v20  ;;  %v14795_v38 = vld [vmem:[#allocation108_spill] sm:$0xff] }
 0xf99   : > { %v5255_v58 = vadd.f32 %v5253_v9, %v5093_v4  ;;  %v5259_v31 = vsub.f32 1.0, %v6657_v0  ;;  %v5263_v37 = vmul.f32 %v6657_v0, %v12306_v8  ;;  %v4479_v2 = vsub.f32 %v14795_v38, %v12511_v33 }
 0xf9a   : > { %6658 = vtanh.f32 %v5254_v54  ;;  %v4480_v4 = vmul.f32 1.442695, %v4478_v55 }
 0xf9b   : > { %6660 = vtanh.f32 %v5255_v58  ;;  %v4482_v9 = vmul.f32 1.442695, %v4479_v2  ;;  %v2398_v55 = vpop.xlane.xlu0 %2397 }
 0xf9f   : > { %v4070_v2 = vpop.xlane.xlu0 %4069 }
 0xfa4   : > { %v6659_v48 = vpop.eup %6658 }
 0xfa5   : > { %v6661_v6 = vpop.eup %6660  ;;  %v5260_v17 = vmul.f32 %v6659_v48, %v5258_v45 }
 0xfa6   : > { %v5261_v32 = vmul.f32 %v6661_v6, %v5259_v31 }
 0xfa7   : > { %v5264_v23 = vadd.f32 %v5262_v14, %v5260_v17 }
 0xfa8   : > { %v5265_v57 = vadd.f32 %v5263_v37, %v5261_v32 }
 0xfa9   : > { %v5334_v1 = vsel %vm5333_vm10, %v5264_v23, %v12303_v20  ;;  %v5266_v12 = vpack.c.bf16 %v5264_v23, %v5264_v23  ;;  %v14790_v20 = vld [vmem:[#allocation96_spill] sm:$0xff] }
 0xfaa   : > { %v5267_v35 = vpack.c.bf16 %v5265_v57, %v5265_v57  ;;  %v5335_v34 = vsel %vm5333_vm10, %v5265_v57, %v12306_v8  ;;  %v3224_v21 = vsub.f32 %v14790_v20, %v12405_v44  ;;  %v14791_v8 = vld [vmem:[#allocation124_spill] sm:$0xff] }
 0xfab   : > { %v5402_v26 = vcombine.low %v5334_v1, %v5335_v34  ;;  %v3225_v29 = vsub.f32 %v14791_v8, %v12405_v44 }
 0xfac   : > { %5300 = vmatprep.mubr.bf16.mxu1 %v5267_v35  ;;  %v3226_v41 = vmul.f32 1.442695, %v3224_v21 }
 0xfad   : > { %5301 = vmatmul.mubr.bf16.vlgmr.msra.gmra.mrb[92].mxu1 %v5266_v12  ;;  %v5409_v56 = vrot.slane %v5402_v26, %v5408_v43  ;;  %v3228_v10 = vmul.f32 1.442695, %v3225_v29 }
 0xfae   : > { %6662 = vpow2.f32 %v3226_v41 }
 0xfaf   : > { %v12496_v47 = vrot.slane %v5409_v56, %v5408_v43  ;;  %6664 = vpow2.f32 %v3228_v10 }
 0xfb0   : > { %6666 = vpow2.f32 %v3644_v40 }
 0xfb1   : > { %5422 = vst.msk [vmem:[#allocation2] sm:$0x3] %vm12492_vm11, %v12496_v47  ;;  %6668 = vpow2.f32 %v3646_v50  ;;  %5427 = vst.msk [vmem:[#allocation14] sm:$0x3] (!%p5903_p8), %vm12492_vm11, %v12496_v47 }
 0xfb2   : > { %6670 = vpow2.f32 %v4480_v4 }
 0xfb3   : > { %6672 = vpow2.f32 %v4482_v9 }
 0xfb8   : > { %v6663_v0 = vpop.eup %6662 }
 0xfb9   : > { %v6665_v13 = vpop.eup %6664  ;;  %v3230_v14 = vsel %vm2382_vm14, %v6663_v0, 0.0 }
 0xfba   : > { %v6667_v17 = vpop.eup %6666 }
 0xfbb   : > { %v6669_v18 = vpop.eup %6668  ;;  %v3648_v37 = vsel %vm2382_vm14, %v6667_v17, 0.0 }
 0xfbc   : > { %v3649_v23 = vsel %vm2382_vm14, %v6669_v18, 0.0 }
 0xfbd   : > { %v3650_v1 = vadd.f32 %v3649_v23, %v3648_v37 }
 0xfee   : > { %v4906_v9 = vpop.xlane.xlu0 %4905 }
0x1080   : > { %v5302_v54 = vpop.f32.mrb[92].mxu1 }
0x1081   : > { %v12518_v58 = vadd.f32 %v5302_v54, %v14761_v52  ;;  %v5304_v22 = vpop.f32.mrb[93].mxu1  ;;  %v3231_v52 = vsel %vm2382_vm14, %v6665_v13, 0.0 }
0x1082   : > { %v12521_v59 = vadd.f32 %v5304_v22, %v14762_v5  ;;  %v5306_v25 = vpop.f32.mrb[94].mxu1  ;;  %v3232_v32 = vadd.f32 %v3231_v52, %v3230_v14  ;;  %v6671_v5 = vpop.eup %6670 }
0x1083   : > { %v5307_v45 = vpop.f32.mrb[95].mxu1  ;;  %v5309_v48 = vsel %vm2382_vm14, %v12518_v58, -inf  ;;  %v6673_v57 = vpop.eup %6672  ;;  %v4484_v30 = vsel %vm2382_vm14, %v6671_v5, 0.0 }
0x1084   : > { %v5310_v31 = vsel %vm2382_vm14, %v12521_v59, -inf  ;;  %v4485_v43 = vsel %vm2382_vm14, %v6673_v57, 0.0 }
0x1085   : > { %v5311_v6 = vmax.f32 %v5309_v48, %v5310_v31  ;;  %v4486_v35 = vadd.f32 %v4485_v43, %v4484_v30 }
0x1087   : > { %5312 = vmax.xlane.f32.xlu1 %v5311_v6 }
0x108b   : > { %3233 = vadd.xlane.f32.xlu1 %v3232_v32 }
0x108f   : > { %3651 = vadd.xlane.f32.xlu1 %v3650_v1 }
0x1093   : > { %4487 = vadd.xlane.f32.xlu1 %v4486_v35 }
0x1114   : > { %v12533_v34 = vpop.xlane.xlu1 %5312 }
0x1115   : > { %v5314_v12 = vsub.f32 %v12518_v58, %v12533_v34  ;;  %v5315_v26 = vsub.f32 %v12521_v59, %v12533_v34 }
0x1117   : > { %v5316_v56 = vmul.f32 1.442695, %v5314_v12  ;;  %v5318_v27 = vmul.f32 1.442695, %v5315_v26 }
0x1118   : > { %v3234_v40 = vpop.xlane.xlu1 %3233 }
0x1119   : > { %6674 = vpow2.f32 %v5316_v56 }
0x111a   : > { %6676 = vpow2.f32 %v5318_v27 }
0x111b   : > { %6678 = vlog2.f32 %v2816_v24 }
0x111c   : > { %v3652_v50 = vpop.xlane.xlu1 %3651  ;;  %6680 = vlog2.f32 %v3234_v40 }
0x111d   : > { %6682 = vlog2.f32 %v3652_v50 }
0x111e   : > { %6684 = vlog2.f32 %v2398_v55 }
0x111f   : > { %6686 = vlog2.f32 %v4070_v2 }
0x1120   : > { %v4488_v4 = vpop.xlane.xlu1 %4487 }
0x1121   : > { %6688 = vlog2.f32 %v4488_v4 }
0x1122   : > { %6690 = vlog2.f32 %v4906_v9 }
0x1123   : > { %v6675_v21 = vpop.eup %6674 }
0x1124   : > { %v6677_v29 = vpop.eup %6676  ;;  %v5320_v41 = vsel %vm2382_vm14, %v6675_v21, 0.0 }
0x1125   : > { %v5321_v19 = vsel %vm2382_vm14, %v6677_v29, 0.0  ;;  %v6679_v54 = vpop.eup %6678 }
0x1126   : > { %v5322_v10 = vadd.f32 %v5321_v19, %v5320_v41  ;;  %v6681_v22 = vpop.eup %6680  ;;  %v2818_v13 = vmul.f32 0.6931472, %v6679_v54 }
0x1127   : > { %v6683_v0 = vpop.eup %6682  ;;  %v3236_v45 = vmul.f32 0.6931472, %v6681_v22 }
0x1128   : > { %5323 = vadd.xlane.f32.xlu1 %v5322_v10  ;;  %v6685_v25 = vpop.eup %6684  ;;  %v3654_v48 = vmul.f32 0.6931472, %v6683_v0  ;;  %v2819_v14 = vadd.f32 %v2818_v13, %v12394_v15 }
0x1129   : > { %v6687_v31 = vpop.eup %6686  ;;  %v2400_v17 = vmul.f32 0.6931472, %v6685_v25  ;;  %v3237_v52 = vadd.f32 %v3236_v45, %v12405_v44 }
0x112a   : > { %v4072_v18 = vmul.f32 0.6931472, %v6687_v31  ;;  %v3655_v32 = vadd.f32 %v3654_v48, %v12505_v42  ;;  %v2820_v1 = vsub.f32 %v14747_v7, %v2819_v14  ;;  %v2821_v30 = vsub.f32 %v14748_v46, %v2819_v14 }
0x112b   : > { %v6689_v6 = vpop.eup %6688  ;;  %v2401_v23 = vadd.f32 %v2400_v17, %v12401_v28  ;;  %v3238_v43 = vsub.f32 %v14790_v20, %v3237_v52  ;;  %v3239_v15 = vsub.f32 %v14791_v8, %v3237_v52 }
0x112c   : > { %v4490_v5 = vmul.f32 0.6931472, %v6689_v6  ;;  %v6691_v57 = vpop.eup %6690  ;;  %v4073_v35 = vadd.f32 %v4072_v18, %v12413_v63  ;;  %v3656_v44 = vsub.f32 %v14792_v39, %v3655_v32  ;;  %v3657_v42 = vsub.f32 %v14793_v16, %v3655_v32 }
0x112d   : > { %v2402_v28 = vsub.f32 %v14751_v51, %v2401_v23  ;;  %v4908_v26 = vmul.f32 0.6931472, %v6691_v57  ;;  %v5338_v56 = vrot.slane %v2820_v1, 7  ;;  %v5339_v27 = vrot.slane %v2821_v30, 7 }
0x112e   : > { %v4491_v12 = vadd.f32 %v4490_v5, %v12511_v33  ;;  %v2403_v7 = vsub.f32 %v14752_v49, %v2401_v23  ;;  %v5344_v46 = vrot.slane %v3238_v43, 6  ;;  %v4074_v20 = vsub.f32 %v14755_v3, %v4073_v35 }
0x112f   : > { %v5345_v63 = vrot.slane %v3239_v15, 6  ;;  %v5350_v21 = vrot.slane %v3656_v44, 5  ;;  %v5351_v8 = vrot.slane %v3657_v42, 5  ;;  %v5378_v33 = vsel %vm2382_vm14, %v2402_v28, %v5338_v56 }
0x1130   : > { %v4492_v39 = vsub.f32 %v14794_v62, %v4491_v12  ;;  %v4493_v16 = vsub.f32 %v14795_v38, %v4491_v12  ;;  %v4075_v51 = vsub.f32 %v14756_v61, %v4073_v35  ;;  %v4909_v29 = vadd.f32 %v4908_v26, %v12466_v53 }
0x1131   : > { %v5379_v49 = vsel %vm2382_vm14, %v2403_v7, %v5339_v27  ;;  %v5381_v41 = vsel %vm5380_vm12, %v5378_v33, %v5344_v46  ;;  %v5356_v3 = vrot.slane %v4074_v20, 4  ;;  %vm5392_vm14 = vcmask 1045504  }
0x1132   : > { %v5382_v10 = vsel %vm5380_vm12, %v5379_v49, %v5345_v63  ;;  %v5384_v24 = vsel %vm5383_vm13, %v5381_v41, %v5350_v21  ;;  %v5362_v55 = vrot.slane %v4492_v39, 3  ;;  %v5363_v50 = vrot.slane %v4493_v16, 3 }
0x1133   : > { %v5385_v40 = vsel %vm5383_vm13, %v5382_v10, %v5351_v8  ;;  %v5357_v2 = vrot.slane %v4075_v51, 4  ;;  %v4910_v38 = vsub.f32 %v12426_v60, %v4909_v29  ;;  %v4911_v4 = vsub.f32 %v12431_v36, %v4909_v29 }
0x1134   : > { %v5387_v53 = vsel %vm5386_vm15, %v5384_v24, %v5356_v3 }
0x1135   : > { %v5388_v9 = vsel %vm5386_vm15, %v5385_v40, %v5357_v2  ;;  %v5390_v54 = vsel %vm5389_vm0, %v5387_v53, %v5362_v55  ;;  %v5368_v13 = vrot.slane %v4910_v38, 2  ;;  %v5369_v45 = vrot.slane %v4911_v4, 2 }
0x1136   : > { %v5391_v22 = vsel %vm5389_vm0, %v5388_v9, %v5363_v50 }
0x1137   : > { %v5393_v36 = vsel %vm5392_vm14, %v5390_v54, %v5368_v13  ;;  %v5394_v31 = vsel %vm5392_vm14, %v5391_v22, %v5369_v45 }
0x11b5   : > { %v5324_v37 = vpop.xlane.xlu1 %5323 }
0x11b6   : > { %6692 = vlog2.f32 %v5324_v37 }
0x11c0   : > { %v6693_v19 = vpop.eup %6692 }
0x11c1   : > { %v5326_v62 = vmul.f32 0.6931472, %v6693_v19 }
0x11c3   : > { %v5327_v61 = vadd.f32 %v5326_v62, %v12533_v34 }
0x11c4   : > { %5426 = sbr.rel (%p5903_p8) target bundleno = 4555 (0x11cb), region = 76 }
0x11c5   : > { %v5328_v0 = vsub.f32 %v12518_v58, %v5327_v61  ;;  %v5329_v25 = vsub.f32 %v12521_v59, %v5327_v61 }
0x11c7   : > { %v5374_v60 = vrot.slane %v5328_v0, 1  ;;  %v5375_v48 = vrot.slane %v5329_v25, 1 }
0x11c9   : > { %v5396_v6 = vsel %vm5395_vm1, %v5393_v36, %v5374_v60  ;;  %v5397_v34 = vsel %vm5395_vm1, %v5394_v31, %v5375_v48 }
0x11ca   : > { %5398 = vst [vmem:[%s8061_s30] sm:$0xff] %v5396_v6  ;;  %5399 = vst [vmem:[%s8061_s30 + $0x8] sm:$0xff] %v5397_v34 }
0x11cb PF: > { %s5911_s22 = sshll.u32 %s7897_s0, 8  ;;  %s5443_s19 = sshll.u32 %s8061_s30, 4  ;;  %s5444_s19 = int_to_ptr.vmem [resolvable:$true] %s5443_s19 }
0x11cc   : > { %s12577_s11 = scalar_lea.hbm %s12647_s9, %s5911_s22  ;;  %s5429_s13 = scalar_lea.sflag [#allocation7], %s369_s14 }
0x11cd   : > { %s7688_s29 = scalar_lea.vmem %s5444_s19, 256  ;;  %p14796_p12 = scmp.ne.s32.totalorder %s13379_s12, 0 }
0x11ce   : > { %p7689_p9 = scmp.ne.s32.totalorder %s5444_s19, %s7688_s29  ;;  %s7807_s25 = smov [#allocation13]  }
0x11cf   : > { %s7692_s3 = sshll.u32 %s7807_s25, 4  ;;  %s7693_s3 = int_to_ptr.vmem [resolvable:$false] %s7692_s3 }
0x11d0   : > { %p7690_p13 = pnand %p7689_p9, %p14796_p12  ;;  %s7694_s27 = scalar_lea.vmem %s7693_s3, 512 }
0x11d1   : > { %p7695_p0 = scmp.lt.s32.totalorder %s5444_s19, %s7693_s3  ;;  %p7696_p3 = scmp.lt.s32.totalorder %s7694_s27, %s7688_s29 }
0x11d2   : > { %p7691_p2 = pneg %p7690_p13 }
0x11d3   : > { %p7697_p6 = por %p7696_p3, %p7695_p0 }
0x11d5   : > { %p7698_p7 = pnand %p7697_p6, %p7691_p2 }
0x11d7   : > { %7701 = shalt.err (!%p7698_p7)
}
0x11d8   : > { %s7702_s14 = scalar_lea.hbm %s12577_s11, 256  ;;  %s7706_s28 = scalar_lea.hbm %s12647_s9, 512 }
0x11d9   : > { %p7703_p10 = scmp.ne.s32.totalorder %s12577_s11, %s7702_s14  ;;  %p7707_p5 = scmp.lt.u32.totalorder %s12577_s11, %s12647_s9 }
0x11da   : > { %p7708_p4 = scmp.lt.u32.totalorder %s7706_s28, %s7702_s14  ;;  %p7710_p9 = scmp.lt.u32.totalorder %s7702_s14, %s12577_s11 }
0x11db   : > { %p7704_p11 = pnand %p7703_p10, %p14796_p12 }
0x11dc   : > { %p7709_p8 = por %p7708_p4, %p7707_p5 }
0x11dd   : > { %p7705_p1 = pneg %p7704_p11 }
0x11de   : > { %p7711_p13 = por %p7710_p9, %p7709_p8 }
0x11e0   : > { %p7712_p2 = pnand %p7711_p13, %p7705_p1 }
0x11e2   : > { %7715 = shalt.err (!%p7712_p2)
}
0x11e3   : > { %6024 = dma.vmem_to_hbm [thread:$0]  (%p14796_p12), %s5444_s19, 256, %s12577_s11, %s5429_s13  }
0x11e4   : > { %s7808_s15 = smov [#allocation14]   ;;  %p14797_p3 = scmp.eq.s32.totalorder %s7897_s0, 1 }
0x11e5   : > { %s5454_s22 = sshll.u32 %s7808_s15, 4  ;;  %s5455_s22 = int_to_ptr.vmem [resolvable:$true] %s5454_s22 }
0x11e6   : > { %s7716_s20 = scalar_lea.vmem %s5455_s22, 32  ;;  %p7723_p10 = scmp.lt.s32.totalorder %s5455_s22, %s5455_s22 }
0x11e7   : > { %p7717_p0 = scmp.ne.s32.totalorder %s5455_s22, %s7716_s20  ;;  %p7724_p11 = scmp.lt.s32.totalorder %s7716_s20, %s7716_s20 }
0x11e9   : > { %p7718_p6 = pnand %p7717_p0, %p14797_p3  ;;  %p7725_p5 = por %p7724_p11, %p7723_p10 }
0x11eb   : > { %p7719_p7 = pneg %p7718_p6 }
0x11ed   : > { %p7726_p4 = pnand %p7725_p5, %p7719_p7 }
0x11ef   : > { %7729 = shalt.err (!%p7726_p4)
}
0x11f0   : > { %s7730_s12 = scalar_lea.hbm %s12648_s10, 32  ;;  %p14798_p1 = pmov %p14797_p3 }
0x11f1   : > { %p7731_p12 = scmp.ne.s32.totalorder %s12648_s10, %s7730_s12  ;;  %p7736_p13 = scmp.lt.u32.totalorder %s7730_s12, %s12648_s10 }
0x11f3   : > { %p7732_p8 = pnand %p7731_p12, %p14798_p1 }
0x11f5   : > { %p7733_p9 = pneg %p7732_p8 }
0x11f7   : > { %p7738_p2 = pnand %p7736_p13, %p7733_p9 }
0x11f9   : > { %7741 = shalt.err (!%p7738_p2)
}
0x11fa   : > { %p14799_p0 = pmov %p14798_p1 }
0x11fc   : > { %6026 = dma.vmem_to_hbm [thread:$0]  (%p14799_p0), %s5455_s22, 32, %s12648_s10, [#allocation15]  }
0x11fd   : > { %p14800_p3 = pmov %p14799_p0 }
0x11fe   : > { %p14801_p6 = pmov %p14799_p0 }
0x11ff   : > { %7773 = dma.done.wait (%p14800_p3), [#allocation15], 32  }
0x1200   : > { %7775 = vsyncadd (%p14801_p6), [#allocation15], 4294967264 }
0x1201 PF: > { %s14802_s14 = sld [smem:[#allocation25_spill]]  ;;  %p6057_p7 = scmp.ge.s32.totalorder %s7794_s26, 2 }
0x1202   : > { %s5470_s30 = sand.u32 1, %s7782_s23  }
0x1203   : > { %s5471_s17 = scalar_lea.sflag [#allocation7], %s5470_s30 }
0x1207   : > { %p14803_p10 = scmp.ne.s32.totalorder %s14802_s14, 0 }
0x1209   : > { %p6044_p11 = pnand %p6057_p7, %p14803_p10 }
0x120b   : > { %7777 = dma.done.wait (!%p6044_p11), %s5471_s17, 256  }
0x120c   : > { %7779 = vsyncadd (!%p6044_p11), %s5471_s17, 4294967040  ;;  %s14804_s26 = sld [smem:[#allocation23_spill]]  ;;  %s14805_s28 = sld [smem:[#allocation22_spill]] }
0x120d   : > { %s14806_s25 = sld [smem:[#allocation24_spill]]  ;;  %s14807_s23 = smov %s7786_s24 }
0x1212   : > { %p29_p5 = scmp.ge.s32.totalorder %s14804_s26, 4   ;;  %s14808_s24 = smov %s14805_s28 }
0x1214   :  { %31 = sbr.rel (!%p29_p5) target bundleno = 19 (0x13), region = 117 }
0x121b   :  { %5476 = vsyncpa [#allocation6], 1 }
0x121c   :  { %5478 = vsyncpa [#allocation6 + $0x1], 1 }
0x121d   :  { %5479 = vsyncpa [#allocation9], 1 }
0x121e   :  { %5480 = vsyncpa [#allocation12], 1 }
0x121f   :  { %5481 = vsyncpa [#allocation7], 1 }
0x1220   :  { %5483 = vsyncpa [#allocation7 + $0x1], 1 }
0x1221   :  { %5484 = vsyncpa [#allocation15], 1 }

</bundles_post_ra>
